<compile_context>
chip_gen: v7x
topology: tpu7x:2x2x1
jax: 0.10.0
libtpu: 0.0.40
codegen_flags: <defaults>
</compile_context>

<pallas_src>
import functools

import jax
import jax.numpy as jnp
from jax.experimental import pallas as pl
from jax.experimental.pallas import tpu as pltpu

C_IN = 2048
C_MID = 512
C_OUT = 1024
BN_EPS = 1e-5


def _context_branch_kernel(
    x_ref,            # (TILE_HW, C_IN)   bf16 activation tile
    w1_ref, b1_ref,   # (C_IN, C_MID) bf16 (BN1 folded), (1, C_MID) f32
    w2_ref, b2_ref,   # (C_MID, C_MID) bf16 (BN2 folded), (1, C_MID) f32
    w3_ref, b3_ref,   # (C_MID, C_OUT) bf16 (BN3 folded), (1, C_OUT) f32
    wr_ref,           # (C_IN, C_OUT) bf16 residual projection
    out_ref,          # (1, C_OUT) f32 pooled accumulator (resident over t)
    *, hw_true, tile_hw, need_mask,
):
    t = pl.program_id(1)

    @pl.when(t == 0)
    def _init():
        out_ref[...] = jnp.zeros_like(out_ref)

    x = x_ref[...]                                              # bf16

    # Conv_context (BN scales already folded into the weight columns).
    h = jnp.dot(x, w1_ref[...], preferred_element_type=jnp.float32) + b1_ref[...]
    h = jnp.dot(h.astype(jnp.bfloat16), w2_ref[...],
                preferred_element_type=jnp.float32) + b2_ref[...]
    h = jnp.dot(h.astype(jnp.bfloat16), w3_ref[...],
                preferred_element_type=jnp.float32) + b3_ref[...]
    main = jnp.maximum(h, 0.0)                                  # (TILE_HW, C_OUT)

    # residual_identity_projection: conv -> ReLU
    res = jnp.maximum(
        jnp.dot(x, wr_ref[...], preferred_element_type=jnp.float32), 0.0)

    y = main + res                                              # f32
    if need_mask:  # zero out padded rows of the last tile (bias makes them nonzero)
        row = jax.lax.broadcasted_iota(jnp.int32, (tile_hw, 1), 0) + t * tile_hw
        y = jnp.where(row < hw_true, y, 0.0)

    # Partial spatial sum for this tile; mean is taken once at the end.
    out_ref[...] += jnp.sum(y, axis=0, keepdims=True)

    @pl.when(t == pl.num_programs(1) - 1)
    def _finalize():
        out_ref[...] *= jnp.float32(1.0 / hw_true)


def context_branch_vsgnet(x_nchw, params, *, tile_hw=256):
    """x_nchw: (B, 2048, H, W) float32.  Returns (B, 1024) float32."""
    B, C, H, W = x_nchw.shape
    assert C == C_IN
    HW = H * W

    (w1, s1, b1, w2, s2, b2, w3, s3, b3, wr) = params

    # Fold eval-mode BN scales into the conv weights (one-time, host side);
    # cast weights to bf16 for MXU throughput, keep biases in f32.
    w1f = (w1 * s1).astype(jnp.bfloat16)
    w2f = (w2 * s2).astype(jnp.bfloat16)
    w3f = (w3 * s3).astype(jnp.bfloat16)
    wrf = wr.astype(jnp.bfloat16)
    b1f, b2f, b3f = (b.astype(jnp.float32) for b in (b1, b2, b3))

    # NCHW -> (B, HW, C): channels on the lane axis.
    x = jnp.transpose(x_nchw, (0, 2, 3, 1)).reshape(B, HW, C).astype(jnp.bfloat16)

    # Row-tile size: multiple of 8 (sublane), 256 when the problem is big
    # enough (saturates the 256-wide MXU on v6e/v7x).
    t_hw = min(tile_hw, max(8, ((HW + 7) // 8) * 8))
    num_tiles = pl.cdiv(HW, t_hw)
    hw_pad = num_tiles * t_hw
    need_mask = hw_pad != HW
    if need_mask:
        x = jnp.pad(x, ((0, 0), (0, hw_pad - HW), (0, 0)))

    kernel = functools.partial(
        _context_branch_kernel, hw_true=HW, tile_hw=t_hw, need_mask=need_mask)

    def const_spec(shape):
        return pl.BlockSpec(shape, lambda b, t: (0,) * len(shape))

    out3 = pl.pallas_call(
        kernel,
        out_shape=jax.ShapeDtypeStruct((B, 1, C_OUT), jnp.float32),
        grid=(B, num_tiles),
        in_specs=[
            pl.BlockSpec((pl.Squeezed(), t_hw, C_IN), lambda b, t: (b, t, 0)),
            const_spec((C_IN, C_MID)), const_spec((1, C_MID)),
            const_spec((C_MID, C_MID)), const_spec((1, C_MID)),
            const_spec((C_MID, C_OUT)), const_spec((1, C_OUT)),
            const_spec((C_IN, C_OUT)),
        ],
        out_specs=pl.BlockSpec((pl.Squeezed(), 1, C_OUT), lambda b, t: (b, 0, 0)),
        compiler_params=pltpu.CompilerParams(
            dimension_semantics=("parallel", "arbitrary"),
            vmem_limit_bytes=48 << 20,   # weights ~7.5 MiB bf16 + tiles; < 64 MiB (v7x)
        ),
    )(x, w1f, b1f, w2f, b2f, w3f, b3f, wrf)

    return out3.reshape(B, C_OUT)


def fold_bn(gamma, beta, mean, var):
    """Fold eval-mode BatchNorm into per-channel scale/bias, kept as (1, C)."""
    scale = gamma / jnp.sqrt(var + BN_EPS)
    bias = beta - mean * scale
    return scale[None, :], bias[None, :]


def make_params(key):
    ks = jax.random.split(key, 8)

    def conv_w(k, cin, cout):
        # matmul layout (in, out); equals PyTorch weight[:, :, 0, 0].T
        return jax.random.normal(k, (cin, cout), jnp.float32) * (1.0 / jnp.sqrt(cin))

    def bn_params(k, c):
        k1, k2, k3, k4 = jax.random.split(k, 4)
        gamma = 1.0 + 0.1 * jax.random.normal(k1, (c,), jnp.float32)
        beta = 0.1 * jax.random.normal(k2, (c,), jnp.float32)
        mean = 0.1 * jax.random.normal(k3, (c,), jnp.float32)
        var = 1.0 + 0.1 * jnp.abs(jax.random.normal(k4, (c,), jnp.float32))
        return gamma, beta, mean, var

    w1 = conv_w(ks[0], C_IN, C_MID)
    w2 = conv_w(ks[1], C_MID, C_MID)
    w3 = conv_w(ks[2], C_MID, C_OUT)
    wr = conv_w(ks[3], C_IN, C_OUT)

    s1, b1 = fold_bn(*bn_params(ks[4], C_MID))
    s2, b2 = fold_bn(*bn_params(ks[5], C_MID))
    s3, b3 = fold_bn(*bn_params(ks[6], C_OUT))

    return (w1, s1, b1, w2, s2, b2, w3, s3, b3, wr)


def reference_forward(x_nchw, params):
    """Pure-JAX f32 reference replicating the PyTorch module (eval-mode BN)."""
    (w1, s1, b1, w2, s2, b2, w3, s3, b3, wr) = params
    B, C, H, W = x_nchw.shape
    x = jnp.transpose(x_nchw, (0, 2, 3, 1)).reshape(B * H * W, C)
    h = (x @ w1) * s1 + b1
    h = (h @ w2) * s2 + b2
    h = (h @ w3) * s3 + b3
    main = jnp.maximum(h, 0.0)
    res = jnp.maximum(x @ wr, 0.0)
    y = (main + res).reshape(B, H * W, C_OUT)
    return jnp.mean(y, axis=1)


if __name__ == "__main__":
    key = jax.random.PRNGKey(0)
    k_x, k_p = jax.random.split(key)

    B, H, W = 2, 8, 8
    x = jax.random.normal(k_x, (B, C_IN, H, W), jnp.float32)
    params = make_params(k_p)

    out = jax.block_until_ready(context_branch_vsgnet(x, params))
    ref = jax.block_until_ready(reference_forward(x, params))

    assert out.shape == (B, C_OUT)
    # bf16 MXU inputs vs f32 reference -> slightly relaxed tolerance.
    assert jnp.allclose(out, ref, atol=2e-2, rtol=2e-2), (
        f"mismatch vs reference, max abs err = {jnp.max(jnp.abs(out - ref))}")

    print("KERNEL_OK")
</pallas_src>

<mosaic_0001>
module attributes {stable_mosaic.version = 11 : i64} {
  func.func @_context_branch_kernel(%arg0: i32, %arg1: i32, %arg2: memref<1x64x2048xbf16, #tpu.memory_space<vmem>>, %arg3: memref<2048x512xbf16, #tpu.memory_space<vmem>>, %arg4: memref<1x512xf32, #tpu.memory_space<vmem>>, %arg5: memref<512x512xbf16, #tpu.memory_space<vmem>>, %arg6: memref<1x512xf32, #tpu.memory_space<vmem>>, %arg7: memref<512x1024xbf16, #tpu.memory_space<vmem>>, %arg8: memref<1x1024xf32, #tpu.memory_space<vmem>>, %arg9: memref<2048x1024xbf16, #tpu.memory_space<vmem>>, %arg10: memref<1x1x1024xf32, #tpu.memory_space<vmem>>) attributes {dimension_semantics = [#tpu.dimension_semantics<parallel>, #tpu.dimension_semantics<arbitrary>], iteration_bounds = array<i64: 2, 1>, scalar_prefetch = 0 : i64, scratch_operands = 0 : i64, tpu.core_type = #tpu.core_type<tc>, window_params = [{transform_indices = @transform_0, window_bounds = array<i64: 1, 64, 2048>}, {pipeline_mode = #tpu.pipeline_mode<synchronous>, transform_indices = @transform_1, window_bounds = array<i64: 2048, 512>}, {pipeline_mode = #tpu.pipeline_mode<synchronous>, transform_indices = @transform_2, window_bounds = array<i64: 1, 512>}, {pipeline_mode = #tpu.pipeline_mode<synchronous>, transform_indices = @transform_3, window_bounds = array<i64: 512, 512>}, {pipeline_mode = #tpu.pipeline_mode<synchronous>, transform_indices = @transform_4, window_bounds = array<i64: 1, 512>}, {pipeline_mode = #tpu.pipeline_mode<synchronous>, transform_indices = @transform_5, window_bounds = array<i64: 512, 1024>}, {pipeline_mode = #tpu.pipeline_mode<synchronous>, transform_indices = @transform_6, window_bounds = array<i64: 1, 1024>}, {pipeline_mode = #tpu.pipeline_mode<synchronous>, transform_indices = @transform_7, window_bounds = array<i64: 2048, 1024>}, {transform_indices = @transform_8, window_bounds = array<i64: 1, 1, 1024>}]} {
    %c0_i32 = arith.constant 0 : i32
    %0 = arith.cmpi eq, %arg1, %c0_i32 : i32
    %1 = arith.extui %0 : i1 to i32
    %c0_i32_0 = arith.constant 0 : i32
    %2 = arith.cmpi ne, %1, %c0_i32_0 : i32
    scf.if %2 {
      %cst_31 = arith.constant 0.000000e+00 : f32
      %40 = vector.broadcast %cst_31 : f32 to vector<1x1024xf32>
      %c0_32 = arith.constant 0 : index
      %c0_33 = arith.constant 0 : index
      %c0_34 = arith.constant 0 : index
      %41 = vector.load %arg10[%c0_32, %c0_33, %c0_34] : memref<1x1x1024xf32, #tpu.memory_space<vmem>>, vector<1x1x1024xf32>
      %42 = vector.shape_cast %41 : vector<1x1x1024xf32> to vector<1x1024xf32>
      %43 = vector.shape_cast %40 : vector<1x1024xf32> to vector<1x1x1024xf32>
      tpu.vector_store %arg10[%c0_32, %c0_33, %c0_34], %43 {strides = array<i32>} : memref<1x1x1024xf32, #tpu.memory_space<vmem>>, vector<1x1x1024xf32>,
    } else {
    }
    %c0 = arith.constant 0 : index
    %c0_1 = arith.constant 0 : index
    %c0_2 = arith.constant 0 : index
    %3 = vector.load %arg2[%c0, %c0_1, %c0_2] : memref<1x64x2048xbf16, #tpu.memory_space<vmem>>, vector<1x64x2048xbf16>
    %4 = vector.shape_cast %3 : vector<1x64x2048xbf16> to vector<64x2048xbf16>
    %c0_3 = arith.constant 0 : index
    %c0_4 = arith.constant 0 : index
    %5 = vector.load %arg3[%c0_3, %c0_4] : memref<2048x512xbf16, #tpu.memory_space<vmem>>, vector<2048x512xbf16>
    %cst = arith.constant dense<0.000000e+00> : vector<64x512xf32>
    %6 = tpu.matmul %4, %5, %cst {dimension_numbers = #tpu.dot_dimension_numbers<[1], [0], [0], [1], [0, 0, 1, 1], [], []>} : vector<64x2048xbf16>, vector<2048x512xbf16>, vector<64x512xf32> -> vector<64x512xf32>
    %c0_5 = arith.constant 0 : index
    %c0_6 = arith.constant 0 : index
    %7 = vector.load %arg4[%c0_5, %c0_6] : memref<1x512xf32, #tpu.memory_space<vmem>>, vector<1x512xf32>
    %8 = vector.broadcast %7 : vector<1x512xf32> to vector<64x512xf32>
    %9 = arith.addf %6, %8 : vector<64x512xf32>
    %10 = arith.truncf %9 : vector<64x512xf32> to vector<64x512xbf16>
    %c0_7 = arith.constant 0 : index
    %c0_8 = arith.constant 0 : index
    %11 = vector.load %arg5[%c0_7, %c0_8] : memref<512x512xbf16, #tpu.memory_space<vmem>>, vector<512x512xbf16>
    %cst_9 = arith.constant dense<0.000000e+00> : vector<64x512xf32>
    %12 = tpu.matmul %10, %11, %cst_9 {dimension_numbers = #tpu.dot_dimension_numbers<[1], [0], [0], [1], [0, 0, 1, 1], [], []>} : vector<64x512xbf16>, vector<512x512xbf16>, vector<64x512xf32> -> vector<64x512xf32>
    %c0_10 = arith.constant 0 : index
    %c0_11 = arith.constant 0 : index
    %13 = vector.load %arg6[%c0_10, %c0_11] : memref<1x512xf32, #tpu.memory_space<vmem>>, vector<1x512xf32>
    %14 = vector.broadcast %13 : vector<1x512xf32> to vector<64x512xf32>
    %15 = arith.addf %12, %14 : vector<64x512xf32>
    %16 = arith.truncf %15 : vector<64x512xf32> to vector<64x512xbf16>
    %c0_12 = arith.constant 0 : index
    %c0_13 = arith.constant 0 : index
    %17 = vector.load %arg7[%c0_12, %c0_13] : memref<512x1024xbf16, #tpu.memory_space<vmem>>, vector<512x1024xbf16>
    %cst_14 = arith.constant dense<0.000000e+00> : vector<64x1024xf32>
    %18 = tpu.matmul %16, %17, %cst_14 {dimension_numbers = #tpu.dot_dimension_numbers<[1], [0], [0], [1], [0, 0, 1, 1], [], []>} : vector<64x512xbf16>, vector<512x1024xbf16>, vector<64x1024xf32> -> vector<64x1024xf32>
    %c0_15 = arith.constant 0 : index
    %c0_16 = arith.constant 0 : index
    %19 = vector.load %arg8[%c0_15, %c0_16] : memref<1x1024xf32, #tpu.memory_space<vmem>>, vector<1x1024xf32>
    %20 = vector.broadcast %19 : vector<1x1024xf32> to vector<64x1024xf32>
    %21 = arith.addf %18, %20 : vector<64x1024xf32>
    %cst_17 = arith.constant 0.000000e+00 : f32
    %22 = vector.broadcast %cst_17 : f32 to vector<64x1024xf32>
    %23 = arith.maximumf %21, %22 : vector<64x1024xf32>
    %c0_18 = arith.constant 0 : index
    %c0_19 = arith.constant 0 : index
    %24 = vector.load %arg9[%c0_18, %c0_19] : memref<2048x1024xbf16, #tpu.memory_space<vmem>>, vector<2048x1024xbf16>
    %cst_20 = arith.constant dense<0.000000e+00> : vector<64x1024xf32>
    %25 = tpu.matmul %4, %24, %cst_20 {dimension_numbers = #tpu.dot_dimension_numbers<[1], [0], [0], [1], [0, 0, 1, 1], [], []>} : vector<64x2048xbf16>, vector<2048x1024xbf16>, vector<64x1024xf32> -> vector<64x1024xf32>
    %cst_21 = arith.constant 0.000000e+00 : f32
    %26 = vector.broadcast %cst_21 : f32 to vector<64x1024xf32>
    %27 = arith.maximumf %25, %26 : vector<64x1024xf32>
    %28 = arith.addf %23, %27 : vector<64x1024xf32>
    %c0_22 = arith.constant 0 : index
    %c0_23 = arith.constant 0 : index
    %c0_24 = arith.constant 0 : index
    %29 = vector.load %arg10[%c0_22, %c0_23, %c0_24] : memref<1x1x1024xf32, #tpu.memory_space<vmem>>, vector<1x1x1024xf32>
    %30 = vector.shape_cast %29 : vector<1x1x1024xf32> to vector<1x1024xf32>
    %cst_25 = arith.constant dense<0.000000e+00> : vector<1024xf32>
    %31 = vector.multi_reduction <add>, %28, %cst_25 [0] : vector<64x1024xf32> to vector<1024xf32>
    %32 = vector.shape_cast %31 : vector<1024xf32> to vector<1x1024xf32>
    %33 = arith.addf %30, %32 : vector<1x1024xf32>
    %c0_26 = arith.constant 0 : index
    %c0_27 = arith.constant 0 : index
    %c0_28 = arith.constant 0 : index
    %34 = vector.load %arg10[%c0_26, %c0_27, %c0_28] : memref<1x1x1024xf32, #tpu.memory_space<vmem>>, vector<1x1x1024xf32>
    %35 = vector.shape_cast %34 : vector<1x1x1024xf32> to vector<1x1024xf32>
    %36 = vector.shape_cast %33 : vector<1x1024xf32> to vector<1x1x1024xf32>
    tpu.vector_store %arg10[%c0_26, %c0_27, %c0_28], %36 {strides = array<i32>} : memref<1x1x1024xf32, #tpu.memory_space<vmem>>, vector<1x1x1024xf32>,
    %c0_i32_29 = arith.constant 0 : i32
    %37 = arith.cmpi eq, %arg1, %c0_i32_29 : i32
    %38 = arith.extui %37 : i1 to i32
    %c0_i32_30 = arith.constant 0 : i32
    %39 = arith.cmpi ne, %38, %c0_i32_30 : i32
    scf.if %39 {
      %c0_31 = arith.constant 0 : index
      %c0_32 = arith.constant 0 : index
      %c0_33 = arith.constant 0 : index
      %40 = vector.load %arg10[%c0_31, %c0_32, %c0_33] : memref<1x1x1024xf32, #tpu.memory_space<vmem>>, vector<1x1x1024xf32>
      %41 = vector.shape_cast %40 : vector<1x1x1024xf32> to vector<1x1024xf32>
      %cst_34 = arith.constant 1.562500e-02 : f32
      %42 = vector.broadcast %cst_34 : f32 to vector<1x1024xf32>
      %43 = arith.mulf %41, %42 : vector<1x1024xf32>
      %c0_35 = arith.constant 0 : index
      %c0_36 = arith.constant 0 : index
      %c0_37 = arith.constant 0 : index
      %44 = vector.load %arg10[%c0_35, %c0_36, %c0_37] : memref<1x1x1024xf32, #tpu.memory_space<vmem>>, vector<1x1x1024xf32>
      %45 = vector.shape_cast %44 : vector<1x1x1024xf32> to vector<1x1024xf32>
      %46 = vector.shape_cast %43 : vector<1x1024xf32> to vector<1x1x1024xf32>
      tpu.vector_store %arg10[%c0_35, %c0_36, %c0_37], %46 {strides = array<i32>} : memref<1x1x1024xf32, #tpu.memory_space<vmem>>, vector<1x1x1024xf32>,
    } else {
    }
    return
  }
  func.func @transform_0(%arg0: i32, %arg1: i32) -> (i32, i32, i32) {
    %c0_i32 = arith.constant 0 : i32
    %c0_i32_0 = arith.constant 0 : i32
    return %arg0, %arg1, %c0_i32 : i32, i32, i32
  }
  func.func @transform_1(%arg0: i32, %arg1: i32) -> (i32, i32) {
    %c0_i32 = arith.constant 0 : i32
    %c0_i32_0 = arith.constant 0 : i32
    %c0_i32_1 = arith.constant 0 : i32
    return %c0_i32, %c0_i32_0 : i32, i32
  }
  func.func @transform_2(%arg0: i32, %arg1: i32) -> (i32, i32) {
    %c0_i32 = arith.constant 0 : i32
    %c0_i32_0 = arith.constant 0 : i32
    %c0_i32_1 = arith.constant 0 : i32
    return %c0_i32, %c0_i32_0 : i32, i32
  }
  func.func @transform_3(%arg0: i32, %arg1: i32) -> (i32, i32) {
    %c0_i32 = arith.constant 0 : i32
    %c0_i32_0 = arith.constant 0 : i32
    %c0_i32_1 = arith.constant 0 : i32
    return %c0_i32, %c0_i32_0 : i32, i32
  }
  func.func @transform_4(%arg0: i32, %arg1: i32) -> (i32, i32) {
    %c0_i32 = arith.constant 0 : i32
    %c0_i32_0 = arith.constant 0 : i32
    %c0_i32_1 = arith.constant 0 : i32
    return %c0_i32, %c0_i32_0 : i32, i32
  }
  func.func @transform_5(%arg0: i32, %arg1: i32) -> (i32, i32) {
    %c0_i32 = arith.constant 0 : i32
    %c0_i32_0 = arith.constant 0 : i32
    %c0_i32_1 = arith.constant 0 : i32
    return %c0_i32, %c0_i32_0 : i32, i32
  }
  func.func @transform_6(%arg0: i32, %arg1: i32) -> (i32, i32) {
    %c0_i32 = arith.constant 0 : i32
    %c0_i32_0 = arith.constant 0 : i32
    %c0_i32_1 = arith.constant 0 : i32
    return %c0_i32, %c0_i32_0 : i32, i32
  }
  func.func @transform_7(%arg0: i32, %arg1: i32) -> (i32, i32) {
    %c0_i32 = arith.constant 0 : i32
    %c0_i32_0 = arith.constant 0 : i32
    %c0_i32_1 = arith.constant 0 : i32
    return %c0_i32, %c0_i32_0 : i32, i32
  }
  func.func @transform_8(%arg0: i32, %arg1: i32) -> (i32, i32, i32) {
    %c0_i32 = arith.constant 0 : i32
    %c0_i32_0 = arith.constant 0 : i32
    %c0_i32_1 = arith.constant 0 : i32
    return %arg0, %c0_i32, %c0_i32_0 : i32, i32, i32
  }
}

</mosaic_0001>

<bundles_post_ra>
// kernel: tpu_custom_call.1
= control target key start
LH: loop header
LB: loop body
LE: loop exit
PB: predicated region body
PF: predicated region fallthrough
CT: control target
= control target key end

     0   :  { %s23764_s0 = inlined_call_operand.hbm [shape: bf16[2,64,2048], index: 0, kind: input, shape index: {}]   ;;  %s23765_s1 = inlined_call_operand.hbm [shape: bf16[2048,512], index: 1, kind: input, shape index: {}]   ;;  %s23766_s2 = inlined_call_operand.hbm [shape: f32[1,512], index: 2, kind: input, shape index: {}]   ;;  %s23767_s3 = inlined_call_operand.hbm [shape: bf16[512,512], index: 3, kind: input, shape index: {}]   ;;  %s23768_s4 = inlined_call_operand.hbm [shape: f32[1,512], index: 4, kind: input, shape index: {}]   ;;  %s23769_s5 = inlined_call_operand.hbm [shape: bf16[512,1024], index: 5, kind: input, shape index: {}]   ;;  %s23770_s6 = inlined_call_operand.hbm [shape: f32[1,1024], index: 6, kind: input, shape index: {}]   ;;  %s23771_s7 = inlined_call_operand.hbm [shape: bf16[2048,1024], index: 7, kind: input, shape index: {}]   ;;  %s23772_s8 = inlined_call_operand.hbm [shape: f32[2,1,1024], index: 8, kind: output, shape index: {}]  }
   0x1   :  { %23918 = sst [smem:[#allocation117_spill]] %s23765_s1 }
   0x2   :  { %23919 = sst [smem:[#allocation118_spill]] %s23767_s3 }
   0x3   :  { %23920 = sst [smem:[#allocation119_spill]] %s23772_s8 }
   0x4   :  { %13 = vsyncpa [#allocation3], 0 }
   0x5   :  { %15 = vsyncpa [#allocation3 + $0x1], 0 }
   0x6   :  { %16 = vsyncpa [#allocation6], 0 }
   0x7   :  { %17 = vsyncpa [#allocation9], 0 }
   0x8   :  { %18 = vsyncpa [#allocation12], 0 }
   0x9   :  { %19 = vsyncpa [#allocation15], 0 }
   0xa   :  { %20 = vsyncpa [#allocation4], 0 }
   0xb   :  { %22 = vsyncpa [#allocation4 + $0x1], 0  ;;  %s21771_s27 = smov 0   ;;  %s21773_s28 = smov 0  }
   0xc   :  { %s21775_s29 = smov 0   ;;  %s21777_s30 = smov 0  }
   0xd   :  { %s21779_s9 = smov 0   ;;  %s21781_s10 = smov 0  }
   0xe LB: > { %23921 = sst [smem:[#allocation23_spill]] %s21700_s30  ;;  %s23773_s11 = sadd.s32 4294967295, %s21708_s10   ;;  %s21708_s10 = sphi %s21781_s10, %s28_s10   ;;  %s21704_s9 = sphi %s21779_s9, %s24216_s9   ;;  %s21700_s30 = sphi %s21777_s30, %s24215_s30   ;;  %s21696_s29 = sphi %s21775_s29, %s24214_s29   ;;  %s21692_s28 = sphi %s21773_s28, %s24213_s28   ;;  %s21688_s27 = sphi %s21771_s27, %s24212_s27  }
   0xf   : > { %p17373_p0 = scmp.ge.s32.totalorder %s21708_s10, 1  ;;  %p21805_p1 = scmp.eq.s32.totalorder %s23773_s11, 0 }
  0x10   : > { %p246_p2 = scmp.lt.s32.totalorder %s21708_s10, 3  ;;  %s21710_s14 = smov [#allocation5]  }
  0x11   : > { %s23922_s12 = scalar_select %p21805_p1, 1, 0 }
  0x12   : > { %p21810_p3 = pnand %p17373_p0, %p246_p2  ;;  %s258_s15 = sshll.u32 %s21710_s14, 4  ;;  %s21814_s15 = int_to_ptr.vmem [resolvable:$true] %s258_s15 }
  0x13   : > { %s21711_s17 = smov [#allocation8]   ;;  %s21712_s19 = smov [#allocation11]  }
  0x14   : > { %s23923_s13 = scalar_select %p21810_p3, 1, 0 }
  0x15   : > { %p20314_p4 = pneg %p21810_p3  ;;  %s282_s18 = sshll.u32 %s21711_s17, 4  ;;  %s21825_s18 = int_to_ptr.vmem [resolvable:$true] %s282_s18 }
  0x16   : > { %s21827_s20 = sshll.u32 %s21712_s19, 4  ;;  %s23925_s1 = sld [smem:[#allocation117_spill]]  ;;  %s307_s20 = int_to_ptr.vmem [resolvable:$true] %s21827_s20 }
  0x17   : > { %p21821_p6 = pnand %p20314_p4, %p21805_p1 }
  0x19   : > { %p21837_p8 = pneg %p21821_p6 }
  0x1c   : > { %s21384_s23 = scalar_lea.hbm %s23925_s1, 65536 }
  0x1d   : > { %p21385_p7 = scmp.ne.s32.totalorder %s23925_s1, %s21384_s23  ;;  %p21391_p11 = scmp.lt.u32.totalorder %s21384_s23, %s23925_s1 }
  0x1f   : > { %p21387_p9 = pnand %p21837_p8, %p21385_p7 }
  0x21   : > { %p21388_p10 = pneg %p21387_p9 }
  0x23   : > { %p21393_p12 = pnand %p21391_p11, %p21388_p10 }
  0x25   : > { %21396 = shalt.err (!%p21393_p12)
}
  0x26   : > { %s21397_s19 = scalar_lea.vmem %s21814_s15, 65536  ;;  %p21405_p4 = scmp.lt.s32.totalorder %s21814_s15, %s21814_s15 }
  0x27   : > { %p21398_p13 = scmp.ne.s32.totalorder %s21814_s15, %s21397_s19  ;;  %p21406_p5 = scmp.lt.s32.totalorder %s21397_s19, %s21397_s19 }
  0x29   : > { %p21400_p0 = pnand %p21398_p13, %p21837_p8  ;;  %p21407_p7 = por %p21406_p5, %p21405_p4 }
  0x2b   : > { %p21401_p2 = pneg %p21400_p0 }
  0x2d   : > { %p21408_p9 = pnand %p21407_p7, %p21401_p2 }
  0x2f   : > { %21411 = shalt.err (!%p21408_p9)
}
  0x30   : > { %s21713_s21 = smov 256   ;;  %s21714_s22 = smov 16  }
  0x31   : > { %20317 = dma.hbm_to_vmem [thread:$0]  (!%p21821_p6), %s23925_s1, 65536, %s21814_s15, [#allocation6], %s21713_s21, %s21713_s21, %s21714_s22  }
  0x32   : > { %s23927_s3 = sld [smem:[#allocation118_spill]] }
  0x38   : > { %s21412_s17 = scalar_lea.hbm %s23927_s3, 16384 }
  0x39   : > { %p21413_p5 = scmp.ne.s32.totalorder %s23927_s3, %s21412_s17  ;;  %p21419_p12 = scmp.lt.u32.totalorder %s21412_s17, %s23927_s3 }
  0x3b   : > { %p21415_p10 = pnand %p21413_p5, %p21837_p8 }
  0x3d   : > { %p21416_p11 = pneg %p21415_p10 }
  0x3f   : > { %p21421_p13 = pnand %p21419_p12, %p21416_p11 }
  0x41   : > { %21424 = shalt.err (!%p21421_p13)
}
  0x42   : > { %s21425_s15 = scalar_lea.vmem %s21825_s18, 16384  ;;  %p21433_p7 = scmp.lt.s32.totalorder %s21825_s18, %s21825_s18 }
  0x43   : > { %p21426_p0 = scmp.ne.s32.totalorder %s21825_s18, %s21425_s15  ;;  %p21434_p9 = scmp.lt.s32.totalorder %s21425_s15, %s21425_s15 }
  0x45   : > { %p21428_p2 = pnand %p21426_p0, %p21837_p8  ;;  %p21435_p5 = por %p21434_p9, %p21433_p7 }
  0x47   : > { %p21429_p4 = pneg %p21428_p2 }
  0x49   : > { %p21436_p10 = pnand %p21435_p5, %p21429_p4 }
  0x4b   : > { %21439 = shalt.err (!%p21436_p10)
}
  0x4c   : > { %20323 = dma.hbm_to_vmem [thread:$0]  (!%p21821_p6), %s23927_s3, 16384, %s21825_s18, [#allocation9], %s21713_s21, %s21713_s21, %s21714_s22  }
  0x4d   : > { %s21440_s24 = scalar_lea.hbm %s23769_s5, 32768 }
  0x4e   : > { %p21441_p11 = scmp.ne.s32.totalorder %s23769_s5, %s21440_s24  ;;  %p21447_p0 = scmp.lt.u32.totalorder %s21440_s24, %s23769_s5 }
  0x50   : > { %p21443_p12 = pnand %p21441_p11, %p21837_p8 }
  0x52   : > { %p21444_p13 = pneg %p21443_p12 }
  0x54   : > { %p21449_p2 = pnand %p21447_p0, %p21444_p13 }
  0x56   : > { %21452 = shalt.err (!%p21449_p2)
}
  0x57   : > { %s21453_s15 = scalar_lea.vmem %s307_s20, 32768  ;;  %p21461_p5 = scmp.lt.s32.totalorder %s307_s20, %s307_s20 }
  0x58   : > { %p21454_p4 = scmp.ne.s32.totalorder %s307_s20, %s21453_s15  ;;  %p21462_p10 = scmp.lt.s32.totalorder %s21453_s15, %s21453_s15 }
  0x5a   : > { %p21456_p7 = pnand %p21454_p4, %p21837_p8  ;;  %p21463_p3 = por %p21462_p10, %p21461_p5 }
  0x5c   : > { %p21457_p9 = pneg %p21456_p7 }
  0x5e   : > { %p21464_p1 = pnand %p21463_p3, %p21457_p9 }
  0x60   : > { %21467 = shalt.err (!%p21464_p1)
}
  0x61   : > { %s21715_s18 = smov 512   ;;  %s21716_s21 = smov 32  }
  0x62   : > { %20329 = dma.hbm_to_vmem [thread:$0]  (!%p21821_p6), %s23769_s5, 32768, %s307_s20, [#allocation12], %s21715_s18, %s21715_s18, %s21716_s21  }
  0x63   : > { %s21717_s30 = smov [#allocation7]   ;;  %s21718_s23 = smov [#allocation10]  }
  0x64   : > { %s272_s11 = sshll.u32 %s21717_s30, 4  ;;  %s296_s24 = sshll.u32 %s21718_s23, 4  ;;  %s273_s11 = int_to_ptr.vmem [resolvable:$true] %s272_s11  ;;  %s297_s24 = int_to_ptr.vmem [resolvable:$true] %s296_s24 }
  0x65   : > { %s21468_s17 = scalar_lea.hbm %s23766_s2, 64 }
  0x66   : > { %p21469_p1 = scmp.ne.s32.totalorder %s23766_s2, %s21468_s17  ;;  %p21475_p12 = scmp.lt.u32.totalorder %s21468_s17, %s23766_s2 }
  0x68   : > { %p21471_p3 = pnand %p21469_p1, %p21837_p8 }
  0x6a   : > { %p21472_p11 = pneg %p21471_p3 }
  0x6c   : > { %p21477_p13 = pnand %p21475_p12, %p21472_p11 }
  0x6e   : > { %21480 = shalt.err (!%p21477_p13)
}
  0x6f   : > { %s21481_s20 = scalar_lea.vmem %s273_s11, 64  ;;  %p21489_p7 = scmp.lt.s32.totalorder %s273_s11, %s273_s11 }
  0x70   : > { %p21482_p0 = scmp.ne.s32.totalorder %s273_s11, %s21481_s20  ;;  %p21490_p9 = scmp.lt.s32.totalorder %s21481_s20, %s21481_s20 }
  0x72   : > { %p21484_p2 = pnand %p21482_p0, %p21837_p8  ;;  %p21491_p5 = por %p21490_p9, %p21489_p7 }
  0x74   : > { %p21485_p4 = pneg %p21484_p2 }
  0x76   : > { %p21492_p10 = pnand %p21491_p5, %p21485_p4 }
  0x78   : > { %21495 = shalt.err (!%p21492_p10)
}
  0x79   : > { %20320 = dma.hbm_to_vmem [thread:$0]  (!%p21821_p6), %s23766_s2, 64, %s273_s11, [#allocation6]  }
  0x7a   : > { %s21496_s30 = scalar_lea.hbm %s23768_s4, 64 }
  0x7b   : > { %p21497_p1 = scmp.ne.s32.totalorder %s23768_s4, %s21496_s30  ;;  %p21503_p12 = scmp.lt.u32.totalorder %s21496_s30, %s23768_s4 }
  0x7d   : > { %p21499_p3 = pnand %p21497_p1, %p21837_p8 }
  0x7f   : > { %p21500_p11 = pneg %p21499_p3 }
  0x81   : > { %p21505_p13 = pnand %p21503_p12, %p21500_p11 }
  0x83   : > { %21508 = shalt.err (!%p21505_p13)
}
  0x84   : > { %s21509_s19 = scalar_lea.vmem %s297_s24, 64  ;;  %p21517_p7 = scmp.lt.s32.totalorder %s297_s24, %s297_s24 }
  0x85   : > { %p21510_p0 = scmp.ne.s32.totalorder %s297_s24, %s21509_s19  ;;  %p21518_p9 = scmp.lt.s32.totalorder %s21509_s19, %s21509_s19 }
  0x87   : > { %p21512_p2 = pnand %p21510_p0, %p21837_p8  ;;  %p21519_p5 = por %p21518_p9, %p21517_p7 }
  0x89   : > { %p21513_p4 = pneg %p21512_p2 }
  0x8b   : > { %p21520_p10 = pnand %p21519_p5, %p21513_p4 }
  0x8d   : > { %21523 = shalt.err (!%p21520_p10)
}
  0x8e   : > { %20326 = dma.hbm_to_vmem [thread:$0]  (!%p21821_p6), %s23768_s4, 64, %s297_s24, [#allocation9]  }
  0x8f   : > { %s21719_s20 = smov [#allocation13]   ;;  %s21720_s8 = smov [#allocation14]  }
  0x90   : > { %s320_s22 = sshll.u32 %s21719_s20, 4  ;;  %s330_s1 = sshll.u32 %s21720_s8, 4  ;;  %s321_s22 = int_to_ptr.vmem [resolvable:$true] %s320_s22  ;;  %s331_s1 = int_to_ptr.vmem [resolvable:$true] %s330_s1 }
  0x91   : > { %s21524_s23 = scalar_lea.hbm %s23770_s6, 128 }
  0x92   : > { %p21525_p1 = scmp.ne.s32.totalorder %s23770_s6, %s21524_s23  ;;  %p21531_p12 = scmp.lt.u32.totalorder %s21524_s23, %s23770_s6 }
  0x94   : > { %p21527_p3 = pnand %p21525_p1, %p21837_p8 }
  0x96   : > { %p21528_p11 = pneg %p21527_p3 }
  0x98   : > { %p21533_p13 = pnand %p21531_p12, %p21528_p11 }
  0x9a   : > { %21536 = shalt.err (!%p21533_p13)
}
  0x9b   : > { %s21537_s24 = scalar_lea.vmem %s321_s22, 128  ;;  %p21545_p7 = scmp.lt.s32.totalorder %s321_s22, %s321_s22 }
  0x9c   : > { %p21538_p0 = scmp.ne.s32.totalorder %s321_s22, %s21537_s24  ;;  %p21546_p9 = scmp.lt.s32.totalorder %s21537_s24, %s21537_s24 }
  0x9e   : > { %p21540_p2 = pnand %p21538_p0, %p21837_p8  ;;  %p21547_p5 = por %p21546_p9, %p21545_p7 }
  0xa0   : > { %p21541_p4 = pneg %p21540_p2 }
  0xa2   : > { %p21548_p10 = pnand %p21547_p5, %p21541_p4 }
  0xa4   : > { %21551 = shalt.err (!%p21548_p10)
}
  0xa5   : > { %20332 = dma.hbm_to_vmem [thread:$0]  (!%p21821_p6), %s23770_s6, 128, %s321_s22, [#allocation12]  }
  0xa6   : > { %s21552_s3 = scalar_lea.hbm %s23771_s7, 131072 }
  0xa7   : > { %p21553_p1 = scmp.ne.s32.totalorder %s23771_s7, %s21552_s3  ;;  %p21559_p12 = scmp.lt.u32.totalorder %s21552_s3, %s23771_s7 }
  0xa9   : > { %p21555_p3 = pnand %p21553_p1, %p21837_p8 }
  0xab   : > { %p21556_p11 = pneg %p21555_p3 }
  0xad   : > { %p21561_p13 = pnand %p21559_p12, %p21556_p11 }
  0xaf   : > { %21564 = shalt.err (!%p21561_p13)
}
  0xb0   : > { %s21565_s17 = scalar_lea.vmem %s331_s1, 131072  ;;  %p21573_p7 = scmp.lt.s32.totalorder %s331_s1, %s331_s1 }
  0xb1   : > { %p21566_p0 = scmp.ne.s32.totalorder %s331_s1, %s21565_s17  ;;  %p21574_p9 = scmp.lt.s32.totalorder %s21565_s17, %s21565_s17 }
  0xb3   : > { %p21568_p2 = pnand %p21566_p0, %p21837_p8  ;;  %p21575_p5 = por %p21574_p9, %p21573_p7 }
  0xb5   : > { %p21569_p4 = pneg %p21568_p2 }
  0xb7   : > { %p21576_p10 = pnand %p21575_p5, %p21569_p4 }
  0xb9   : > { %21579 = shalt.err (!%p21576_p10)
}
  0xba   : > { %20335 = dma.hbm_to_vmem [thread:$0]  (!%p21821_p6), %s23771_s7, 131072, %s331_s1, [#allocation15], %s21715_s18, %s21715_s18, %s21716_s21  }
  0xbb   : > { %s17372_s16 = sadd.s32 4294967294, %s21708_s10   ;;  %s40_s26 = sadd.s32 1, %s21704_s9 }
  0xbc   : > { %s49_s24 = sadd.s32 1, %s21696_s29  ;;  %p42_p8 = scmp.ge.s32.totalorder %s40_s26, 2 }
  0xbd   : > { %p56_p1 = scmp.ne.s32.totalorder %s21696_s29, %s21692_s28  ;;  %p57_p3 = scmp.eq.s32.totalorder %s21708_s10, 0 }
  0xbe   : > { %p62_p11 = scmp.ne.s32.totalorder %s21692_s28, %s21688_s27  ;;  %s24218_s26 = smov (%p42_p8, %s40_s26), 0 }
  0xbf   : > { %p21988_p12 = por %p57_p3, %p56_p1  ;;  %p23929_p13 = scmp.ne.s32.totalorder %s23922_s12, 0 }
  0xc0   : > { %s44_s21 = ssub.s32 %s21704_s9, %s24218_s26  ;;  %s23931_s1 = sadd.s32 4294967295, %s21708_s10  }
  0xc1   : > { %p21994_p6 = por %p23929_p13, %p62_p11  ;;  %p233_p0 = scmp.eq.s32.totalorder %s23931_s1, 1 }
  0xc2   : > { %p47_p2 = scmp.eq.s32.totalorder %s44_s21, 0  ;;  %p239_p4 = scmp.eq.s32.totalorder %s17372_s16, 1 }
  0xc3   : > { %p22002_p7 = por %p233_p0, %p56_p1  ;;  %p20351_p9 = scmp.lt.s32.totalorder %s21708_s10, 2 }
  0xc4   : > { %s22008_s20 = scalar_select %p47_p2, %s21696_s29, %s49_s24  }
  0xc5   : > { %s23932_s15 = scalar_select %p22002_p7, 1, 0 }
  0xc6   : > { %p22010_p5 = por %p239_p4, %p62_p11  ;;  %s344_s3 = sand.u32 1, %s21696_s29  }
  0xc7   : > { %s17382_s30 = sshll.u32 %s344_s3, 9  ;;  %s19384_s23 = sshll.u32 %s21704_s9, 13 }
  0xc8   : > { %s23933_s8 = scalar_select %p22010_p5, 1, 0 }
  0xc9   : > { %s22019_s17 = scalar_lea.hbm %s23764_s0, %s19384_s23  ;;  %s348_s22 = scalar_lea.vmem [#allocation2], %s17382_s30 }
  0xca   : > { %s358_s19 = sshll.u32 %s348_s22, 4  ;;  %p22025_p10 = pnand %p20351_p9, %p21988_p12  ;;  %s22021_s19 = int_to_ptr.vmem [resolvable:$true] %s358_s19 }
  0xcb   : > { %s22029_s24 = scalar_lea.sflag [#allocation3], %s344_s3  ;;  %s21580_s21 = scalar_lea.hbm %s22019_s17, 8192 }
  0xcc   : > { %p21581_p8 = scmp.ne.s32.totalorder %s22019_s17, %s21580_s21  ;;  %p21582_p1 = pneg %p22025_p10 }
  0xcd   : > { %s21585_s11 = scalar_lea.hbm %s23764_s0, 16384  ;;  %p21586_p12 = scmp.lt.u32.totalorder %s22019_s17, %s23764_s0 }
  0xce   : > { %p21583_p3 = pnand %p21582_p1, %p21581_p8  ;;  %p21587_p13 = scmp.lt.u32.totalorder %s21585_s11, %s21580_s21 }
  0xcf   : > { %p21589_p2 = scmp.lt.u32.totalorder %s21580_s21, %s22019_s17 }
  0xd0   : > { %p21584_p11 = pneg %p21583_p3  ;;  %p21588_p0 = por %p21587_p13, %p21586_p12 }
  0xd2   : > { %p21590_p4 = por %p21589_p2, %p21588_p0 }
  0xd4   : > { %p21591_p9 = pnand %p21590_p4, %p21584_p11 }
  0xd6   : > { %21594 = shalt.err (!%p21591_p9)
}
  0xd7   : > { %s21595_s3 = scalar_lea.vmem %s22021_s19, 8192  ;;  %s21721_s14 = smov [#allocation2]  }
  0xd8   : > { %p21596_p8 = scmp.ne.s32.totalorder %s22021_s19, %s21595_s3  ;;  %s21600_s22 = sshll.u32 %s21721_s14, 4  ;;  %s21601_s22 = int_to_ptr.vmem [resolvable:$false] %s21600_s22 }
  0xd9   : > { %s21602_s1 = scalar_lea.vmem %s21601_s22, 16384  ;;  %p21603_p7 = scmp.lt.s32.totalorder %s22021_s19, %s21601_s22 }
  0xda   : > { %p21598_p3 = pnand %p21596_p8, %p21582_p1  ;;  %p21604_p12 = scmp.lt.s32.totalorder %s21602_s1, %s21595_s3 }
  0xdc   : > { %p21599_p5 = pneg %p21598_p3  ;;  %p21605_p13 = por %p21604_p12, %p21603_p7 }
  0xde   : > { %p21606_p0 = pnand %p21605_p13, %p21599_p5 }
  0xe0   : > { %21609 = shalt.err (!%p21606_p0)
}
  0xe1   : > { %s21722_s21 = smov 1024   ;;  %s21723_s30 = smov 64  }
  0xe2   : > { %20339 = dma.hbm_to_vmem [thread:$0]  (!%p22025_p10), %s22019_s17, 8192, %s22021_s19, %s22029_s24, %s21722_s21, %s21722_s21, %s21723_s30  }
  0xe3   : > { %p23935_p1 = scmp.ne.s32.totalorder %s23923_s13, 0 }
  0xe5   : > { %370 = sbr.rel (%p23935_p1) target bundleno = 2776 (0xad8), region = 52 }
  0xec   : > { %s22060_s11 = sand.u32 1, %s21692_s28  }
  0xed   : > { %s17386_s23 = sshll.u32 %s22060_s11, 9  ;;  %s373_s25 = scalar_lea.sflag [#allocation3], %s22060_s11 }
  0xee   : > { %s22064_s3 = scalar_lea.vmem [#allocation2], %s17386_s23 }
  0xef   : > { %21663 = dma.done.wait (%p21994_p6), %s373_s25, 8192  }
  0xf0   : > { %21665 = vsyncadd (%p21994_p6), %s373_s25, 4294959104  ;;  %p23936_p7 = scmp.ne.s32.totalorder %s23922_s12, 0 }
  0xf2   : > { %21667 = dma.done.wait (%p23936_p7), [#allocation6], 65600  }
  0xf3   : > { %21669 = vsyncadd (%p23936_p7), [#allocation6], 4294901696 }
  0xf4   : > { %21671 = dma.done.wait (%p23936_p7), [#allocation9], 16448  }
  0xf5   : > { %21673 = vsyncadd (%p23936_p7), [#allocation9], 4294950848 }
  0xf6   : > { %21675 = dma.done.wait (%p23936_p7), [#allocation12], 32896  }
  0xf7   : > { %21677 = vsyncadd (%p23936_p7), [#allocation12], 4294934400 }
  0xf8   : > { %21679 = dma.done.wait (%p23936_p7), [#allocation15], 131072  }
  0xf9   : > { %21681 = vsyncadd (%p23936_p7), [#allocation15], 4294836224  ;;  %v20423_v0 = vld [vmem:[#allocation5 + $0x4] ss:$16 sps:$4 sm:$0xff]   ;;  %v20425_v1 = vld [vmem:[#allocation5 + $0xc] ss:$16 sps:$4 sm:$0xff]  }
  0xfa   : > { %3921 = vmatprep.subr.bf16.mxu0 %v20423_v0  ;;  %v20427_v2 = vld [vmem:[#allocation5] ss:$16 sps:$4 sm:$0xff]   ;;  %v20428_v3 = vld [vmem:[#allocation5 + $0x8] ss:$16 sps:$4 sm:$0xff]   ;;  %4505 = vmatprep.subr.bf16.mxu1 %v20425_v1  ;;  %v20429_v4 = vld [vmem:[#allocation5 + $0x24] ss:$16 sps:$4 sm:$0xff]  }
  0xfb   : > { %3922 = vmatpush1.bf16.msra.mxu0 %v20427_v2  ;;  %4506 = vmatpush1.bf16.msra.mxu1 %v20428_v3  ;;  %v20431_v5 = vld [vmem:[#allocation5 + $0x2c] ss:$16 sps:$4 sm:$0xff]   ;;  %v20433_v6 = vld [vmem:[#allocation5 + $0x20] ss:$16 sps:$4 sm:$0xff]   ;;  %v20434_v7 = vld [vmem:[#allocation5 + $0x28] ss:$16 sps:$4 sm:$0xff]  }
  0xfc   : > { %3923 = vmatprep.subr.bf16.mxu0 %v20429_v4  ;;  %4507 = vmatprep.subr.bf16.mxu1 %v20431_v5  ;;  %v20435_v8 = vld [vmem:[#allocation5 + $0x44] ss:$16 sps:$4 sm:$0xff]   ;;  %v20437_v9 = vld [vmem:[#allocation5 + $0x4c] ss:$16 sps:$4 sm:$0xff]   ;;  %v20439_v10 = vld [vmem:[#allocation5 + $0x40] ss:$16 sps:$4 sm:$0xff]  }
  0xfd   : > { %v20440_v11 = vld [vmem:[#allocation5 + $0x48] ss:$16 sps:$4 sm:$0xff]   ;;  %v20441_v12 = vld [vmem:[#allocation5 + $0x64] ss:$16 sps:$4 sm:$0xff]   ;;  %v20443_v13 = vld [vmem:[#allocation5 + $0x6c] ss:$16 sps:$4 sm:$0xff]  }
  0xfe   : > { %v20445_v14 = vld [vmem:[#allocation5 + $0x60] ss:$16 sps:$4 sm:$0xff]   ;;  %v20446_v15 = vld [vmem:[#allocation5 + $0x68] ss:$16 sps:$4 sm:$0xff]   ;;  %v20447_v16 = vld [vmem:[#allocation5 + $0x84] ss:$16 sps:$4 sm:$0xff]  }
  0xff   : > { %3924 = vmatpush1.bf16.msra.mxu0 %v20433_v6  ;;  %4508 = vmatpush1.bf16.msra.mxu1 %v20434_v7  ;;  %v20449_v17 = vld [vmem:[#allocation5 + $0x8c] ss:$16 sps:$4 sm:$0xff]   ;;  %v20451_v18 = vld [vmem:[#allocation5 + $0x80] ss:$16 sps:$4 sm:$0xff]   ;;  %v20452_v19 = vld [vmem:[#allocation5 + $0x88] ss:$16 sps:$4 sm:$0xff]  }
 0x100   : > { %3925 = vmatprep.subr.bf16.mxu0 %v20435_v8  ;;  %4509 = vmatprep.subr.bf16.mxu1 %v20437_v9  ;;  %v20453_v20 = vld [vmem:[#allocation5 + $0xa4] ss:$16 sps:$4 sm:$0xff]   ;;  %v20455_v21 = vld [vmem:[#allocation5 + $0xac] ss:$16 sps:$4 sm:$0xff]   ;;  %v20457_v22 = vld [vmem:[#allocation5 + $0xa0] ss:$16 sps:$4 sm:$0xff]  }
 0x101   : > { %v20458_v23 = vld [vmem:[#allocation5 + $0xa8] ss:$16 sps:$4 sm:$0xff]   ;;  %v20459_v24 = vld [vmem:[#allocation5 + $0xc4] ss:$16 sps:$4 sm:$0xff]   ;;  %v20461_v25 = vld [vmem:[#allocation5 + $0xcc] ss:$16 sps:$4 sm:$0xff]  }
 0x102   : > { %v20463_v26 = vld [vmem:[#allocation5 + $0xc0] ss:$16 sps:$4 sm:$0xff]   ;;  %v20464_v27 = vld [vmem:[#allocation5 + $0xc8] ss:$16 sps:$4 sm:$0xff]   ;;  %v20465_v28 = vld [vmem:[#allocation5 + $0xe4] ss:$16 sps:$4 sm:$0xff]  }
 0x103   : > { %3926 = vmatpush1.bf16.msra.mxu0 %v20439_v10  ;;  %4510 = vmatpush1.bf16.msra.mxu1 %v20440_v11  ;;  %v20467_v29 = vld [vmem:[#allocation5 + $0xec] ss:$16 sps:$4 sm:$0xff]   ;;  %v20469_v30 = vld [vmem:[#allocation5 + $0xe0] ss:$16 sps:$4 sm:$0xff]   ;;  %v20470_v31 = vld [vmem:[#allocation5 + $0xe8] ss:$16 sps:$4 sm:$0xff]  }
 0x104   : > { %3927 = vmatprep.subr.bf16.mxu0 %v20441_v12  ;;  %4511 = vmatprep.subr.bf16.mxu1 %v20443_v13  ;;  %v20471_v32 = vld [vmem:[#allocation5 + $0x104] ss:$16 sps:$4 sm:$0xff]   ;;  %v20473_v33 = vld [vmem:[#allocation5 + $0x10c] ss:$16 sps:$4 sm:$0xff]   ;;  %v20475_v34 = vld [vmem:[#allocation5 + $0x100] ss:$16 sps:$4 sm:$0xff]  }
 0x105   : > { %v20476_v35 = vld [vmem:[#allocation5 + $0x108] ss:$16 sps:$4 sm:$0xff]   ;;  %v20477_v36 = vld [vmem:[#allocation5 + $0x124] ss:$16 sps:$4 sm:$0xff]   ;;  %v20479_v37 = vld [vmem:[#allocation5 + $0x12c] ss:$16 sps:$4 sm:$0xff]  }
 0x106   : > { %v20481_v38 = vld [vmem:[#allocation5 + $0x120] ss:$16 sps:$4 sm:$0xff]   ;;  %v20482_v39 = vld [vmem:[#allocation5 + $0x128] ss:$16 sps:$4 sm:$0xff]   ;;  %v20483_v40 = vld [vmem:[#allocation5 + $0x144] ss:$16 sps:$4 sm:$0xff]  }
 0x107   : > { %3928 = vmatpush1.bf16.msra.mxu0 %v20445_v14  ;;  %4512 = vmatpush1.bf16.msra.mxu1 %v20446_v15  ;;  %v20485_v41 = vld [vmem:[#allocation5 + $0x14c] ss:$16 sps:$4 sm:$0xff]   ;;  %v20487_v42 = vld [vmem:[#allocation5 + $0x140] ss:$16 sps:$4 sm:$0xff]   ;;  %v20488_v43 = vld [vmem:[#allocation5 + $0x148] ss:$16 sps:$4 sm:$0xff]  }
 0x108   : > { %3929 = vmatprep.subr.bf16.mxu0 %v20447_v16  ;;  %4513 = vmatprep.subr.bf16.mxu1 %v20449_v17  ;;  %v20489_v44 = vld [vmem:[#allocation5 + $0x164] ss:$16 sps:$4 sm:$0xff]   ;;  %v20491_v45 = vld [vmem:[#allocation5 + $0x16c] ss:$16 sps:$4 sm:$0xff]   ;;  %v20493_v48 = vld [vmem:[#allocation5 + $0x160] ss:$16 sps:$4 sm:$0xff]  }
 0x109   : > { %v443_v46 = vld [vmem:[%s22064_s3] sm:$0xff]  ;;  %v20494_v49 = vld [vmem:[#allocation5 + $0x168] ss:$16 sps:$4 sm:$0xff]   ;;  %v20497_v52 = vld [vmem:[#allocation5 + $0x18c] ss:$16 sps:$4 sm:$0xff]   ;;  %s24207_s12 = sld [smem:[#allocation23_spill]] }
 0x10a   : > { %v451_v47 = vld [vmem:[%s22064_s3 + $0x40] sm:$0xff]  ;;  %v20500_v54 = vld [vmem:[#allocation5 + $0x188] ss:$16 sps:$4 sm:$0xff]   ;;  %v20503_v56 = vld [vmem:[#allocation5 + $0x1ac] ss:$16 sps:$4 sm:$0xff]   ;;  %s17394_s13 = sshll.u32 %s22060_s11, 3 }
 0x10b   : > { %3930 = vmatpush1.bf16.msra.mxu0 %v20451_v18  ;;  %4514 = vmatpush1.bf16.msra.mxu1 %v20452_v19  ;;  %v22088_v50 = vcombine.high %v443_v46, %v451_v47  ;;  %v20495_v51 = vld [vmem:[#allocation5 + $0x184] ss:$16 sps:$4 sm:$0xff]   ;;  %v20499_v53 = vld [vmem:[#allocation5 + $0x180] ss:$16 sps:$4 sm:$0xff]   ;;  %v20506_v58 = vld [vmem:[#allocation5 + $0x1a8] ss:$16 sps:$4 sm:$0xff]   ;;  %v22092_v5 = vcombine.low %v443_v46, %v451_v47 }
 0x10c   : > { %3931 = vmatprep.subr.bf16.mxu0 %v20453_v20  ;;  %4515 = vmatprep.subr.bf16.mxu1 %v20455_v21  ;;  %v20501_v55 = vld [vmem:[#allocation5 + $0x1a4] ss:$16 sps:$4 sm:$0xff]   ;;  %v20505_v57 = vld [vmem:[#allocation5 + $0x1a0] ss:$16 sps:$4 sm:$0xff]   ;;  %v20509_v60 = vld [vmem:[#allocation5 + $0x1cc] ss:$16 sps:$4 sm:$0xff]  }
 0x10d   : > { %3953 = vmatprep.mubr.bf16.mxu0 %v22088_v50  ;;  %4537 = vmatprep.mubr.bf16.mxu1 %v22088_v50  ;;  %v20507_v59 = vld [vmem:[#allocation5 + $0x1c4] ss:$16 sps:$4 sm:$0xff]   ;;  %v20511_v61 = vld [vmem:[#allocation5 + $0x1c0] ss:$16 sps:$4 sm:$0xff]   ;;  %v20512_v62 = vld [vmem:[#allocation5 + $0x1c8] ss:$16 sps:$4 sm:$0xff]  }
 0x10e   : > { %v20513_v63 = vld [vmem:[#allocation5 + $0x1e4] ss:$16 sps:$4 sm:$0xff]   ;;  %v20515_v0 = vld [vmem:[#allocation5 + $0x1ec] ss:$16 sps:$4 sm:$0xff]   ;;  %v20517_v1 = vld [vmem:[#allocation5 + $0x1e0] ss:$16 sps:$4 sm:$0xff]  }
 0x10f   : > { %3932 = vmatpush1.bf16.msra.mxu0 %v20457_v22  ;;  %4516 = vmatpush1.bf16.msra.mxu1 %v20458_v23  ;;  %v20518_v2 = vld [vmem:[#allocation5 + $0x1e8] ss:$16 sps:$4 sm:$0xff]   ;;  %v20521_v3 = vld [vmem:[#allocation5 + $0x204] ss:$16 sps:$4 sm:$0xff]   ;;  %v20524_v4 = vld [vmem:[#allocation5 + $0x20c] ss:$16 sps:$4 sm:$0xff]  }
 0x110   : > { %3933 = vmatprep.subr.bf16.mxu0 %v20459_v24  ;;  %4517 = vmatprep.subr.bf16.mxu1 %v20461_v25  ;;  %v20519_v6 = vld [vmem:[#allocation5 + $0x200] ss:$16 sps:$4 sm:$0xff]   ;;  %v20522_v7 = vld [vmem:[#allocation5 + $0x208] ss:$16 sps:$4 sm:$0xff]   ;;  %v20527_v8 = vld [vmem:[#allocation5 + $0x224] ss:$16 sps:$4 sm:$0xff]  }
 0x111   : > { %v20530_v9 = vld [vmem:[#allocation5 + $0x22c] ss:$16 sps:$4 sm:$0xff]   ;;  %v20525_v10 = vld [vmem:[#allocation5 + $0x220] ss:$16 sps:$4 sm:$0xff]   ;;  %v20528_v11 = vld [vmem:[#allocation5 + $0x228] ss:$16 sps:$4 sm:$0xff]  }
 0x112   : > { %v20533_v12 = vld [vmem:[#allocation5 + $0x244] ss:$16 sps:$4 sm:$0xff]   ;;  %v20536_v13 = vld [vmem:[#allocation5 + $0x24c] ss:$16 sps:$4 sm:$0xff]   ;;  %v20531_v16 = vld [vmem:[#allocation5 + $0x240] ss:$16 sps:$4 sm:$0xff]  }
 0x113   : > { %3934 = vmatpush1.bf16.msra.mxu0 %v20463_v26  ;;  %4518 = vmatpush1.bf16.msra.mxu1 %v20464_v27  ;;  %v459_v14 = vld [vmem:[%s22064_s3 + $0x80] sm:$0xff]  ;;  %v20534_v17 = vld [vmem:[#allocation5 + $0x248] ss:$16 sps:$4 sm:$0xff]   ;;  %v20542_v21 = vld [vmem:[#allocation5 + $0x26c] ss:$16 sps:$4 sm:$0xff]   ;;  %s19385_s18 = sshll.u32 %s24207_s12, 7 }
 0x114   : > { %3935 = vmatprep.subr.bf16.mxu0 %v20465_v28  ;;  %4519 = vmatprep.subr.bf16.mxu1 %v20467_v29  ;;  %v467_v15 = vld [vmem:[%s22064_s3 + $0xc0] sm:$0xff]  ;;  %v20540_v23 = vld [vmem:[#allocation5 + $0x268] ss:$16 sps:$4 sm:$0xff]   ;;  %v20548_v27 = vld [vmem:[#allocation5 + $0x28c] ss:$16 sps:$4 sm:$0xff]   ;;  %s436_s17 = scalar_lea.vmem [#allocation16], %s17394_s13 }
 0x115   : > { %v22098_v18 = vcombine.high %v459_v14, %v467_v15  ;;  %v22100_v19 = vcombine.low %v459_v14, %v467_v15  ;;  %v20539_v20 = vld [vmem:[#allocation5 + $0x264] ss:$16 sps:$4 sm:$0xff]   ;;  %v20537_v22 = vld [vmem:[#allocation5 + $0x260] ss:$16 sps:$4 sm:$0xff]   ;;  %v20566_v47 = vld [vmem:[#allocation5 + $0x2ec] ss:$16 sps:$4 sm:$0xff]  }
 0x116   : > { %v475_v24 = vld [vmem:[%s22064_s3 + $0x100] sm:$0xff]  ;;  %v20608_v14 = vld [vmem:[#allocation5 + $0x3cc] ss:$16 sps:$4 sm:$0xff]   ;;  %s17223_s19 = sshll.u32 %s436_s17, 4  ;;  %s24208_s14 = sld [smem:[#allocation119_spill]]  ;;  %s23717_s19 = int_to_ptr.vmem [resolvable:$true] %s17223_s19 }
 0x117   : > { %3936 = vmatpush1.bf16.msra.mxu0 %v20469_v30  ;;  %4520 = vmatpush1.bf16.msra.mxu1 %v20470_v31  ;;  %v483_v25 = vld [vmem:[%s22064_s3 + $0x140] sm:$0xff]  ;;  %v20546_v31 = vld [vmem:[#allocation5 + $0x288] ss:$16 sps:$4 sm:$0xff]   ;;  %s17209_s1 = scalar_lea.sflag [#allocation4], %s22060_s11  ;;  %s21610_s21 = scalar_lea.vmem %s23717_s19, 128 }
 0x118   : > { %3937 = vmatprep.subr.bf16.mxu0 %v20471_v32  ;;  %4521 = vmatprep.subr.bf16.mxu1 %v20473_v33  ;;  %v20545_v26 = vld [vmem:[#allocation5 + $0x284] ss:$16 sps:$4 sm:$0xff]   ;;  %v22108_v28 = vcombine.high %v475_v24, %v483_v25  ;;  %v22112_v29 = vcombine.low %v475_v24, %v483_v25  ;;  %v20543_v30 = vld [vmem:[#allocation5 + $0x280] ss:$16 sps:$4 sm:$0xff]   ;;  %v20554_v33 = vld [vmem:[#allocation5 + $0x2ac] ss:$16 sps:$4 sm:$0xff]   ;;  %p21611_p6 = scmp.ne.s32.totalorder %s23717_s19, %s21610_s21 }
 0x119   : > { %v20551_v32 = vld [vmem:[#allocation5 + $0x2a4] ss:$16 sps:$4 sm:$0xff]   ;;  %v20603_v15 = vld [vmem:[#allocation5 + $0x3c0] ss:$16 sps:$4 sm:$0xff]   ;;  %v20620_v24 = vld [vmem:[#allocation5 + $0x40c] ss:$16 sps:$4 sm:$0xff]  }
 0x11a   : > { %v20563_v46 = vld [vmem:[#allocation5 + $0x2e4] ss:$16 sps:$4 sm:$0xff]   ;;  %v20615_v25 = vld [vmem:[#allocation5 + $0x400] ss:$16 sps:$4 sm:$0xff]   ;;  %p24209_p5 = scmp.ne.s32.totalorder %s23932_s15, 0  ;;  %s21725_s30 = smov [#allocation16]  }
 0x11b   : > { %3938 = vmatpush1.bf16.msra.mxu0 %v20475_v34  ;;  %4522 = vmatpush1.bf16.msra.mxu1 %v20476_v35  ;;  %v491_v34 = vld [vmem:[%s22064_s3 + $0x180] sm:$0xff]  ;;  %s21614_s23 = sshll.u32 %s21725_s30, 4  ;;  %s21615_s23 = int_to_ptr.vmem [resolvable:$false] %s21614_s23 }
 0x11c   : > { %3939 = vmatprep.subr.bf16.mxu0 %v20477_v36  ;;  %4523 = vmatprep.subr.bf16.mxu1 %v20479_v37  ;;  %v499_v35 = vld [vmem:[%s22064_s3 + $0x1c0] sm:$0xff]  ;;  %v20552_v37 = vld [vmem:[#allocation5 + $0x2a8] ss:$16 sps:$4 sm:$0xff]   ;;  %s23715_s22 = scalar_lea.hbm %s24208_s14, %s19385_s18  ;;  %p21612_p10 = pnand %p21611_p6, %p24209_p5 }
 0x11d   : > { %v20549_v36 = vld [vmem:[#allocation5 + $0x2a0] ss:$16 sps:$4 sm:$0xff]   ;;  %s21616_s25 = scalar_lea.vmem %s21615_s23, 256  ;;  %p21617_p2 = scmp.lt.s32.totalorder %s23717_s19, %s21615_s23 }
 0x11e   : > { %p21613_p11 = pneg %p21612_p10  ;;  %p21618_p4 = scmp.lt.s32.totalorder %s21616_s25, %s21610_s21 }
 0x11f   : > { %3940 = vmatpush1.bf16.msra.mxu0 %v20481_v38  ;;  %4524 = vmatpush1.bf16.msra.mxu1 %v20482_v39  ;;  %v22118_v38 = vcombine.high %v491_v34, %v499_v35  ;;  %v20557_v39 = vld [vmem:[#allocation5 + $0x2c4] ss:$16 sps:$4 sm:$0xff]  }
 0x120   : > { %3941 = vmatprep.subr.bf16.mxu0 %v20483_v40  ;;  %4525 = vmatprep.subr.bf16.mxu1 %v20485_v41  ;;  %v20560_v40 = vld [vmem:[#allocation5 + $0x2cc] ss:$16 sps:$4 sm:$0xff]   ;;  %v20555_v41 = vld [vmem:[#allocation5 + $0x2c0] ss:$16 sps:$4 sm:$0xff]   ;;  %p21619_p9 = por %p21618_p4, %p21617_p2 }
 0x122   : > { %p21620_p8 = pnand %p21619_p9, %p21613_p11 }
 0x123   : > { %3942 = vmatpush1.bf16.msra.mxu0 %v20487_v42  ;;  %4526 = vmatpush1.bf16.msra.mxu1 %v20488_v43  ;;  %v20558_v42 = vld [vmem:[#allocation5 + $0x2c8] ss:$16 sps:$4 sm:$0xff]   ;;  %v22122_v43 = vcombine.low %v491_v34, %v499_v35  ;;  %v20621_v35 = vld [vmem:[#allocation5 + $0x420] ss:$16 sps:$4 sm:$0xff]  }
 0x124   : > { %3943 = vmatprep.subr.bf16.mxu0 %v20489_v44  ;;  %4527 = vmatprep.subr.bf16.mxu1 %v20491_v45  ;;  %v22125_v44 = vld [vmem:[%s22064_s3 + $0x8] sm:$0xff] }
 0x125   : > { %v22128_v45 = vld [vmem:[%s22064_s3 + $0x48] sm:$0xff] }
 0x127   : > { %3944 = vmatpush1.bf16.msra.mxu0 %v20493_v48  ;;  %4528 = vmatpush1.bf16.msra.mxu1 %v20494_v49  ;;  %v22132_v48 = vcombine.high %v22125_v44, %v22128_v45  ;;  %v20561_v49 = vld [vmem:[#allocation5 + $0x2e0] ss:$16 sps:$4 sm:$0xff]  }
 0x128   : > { %3945 = vmatprep.subr.bf16.mxu0 %v20495_v51  ;;  %4529 = vmatprep.subr.bf16.mxu1 %v20497_v52  ;;  %v20564_v51 = vld [vmem:[#allocation5 + $0x2e8] ss:$16 sps:$4 sm:$0xff]   ;;  %v20569_v52 = vld [vmem:[#allocation5 + $0x304] ss:$16 sps:$4 sm:$0xff]  }
 0x12b   : > { %3946 = vmatpush1.bf16.msra.mxu0 %v20499_v53  ;;  %4530 = vmatpush1.bf16.msra.mxu1 %v20500_v54  ;;  %v20572_v53 = vld [vmem:[#allocation5 + $0x30c] ss:$16 sps:$4 sm:$0xff]   ;;  %v20567_v54 = vld [vmem:[#allocation5 + $0x300] ss:$16 sps:$4 sm:$0xff]  }
 0x12c   : > { %3947 = vmatprep.subr.bf16.mxu0 %v20501_v55  ;;  %4531 = vmatprep.subr.bf16.mxu1 %v20503_v56  ;;  %v20570_v55 = vld [vmem:[#allocation5 + $0x308] ss:$16 sps:$4 sm:$0xff]   ;;  %v20575_v56 = vld [vmem:[#allocation5 + $0x324] ss:$16 sps:$4 sm:$0xff]  }
 0x12f   : > { %3948 = vmatpush1.bf16.msra.mxu0 %v20505_v57  ;;  %4532 = vmatpush1.bf16.msra.mxu1 %v20506_v58  ;;  %v20578_v57 = vld [vmem:[#allocation5 + $0x32c] ss:$16 sps:$4 sm:$0xff]   ;;  %v20573_v58 = vld [vmem:[#allocation5 + $0x320] ss:$16 sps:$4 sm:$0xff]  }
 0x130   : > { %3949 = vmatprep.subr.bf16.mxu0 %v20507_v59  ;;  %4533 = vmatprep.subr.bf16.mxu1 %v20509_v60  ;;  %v20576_v59 = vld [vmem:[#allocation5 + $0x328] ss:$16 sps:$4 sm:$0xff]   ;;  %v20581_v60 = vld [vmem:[#allocation5 + $0x344] ss:$16 sps:$4 sm:$0xff]  }
 0x133   : > { %3950 = vmatpush1.bf16.msra.mxu0 %v20511_v61  ;;  %4534 = vmatpush1.bf16.msra.mxu1 %v20512_v62  ;;  %v20584_v61 = vld [vmem:[#allocation5 + $0x34c] ss:$16 sps:$4 sm:$0xff]   ;;  %v20579_v62 = vld [vmem:[#allocation5 + $0x340] ss:$16 sps:$4 sm:$0xff]  }
 0x134   : > { %3951 = vmatprep.subr.bf16.mxu0 %v20513_v63  ;;  %4535 = vmatprep.subr.bf16.mxu1 %v20515_v0  ;;  %v20582_v63 = vld [vmem:[#allocation5 + $0x348] ss:$16 sps:$4 sm:$0xff]   ;;  %v20587_v0 = vld [vmem:[#allocation5 + $0x364] ss:$16 sps:$4 sm:$0xff]  }
 0x137   : > { %3952 = vmatpush1.bf16.msra.mxu0 %v20517_v1  ;;  %4536 = vmatpush1.bf16.msra.mxu1 %v20518_v2  ;;  %v20590_v1 = vld [vmem:[#allocation5 + $0x36c] ss:$16 sps:$4 sm:$0xff]   ;;  %v20585_v2 = vld [vmem:[#allocation5 + $0x360] ss:$16 sps:$4 sm:$0xff]  }
 0x138   : > { %3994 = vmatprep.subr.bf16.mxu0 %v20521_v3  ;;  %4578 = vmatprep.subr.bf16.mxu1 %v20524_v4  ;;  %v20588_v3 = vld [vmem:[#allocation5 + $0x368] ss:$16 sps:$4 sm:$0xff]   ;;  %v20593_v4 = vld [vmem:[#allocation5 + $0x384] ss:$16 sps:$4 sm:$0xff]  }
 0x13a   : > { %3954 = vmatmul.mubr.bf16.vlgmr.msra.gmra.mrb[0].mxu0 %v22092_v5  ;;  %4538 = vmatmul.mubr.bf16.vlgmr.msra.gmra.mrb[0].mxu1 %v22092_v5 }
 0x13b   : > { %3995 = vmatpush1.bf16.msra.mxu0 %v20519_v6  ;;  %4579 = vmatpush1.bf16.msra.mxu1 %v20522_v7  ;;  %v20596_v6 = vld [vmem:[#allocation5 + $0x38c] ss:$16 sps:$4 sm:$0xff]   ;;  %v20591_v7 = vld [vmem:[#allocation5 + $0x380] ss:$16 sps:$4 sm:$0xff]  }
 0x13c   : > { %3996 = vmatprep.subr.bf16.mxu0 %v20527_v8  ;;  %4580 = vmatprep.subr.bf16.mxu1 %v20530_v9  ;;  %v20594_v8 = vld [vmem:[#allocation5 + $0x388] ss:$16 sps:$4 sm:$0xff]   ;;  %v20599_v9 = vld [vmem:[#allocation5 + $0x3a4] ss:$16 sps:$4 sm:$0xff]  }
 0x13d   : > { %3963 = vmatprep.mubr.bf16.mxu0 %v22098_v18  ;;  %4547 = vmatprep.mubr.bf16.mxu1 %v22098_v18 }
 0x13f   : > { %3997 = vmatpush1.bf16.msra.mxu0 %v20525_v10  ;;  %4581 = vmatpush1.bf16.msra.mxu1 %v20528_v11  ;;  %v20602_v10 = vld [vmem:[#allocation5 + $0x3ac] ss:$16 sps:$4 sm:$0xff]   ;;  %v20597_v11 = vld [vmem:[#allocation5 + $0x3a0] ss:$16 sps:$4 sm:$0xff]  }
 0x140   : > { %3998 = vmatprep.subr.bf16.mxu0 %v20533_v12  ;;  %4582 = vmatprep.subr.bf16.mxu1 %v20536_v13  ;;  %v20600_v12 = vld [vmem:[#allocation5 + $0x3a8] ss:$16 sps:$4 sm:$0xff]   ;;  %v20605_v13 = vld [vmem:[#allocation5 + $0x3c4] ss:$16 sps:$4 sm:$0xff]  }
 0x142   : > { %3964 = vmatmul.mubr.bf16.gmra.mrb[4].mxu0 %v22100_v19  ;;  %4548 = vmatmul.mubr.bf16.gmra.mrb[4].mxu1 %v22100_v19 }
 0x143   : > { %3999 = vmatpush1.bf16.msra.mxu0 %v20531_v16  ;;  %4583 = vmatpush1.bf16.msra.mxu1 %v20534_v17  ;;  %v20606_v16 = vld [vmem:[#allocation5 + $0x3c8] ss:$16 sps:$4 sm:$0xff]   ;;  %v20611_v17 = vld [vmem:[#allocation5 + $0x3e4] ss:$16 sps:$4 sm:$0xff]  }
 0x144   : > { %4000 = vmatprep.subr.bf16.mxu0 %v20539_v20  ;;  %4584 = vmatprep.subr.bf16.mxu1 %v20542_v21  ;;  %v20614_v20 = vld [vmem:[#allocation5 + $0x3ec] ss:$16 sps:$4 sm:$0xff]   ;;  %v20609_v21 = vld [vmem:[#allocation5 + $0x3e0] ss:$16 sps:$4 sm:$0xff]  }
 0x145   : > { %3973 = vmatprep.mubr.bf16.mxu0 %v22108_v28  ;;  %4557 = vmatprep.mubr.bf16.mxu1 %v22108_v28 }
 0x147   : > { %4001 = vmatpush1.bf16.msra.mxu0 %v20537_v22  ;;  %4585 = vmatpush1.bf16.msra.mxu1 %v20540_v23  ;;  %v20612_v22 = vld [vmem:[#allocation5 + $0x3e8] ss:$16 sps:$4 sm:$0xff]   ;;  %v20617_v23 = vld [vmem:[#allocation5 + $0x404] ss:$16 sps:$4 sm:$0xff]  }
 0x148   : > { %4002 = vmatprep.subr.bf16.mxu0 %v20545_v26  ;;  %4586 = vmatprep.subr.bf16.mxu1 %v20548_v27  ;;  %v20618_v26 = vld [vmem:[#allocation5 + $0x408] ss:$16 sps:$4 sm:$0xff]   ;;  %v22140_v27 = vcombine.low %v22125_v44, %v22128_v45  ;;  %v20627_v44 = vld [vmem:[#allocation5 + $0x440] ss:$16 sps:$4 sm:$0xff]  }
 0x149   : > { %v20630_v45 = vld [vmem:[#allocation5 + $0x448] ss:$16 sps:$4 sm:$0xff]  }
 0x14a   : > { %3974 = vmatmul.mubr.bf16.gmra.mrb[8].mxu0 %v22112_v29  ;;  %4558 = vmatmul.mubr.bf16.gmra.mrb[8].mxu1 %v22112_v29 }
 0x14b   : > { %4003 = vmatpush1.bf16.msra.mxu0 %v20543_v30  ;;  %4587 = vmatpush1.bf16.msra.mxu1 %v20546_v31  ;;  %v460_v30 = vld [vmem:[%s22064_s3 + $0x88] sm:$0xff] }
 0x14c   : > { %4004 = vmatprep.subr.bf16.mxu0 %v20551_v32  ;;  %4588 = vmatprep.subr.bf16.mxu1 %v20554_v33  ;;  %v468_v31 = vld [vmem:[%s22064_s3 + $0xc8] sm:$0xff]  ;;  %v20623_v32 = vld [vmem:[#allocation5 + $0x424] ss:$16 sps:$4 sm:$0xff]  }
 0x14d   : > { %3983 = vmatprep.mubr.bf16.mxu0 %v22118_v38  ;;  %4567 = vmatprep.mubr.bf16.mxu1 %v22118_v38  ;;  %v20626_v33 = vld [vmem:[#allocation5 + $0x42c] ss:$16 sps:$4 sm:$0xff]   ;;  %v22144_v34 = vcombine.high %v460_v30, %v468_v31 }
 0x14f   : > { %4005 = vmatpush1.bf16.msra.mxu0 %v20549_v36  ;;  %4589 = vmatpush1.bf16.msra.mxu1 %v20552_v37  ;;  %v20624_v36 = vld [vmem:[#allocation5 + $0x428] ss:$16 sps:$4 sm:$0xff]   ;;  %v20629_v37 = vld [vmem:[#allocation5 + $0x444] ss:$16 sps:$4 sm:$0xff]  }
 0x150   : > { %4006 = vmatprep.subr.bf16.mxu0 %v20557_v39  ;;  %4590 = vmatprep.subr.bf16.mxu1 %v20560_v40  ;;  %v20632_v39 = vld [vmem:[#allocation5 + $0x44c] ss:$16 sps:$4 sm:$0xff]  }
 0x151   : > { %v476_v40 = vld [vmem:[%s22064_s3 + $0x108] sm:$0xff] }
 0x152   : > { %3984 = vmatmul.mubr.bf16.gmra.mrb[12].mxu0 %v22122_v43  ;;  %4568 = vmatmul.mubr.bf16.gmra.mrb[12].mxu1 %v22122_v43 }
 0x153   : > { %4007 = vmatpush1.bf16.msra.mxu0 %v20555_v41  ;;  %4591 = vmatpush1.bf16.msra.mxu1 %v20558_v42  ;;  %v22151_v41 = vcombine.low %v460_v30, %v468_v31  ;;  %v484_v42 = vld [vmem:[%s22064_s3 + $0x148] sm:$0xff]  ;;  %v20683_v31 = vld [vmem:[#allocation5 + $0x564] ss:$16 sps:$4 sm:$0xff]  }
 0x154   : > { %4008 = vmatprep.subr.bf16.mxu0 %v20563_v46  ;;  %4592 = vmatprep.subr.bf16.mxu1 %v20566_v47  ;;  %v20635_v46 = vld [vmem:[#allocation5 + $0x464] ss:$16 sps:$4 sm:$0xff]   ;;  %v20638_v47 = vld [vmem:[#allocation5 + $0x46c] ss:$16 sps:$4 sm:$0xff]   ;;  %v20678_v30 = vld [vmem:[#allocation5 + $0x548] ss:$16 sps:$4 sm:$0xff]  }
 0x155   : > { %4026 = vmatprep.mubr.bf16.mxu0 %v22132_v48  ;;  %4610 = vmatprep.mubr.bf16.mxu1 %v22132_v48 }
 0x157   : > { %4009 = vmatpush1.bf16.msra.mxu0 %v20561_v49  ;;  %4593 = vmatpush1.bf16.msra.mxu1 %v20564_v51  ;;  %v22154_v49 = vcombine.high %v476_v40, %v484_v42  ;;  %v20633_v51 = vld [vmem:[#allocation5 + $0x460] ss:$16 sps:$4 sm:$0xff]  }
 0x158   : > { %4010 = vmatprep.subr.bf16.mxu0 %v20569_v52  ;;  %4594 = vmatprep.subr.bf16.mxu1 %v20572_v53  ;;  %v20636_v52 = vld [vmem:[#allocation5 + $0x468] ss:$16 sps:$4 sm:$0xff]   ;;  %v20641_v53 = vld [vmem:[#allocation5 + $0x484] ss:$16 sps:$4 sm:$0xff]  }
 0x15b   : > { %4011 = vmatpush1.bf16.msra.mxu0 %v20567_v54  ;;  %4595 = vmatpush1.bf16.msra.mxu1 %v20570_v55  ;;  %v20644_v54 = vld [vmem:[#allocation5 + $0x48c] ss:$16 sps:$4 sm:$0xff]  }
 0x15c   : > { %4012 = vmatprep.subr.bf16.mxu0 %v20575_v56  ;;  %4596 = vmatprep.subr.bf16.mxu1 %v20578_v57  ;;  %v492_v55 = vld [vmem:[%s22064_s3 + $0x188] sm:$0xff]  ;;  %v22161_v56 = vcombine.low %v476_v40, %v484_v42  ;;  %v20695_v42 = vld [vmem:[#allocation5 + $0x5a4] ss:$16 sps:$4 sm:$0xff]  }
 0x15d   : > { %v500_v57 = vld [vmem:[%s22064_s3 + $0x1c8] sm:$0xff] }
 0x15e   : > { %v20690_v40 = vld [vmem:[#allocation5 + $0x588] ss:$16 sps:$4 sm:$0xff]  }
 0x15f   : > { %4013 = vmatpush1.bf16.msra.mxu0 %v20573_v58  ;;  %4597 = vmatpush1.bf16.msra.mxu1 %v20576_v59  ;;  %v20639_v58 = vld [vmem:[#allocation5 + $0x480] ss:$16 sps:$4 sm:$0xff]   ;;  %v20642_v59 = vld [vmem:[#allocation5 + $0x488] ss:$16 sps:$4 sm:$0xff]  }
 0x160   : > { %4014 = vmatprep.subr.bf16.mxu0 %v20581_v60  ;;  %4598 = vmatprep.subr.bf16.mxu1 %v20584_v61  ;;  %v20647_v60 = vld [vmem:[#allocation5 + $0x4a4] ss:$16 sps:$4 sm:$0xff]   ;;  %v20650_v61 = vld [vmem:[#allocation5 + $0x4ac] ss:$16 sps:$4 sm:$0xff]  }
 0x163   : > { %4015 = vmatpush1.bf16.msra.mxu0 %v20579_v62  ;;  %4599 = vmatpush1.bf16.msra.mxu1 %v20582_v63  ;;  %v22164_v62 = vcombine.high %v492_v55, %v500_v57  ;;  %v20645_v63 = vld [vmem:[#allocation5 + $0x4a0] ss:$16 sps:$4 sm:$0xff]  }
 0x164   : > { %4016 = vmatprep.subr.bf16.mxu0 %v20587_v0  ;;  %4600 = vmatprep.subr.bf16.mxu1 %v20590_v1  ;;  %v20648_v0 = vld [vmem:[#allocation5 + $0x4a8] ss:$16 sps:$4 sm:$0xff]   ;;  %v20653_v1 = vld [vmem:[#allocation5 + $0x4c4] ss:$16 sps:$4 sm:$0xff]  }
 0x167   : > { %4017 = vmatpush1.bf16.msra.mxu0 %v20585_v2  ;;  %4601 = vmatpush1.bf16.msra.mxu1 %v20588_v3  ;;  %v20656_v2 = vld [vmem:[#allocation5 + $0x4cc] ss:$16 sps:$4 sm:$0xff]   ;;  %v22171_v3 = vld [vmem:[%s22064_s3 + $0x10] sm:$0xff] }
 0x168   : > { %4018 = vmatprep.subr.bf16.mxu0 %v20593_v4  ;;  %4602 = vmatprep.subr.bf16.mxu1 %v20596_v6  ;;  %v22173_v4 = vcombine.low %v492_v55, %v500_v57  ;;  %v22176_v6 = vld [vmem:[%s22064_s3 + $0x50] sm:$0xff]  ;;  %v20710_v55 = vld [vmem:[#allocation5 + $0x5ec] ss:$16 sps:$4 sm:$0xff]  }
 0x169   : > { %v20705_v57 = vld [vmem:[#allocation5 + $0x5e0] ss:$16 sps:$4 sm:$0xff]  }
 0x16b   : > { %4019 = vmatpush1.bf16.msra.mxu0 %v20591_v7  ;;  %4603 = vmatpush1.bf16.msra.mxu1 %v20594_v8  ;;  %v20651_v7 = vld [vmem:[#allocation5 + $0x4c0] ss:$16 sps:$4 sm:$0xff]   ;;  %v20654_v8 = vld [vmem:[#allocation5 + $0x4c8] ss:$16 sps:$4 sm:$0xff]  }
 0x16c   : > { %4020 = vmatprep.subr.bf16.mxu0 %v20599_v9  ;;  %4604 = vmatprep.subr.bf16.mxu1 %v20602_v10  ;;  %v20659_v9 = vld [vmem:[#allocation5 + $0x4e4] ss:$16 sps:$4 sm:$0xff]   ;;  %v20662_v10 = vld [vmem:[#allocation5 + $0x4ec] ss:$16 sps:$4 sm:$0xff]  }
 0x16f   : > { %4021 = vmatpush1.bf16.msra.mxu0 %v20597_v11  ;;  %4605 = vmatpush1.bf16.msra.mxu1 %v20600_v12  ;;  %v22180_v11 = vcombine.high %v22171_v3, %v22176_v6  ;;  %v20657_v12 = vld [vmem:[#allocation5 + $0x4e0] ss:$16 sps:$4 sm:$0xff]  }
 0x170   : > { %4022 = vmatprep.subr.bf16.mxu0 %v20605_v13  ;;  %4606 = vmatprep.subr.bf16.mxu1 %v20608_v14  ;;  %v20660_v13 = vld [vmem:[#allocation5 + $0x4e8] ss:$16 sps:$4 sm:$0xff]   ;;  %v20665_v14 = vld [vmem:[#allocation5 + $0x504] ss:$16 sps:$4 sm:$0xff]  }
 0x173   : > { %4023 = vmatpush1.bf16.msra.mxu0 %v20603_v15  ;;  %4607 = vmatpush1.bf16.msra.mxu1 %v20606_v16  ;;  %v20668_v15 = vld [vmem:[#allocation5 + $0x50c] ss:$16 sps:$4 sm:$0xff]   ;;  %v20663_v16 = vld [vmem:[#allocation5 + $0x500] ss:$16 sps:$4 sm:$0xff]  }
 0x174   : > { %4024 = vmatprep.subr.bf16.mxu0 %v20611_v17  ;;  %4608 = vmatprep.subr.bf16.mxu1 %v20614_v20  ;;  %v20666_v17 = vld [vmem:[#allocation5 + $0x508] ss:$16 sps:$4 sm:$0xff]   ;;  %v20671_v20 = vld [vmem:[#allocation5 + $0x524] ss:$16 sps:$4 sm:$0xff]  }
 0x177   : > { %4025 = vmatpush1.bf16.msra.mxu0 %v20609_v21  ;;  %4609 = vmatpush1.bf16.msra.mxu1 %v20612_v22  ;;  %v20674_v21 = vld [vmem:[#allocation5 + $0x52c] ss:$16 sps:$4 sm:$0xff]   ;;  %v20669_v22 = vld [vmem:[#allocation5 + $0x520] ss:$16 sps:$4 sm:$0xff]  }
 0x178   : > { %4067 = vmatprep.subr.bf16.mxu0 %v20617_v23  ;;  %4651 = vmatprep.subr.bf16.mxu1 %v20620_v24  ;;  %v20672_v23 = vld [vmem:[#allocation5 + $0x528] ss:$16 sps:$4 sm:$0xff]   ;;  %v20677_v24 = vld [vmem:[#allocation5 + $0x544] ss:$16 sps:$4 sm:$0xff]  }
 0x17a   : > { %4027 = vmatmul.mubr.bf16.vlgmr.msra.gmra.mrb[0].mxu0 %v22140_v27  ;;  %4611 = vmatmul.mubr.bf16.vlgmr.msra.gmra.mrb[0].mxu1 %v22140_v27 }
 0x17b   : > { %4068 = vmatpush1.bf16.msra.mxu0 %v20615_v25  ;;  %4652 = vmatpush1.bf16.msra.mxu1 %v20618_v26  ;;  %v20680_v25 = vld [vmem:[#allocation5 + $0x54c] ss:$16 sps:$4 sm:$0xff]   ;;  %v20675_v26 = vld [vmem:[#allocation5 + $0x540] ss:$16 sps:$4 sm:$0xff]  }
 0x17c   : > { %4069 = vmatprep.subr.bf16.mxu0 %v20623_v32  ;;  %4653 = vmatprep.subr.bf16.mxu1 %v20626_v33  ;;  %v20686_v32 = vld [vmem:[#allocation5 + $0x56c] ss:$16 sps:$4 sm:$0xff]   ;;  %v20681_v33 = vld [vmem:[#allocation5 + $0x560] ss:$16 sps:$4 sm:$0xff]  }
 0x17d   : > { %4036 = vmatprep.mubr.bf16.mxu0 %v22144_v34  ;;  %4620 = vmatprep.mubr.bf16.mxu1 %v22144_v34 }
 0x17f   : > { %4070 = vmatpush1.bf16.msra.mxu0 %v20621_v35  ;;  %4654 = vmatpush1.bf16.msra.mxu1 %v20624_v36  ;;  %v20684_v35 = vld [vmem:[#allocation5 + $0x568] ss:$16 sps:$4 sm:$0xff]   ;;  %v20689_v36 = vld [vmem:[#allocation5 + $0x584] ss:$16 sps:$4 sm:$0xff]  }
 0x180   : > { %4071 = vmatprep.subr.bf16.mxu0 %v20629_v37  ;;  %4655 = vmatprep.subr.bf16.mxu1 %v20632_v39  ;;  %v20692_v37 = vld [vmem:[#allocation5 + $0x58c] ss:$16 sps:$4 sm:$0xff]   ;;  %v20687_v39 = vld [vmem:[#allocation5 + $0x580] ss:$16 sps:$4 sm:$0xff]  }
 0x182   : > { %4037 = vmatmul.mubr.bf16.gmra.mrb[4].mxu0 %v22151_v41  ;;  %4621 = vmatmul.mubr.bf16.gmra.mrb[4].mxu1 %v22151_v41 }
 0x183   : > { %4072 = vmatpush1.bf16.msra.mxu0 %v20627_v44  ;;  %4656 = vmatpush1.bf16.msra.mxu1 %v20630_v45  ;;  %v20698_v44 = vld [vmem:[#allocation5 + $0x5ac] ss:$16 sps:$4 sm:$0xff]   ;;  %v20693_v45 = vld [vmem:[#allocation5 + $0x5a0] ss:$16 sps:$4 sm:$0xff]  }
 0x184   : > { %4073 = vmatprep.subr.bf16.mxu0 %v20635_v46  ;;  %4657 = vmatprep.subr.bf16.mxu1 %v20638_v47  ;;  %v20696_v46 = vld [vmem:[#allocation5 + $0x5a8] ss:$16 sps:$4 sm:$0xff]   ;;  %v20701_v47 = vld [vmem:[#allocation5 + $0x5c4] ss:$16 sps:$4 sm:$0xff]  }
 0x185   : > { %4046 = vmatprep.mubr.bf16.mxu0 %v22154_v49  ;;  %4630 = vmatprep.mubr.bf16.mxu1 %v22154_v49 }
 0x187   : > { %4074 = vmatpush1.bf16.msra.mxu0 %v20633_v51  ;;  %4658 = vmatpush1.bf16.msra.mxu1 %v20636_v52  ;;  %v20704_v51 = vld [vmem:[#allocation5 + $0x5cc] ss:$16 sps:$4 sm:$0xff]   ;;  %v20699_v52 = vld [vmem:[#allocation5 + $0x5c0] ss:$16 sps:$4 sm:$0xff]  }
 0x188   : > { %4075 = vmatprep.subr.bf16.mxu0 %v20641_v53  ;;  %4659 = vmatprep.subr.bf16.mxu1 %v20644_v54  ;;  %v20702_v53 = vld [vmem:[#allocation5 + $0x5c8] ss:$16 sps:$4 sm:$0xff]   ;;  %v20707_v54 = vld [vmem:[#allocation5 + $0x5e4] ss:$16 sps:$4 sm:$0xff]  }
 0x18a   : > { %4047 = vmatmul.mubr.bf16.gmra.mrb[8].mxu0 %v22161_v56  ;;  %4631 = vmatmul.mubr.bf16.gmra.mrb[8].mxu1 %v22161_v56 }
 0x18b   : > { %4076 = vmatpush1.bf16.msra.mxu0 %v20639_v58  ;;  %4660 = vmatpush1.bf16.msra.mxu1 %v20642_v59  ;;  %v20708_v58 = vld [vmem:[#allocation5 + $0x5e8] ss:$16 sps:$4 sm:$0xff]   ;;  %v20713_v59 = vld [vmem:[#allocation5 + $0x604] ss:$16 sps:$4 sm:$0xff]  }
 0x18c   : > { %4077 = vmatprep.subr.bf16.mxu0 %v20647_v60  ;;  %4661 = vmatprep.subr.bf16.mxu1 %v20650_v61  ;;  %v20716_v60 = vld [vmem:[#allocation5 + $0x60c] ss:$16 sps:$4 sm:$0xff]   ;;  %v461_v61 = vld [vmem:[%s22064_s3 + $0x90] sm:$0xff] }
 0x18d   : > { %4056 = vmatprep.mubr.bf16.mxu0 %v22164_v62  ;;  %4640 = vmatprep.mubr.bf16.mxu1 %v22164_v62 }
 0x18f   : > { %4078 = vmatpush1.bf16.msra.mxu0 %v20645_v63  ;;  %4662 = vmatpush1.bf16.msra.mxu1 %v20648_v0  ;;  %v22189_v63 = vcombine.low %v22171_v3, %v22176_v6  ;;  %v469_v0 = vld [vmem:[%s22064_s3 + $0xd0] sm:$0xff]  ;;  %v20720_v6 = vld [vmem:[#allocation5 + $0x628] ss:$16 sps:$4 sm:$0xff]  }
 0x190   : > { %4079 = vmatprep.subr.bf16.mxu0 %v20653_v1  ;;  %4663 = vmatprep.subr.bf16.mxu1 %v20656_v2  ;;  %v20711_v1 = vld [vmem:[#allocation5 + $0x600] ss:$16 sps:$4 sm:$0xff]   ;;  %v20714_v2 = vld [vmem:[#allocation5 + $0x608] ss:$16 sps:$4 sm:$0xff]  }
 0x191   : > { %v20717_v3 = vld [vmem:[#allocation5 + $0x620] ss:$16 sps:$4 sm:$0xff]  }
 0x192   : > { %4057 = vmatmul.mubr.bf16.gmra.mrb[12].mxu0 %v22173_v4  ;;  %4641 = vmatmul.mubr.bf16.gmra.mrb[12].mxu1 %v22173_v4 }
 0x193   : > { %4080 = vmatpush1.bf16.msra.mxu0 %v20651_v7  ;;  %4664 = vmatpush1.bf16.msra.mxu1 %v20654_v8  ;;  %v20719_v7 = vld [vmem:[#allocation5 + $0x624] ss:$16 sps:$4 sm:$0xff]   ;;  %v20722_v8 = vld [vmem:[#allocation5 + $0x62c] ss:$16 sps:$4 sm:$0xff]  }
 0x194   : > { %4081 = vmatprep.subr.bf16.mxu0 %v20659_v9  ;;  %4665 = vmatprep.subr.bf16.mxu1 %v20662_v10  ;;  %v22192_v9 = vcombine.high %v461_v61, %v469_v0  ;;  %v20725_v10 = vld [vmem:[#allocation5 + $0x644] ss:$16 sps:$4 sm:$0xff]  }
 0x195   : > { %4099 = vmatprep.mubr.bf16.mxu0 %v22180_v11  ;;  %4683 = vmatprep.mubr.bf16.mxu1 %v22180_v11 }
 0x197   : > { %4082 = vmatpush1.bf16.msra.mxu0 %v20657_v12  ;;  %4666 = vmatpush1.bf16.msra.mxu1 %v20660_v13  ;;  %v20728_v12 = vld [vmem:[#allocation5 + $0x64c] ss:$16 sps:$4 sm:$0xff]   ;;  %v477_v13 = vld [vmem:[%s22064_s3 + $0x110] sm:$0xff] }
 0x198   : > { %4083 = vmatprep.subr.bf16.mxu0 %v20665_v14  ;;  %4667 = vmatprep.subr.bf16.mxu1 %v20668_v15  ;;  %v22199_v14 = vcombine.low %v461_v61, %v469_v0  ;;  %v485_v15 = vld [vmem:[%s22064_s3 + $0x150] sm:$0xff]  ;;  %v20764_v61 = vld [vmem:[#allocation5 + $0x70c] ss:$16 sps:$4 sm:$0xff]  }
 0x199   : > { %v20759_v0 = vld [vmem:[#allocation5 + $0x700] ss:$16 sps:$4 sm:$0xff]  }
 0x19b   : > { %4084 = vmatpush1.bf16.msra.mxu0 %v20663_v16  ;;  %4668 = vmatpush1.bf16.msra.mxu1 %v20666_v17  ;;  %v20723_v16 = vld [vmem:[#allocation5 + $0x640] ss:$16 sps:$4 sm:$0xff]   ;;  %v20726_v17 = vld [vmem:[#allocation5 + $0x648] ss:$16 sps:$4 sm:$0xff]  }
 0x19c   : > { %4085 = vmatprep.subr.bf16.mxu0 %v20671_v20  ;;  %4669 = vmatprep.subr.bf16.mxu1 %v20674_v21  ;;  %v20731_v20 = vld [vmem:[#allocation5 + $0x664] ss:$16 sps:$4 sm:$0xff]   ;;  %v20734_v21 = vld [vmem:[#allocation5 + $0x66c] ss:$16 sps:$4 sm:$0xff]  }
 0x19f   : > { %4086 = vmatpush1.bf16.msra.mxu0 %v20669_v22  ;;  %4670 = vmatpush1.bf16.msra.mxu1 %v20672_v23  ;;  %v22202_v22 = vcombine.high %v477_v13, %v485_v15  ;;  %v20729_v23 = vld [vmem:[#allocation5 + $0x660] ss:$16 sps:$4 sm:$0xff]  }
 0x1a0   : > { %4087 = vmatprep.subr.bf16.mxu0 %v20677_v24  ;;  %4671 = vmatprep.subr.bf16.mxu1 %v20680_v25  ;;  %v20732_v24 = vld [vmem:[#allocation5 + $0x668] ss:$16 sps:$4 sm:$0xff]   ;;  %v20737_v25 = vld [vmem:[#allocation5 + $0x684] ss:$16 sps:$4 sm:$0xff]  }
 0x1a1   : > { %23937 = vst [vmem:[#allocation24_spill] sm:$0xff] %v22202_v22 }
 0x1a3   : > { %4088 = vmatpush1.bf16.msra.mxu0 %v20675_v26  ;;  %4672 = vmatpush1.bf16.msra.mxu1 %v20678_v30  ;;  %v20740_v26 = vld [vmem:[#allocation5 + $0x68c] ss:$16 sps:$4 sm:$0xff]   ;;  %v20735_v30 = vld [vmem:[#allocation5 + $0x680] ss:$16 sps:$4 sm:$0xff]  }
 0x1a4   : > { %4089 = vmatprep.subr.bf16.mxu0 %v20683_v31  ;;  %4673 = vmatprep.subr.bf16.mxu1 %v20686_v32  ;;  %v20738_v31 = vld [vmem:[#allocation5 + $0x688] ss:$16 sps:$4 sm:$0xff]   ;;  %v22208_v32 = vcombine.low %v477_v13, %v485_v15  ;;  %v20779_v15 = vld [vmem:[#allocation5 + $0x764] ss:$16 sps:$4 sm:$0xff]  }
 0x1a5   : > { %v20774_v13 = vld [vmem:[#allocation5 + $0x748] ss:$16 sps:$4 sm:$0xff]  }
 0x1a6   : > { %23938 = vst [vmem:[#allocation25_spill] sm:$0xff] %v22208_v32 }
 0x1a7   : > { %4090 = vmatpush1.bf16.msra.mxu0 %v20681_v33  ;;  %4674 = vmatpush1.bf16.msra.mxu1 %v20684_v35  ;;  %v493_v33 = vld [vmem:[%s22064_s3 + $0x190] sm:$0xff] }
 0x1a8   : > { %4091 = vmatprep.subr.bf16.mxu0 %v20689_v36  ;;  %4675 = vmatprep.subr.bf16.mxu1 %v20692_v37  ;;  %v501_v35 = vld [vmem:[%s22064_s3 + $0x1d0] sm:$0xff]  ;;  %v20746_v37 = vld [vmem:[#allocation5 + $0x6ac] ss:$16 sps:$4 sm:$0xff]  }
 0x1a9   : > { %v20743_v36 = vld [vmem:[#allocation5 + $0x6a4] ss:$16 sps:$4 sm:$0xff]  }
 0x1ab   : > { %4092 = vmatpush1.bf16.msra.mxu0 %v20687_v39  ;;  %4676 = vmatpush1.bf16.msra.mxu1 %v20690_v40  ;;  %v22212_v39 = vcombine.high %v493_v33, %v501_v35  ;;  %v20741_v40 = vld [vmem:[#allocation5 + $0x6a0] ss:$16 sps:$4 sm:$0xff]  }
 0x1ac   : > { %4093 = vmatprep.subr.bf16.mxu0 %v20695_v42  ;;  %4677 = vmatprep.subr.bf16.mxu1 %v20698_v44  ;;  %v20744_v42 = vld [vmem:[#allocation5 + $0x6a8] ss:$16 sps:$4 sm:$0xff]   ;;  %v20749_v44 = vld [vmem:[#allocation5 + $0x6c4] ss:$16 sps:$4 sm:$0xff]  }
 0x1ad   : > { %23939 = vst [vmem:[#allocation26_spill] sm:$0xff] %v22212_v39 }
 0x1af   : > { %4094 = vmatpush1.bf16.msra.mxu0 %v20693_v45  ;;  %4678 = vmatpush1.bf16.msra.mxu1 %v20696_v46  ;;  %v20752_v45 = vld [vmem:[#allocation5 + $0x6cc] ss:$16 sps:$4 sm:$0xff]  }
 0x1b0   : > { %4095 = vmatprep.subr.bf16.mxu0 %v20701_v47  ;;  %4679 = vmatprep.subr.bf16.mxu1 %v20704_v51  ;;  %v22219_v46 = vld [vmem:[%s22064_s3 + $0x18] sm:$0xff]  ;;  %v22221_v47 = vcombine.low %v493_v33, %v501_v35  ;;  %v20797_v35 = vld [vmem:[#allocation5 + $0x7c4] ss:$16 sps:$4 sm:$0xff]  }
 0x1b1   : > { %v22224_v51 = vld [vmem:[%s22064_s3 + $0x58] sm:$0xff] }
 0x1b2   : > { %23940 = vst [vmem:[#allocation27_spill] sm:$0xff] %v22221_v47  ;;  %v20792_v33 = vld [vmem:[#allocation5 + $0x7a8] ss:$16 sps:$4 sm:$0xff]  }
 0x1b3   : > { %4096 = vmatpush1.bf16.msra.mxu0 %v20699_v52  ;;  %4680 = vmatpush1.bf16.msra.mxu1 %v20702_v53  ;;  %v20747_v52 = vld [vmem:[#allocation5 + $0x6c0] ss:$16 sps:$4 sm:$0xff]   ;;  %v20750_v53 = vld [vmem:[#allocation5 + $0x6c8] ss:$16 sps:$4 sm:$0xff]  }
 0x1b4   : > { %4097 = vmatprep.subr.bf16.mxu0 %v20707_v54  ;;  %4681 = vmatprep.subr.bf16.mxu1 %v20710_v55  ;;  %v20755_v54 = vld [vmem:[#allocation5 + $0x6e4] ss:$16 sps:$4 sm:$0xff]   ;;  %v20758_v55 = vld [vmem:[#allocation5 + $0x6ec] ss:$16 sps:$4 sm:$0xff]  }
 0x1b7   : > { %4098 = vmatpush1.bf16.msra.mxu0 %v20705_v57  ;;  %4682 = vmatpush1.bf16.msra.mxu1 %v20708_v58  ;;  %v22228_v57 = vcombine.high %v22219_v46, %v22224_v51  ;;  %v20753_v58 = vld [vmem:[#allocation5 + $0x6e0] ss:$16 sps:$4 sm:$0xff]  }
 0x1b8   : > { %4140 = vmatprep.subr.bf16.mxu0 %v20713_v59  ;;  %4724 = vmatprep.subr.bf16.mxu1 %v20716_v60  ;;  %v20756_v59 = vld [vmem:[#allocation5 + $0x6e8] ss:$16 sps:$4 sm:$0xff]   ;;  %v20761_v60 = vld [vmem:[#allocation5 + $0x704] ss:$16 sps:$4 sm:$0xff]  }
 0x1b9   : > { %23941 = vst [vmem:[#allocation28_spill] sm:$0xff] %v22228_v57 }
 0x1ba   : > { %4100 = vmatmul.mubr.bf16.vlgmr.msra.gmra.mrb[0].mxu0 %v22189_v63  ;;  %4684 = vmatmul.mubr.bf16.vlgmr.msra.gmra.mrb[0].mxu1 %v22189_v63 }
 0x1bb   : > { %4141 = vmatpush1.bf16.msra.mxu0 %v20711_v1  ;;  %4725 = vmatpush1.bf16.msra.mxu1 %v20714_v2  ;;  %v20762_v1 = vld [vmem:[#allocation5 + $0x708] ss:$16 sps:$4 sm:$0xff]   ;;  %v20767_v2 = vld [vmem:[#allocation5 + $0x724] ss:$16 sps:$4 sm:$0xff]  }
 0x1bc   : > { %4142 = vmatprep.subr.bf16.mxu0 %v20719_v7  ;;  %4726 = vmatprep.subr.bf16.mxu1 %v20722_v8  ;;  %v20770_v7 = vld [vmem:[#allocation5 + $0x72c] ss:$16 sps:$4 sm:$0xff]   ;;  %v20765_v8 = vld [vmem:[#allocation5 + $0x720] ss:$16 sps:$4 sm:$0xff]  }
 0x1bd   : > { %4109 = vmatprep.mubr.bf16.mxu0 %v22192_v9  ;;  %4693 = vmatprep.mubr.bf16.mxu1 %v22192_v9 }
 0x1bf   : > { %4143 = vmatpush1.bf16.msra.mxu0 %v20717_v3  ;;  %4727 = vmatpush1.bf16.msra.mxu1 %v20720_v6  ;;  %v20768_v3 = vld [vmem:[#allocation5 + $0x728] ss:$16 sps:$4 sm:$0xff]   ;;  %v20773_v6 = vld [vmem:[#allocation5 + $0x744] ss:$16 sps:$4 sm:$0xff]  }
 0x1c0   : > { %4144 = vmatprep.subr.bf16.mxu0 %v20725_v10  ;;  %4728 = vmatprep.subr.bf16.mxu1 %v20728_v12  ;;  %v20776_v10 = vld [vmem:[#allocation5 + $0x74c] ss:$16 sps:$4 sm:$0xff]   ;;  %v20771_v12 = vld [vmem:[#allocation5 + $0x740] ss:$16 sps:$4 sm:$0xff]  }
 0x1c2   : > { %4110 = vmatmul.mubr.bf16.gmra.mrb[4].mxu0 %v22199_v14  ;;  %4694 = vmatmul.mubr.bf16.gmra.mrb[4].mxu1 %v22199_v14 }
 0x1c3   : > { %4145 = vmatpush1.bf16.msra.mxu0 %v20723_v16  ;;  %4729 = vmatpush1.bf16.msra.mxu1 %v20726_v17  ;;  %v20782_v16 = vld [vmem:[#allocation5 + $0x76c] ss:$16 sps:$4 sm:$0xff]   ;;  %v20777_v17 = vld [vmem:[#allocation5 + $0x760] ss:$16 sps:$4 sm:$0xff]  }
 0x1c4   : > { %4146 = vmatprep.subr.bf16.mxu0 %v20731_v20  ;;  %4730 = vmatprep.subr.bf16.mxu1 %v20734_v21  ;;  %v20780_v20 = vld [vmem:[#allocation5 + $0x768] ss:$16 sps:$4 sm:$0xff]   ;;  %v20785_v21 = vld [vmem:[#allocation5 + $0x784] ss:$16 sps:$4 sm:$0xff]  }
 0x1c5   : > { %4119 = vmatprep.mubr.bf16.mxu0 %v22202_v22  ;;  %4703 = vmatprep.mubr.bf16.mxu1 %v22202_v22 }
 0x1c7   : > { %4147 = vmatpush1.bf16.msra.mxu0 %v20729_v23  ;;  %4731 = vmatpush1.bf16.msra.mxu1 %v20732_v24  ;;  %v20788_v23 = vld [vmem:[#allocation5 + $0x78c] ss:$16 sps:$4 sm:$0xff]   ;;  %v20783_v24 = vld [vmem:[#allocation5 + $0x780] ss:$16 sps:$4 sm:$0xff]  }
 0x1c8   : > { %4148 = vmatprep.subr.bf16.mxu0 %v20737_v25  ;;  %4732 = vmatprep.subr.bf16.mxu1 %v20740_v26  ;;  %v20786_v25 = vld [vmem:[#allocation5 + $0x788] ss:$16 sps:$4 sm:$0xff]   ;;  %v20791_v26 = vld [vmem:[#allocation5 + $0x7a4] ss:$16 sps:$4 sm:$0xff]  }
 0x1ca   : > { %4120 = vmatmul.mubr.bf16.gmra.mrb[8].mxu0 %v22208_v32  ;;  %4704 = vmatmul.mubr.bf16.gmra.mrb[8].mxu1 %v22208_v32  ;;  %v6380_v32 = vld [vmem:[#allocation11 + $0x588] sm:$0xff] }
 0x1cb   : > { %4149 = vmatpush1.bf16.msra.mxu0 %v20735_v30  ;;  %4733 = vmatpush1.bf16.msra.mxu1 %v20738_v31  ;;  %v20794_v30 = vld [vmem:[#allocation5 + $0x7ac] ss:$16 sps:$4 sm:$0xff]   ;;  %v20789_v31 = vld [vmem:[#allocation5 + $0x7a0] ss:$16 sps:$4 sm:$0xff]  }
 0x1cc   : > { %4150 = vmatprep.subr.bf16.mxu0 %v20743_v36  ;;  %4734 = vmatprep.subr.bf16.mxu1 %v20746_v37  ;;  %v20800_v36 = vld [vmem:[#allocation5 + $0x7cc] ss:$16 sps:$4 sm:$0xff]   ;;  %v20795_v37 = vld [vmem:[#allocation5 + $0x7c0] ss:$16 sps:$4 sm:$0xff]  }
 0x1cd   : > { %4129 = vmatprep.mubr.bf16.mxu0 %v22212_v39  ;;  %4713 = vmatprep.mubr.bf16.mxu1 %v22212_v39  ;;  %v6383_v39 = vld [vmem:[#allocation11 + $0x5a0] sm:$0xff] }
 0x1cf   : > { %4151 = vmatpush1.bf16.msra.mxu0 %v20741_v40  ;;  %4735 = vmatpush1.bf16.msra.mxu1 %v20744_v42  ;;  %v20798_v40 = vld [vmem:[#allocation5 + $0x7c8] ss:$16 sps:$4 sm:$0xff]   ;;  %v20803_v42 = vld [vmem:[#allocation5 + $0x7e4] ss:$16 sps:$4 sm:$0xff]  }
 0x1d0   : > { %4152 = vmatprep.subr.bf16.mxu0 %v20749_v44  ;;  %4736 = vmatprep.subr.bf16.mxu1 %v20752_v45  ;;  %v20806_v44 = vld [vmem:[#allocation5 + $0x7ec] ss:$16 sps:$4 sm:$0xff]   ;;  %v20801_v45 = vld [vmem:[#allocation5 + $0x7e0] ss:$16 sps:$4 sm:$0xff]  }
 0x1d2   : > { %4130 = vmatmul.mubr.bf16.gmra.mrb[12].mxu0 %v22221_v47  ;;  %4714 = vmatmul.mubr.bf16.gmra.mrb[12].mxu1 %v22221_v47 }
 0x1d3   : > { %4153 = vmatpush1.bf16.msra.mxu0 %v20747_v52  ;;  %4737 = vmatpush1.bf16.msra.mxu1 %v20750_v53  ;;  %v20804_v52 = vld [vmem:[#allocation5 + $0x7e8] ss:$16 sps:$4 sm:$0xff]   ;;  %v20809_v53 = vld [vmem:[#allocation5 + $0x804] ss:$16 sps:$4 sm:$0xff]  }
 0x1d4   : > { %4154 = vmatprep.subr.bf16.mxu0 %v20755_v54  ;;  %4738 = vmatprep.subr.bf16.mxu1 %v20758_v55  ;;  %v20812_v54 = vld [vmem:[#allocation5 + $0x80c] ss:$16 sps:$4 sm:$0xff]   ;;  %v20807_v55 = vld [vmem:[#allocation5 + $0x800] ss:$16 sps:$4 sm:$0xff]  }
 0x1d5   : > { %4172 = vmatprep.mubr.bf16.mxu0 %v22228_v57  ;;  %4756 = vmatprep.mubr.bf16.mxu1 %v22228_v57 }
 0x1d7   : > { %4155 = vmatpush1.bf16.msra.mxu0 %v20753_v58  ;;  %4739 = vmatpush1.bf16.msra.mxu1 %v20756_v59  ;;  %v22236_v58 = vcombine.low %v22219_v46, %v22224_v51  ;;  %v462_v59 = vld [vmem:[%s22064_s3 + $0x98] sm:$0xff]  ;;  %v20813_v46 = vld [vmem:[#allocation5 + $0x820] ss:$16 sps:$4 sm:$0xff]  }
 0x1d8   : > { %4156 = vmatprep.subr.bf16.mxu0 %v20761_v60  ;;  %4740 = vmatprep.subr.bf16.mxu1 %v20764_v61  ;;  %v470_v60 = vld [vmem:[%s22064_s3 + $0xd8] sm:$0xff] }
 0x1d9   : > { %23942 = vst [vmem:[#allocation29_spill] sm:$0xff] %v22236_v58  ;;  %v20810_v61 = vld [vmem:[#allocation5 + $0x808] ss:$16 sps:$4 sm:$0xff]  }
 0x1da   : > { %v20816_v51 = vld [vmem:[#allocation5 + $0x828] ss:$16 sps:$4 sm:$0xff]  }
 0x1db   : > { %4157 = vmatpush1.bf16.msra.mxu0 %v20759_v0  ;;  %4741 = vmatpush1.bf16.msra.mxu1 %v20762_v1  ;;  %v20815_v0 = vld [vmem:[#allocation5 + $0x824] ss:$16 sps:$4 sm:$0xff]   ;;  %v20818_v1 = vld [vmem:[#allocation5 + $0x82c] ss:$16 sps:$4 sm:$0xff]  }
 0x1dc   : > { %4158 = vmatprep.subr.bf16.mxu0 %v20767_v2  ;;  %4742 = vmatprep.subr.bf16.mxu1 %v20770_v7  ;;  %v22240_v2 = vcombine.high %v462_v59, %v470_v60  ;;  %v20821_v7 = vld [vmem:[#allocation5 + $0x844] ss:$16 sps:$4 sm:$0xff]  }
 0x1de   : > { %23943 = vst [vmem:[#allocation30_spill] sm:$0xff] %v22240_v2 }
 0x1df   : > { %4159 = vmatpush1.bf16.msra.mxu0 %v20765_v8  ;;  %4743 = vmatpush1.bf16.msra.mxu1 %v20768_v3  ;;  %v20824_v8 = vld [vmem:[#allocation5 + $0x84c] ss:$16 sps:$4 sm:$0xff]   ;;  %v20819_v3 = vld [vmem:[#allocation5 + $0x840] ss:$16 sps:$4 sm:$0xff]  }
 0x1e0   : > { %4160 = vmatprep.subr.bf16.mxu0 %v20773_v6  ;;  %4744 = vmatprep.subr.bf16.mxu1 %v20776_v10  ;;  %v20822_v6 = vld [vmem:[#allocation5 + $0x848] ss:$16 sps:$4 sm:$0xff]   ;;  %v22246_v10 = vcombine.low %v462_v59, %v470_v60  ;;  %v20851_v60 = vld [vmem:[#allocation5 + $0x8e4] ss:$16 sps:$4 sm:$0xff]  }
 0x1e1   : > { %v20846_v59 = vld [vmem:[#allocation5 + $0x8c8] ss:$16 sps:$4 sm:$0xff]  }
 0x1e2   : > { %23944 = vst [vmem:[#allocation31_spill] sm:$0xff] %v22246_v10 }
 0x1e3   : > { %4161 = vmatpush1.bf16.msra.mxu0 %v20771_v12  ;;  %4745 = vmatpush1.bf16.msra.mxu1 %v20774_v13  ;;  %v478_v12 = vld [vmem:[%s22064_s3 + $0x118] sm:$0xff] }
 0x1e4   : > { %4162 = vmatprep.subr.bf16.mxu0 %v20779_v15  ;;  %4746 = vmatprep.subr.bf16.mxu1 %v20782_v16  ;;  %v486_v13 = vld [vmem:[%s22064_s3 + $0x158] sm:$0xff]  ;;  %v20827_v15 = vld [vmem:[#allocation5 + $0x864] ss:$16 sps:$4 sm:$0xff]  }
 0x1e5   : > { %v20830_v16 = vld [vmem:[#allocation5 + $0x86c] ss:$16 sps:$4 sm:$0xff]  }
 0x1e7   : > { %4163 = vmatpush1.bf16.msra.mxu0 %v20777_v17  ;;  %4747 = vmatpush1.bf16.msra.mxu1 %v20780_v20  ;;  %v22250_v17 = vcombine.high %v478_v12, %v486_v13  ;;  %v20825_v20 = vld [vmem:[#allocation5 + $0x860] ss:$16 sps:$4 sm:$0xff]  }
 0x1e8   : > { %4164 = vmatprep.subr.bf16.mxu0 %v20785_v21  ;;  %4748 = vmatprep.subr.bf16.mxu1 %v20788_v23  ;;  %v20828_v21 = vld [vmem:[#allocation5 + $0x868] ss:$16 sps:$4 sm:$0xff]   ;;  %v20833_v23 = vld [vmem:[#allocation5 + $0x884] ss:$16 sps:$4 sm:$0xff]  }
 0x1e9   : > { %23945 = vst [vmem:[#allocation32_spill] sm:$0xff] %v22250_v17 }
 0x1eb   : > { %4165 = vmatpush1.bf16.msra.mxu0 %v20783_v24  ;;  %4749 = vmatpush1.bf16.msra.mxu1 %v20786_v25  ;;  %v20836_v24 = vld [vmem:[#allocation5 + $0x88c] ss:$16 sps:$4 sm:$0xff]  }
 0x1ec   : > { %4166 = vmatprep.subr.bf16.mxu0 %v20791_v26  ;;  %4750 = vmatprep.subr.bf16.mxu1 %v20794_v30  ;;  %v494_v25 = vld [vmem:[%s22064_s3 + $0x198] sm:$0xff]  ;;  %v22257_v26 = vcombine.low %v478_v12, %v486_v13  ;;  %v20861_v13 = vld [vmem:[#allocation5 + $0x920] ss:$16 sps:$4 sm:$0xff]  }
 0x1ed   : > { %v502_v30 = vld [vmem:[%s22064_s3 + $0x1d8] sm:$0xff] }
 0x1ee   : > { %23946 = vst [vmem:[#allocation33_spill] sm:$0xff] %v22257_v26  ;;  %v20866_v12 = vld [vmem:[#allocation5 + $0x92c] ss:$16 sps:$4 sm:$0xff]  }
 0x1ef   : > { %4167 = vmatpush1.bf16.msra.mxu0 %v20789_v31  ;;  %4751 = vmatpush1.bf16.msra.mxu1 %v20792_v33  ;;  %v20831_v31 = vld [vmem:[#allocation5 + $0x880] ss:$16 sps:$4 sm:$0xff]   ;;  %v20834_v33 = vld [vmem:[#allocation5 + $0x888] ss:$16 sps:$4 sm:$0xff]  }
 0x1f0   : > { %4168 = vmatprep.subr.bf16.mxu0 %v20797_v35  ;;  %4752 = vmatprep.subr.bf16.mxu1 %v20800_v36  ;;  %v20839_v35 = vld [vmem:[#allocation5 + $0x8a4] ss:$16 sps:$4 sm:$0xff]   ;;  %v20842_v36 = vld [vmem:[#allocation5 + $0x8ac] ss:$16 sps:$4 sm:$0xff]  }
 0x1f3   : > { %4169 = vmatpush1.bf16.msra.mxu0 %v20795_v37  ;;  %4753 = vmatpush1.bf16.msra.mxu1 %v20798_v40  ;;  %v22260_v37 = vcombine.high %v494_v25, %v502_v30  ;;  %v20837_v40 = vld [vmem:[#allocation5 + $0x8a0] ss:$16 sps:$4 sm:$0xff]  }
 0x1f4   : > { %4170 = vmatprep.subr.bf16.mxu0 %v20803_v42  ;;  %4754 = vmatprep.subr.bf16.mxu1 %v20806_v44  ;;  %v20840_v42 = vld [vmem:[#allocation5 + $0x8a8] ss:$16 sps:$4 sm:$0xff]   ;;  %v20845_v44 = vld [vmem:[#allocation5 + $0x8c4] ss:$16 sps:$4 sm:$0xff]  }
 0x1f5   : > { %23947 = vst [vmem:[#allocation34_spill] sm:$0xff] %v22260_v37 }
 0x1f7   : > { %4171 = vmatpush1.bf16.msra.mxu0 %v20801_v45  ;;  %4755 = vmatpush1.bf16.msra.mxu1 %v20804_v52  ;;  %v20848_v45 = vld [vmem:[#allocation5 + $0x8cc] ss:$16 sps:$4 sm:$0xff]   ;;  %v22267_v52 = vld [vmem:[%s22064_s3 + $0x20] sm:$0xff] }
 0x1f8   : > { %4213 = vmatprep.subr.bf16.mxu0 %v20809_v53  ;;  %4797 = vmatprep.subr.bf16.mxu1 %v20812_v54  ;;  %v22269_v53 = vcombine.low %v494_v25, %v502_v30  ;;  %v22272_v54 = vld [vmem:[%s22064_s3 + $0x60] sm:$0xff]  ;;  %v20878_v25 = vld [vmem:[#allocation5 + $0x96c] ss:$16 sps:$4 sm:$0xff]  }
 0x1f9   : > { %v20873_v30 = vld [vmem:[#allocation5 + $0x960] ss:$16 sps:$4 sm:$0xff]  }
 0x1fa   : > { %4173 = vmatmul.mubr.bf16.vlgmr.msra.gmra.mrb[0].mxu0 %v22236_v58  ;;  %4757 = vmatmul.mubr.bf16.vlgmr.msra.gmra.mrb[0].mxu1 %v22236_v58  ;;  %23948 = vst [vmem:[#allocation35_spill] sm:$0xff] %v22269_v53 }
 0x1fb   : > { %4214 = vmatpush1.bf16.msra.mxu0 %v20807_v55  ;;  %4798 = vmatpush1.bf16.msra.mxu1 %v20810_v61  ;;  %v20843_v55 = vld [vmem:[#allocation5 + $0x8c0] ss:$16 sps:$4 sm:$0xff]   ;;  %v20854_v61 = vld [vmem:[#allocation5 + $0x8ec] ss:$16 sps:$4 sm:$0xff]  }
 0x1fc   : > { %4215 = vmatprep.subr.bf16.mxu0 %v20815_v0  ;;  %4799 = vmatprep.subr.bf16.mxu1 %v20818_v1  ;;  %v22276_v0 = vcombine.high %v22267_v52, %v22272_v54  ;;  %v20849_v1 = vld [vmem:[#allocation5 + $0x8e0] ss:$16 sps:$4 sm:$0xff]  }
 0x1fd   : > { %4182 = vmatprep.mubr.bf16.mxu0 %v22240_v2  ;;  %4766 = vmatprep.mubr.bf16.mxu1 %v22240_v2  ;;  %v6367_v2 = vld [vmem:[#allocation11 + $0x520] sm:$0xff] }
 0x1fe   : > { %23949 = vst [vmem:[#allocation36_spill] sm:$0xff] %v22276_v0 }
 0x1ff   : > { %4216 = vmatpush1.bf16.msra.mxu0 %v20813_v46  ;;  %4800 = vmatpush1.bf16.msra.mxu1 %v20816_v51  ;;  %v20852_v46 = vld [vmem:[#allocation5 + $0x8e8] ss:$16 sps:$4 sm:$0xff]   ;;  %v20857_v51 = vld [vmem:[#allocation5 + $0x904] ss:$16 sps:$4 sm:$0xff]  }
 0x200   : > { %4217 = vmatprep.subr.bf16.mxu0 %v20821_v7  ;;  %4801 = vmatprep.subr.bf16.mxu1 %v20824_v8  ;;  %v20860_v7 = vld [vmem:[#allocation5 + $0x90c] ss:$16 sps:$4 sm:$0xff]   ;;  %v20855_v8 = vld [vmem:[#allocation5 + $0x900] ss:$16 sps:$4 sm:$0xff]  }
 0x202   : > { %4183 = vmatmul.mubr.bf16.gmra.mrb[4].mxu0 %v22246_v10  ;;  %4767 = vmatmul.mubr.bf16.gmra.mrb[4].mxu1 %v22246_v10 }
 0x203   : > { %4218 = vmatpush1.bf16.msra.mxu0 %v20819_v3  ;;  %4802 = vmatpush1.bf16.msra.mxu1 %v20822_v6  ;;  %v20858_v3 = vld [vmem:[#allocation5 + $0x908] ss:$16 sps:$4 sm:$0xff]   ;;  %v20863_v6 = vld [vmem:[#allocation5 + $0x924] ss:$16 sps:$4 sm:$0xff]  }
 0x204   : > { %4219 = vmatprep.subr.bf16.mxu0 %v20827_v15  ;;  %4803 = vmatprep.subr.bf16.mxu1 %v20830_v16  ;;  %v20864_v15 = vld [vmem:[#allocation5 + $0x928] ss:$16 sps:$4 sm:$0xff]   ;;  %v20869_v16 = vld [vmem:[#allocation5 + $0x944] ss:$16 sps:$4 sm:$0xff]  }
 0x205   : > { %4192 = vmatprep.mubr.bf16.mxu0 %v22250_v17  ;;  %4776 = vmatprep.mubr.bf16.mxu1 %v22250_v17 }
 0x207   : > { %4220 = vmatpush1.bf16.msra.mxu0 %v20825_v20  ;;  %4804 = vmatpush1.bf16.msra.mxu1 %v20828_v21  ;;  %v20872_v20 = vld [vmem:[#allocation5 + $0x94c] ss:$16 sps:$4 sm:$0xff]   ;;  %v20867_v21 = vld [vmem:[#allocation5 + $0x940] ss:$16 sps:$4 sm:$0xff]  }
 0x208   : > { %4221 = vmatprep.subr.bf16.mxu0 %v20833_v23  ;;  %4805 = vmatprep.subr.bf16.mxu1 %v20836_v24  ;;  %v20870_v23 = vld [vmem:[#allocation5 + $0x948] ss:$16 sps:$4 sm:$0xff]   ;;  %v20875_v24 = vld [vmem:[#allocation5 + $0x964] ss:$16 sps:$4 sm:$0xff]  }
 0x20a   : > { %4193 = vmatmul.mubr.bf16.gmra.mrb[8].mxu0 %v22257_v26  ;;  %4777 = vmatmul.mubr.bf16.gmra.mrb[8].mxu1 %v22257_v26 }
 0x20b   : > { %4222 = vmatpush1.bf16.msra.mxu0 %v20831_v31  ;;  %4806 = vmatpush1.bf16.msra.mxu1 %v20834_v33  ;;  %v20876_v31 = vld [vmem:[#allocation5 + $0x968] ss:$16 sps:$4 sm:$0xff]   ;;  %v20881_v33 = vld [vmem:[#allocation5 + $0x984] ss:$16 sps:$4 sm:$0xff]  }
 0x20c   : > { %4223 = vmatprep.subr.bf16.mxu0 %v20839_v35  ;;  %4807 = vmatprep.subr.bf16.mxu1 %v20842_v36  ;;  %v20884_v35 = vld [vmem:[#allocation5 + $0x98c] ss:$16 sps:$4 sm:$0xff]   ;;  %v20879_v36 = vld [vmem:[#allocation5 + $0x980] ss:$16 sps:$4 sm:$0xff]  }
 0x20d   : > { %4202 = vmatprep.mubr.bf16.mxu0 %v22260_v37  ;;  %4786 = vmatprep.mubr.bf16.mxu1 %v22260_v37 }
 0x20f   : > { %4224 = vmatpush1.bf16.msra.mxu0 %v20837_v40  ;;  %4808 = vmatpush1.bf16.msra.mxu1 %v20840_v42  ;;  %v20882_v40 = vld [vmem:[#allocation5 + $0x988] ss:$16 sps:$4 sm:$0xff]   ;;  %v20887_v42 = vld [vmem:[#allocation5 + $0x9a4] ss:$16 sps:$4 sm:$0xff]  }
 0x210   : > { %4225 = vmatprep.subr.bf16.mxu0 %v20845_v44  ;;  %4809 = vmatprep.subr.bf16.mxu1 %v20848_v45  ;;  %v20890_v44 = vld [vmem:[#allocation5 + $0x9ac] ss:$16 sps:$4 sm:$0xff]   ;;  %v20885_v45 = vld [vmem:[#allocation5 + $0x9a0] ss:$16 sps:$4 sm:$0xff]  }
 0x212   : > { %4203 = vmatmul.mubr.bf16.gmra.mrb[12].mxu0 %v22269_v53  ;;  %4787 = vmatmul.mubr.bf16.gmra.mrb[12].mxu1 %v22269_v53 }
 0x213   : > { %4226 = vmatpush1.bf16.msra.mxu0 %v20843_v55  ;;  %4810 = vmatpush1.bf16.msra.mxu1 %v20846_v59  ;;  %v20888_v55 = vld [vmem:[#allocation5 + $0x9a8] ss:$16 sps:$4 sm:$0xff]   ;;  %v20893_v59 = vld [vmem:[#allocation5 + $0x9c4] ss:$16 sps:$4 sm:$0xff]  }
 0x214   : > { %4227 = vmatprep.subr.bf16.mxu0 %v20851_v60  ;;  %4811 = vmatprep.subr.bf16.mxu1 %v20854_v61  ;;  %v20896_v60 = vld [vmem:[#allocation5 + $0x9cc] ss:$16 sps:$4 sm:$0xff]   ;;  %v20891_v61 = vld [vmem:[#allocation5 + $0x9c0] ss:$16 sps:$4 sm:$0xff]  }
 0x215   : > { %4245 = vmatprep.mubr.bf16.mxu0 %v22276_v0  ;;  %4829 = vmatprep.mubr.bf16.mxu1 %v22276_v0 }
 0x217   : > { %4228 = vmatpush1.bf16.msra.mxu0 %v20849_v1  ;;  %4812 = vmatpush1.bf16.msra.mxu1 %v20852_v46  ;;  %v20894_v1 = vld [vmem:[#allocation5 + $0x9c8] ss:$16 sps:$4 sm:$0xff]   ;;  %v20899_v46 = vld [vmem:[#allocation5 + $0x9e4] ss:$16 sps:$4 sm:$0xff]  }
 0x218   : > { %4229 = vmatprep.subr.bf16.mxu0 %v20857_v51  ;;  %4813 = vmatprep.subr.bf16.mxu1 %v20860_v7  ;;  %v20902_v51 = vld [vmem:[#allocation5 + $0x9ec] ss:$16 sps:$4 sm:$0xff]   ;;  %v20897_v7 = vld [vmem:[#allocation5 + $0x9e0] ss:$16 sps:$4 sm:$0xff]  }
 0x21b   : > { %4230 = vmatpush1.bf16.msra.mxu0 %v20855_v8  ;;  %4814 = vmatpush1.bf16.msra.mxu1 %v20858_v3  ;;  %v20900_v8 = vld [vmem:[#allocation5 + $0x9e8] ss:$16 sps:$4 sm:$0xff]   ;;  %v20905_v3 = vld [vmem:[#allocation5 + $0xa04] ss:$16 sps:$4 sm:$0xff]  }
 0x21c   : > { %4231 = vmatprep.subr.bf16.mxu0 %v20863_v6  ;;  %4815 = vmatprep.subr.bf16.mxu1 %v20866_v12  ;;  %v20908_v6 = vld [vmem:[#allocation5 + $0xa0c] ss:$16 sps:$4 sm:$0xff]   ;;  %v463_v12 = vld [vmem:[%s22064_s3 + $0xa0] sm:$0xff] }
 0x21f   : > { %4232 = vmatpush1.bf16.msra.mxu0 %v20861_v13  ;;  %4816 = vmatpush1.bf16.msra.mxu1 %v20864_v15  ;;  %v471_v13 = vld [vmem:[%s22064_s3 + $0xe0] sm:$0xff]  ;;  %v22286_v15 = vcombine.low %v22267_v52, %v22272_v54  ;;  %v20920_v54 = vld [vmem:[#allocation5 + $0xa4c] ss:$16 sps:$4 sm:$0xff]  }
 0x220   : > { %4233 = vmatprep.subr.bf16.mxu0 %v20869_v16  ;;  %4817 = vmatprep.subr.bf16.mxu1 %v20872_v20  ;;  %v20903_v16 = vld [vmem:[#allocation5 + $0xa00] ss:$16 sps:$4 sm:$0xff]   ;;  %v20906_v20 = vld [vmem:[#allocation5 + $0xa08] ss:$16 sps:$4 sm:$0xff]   ;;  %v20917_v52 = vld [vmem:[#allocation5 + $0xa44] ss:$16 sps:$4 sm:$0xff]  }
 0x221   : > { %23950 = vst [vmem:[#allocation37_spill] sm:$0xff] %v22286_v15 }
 0x223   : > { %4234 = vmatpush1.bf16.msra.mxu0 %v20867_v21  ;;  %4818 = vmatpush1.bf16.msra.mxu1 %v20870_v23  ;;  %v20911_v21 = vld [vmem:[#allocation5 + $0xa24] ss:$16 sps:$4 sm:$0xff]   ;;  %v20914_v23 = vld [vmem:[#allocation5 + $0xa2c] ss:$16 sps:$4 sm:$0xff]  }
 0x224   : > { %4235 = vmatprep.subr.bf16.mxu0 %v20875_v24  ;;  %4819 = vmatprep.subr.bf16.mxu1 %v20878_v25  ;;  %v20909_v24 = vld [vmem:[#allocation5 + $0xa20] ss:$16 sps:$4 sm:$0xff]   ;;  %v20912_v25 = vld [vmem:[#allocation5 + $0xa28] ss:$16 sps:$4 sm:$0xff]  }
 0x227   : > { %4236 = vmatpush1.bf16.msra.mxu0 %v20873_v30  ;;  %4820 = vmatpush1.bf16.msra.mxu1 %v20876_v31  ;;  %v22288_v30 = vcombine.high %v463_v12, %v471_v13  ;;  %v479_v31 = vld [vmem:[%s22064_s3 + $0x120] sm:$0xff] }
 0x228   : > { %4237 = vmatprep.subr.bf16.mxu0 %v20881_v33  ;;  %4821 = vmatprep.subr.bf16.mxu1 %v20884_v35  ;;  %v487_v33 = vld [vmem:[%s22064_s3 + $0x160] sm:$0xff]  ;;  %v22296_v35 = vcombine.low %v463_v12, %v471_v13  ;;  %v20936_v13 = vld [vmem:[#allocation5 + $0xaa8] ss:$16 sps:$4 sm:$0xff]  }
 0x229   : > { %23951 = vst [vmem:[#allocation38_spill] sm:$0xff] %v22288_v30  ;;  %v20933_v12 = vld [vmem:[#allocation5 + $0xaa0] ss:$16 sps:$4 sm:$0xff]  }
 0x22a   : > { %23952 = vst [vmem:[#allocation39_spill] sm:$0xff] %v22296_v35 }
 0x22b   : > { %4238 = vmatpush1.bf16.msra.mxu0 %v20879_v36  ;;  %4822 = vmatpush1.bf16.msra.mxu1 %v20882_v40  ;;  %v20915_v36 = vld [vmem:[#allocation5 + $0xa40] ss:$16 sps:$4 sm:$0xff]   ;;  %v20918_v40 = vld [vmem:[#allocation5 + $0xa48] ss:$16 sps:$4 sm:$0xff]  }
 0x22c   : > { %4239 = vmatprep.subr.bf16.mxu0 %v20887_v42  ;;  %4823 = vmatprep.subr.bf16.mxu1 %v20890_v44  ;;  %v20923_v42 = vld [vmem:[#allocation5 + $0xa64] ss:$16 sps:$4 sm:$0xff]   ;;  %v20926_v44 = vld [vmem:[#allocation5 + $0xa6c] ss:$16 sps:$4 sm:$0xff]  }
 0x22f   : > { %4240 = vmatpush1.bf16.msra.mxu0 %v20885_v45  ;;  %4824 = vmatpush1.bf16.msra.mxu1 %v20888_v55  ;;  %v20921_v45 = vld [vmem:[#allocation5 + $0xa60] ss:$16 sps:$4 sm:$0xff]   ;;  %v20924_v55 = vld [vmem:[#allocation5 + $0xa68] ss:$16 sps:$4 sm:$0xff]  }
 0x230   : > { %4241 = vmatprep.subr.bf16.mxu0 %v20893_v59  ;;  %4825 = vmatprep.subr.bf16.mxu1 %v20896_v60  ;;  %v22298_v59 = vcombine.high %v479_v31, %v487_v33  ;;  %v20929_v60 = vld [vmem:[#allocation5 + $0xa84] ss:$16 sps:$4 sm:$0xff]  }
 0x232   : > { %23953 = vst [vmem:[#allocation40_spill] sm:$0xff] %v22298_v59 }
 0x233   : > { %4242 = vmatpush1.bf16.msra.mxu0 %v20891_v61  ;;  %4826 = vmatpush1.bf16.msra.mxu1 %v20894_v1  ;;  %v20932_v61 = vld [vmem:[#allocation5 + $0xa8c] ss:$16 sps:$4 sm:$0xff]   ;;  %v495_v1 = vld [vmem:[%s22064_s3 + $0x1a0] sm:$0xff] }
 0x234   : > { %4243 = vmatprep.subr.bf16.mxu0 %v20899_v46  ;;  %4827 = vmatprep.subr.bf16.mxu1 %v20902_v51  ;;  %v503_v46 = vld [vmem:[%s22064_s3 + $0x1e0] sm:$0xff]  ;;  %v22306_v51 = vcombine.low %v479_v31, %v487_v33  ;;  %v20950_v33 = vld [vmem:[#allocation5 + $0xaec] ss:$16 sps:$4 sm:$0xff]  }
 0x235   : > { %v20947_v31 = vld [vmem:[#allocation5 + $0xae4] ss:$16 sps:$4 sm:$0xff]  }
 0x236   : > { %23954 = vst [vmem:[#allocation41_spill] sm:$0xff] %v22306_v51 }
 0x237   : > { %4244 = vmatpush1.bf16.msra.mxu0 %v20897_v7  ;;  %4828 = vmatpush1.bf16.msra.mxu1 %v20900_v8  ;;  %v20927_v7 = vld [vmem:[#allocation5 + $0xa80] ss:$16 sps:$4 sm:$0xff]   ;;  %v20930_v8 = vld [vmem:[#allocation5 + $0xa88] ss:$16 sps:$4 sm:$0xff]  }
 0x238   : > { %4286 = vmatprep.subr.bf16.mxu0 %v20905_v3  ;;  %4870 = vmatprep.subr.bf16.mxu1 %v20908_v6  ;;  %v20935_v3 = vld [vmem:[#allocation5 + $0xaa4] ss:$16 sps:$4 sm:$0xff]   ;;  %v20938_v6 = vld [vmem:[#allocation5 + $0xaac] ss:$16 sps:$4 sm:$0xff]  }
 0x23a   : > { %4246 = vmatmul.mubr.bf16.vlgmr.msra.gmra.mrb[0].mxu0 %v22286_v15  ;;  %4830 = vmatmul.mubr.bf16.vlgmr.msra.gmra.mrb[0].mxu1 %v22286_v15 }
 0x23b   : > { %4287 = vmatpush1.bf16.msra.mxu0 %v20903_v16  ;;  %4871 = vmatpush1.bf16.msra.mxu1 %v20906_v20  ;;  %v22308_v16 = vcombine.high %v495_v1, %v503_v46  ;;  %v20941_v20 = vld [vmem:[#allocation5 + $0xac4] ss:$16 sps:$4 sm:$0xff]  }
 0x23c   : > { %4288 = vmatprep.subr.bf16.mxu0 %v20911_v21  ;;  %4872 = vmatprep.subr.bf16.mxu1 %v20914_v23  ;;  %v20944_v21 = vld [vmem:[#allocation5 + $0xacc] ss:$16 sps:$4 sm:$0xff]  }
 0x23d   : > { %4255 = vmatprep.mubr.bf16.mxu0 %v22288_v30  ;;  %4839 = vmatprep.mubr.bf16.mxu1 %v22288_v30  ;;  %23955 = vst [vmem:[#allocation42_spill] sm:$0xff] %v22308_v16  ;;  %v22313_v23 = vld [vmem:[%s22064_s3 + $0x28] sm:$0xff] }
 0x23f   : > { %4289 = vmatpush1.bf16.msra.mxu0 %v20909_v24  ;;  %4873 = vmatpush1.bf16.msra.mxu1 %v20912_v25  ;;  %v22316_v24 = vld [vmem:[%s22064_s3 + $0x68] sm:$0xff]  ;;  %v22320_v25 = vcombine.low %v495_v1, %v503_v46  ;;  %v20957_v46 = vld [vmem:[#allocation5 + $0xb20] ss:$16 sps:$4 sm:$0xff]  }
 0x240   : > { %4290 = vmatprep.subr.bf16.mxu0 %v20917_v52  ;;  %4874 = vmatprep.subr.bf16.mxu1 %v20920_v54  ;;  %v20939_v52 = vld [vmem:[#allocation5 + $0xac0] ss:$16 sps:$4 sm:$0xff]   ;;  %v20942_v54 = vld [vmem:[#allocation5 + $0xac8] ss:$16 sps:$4 sm:$0xff]   ;;  %v20962_v1 = vld [vmem:[#allocation5 + $0xb2c] ss:$16 sps:$4 sm:$0xff]  }
 0x241   : > { %23956 = vst [vmem:[#allocation43_spill] sm:$0xff] %v22320_v25 }
 0x242   : > { %4256 = vmatmul.mubr.bf16.gmra.mrb[4].mxu0 %v22296_v35  ;;  %4840 = vmatmul.mubr.bf16.gmra.mrb[4].mxu1 %v22296_v35 }
 0x243   : > { %4291 = vmatpush1.bf16.msra.mxu0 %v20915_v36  ;;  %4875 = vmatpush1.bf16.msra.mxu1 %v20918_v40  ;;  %v22324_v36 = vcombine.high %v22313_v23, %v22316_v24  ;;  %v20945_v40 = vld [vmem:[#allocation5 + $0xae0] ss:$16 sps:$4 sm:$0xff]  }
 0x244   : > { %4292 = vmatprep.subr.bf16.mxu0 %v20923_v42  ;;  %4876 = vmatprep.subr.bf16.mxu1 %v20926_v44  ;;  %v20948_v42 = vld [vmem:[#allocation5 + $0xae8] ss:$16 sps:$4 sm:$0xff]   ;;  %v20953_v44 = vld [vmem:[#allocation5 + $0xb04] ss:$16 sps:$4 sm:$0xff]  }
 0x245   : > { %4265 = vmatprep.mubr.bf16.mxu0 %v22298_v59  ;;  %4849 = vmatprep.mubr.bf16.mxu1 %v22298_v59  ;;  %23957 = vst [vmem:[#allocation44_spill] sm:$0xff] %v22324_v36  ;;  %v21295_v59 = vld [vmem:[#allocation8 + $0x224] ss:$16 sps:$4 sm:$0xff]  }
 0x247   : > { %4293 = vmatpush1.bf16.msra.mxu0 %v20921_v45  ;;  %4877 = vmatpush1.bf16.msra.mxu1 %v20924_v55  ;;  %v20956_v45 = vld [vmem:[#allocation5 + $0xb0c] ss:$16 sps:$4 sm:$0xff]   ;;  %v20951_v55 = vld [vmem:[#allocation5 + $0xb00] ss:$16 sps:$4 sm:$0xff]  }
 0x248   : > { %4294 = vmatprep.subr.bf16.mxu0 %v20929_v60  ;;  %4878 = vmatprep.subr.bf16.mxu1 %v20932_v61  ;;  %v20954_v60 = vld [vmem:[#allocation5 + $0xb08] ss:$16 sps:$4 sm:$0xff]   ;;  %v20959_v61 = vld [vmem:[#allocation5 + $0xb24] ss:$16 sps:$4 sm:$0xff]  }
 0x24a   : > { %4266 = vmatmul.mubr.bf16.gmra.mrb[8].mxu0 %v22306_v51  ;;  %4850 = vmatmul.mubr.bf16.gmra.mrb[8].mxu1 %v22306_v51 }
 0x24b   : > { %4295 = vmatpush1.bf16.msra.mxu0 %v20927_v7  ;;  %4879 = vmatpush1.bf16.msra.mxu1 %v20930_v8  ;;  %v20960_v7 = vld [vmem:[#allocation5 + $0xb28] ss:$16 sps:$4 sm:$0xff]   ;;  %v20965_v8 = vld [vmem:[#allocation5 + $0xb44] ss:$16 sps:$4 sm:$0xff]  }
 0x24c   : > { %4296 = vmatprep.subr.bf16.mxu0 %v20935_v3  ;;  %4880 = vmatprep.subr.bf16.mxu1 %v20938_v6  ;;  %v20968_v3 = vld [vmem:[#allocation5 + $0xb4c] ss:$16 sps:$4 sm:$0xff]   ;;  %v20963_v6 = vld [vmem:[#allocation5 + $0xb40] ss:$16 sps:$4 sm:$0xff]  }
 0x24d   : > { %4275 = vmatprep.mubr.bf16.mxu0 %v22308_v16  ;;  %4859 = vmatprep.mubr.bf16.mxu1 %v22308_v16 }
 0x24f   : > { %4297 = vmatpush1.bf16.msra.mxu0 %v20933_v12  ;;  %4881 = vmatpush1.bf16.msra.mxu1 %v20936_v13  ;;  %v20966_v12 = vld [vmem:[#allocation5 + $0xb48] ss:$16 sps:$4 sm:$0xff]   ;;  %v20971_v13 = vld [vmem:[#allocation5 + $0xb64] ss:$16 sps:$4 sm:$0xff]  }
 0x250   : > { %4298 = vmatprep.subr.bf16.mxu0 %v20941_v20  ;;  %4882 = vmatprep.subr.bf16.mxu1 %v20944_v21  ;;  %v20974_v20 = vld [vmem:[#allocation5 + $0xb6c] ss:$16 sps:$4 sm:$0xff]   ;;  %v20969_v21 = vld [vmem:[#allocation5 + $0xb60] ss:$16 sps:$4 sm:$0xff]  }
 0x252   : > { %4276 = vmatmul.mubr.bf16.gmra.mrb[12].mxu0 %v22320_v25  ;;  %4860 = vmatmul.mubr.bf16.gmra.mrb[12].mxu1 %v22320_v25 }
 0x253   : > { %4299 = vmatpush1.bf16.msra.mxu0 %v20939_v52  ;;  %4883 = vmatpush1.bf16.msra.mxu1 %v20942_v54  ;;  %v20972_v52 = vld [vmem:[#allocation5 + $0xb68] ss:$16 sps:$4 sm:$0xff]   ;;  %v20977_v54 = vld [vmem:[#allocation5 + $0xb84] ss:$16 sps:$4 sm:$0xff]  }
 0x254   : > { %4300 = vmatprep.subr.bf16.mxu0 %v20947_v31  ;;  %4884 = vmatprep.subr.bf16.mxu1 %v20950_v33  ;;  %v20980_v31 = vld [vmem:[#allocation5 + $0xb8c] ss:$16 sps:$4 sm:$0xff]   ;;  %v20975_v33 = vld [vmem:[#allocation5 + $0xb80] ss:$16 sps:$4 sm:$0xff]  }
 0x255   : > { %4318 = vmatprep.mubr.bf16.mxu0 %v22324_v36  ;;  %4902 = vmatprep.mubr.bf16.mxu1 %v22324_v36 }
 0x257   : > { %4301 = vmatpush1.bf16.msra.mxu0 %v20945_v40  ;;  %4885 = vmatpush1.bf16.msra.mxu1 %v20948_v42  ;;  %v20978_v40 = vld [vmem:[#allocation5 + $0xb88] ss:$16 sps:$4 sm:$0xff]   ;;  %v20983_v42 = vld [vmem:[#allocation5 + $0xba4] ss:$16 sps:$4 sm:$0xff]  }
 0x258   : > { %4302 = vmatprep.subr.bf16.mxu0 %v20953_v44  ;;  %4886 = vmatprep.subr.bf16.mxu1 %v20956_v45  ;;  %v20986_v44 = vld [vmem:[#allocation5 + $0xbac] ss:$16 sps:$4 sm:$0xff]   ;;  %v20981_v45 = vld [vmem:[#allocation5 + $0xba0] ss:$16 sps:$4 sm:$0xff]  }
 0x25b   : > { %4303 = vmatpush1.bf16.msra.mxu0 %v20951_v55  ;;  %4887 = vmatpush1.bf16.msra.mxu1 %v20954_v60  ;;  %v20984_v55 = vld [vmem:[#allocation5 + $0xba8] ss:$16 sps:$4 sm:$0xff]   ;;  %v20989_v60 = vld [vmem:[#allocation5 + $0xbc4] ss:$16 sps:$4 sm:$0xff]  }
 0x25c   : > { %4304 = vmatprep.subr.bf16.mxu0 %v20959_v61  ;;  %4888 = vmatprep.subr.bf16.mxu1 %v20962_v1  ;;  %v20992_v61 = vld [vmem:[#allocation5 + $0xbcc] ss:$16 sps:$4 sm:$0xff]   ;;  %v20987_v1 = vld [vmem:[#allocation5 + $0xbc0] ss:$16 sps:$4 sm:$0xff]  }
 0x25f   : > { %4305 = vmatpush1.bf16.msra.mxu0 %v20957_v46  ;;  %4889 = vmatpush1.bf16.msra.mxu1 %v20960_v7  ;;  %v20990_v46 = vld [vmem:[#allocation5 + $0xbc8] ss:$16 sps:$4 sm:$0xff]   ;;  %v20995_v7 = vld [vmem:[#allocation5 + $0xbe4] ss:$16 sps:$4 sm:$0xff]  }
 0x260   : > { %4306 = vmatprep.subr.bf16.mxu0 %v20965_v8  ;;  %4890 = vmatprep.subr.bf16.mxu1 %v20968_v3  ;;  %v20998_v8 = vld [vmem:[#allocation5 + $0xbec] ss:$16 sps:$4 sm:$0xff]   ;;  %v20993_v3 = vld [vmem:[#allocation5 + $0xbe0] ss:$16 sps:$4 sm:$0xff]  }
 0x263   : > { %4307 = vmatpush1.bf16.msra.mxu0 %v20963_v6  ;;  %4891 = vmatpush1.bf16.msra.mxu1 %v20966_v12  ;;  %v20996_v6 = vld [vmem:[#allocation5 + $0xbe8] ss:$16 sps:$4 sm:$0xff]   ;;  %v21001_v12 = vld [vmem:[#allocation5 + $0xc04] ss:$16 sps:$4 sm:$0xff]  }
 0x264   : > { %4308 = vmatprep.subr.bf16.mxu0 %v20971_v13  ;;  %4892 = vmatprep.subr.bf16.mxu1 %v20974_v20  ;;  %v21004_v13 = vld [vmem:[#allocation5 + $0xc0c] ss:$16 sps:$4 sm:$0xff]   ;;  %v20999_v20 = vld [vmem:[#allocation5 + $0xc00] ss:$16 sps:$4 sm:$0xff]  }
 0x267   : > { %4309 = vmatpush1.bf16.msra.mxu0 %v20969_v21  ;;  %4893 = vmatpush1.bf16.msra.mxu1 %v20972_v52  ;;  %v21002_v21 = vld [vmem:[#allocation5 + $0xc08] ss:$16 sps:$4 sm:$0xff]   ;;  %v22332_v52 = vcombine.low %v22313_v23, %v22316_v24  ;;  %v21013_v23 = vld [vmem:[#allocation5 + $0xc44] ss:$16 sps:$4 sm:$0xff]   ;;  %v21016_v24 = vld [vmem:[#allocation5 + $0xc4c] ss:$16 sps:$4 sm:$0xff]  }
 0x268   : > { %4310 = vmatprep.subr.bf16.mxu0 %v20977_v54  ;;  %4894 = vmatprep.subr.bf16.mxu1 %v20980_v31  ;;  %v21007_v54 = vld [vmem:[#allocation5 + $0xc24] ss:$16 sps:$4 sm:$0xff]   ;;  %v21010_v31 = vld [vmem:[#allocation5 + $0xc2c] ss:$16 sps:$4 sm:$0xff]  }
 0x269   : > { %23958 = vst [vmem:[#allocation45_spill] sm:$0xff] %v22332_v52 }
 0x26b   : > { %4311 = vmatpush1.bf16.msra.mxu0 %v20975_v33  ;;  %4895 = vmatpush1.bf16.msra.mxu1 %v20978_v40  ;;  %v464_v33 = vld [vmem:[%s22064_s3 + $0xa8] sm:$0xff] }
 0x26c   : > { %4312 = vmatprep.subr.bf16.mxu0 %v20983_v42  ;;  %4896 = vmatprep.subr.bf16.mxu1 %v20986_v44  ;;  %v472_v40 = vld [vmem:[%s22064_s3 + $0xe8] sm:$0xff]  ;;  %v21005_v42 = vld [vmem:[#allocation5 + $0xc20] ss:$16 sps:$4 sm:$0xff]  }
 0x26d   : > { %v21008_v44 = vld [vmem:[#allocation5 + $0xc28] ss:$16 sps:$4 sm:$0xff]  }
 0x26f   : > { %4313 = vmatpush1.bf16.msra.mxu0 %v20981_v45  ;;  %4897 = vmatpush1.bf16.msra.mxu1 %v20984_v55  ;;  %v22336_v45 = vcombine.high %v464_v33, %v472_v40  ;;  %v480_v55 = vld [vmem:[%s22064_s3 + $0x128] sm:$0xff] }
 0x270   : > { %4314 = vmatprep.subr.bf16.mxu0 %v20989_v60  ;;  %4898 = vmatprep.subr.bf16.mxu1 %v20992_v61  ;;  %v488_v60 = vld [vmem:[%s22064_s3 + $0x168] sm:$0xff]  ;;  %v21011_v61 = vld [vmem:[#allocation5 + $0xc40] ss:$16 sps:$4 sm:$0xff]  }
 0x271   : > { %23959 = vst [vmem:[#allocation46_spill] sm:$0xff] %v22336_v45 }
 0x273   : > { %4315 = vmatpush1.bf16.msra.mxu0 %v20987_v1  ;;  %4899 = vmatpush1.bf16.msra.mxu1 %v20990_v46  ;;  %v21014_v1 = vld [vmem:[#allocation5 + $0xc48] ss:$16 sps:$4 sm:$0xff]   ;;  %v21019_v46 = vld [vmem:[#allocation5 + $0xc64] ss:$16 sps:$4 sm:$0xff]  }
 0x274   : > { %4316 = vmatprep.subr.bf16.mxu0 %v20995_v7  ;;  %4900 = vmatprep.subr.bf16.mxu1 %v20998_v8  ;;  %v21022_v7 = vld [vmem:[#allocation5 + $0xc6c] ss:$16 sps:$4 sm:$0xff]   ;;  %v22344_v8 = vcombine.low %v464_v33, %v472_v40  ;;  %v21026_v33 = vld [vmem:[#allocation5 + $0xc88] ss:$16 sps:$4 sm:$0xff]   ;;  %v21031_v40 = vld [vmem:[#allocation5 + $0xca4] ss:$16 sps:$4 sm:$0xff]  }
 0x276   : > { %23960 = vst [vmem:[#allocation47_spill] sm:$0xff] %v22344_v8 }
 0x277   : > { %4317 = vmatpush1.bf16.msra.mxu0 %v20993_v3  ;;  %4901 = vmatpush1.bf16.msra.mxu1 %v20996_v6  ;;  %v21017_v3 = vld [vmem:[#allocation5 + $0xc60] ss:$16 sps:$4 sm:$0xff]   ;;  %v21020_v6 = vld [vmem:[#allocation5 + $0xc68] ss:$16 sps:$4 sm:$0xff]  }
 0x278   : > { %4359 = vmatprep.subr.bf16.mxu0 %v21001_v12  ;;  %4943 = vmatprep.subr.bf16.mxu1 %v21004_v13  ;;  %v22346_v12 = vcombine.high %v480_v55, %v488_v60  ;;  %v21025_v13 = vld [vmem:[#allocation5 + $0xc84] ss:$16 sps:$4 sm:$0xff]  }
 0x27a   : > { %4319 = vmatmul.mubr.bf16.vlgmr.msra.gmra.mrb[0].mxu0 %v22332_v52  ;;  %4903 = vmatmul.mubr.bf16.vlgmr.msra.gmra.mrb[0].mxu1 %v22332_v52  ;;  %23961 = vst [vmem:[#allocation48_spill] sm:$0xff] %v22346_v12 }
 0x27b   : > { %4360 = vmatpush1.bf16.msra.mxu0 %v20999_v20  ;;  %4944 = vmatpush1.bf16.msra.mxu1 %v21002_v21  ;;  %v21028_v20 = vld [vmem:[#allocation5 + $0xc8c] ss:$16 sps:$4 sm:$0xff]  }
 0x27c   : > { %4361 = vmatprep.subr.bf16.mxu0 %v21007_v54  ;;  %4945 = vmatprep.subr.bf16.mxu1 %v21010_v31  ;;  %v496_v21 = vld [vmem:[%s22064_s3 + $0x1a8] sm:$0xff]  ;;  %v21023_v31 = vld [vmem:[#allocation5 + $0xc80] ss:$16 sps:$4 sm:$0xff]  }
 0x27d   : > { %4328 = vmatprep.mubr.bf16.mxu0 %v22336_v45  ;;  %4912 = vmatprep.mubr.bf16.mxu1 %v22336_v45  ;;  %v504_v54 = vld [vmem:[%s22064_s3 + $0x1e8] sm:$0xff] }
 0x27f   : > { %4362 = vmatpush1.bf16.msra.mxu0 %v21005_v42  ;;  %4946 = vmatpush1.bf16.msra.mxu1 %v21008_v44  ;;  %v21034_v42 = vld [vmem:[#allocation5 + $0xcac] ss:$16 sps:$4 sm:$0xff]   ;;  %v22354_v44 = vcombine.low %v480_v55, %v488_v60  ;;  %v21037_v55 = vld [vmem:[#allocation5 + $0xcc4] ss:$16 sps:$4 sm:$0xff]  }
 0x280   : > { %4363 = vmatprep.subr.bf16.mxu0 %v21013_v23  ;;  %4947 = vmatprep.subr.bf16.mxu1 %v21016_v24  ;;  %v22356_v23 = vcombine.high %v496_v21, %v504_v54  ;;  %v21029_v24 = vld [vmem:[#allocation5 + $0xca0] ss:$16 sps:$4 sm:$0xff]   ;;  %v21040_v60 = vld [vmem:[#allocation5 + $0xccc] ss:$16 sps:$4 sm:$0xff]  }
 0x281   : > { %23962 = vst [vmem:[#allocation49_spill] sm:$0xff] %v22354_v44 }
 0x282   : > { %4329 = vmatmul.mubr.bf16.gmra.mrb[4].mxu0 %v22344_v8  ;;  %4913 = vmatmul.mubr.bf16.gmra.mrb[4].mxu1 %v22344_v8  ;;  %23963 = vst [vmem:[#allocation50_spill] sm:$0xff] %v22356_v23 }
 0x283   : > { %4364 = vmatpush1.bf16.msra.mxu0 %v21011_v61  ;;  %4948 = vmatpush1.bf16.msra.mxu1 %v21014_v1  ;;  %v21032_v61 = vld [vmem:[#allocation5 + $0xca8] ss:$16 sps:$4 sm:$0xff]   ;;  %v22362_v1 = vcombine.low %v496_v21, %v504_v54  ;;  %v21041_v21 = vld [vmem:[#allocation5 + $0xce0] ss:$16 sps:$4 sm:$0xff]  }
 0x284   : > { %4365 = vmatprep.subr.bf16.mxu0 %v21019_v46  ;;  %4949 = vmatprep.subr.bf16.mxu1 %v21022_v7  ;;  %v22365_v46 = vld [vmem:[%s22064_s3 + $0x30] sm:$0xff]  ;;  %v21044_v54 = vld [vmem:[#allocation5 + $0xce8] ss:$16 sps:$4 sm:$0xff]  }
 0x285   : > { %4338 = vmatprep.mubr.bf16.mxu0 %v22346_v12  ;;  %4922 = vmatprep.mubr.bf16.mxu1 %v22346_v12  ;;  %23964 = vst [vmem:[#allocation51_spill] sm:$0xff] %v22362_v1  ;;  %v22368_v7 = vld [vmem:[%s22064_s3 + $0x70] sm:$0xff] }
 0x287   : > { %4366 = vmatpush1.bf16.msra.mxu0 %v21017_v3  ;;  %4950 = vmatpush1.bf16.msra.mxu1 %v21020_v6  ;;  %v21035_v3 = vld [vmem:[#allocation5 + $0xcc0] ss:$16 sps:$4 sm:$0xff]   ;;  %v21038_v6 = vld [vmem:[#allocation5 + $0xcc8] ss:$16 sps:$4 sm:$0xff]  }
 0x288   : > { %4367 = vmatprep.subr.bf16.mxu0 %v21025_v13  ;;  %4951 = vmatprep.subr.bf16.mxu1 %v21028_v20  ;;  %v21043_v13 = vld [vmem:[#allocation5 + $0xce4] ss:$16 sps:$4 sm:$0xff]   ;;  %v21046_v20 = vld [vmem:[#allocation5 + $0xcec] ss:$16 sps:$4 sm:$0xff]  }
 0x28a   : > { %4339 = vmatmul.mubr.bf16.gmra.mrb[8].mxu0 %v22354_v44  ;;  %4923 = vmatmul.mubr.bf16.gmra.mrb[8].mxu1 %v22354_v44 }
 0x28b   : > { %4368 = vmatpush1.bf16.msra.mxu0 %v21023_v31  ;;  %4952 = vmatpush1.bf16.msra.mxu1 %v21026_v33  ;;  %v22372_v31 = vcombine.high %v22365_v46, %v22368_v7  ;;  %v21049_v33 = vld [vmem:[#allocation5 + $0xd04] ss:$16 sps:$4 sm:$0xff]  }
 0x28c   : > { %4369 = vmatprep.subr.bf16.mxu0 %v21031_v40  ;;  %4953 = vmatprep.subr.bf16.mxu1 %v21034_v42  ;;  %v21052_v40 = vld [vmem:[#allocation5 + $0xd0c] ss:$16 sps:$4 sm:$0xff]   ;;  %v21047_v42 = vld [vmem:[#allocation5 + $0xd00] ss:$16 sps:$4 sm:$0xff]  }
 0x28d   : > { %4348 = vmatprep.mubr.bf16.mxu0 %v22356_v23  ;;  %4932 = vmatprep.mubr.bf16.mxu1 %v22356_v23  ;;  %23965 = vst [vmem:[#allocation52_spill] sm:$0xff] %v22372_v31  ;;  %v21226_v23 = vld [vmem:[#allocation8 + $0xac] ss:$16 sps:$4 sm:$0xff]  }
 0x28f   : > { %4370 = vmatpush1.bf16.msra.mxu0 %v21029_v24  ;;  %4954 = vmatpush1.bf16.msra.mxu1 %v21032_v61  ;;  %v21050_v24 = vld [vmem:[#allocation5 + $0xd08] ss:$16 sps:$4 sm:$0xff]   ;;  %v21055_v61 = vld [vmem:[#allocation5 + $0xd24] ss:$16 sps:$4 sm:$0xff]  }
 0x290   : > { %4371 = vmatprep.subr.bf16.mxu0 %v21037_v55  ;;  %4955 = vmatprep.subr.bf16.mxu1 %v21040_v60  ;;  %v21058_v55 = vld [vmem:[#allocation5 + $0xd2c] ss:$16 sps:$4 sm:$0xff]   ;;  %v21053_v60 = vld [vmem:[#allocation5 + $0xd20] ss:$16 sps:$4 sm:$0xff]  }
 0x292   : > { %4349 = vmatmul.mubr.bf16.gmra.mrb[12].mxu0 %v22362_v1  ;;  %4933 = vmatmul.mubr.bf16.gmra.mrb[12].mxu1 %v22362_v1  ;;  %v21218_v1 = vld [vmem:[#allocation8 + $0x88] ss:$16 sps:$4 sm:$0xff]  }
 0x293   : > { %4372 = vmatpush1.bf16.msra.mxu0 %v21035_v3  ;;  %4956 = vmatpush1.bf16.msra.mxu1 %v21038_v6  ;;  %v21056_v3 = vld [vmem:[#allocation5 + $0xd28] ss:$16 sps:$4 sm:$0xff]   ;;  %v21061_v6 = vld [vmem:[#allocation5 + $0xd44] ss:$16 sps:$4 sm:$0xff]  }
 0x294   : > { %4373 = vmatprep.subr.bf16.mxu0 %v21043_v13  ;;  %4957 = vmatprep.subr.bf16.mxu1 %v21046_v20  ;;  %v21064_v13 = vld [vmem:[#allocation5 + $0xd4c] ss:$16 sps:$4 sm:$0xff]   ;;  %v21059_v20 = vld [vmem:[#allocation5 + $0xd40] ss:$16 sps:$4 sm:$0xff]  }
 0x295   : > { %4391 = vmatprep.mubr.bf16.mxu0 %v22372_v31  ;;  %4975 = vmatprep.mubr.bf16.mxu1 %v22372_v31  ;;  %v21062_v31 = vld [vmem:[#allocation5 + $0xd48] ss:$16 sps:$4 sm:$0xff]  }
 0x297   : > { %4374 = vmatpush1.bf16.msra.mxu0 %v21041_v21  ;;  %4958 = vmatpush1.bf16.msra.mxu1 %v21044_v54  ;;  %v21067_v21 = vld [vmem:[#allocation5 + $0xd64] ss:$16 sps:$4 sm:$0xff]   ;;  %v21070_v54 = vld [vmem:[#allocation5 + $0xd6c] ss:$16 sps:$4 sm:$0xff]  }
 0x298   : > { %4375 = vmatprep.subr.bf16.mxu0 %v21049_v33  ;;  %4959 = vmatprep.subr.bf16.mxu1 %v21052_v40  ;;  %v21065_v33 = vld [vmem:[#allocation5 + $0xd60] ss:$16 sps:$4 sm:$0xff]   ;;  %v21068_v40 = vld [vmem:[#allocation5 + $0xd68] ss:$16 sps:$4 sm:$0xff]  }
 0x29b   : > { %4376 = vmatpush1.bf16.msra.mxu0 %v21047_v42  ;;  %4960 = vmatpush1.bf16.msra.mxu1 %v21050_v24  ;;  %v21073_v42 = vld [vmem:[#allocation5 + $0xd84] ss:$16 sps:$4 sm:$0xff]   ;;  %v21076_v24 = vld [vmem:[#allocation5 + $0xd8c] ss:$16 sps:$4 sm:$0xff]  }
 0x29c   : > { %4377 = vmatprep.subr.bf16.mxu0 %v21055_v61  ;;  %4961 = vmatprep.subr.bf16.mxu1 %v21058_v55  ;;  %v21071_v61 = vld [vmem:[#allocation5 + $0xd80] ss:$16 sps:$4 sm:$0xff]   ;;  %v21074_v55 = vld [vmem:[#allocation5 + $0xd88] ss:$16 sps:$4 sm:$0xff]  }
 0x29f   : > { %4378 = vmatpush1.bf16.msra.mxu0 %v21053_v60  ;;  %4962 = vmatpush1.bf16.msra.mxu1 %v21056_v3  ;;  %v21079_v60 = vld [vmem:[#allocation5 + $0xda4] ss:$16 sps:$4 sm:$0xff]   ;;  %v21082_v3 = vld [vmem:[#allocation5 + $0xdac] ss:$16 sps:$4 sm:$0xff]  }
 0x2a0   : > { %4379 = vmatprep.subr.bf16.mxu0 %v21061_v6  ;;  %4963 = vmatprep.subr.bf16.mxu1 %v21064_v13  ;;  %v21077_v6 = vld [vmem:[#allocation5 + $0xda0] ss:$16 sps:$4 sm:$0xff]   ;;  %v21080_v13 = vld [vmem:[#allocation5 + $0xda8] ss:$16 sps:$4 sm:$0xff]  }
 0x2a3   : > { %4380 = vmatpush1.bf16.msra.mxu0 %v21059_v20  ;;  %4964 = vmatpush1.bf16.msra.mxu1 %v21062_v31  ;;  %v21085_v31 = vld [vmem:[#allocation5 + $0xdc4] ss:$16 sps:$4 sm:$0xff]   ;;  %v21088_v20 = vld [vmem:[#allocation5 + $0xdcc] ss:$16 sps:$4 sm:$0xff]  }
 0x2a4   : > { %4381 = vmatprep.subr.bf16.mxu0 %v21067_v21  ;;  %4965 = vmatprep.subr.bf16.mxu1 %v21070_v54  ;;  %v21083_v21 = vld [vmem:[#allocation5 + $0xdc0] ss:$16 sps:$4 sm:$0xff]   ;;  %v21086_v54 = vld [vmem:[#allocation5 + $0xdc8] ss:$16 sps:$4 sm:$0xff]  }
 0x2a7   : > { %4382 = vmatpush1.bf16.msra.mxu0 %v21065_v33  ;;  %4966 = vmatpush1.bf16.msra.mxu1 %v21068_v40  ;;  %v21091_v33 = vld [vmem:[#allocation5 + $0xde4] ss:$16 sps:$4 sm:$0xff]   ;;  %v21094_v40 = vld [vmem:[#allocation5 + $0xdec] ss:$16 sps:$4 sm:$0xff]  }
 0x2a8   : > { %4383 = vmatprep.subr.bf16.mxu0 %v21073_v42  ;;  %4967 = vmatprep.subr.bf16.mxu1 %v21076_v24  ;;  %v21089_v42 = vld [vmem:[#allocation5 + $0xde0] ss:$16 sps:$4 sm:$0xff]   ;;  %v21092_v24 = vld [vmem:[#allocation5 + $0xde8] ss:$16 sps:$4 sm:$0xff]  }
 0x2ab   : > { %4384 = vmatpush1.bf16.msra.mxu0 %v21071_v61  ;;  %4968 = vmatpush1.bf16.msra.mxu1 %v21074_v55  ;;  %v21097_v61 = vld [vmem:[#allocation5 + $0xe04] ss:$16 sps:$4 sm:$0xff]   ;;  %v21100_v55 = vld [vmem:[#allocation5 + $0xe0c] ss:$16 sps:$4 sm:$0xff]  }
 0x2ac   : > { %4385 = vmatprep.subr.bf16.mxu0 %v21079_v60  ;;  %4969 = vmatprep.subr.bf16.mxu1 %v21082_v3  ;;  %v22380_v60 = vcombine.low %v22365_v46, %v22368_v7  ;;  %v465_v3 = vld [vmem:[%s22064_s3 + $0xb0] sm:$0xff]  ;;  %v21104_v7 = vld [vmem:[#allocation5 + $0xe28] ss:$16 sps:$4 sm:$0xff]  }
 0x2ad   : > { %v21101_v46 = vld [vmem:[#allocation5 + $0xe20] ss:$16 sps:$4 sm:$0xff]  }
 0x2ae   : > { %23966 = vst [vmem:[#allocation53_spill] sm:$0xff] %v22380_v60 }
 0x2af   : > { %4386 = vmatpush1.bf16.msra.mxu0 %v21077_v6  ;;  %4970 = vmatpush1.bf16.msra.mxu1 %v21080_v13  ;;  %v473_v6 = vld [vmem:[%s22064_s3 + $0xf0] sm:$0xff] }
 0x2b0   : > { %4387 = vmatprep.subr.bf16.mxu0 %v21085_v31  ;;  %4971 = vmatprep.subr.bf16.mxu1 %v21088_v20  ;;  %v21095_v13 = vld [vmem:[#allocation5 + $0xe00] ss:$16 sps:$4 sm:$0xff]   ;;  %v21098_v31 = vld [vmem:[#allocation5 + $0xe08] ss:$16 sps:$4 sm:$0xff]   ;;  %v21103_v20 = vld [vmem:[#allocation5 + $0xe24] ss:$16 sps:$4 sm:$0xff]  }
 0x2b3   : > { %4388 = vmatpush1.bf16.msra.mxu0 %v21083_v21  ;;  %4972 = vmatpush1.bf16.msra.mxu1 %v21086_v54  ;;  %v21106_v21 = vld [vmem:[#allocation5 + $0xe2c] ss:$16 sps:$4 sm:$0xff]   ;;  %v22384_v54 = vcombine.high %v465_v3, %v473_v6 }
 0x2b4   : > { %4389 = vmatprep.subr.bf16.mxu0 %v21091_v33  ;;  %4973 = vmatprep.subr.bf16.mxu1 %v21094_v40  ;;  %v21109_v33 = vld [vmem:[#allocation5 + $0xe44] ss:$16 sps:$4 sm:$0xff]   ;;  %v21112_v40 = vld [vmem:[#allocation5 + $0xe4c] ss:$16 sps:$4 sm:$0xff]  }
 0x2b5   : > { %23967 = vst [vmem:[#allocation54_spill] sm:$0xff] %v22384_v54 }
 0x2b7   : > { %4390 = vmatpush1.bf16.msra.mxu0 %v21089_v42  ;;  %4974 = vmatpush1.bf16.msra.mxu1 %v21092_v24  ;;  %v22390_v42 = vcombine.low %v465_v3, %v473_v6  ;;  %v481_v24 = vld [vmem:[%s22064_s3 + $0x130] sm:$0xff]  ;;  %v21116_v6 = vld [vmem:[#allocation5 + $0xe68] ss:$16 sps:$4 sm:$0xff]  }
 0x2b8   : > { %4432 = vmatprep.subr.bf16.mxu0 %v21097_v61  ;;  %5016 = vmatprep.subr.bf16.mxu1 %v21100_v55  ;;  %v489_v61 = vld [vmem:[%s22064_s3 + $0x170] sm:$0xff] }
 0x2b9   : > { %23968 = vst [vmem:[#allocation55_spill] sm:$0xff] %v22390_v42  ;;  %v21107_v55 = vld [vmem:[#allocation5 + $0xe40] ss:$16 sps:$4 sm:$0xff]  }
 0x2ba   : > { %4392 = vmatmul.mubr.bf16.vlgmr.msra.gmra.mrb[0].mxu0 %v22380_v60  ;;  %4976 = vmatmul.mubr.bf16.vlgmr.msra.gmra.mrb[0].mxu1 %v22380_v60  ;;  %v21110_v60 = vld [vmem:[#allocation5 + $0xe48] ss:$16 sps:$4 sm:$0xff]   ;;  %v21113_v3 = vld [vmem:[#allocation5 + $0xe60] ss:$16 sps:$4 sm:$0xff]  }
 0x2bb   : > { %4433 = vmatpush1.bf16.msra.mxu0 %v21095_v13  ;;  %5017 = vmatpush1.bf16.msra.mxu1 %v21098_v31  ;;  %v21115_v13 = vld [vmem:[#allocation5 + $0xe64] ss:$16 sps:$4 sm:$0xff]   ;;  %v21118_v31 = vld [vmem:[#allocation5 + $0xe6c] ss:$16 sps:$4 sm:$0xff]  }
 0x2bc   : > { %4434 = vmatprep.subr.bf16.mxu0 %v21103_v20  ;;  %5018 = vmatprep.subr.bf16.mxu1 %v21106_v21  ;;  %v22394_v20 = vcombine.high %v481_v24, %v489_v61  ;;  %v21121_v21 = vld [vmem:[#allocation5 + $0xe84] ss:$16 sps:$4 sm:$0xff]  }
 0x2bd   : > { %4401 = vmatprep.mubr.bf16.mxu0 %v22384_v54  ;;  %4985 = vmatprep.mubr.bf16.mxu1 %v22384_v54  ;;  %v21119_v54 = vld [vmem:[#allocation5 + $0xe80] ss:$16 sps:$4 sm:$0xff]  }
 0x2be   : > { %23969 = vst [vmem:[#allocation56_spill] sm:$0xff] %v22394_v20 }
 0x2bf   : > { %4435 = vmatpush1.bf16.msra.mxu0 %v21101_v46  ;;  %5019 = vmatpush1.bf16.msra.mxu1 %v21104_v7  ;;  %v21124_v46 = vld [vmem:[#allocation5 + $0xe8c] ss:$16 sps:$4 sm:$0xff]   ;;  %v22400_v7 = vcombine.low %v481_v24, %v489_v61  ;;  %v21125_v24 = vld [vmem:[#allocation5 + $0xea0] ss:$16 sps:$4 sm:$0xff]   ;;  %v21128_v61 = vld [vmem:[#allocation5 + $0xea8] ss:$16 sps:$4 sm:$0xff]  }
 0x2c0   : > { %4436 = vmatprep.subr.bf16.mxu0 %v21109_v33  ;;  %5020 = vmatprep.subr.bf16.mxu1 %v21112_v40  ;;  %v497_v33 = vld [vmem:[%s22064_s3 + $0x1b0] sm:$0xff] }
 0x2c1   : > { %23970 = vst [vmem:[#allocation57_spill] sm:$0xff] %v22400_v7  ;;  %v505_v40 = vld [vmem:[%s22064_s3 + $0x1f0] sm:$0xff] }
 0x2c2   : > { %4402 = vmatmul.mubr.bf16.gmra.mrb[4].mxu0 %v22390_v42  ;;  %4986 = vmatmul.mubr.bf16.gmra.mrb[4].mxu1 %v22390_v42  ;;  %v21122_v42 = vld [vmem:[#allocation5 + $0xe88] ss:$16 sps:$4 sm:$0xff]  }
 0x2c3   : > { %4437 = vmatpush1.bf16.msra.mxu0 %v21107_v55  ;;  %5021 = vmatpush1.bf16.msra.mxu1 %v21110_v60  ;;  %v21127_v60 = vld [vmem:[#allocation5 + $0xea4] ss:$16 sps:$4 sm:$0xff]   ;;  %v21130_v55 = vld [vmem:[#allocation5 + $0xeac] ss:$16 sps:$4 sm:$0xff]  }
 0x2c4   : > { %4438 = vmatprep.subr.bf16.mxu0 %v21115_v13  ;;  %5022 = vmatprep.subr.bf16.mxu1 %v21118_v31  ;;  %v22404_v13 = vcombine.high %v497_v33, %v505_v40  ;;  %v21133_v31 = vld [vmem:[#allocation5 + $0xec4] ss:$16 sps:$4 sm:$0xff]  }
 0x2c5   : > { %4411 = vmatprep.mubr.bf16.mxu0 %v22394_v20  ;;  %4995 = vmatprep.mubr.bf16.mxu1 %v22394_v20  ;;  %v21155_v20 = vld [vmem:[#allocation5 + $0xf40] ss:$16 sps:$4 sm:$0xff]  }
 0x2c6   : > { %23971 = vst [vmem:[#allocation58_spill] sm:$0xff] %v22404_v13 }
 0x2c7   : > { %4439 = vmatpush1.bf16.msra.mxu0 %v21113_v3  ;;  %5023 = vmatpush1.bf16.msra.mxu1 %v21116_v6  ;;  %v21136_v3 = vld [vmem:[#allocation5 + $0xecc] ss:$16 sps:$4 sm:$0xff]   ;;  %v22410_v6 = vcombine.low %v497_v33, %v505_v40  ;;  %v21137_v33 = vld [vmem:[#allocation5 + $0xee0] ss:$16 sps:$4 sm:$0xff]   ;;  %v21140_v40 = vld [vmem:[#allocation5 + $0xee8] ss:$16 sps:$4 sm:$0xff]  }
 0x2c8   : > { %4440 = vmatprep.subr.bf16.mxu0 %v21121_v21  ;;  %5024 = vmatprep.subr.bf16.mxu1 %v21124_v46  ;;  %v22413_v21 = vld [vmem:[%s22064_s3 + $0x38] sm:$0xff] }
 0x2c9   : > { %23972 = vst [vmem:[#allocation59_spill] sm:$0xff] %v22410_v6  ;;  %v22416_v46 = vld [vmem:[%s22064_s3 + $0x78] sm:$0xff] }
 0x2ca   : > { %4412 = vmatmul.mubr.bf16.gmra.mrb[8].mxu0 %v22400_v7  ;;  %4996 = vmatmul.mubr.bf16.gmra.mrb[8].mxu1 %v22400_v7  ;;  %v22420_v7 = vcombine.high %v22413_v21, %v22416_v46 }
 0x2cb   : > { %4441 = vmatpush1.bf16.msra.mxu0 %v21119_v54  ;;  %5025 = vmatpush1.bf16.msra.mxu1 %v21122_v42  ;;  %v21131_v54 = vld [vmem:[#allocation5 + $0xec0] ss:$16 sps:$4 sm:$0xff]   ;;  %v21134_v42 = vld [vmem:[#allocation5 + $0xec8] ss:$16 sps:$4 sm:$0xff]  }
 0x2cc   : > { %4442 = vmatprep.subr.bf16.mxu0 %v21127_v60  ;;  %5026 = vmatprep.subr.bf16.mxu1 %v21130_v55  ;;  %v21139_v60 = vld [vmem:[#allocation5 + $0xee4] ss:$16 sps:$4 sm:$0xff]   ;;  %v21142_v55 = vld [vmem:[#allocation5 + $0xeec] ss:$16 sps:$4 sm:$0xff]   ;;  %23973 = vst [vmem:[#allocation60_spill] sm:$0xff] %v22420_v7 }
 0x2cd   : > { %4421 = vmatprep.mubr.bf16.mxu0 %v22404_v13  ;;  %5005 = vmatprep.mubr.bf16.mxu1 %v22404_v13  ;;  %v21151_v13 = vld [vmem:[#allocation5 + $0xf24] ss:$16 sps:$4 sm:$0xff]  }
 0x2cf   : > { %4443 = vmatpush1.bf16.msra.mxu0 %v21125_v24  ;;  %5027 = vmatpush1.bf16.msra.mxu1 %v21128_v61  ;;  %v21145_v24 = vld [vmem:[#allocation5 + $0xf04] ss:$16 sps:$4 sm:$0xff]   ;;  %v21148_v61 = vld [vmem:[#allocation5 + $0xf0c] ss:$16 sps:$4 sm:$0xff]  }
 0x2d0   : > { %4444 = vmatprep.subr.bf16.mxu0 %v21133_v31  ;;  %5028 = vmatprep.subr.bf16.mxu1 %v21136_v3  ;;  %v21143_v31 = vld [vmem:[#allocation5 + $0xf00] ss:$16 sps:$4 sm:$0xff]   ;;  %v21146_v3 = vld [vmem:[#allocation5 + $0xf08] ss:$16 sps:$4 sm:$0xff]  }
 0x2d2   : > { %4422 = vmatmul.mubr.bf16.gmra.mrb[12].mxu0 %v22410_v6  ;;  %5006 = vmatmul.mubr.bf16.gmra.mrb[12].mxu1 %v22410_v6  ;;  %v21154_v6 = vld [vmem:[#allocation5 + $0xf2c] ss:$16 sps:$4 sm:$0xff]  }
 0x2d3   : > { %4445 = vmatpush1.bf16.msra.mxu0 %v21131_v54  ;;  %5029 = vmatpush1.bf16.msra.mxu1 %v21134_v42  ;;  %v21149_v54 = vld [vmem:[#allocation5 + $0xf20] ss:$16 sps:$4 sm:$0xff]   ;;  %v21152_v42 = vld [vmem:[#allocation5 + $0xf28] ss:$16 sps:$4 sm:$0xff]  }
 0x2d4   : > { %4446 = vmatprep.subr.bf16.mxu0 %v21139_v60  ;;  %5030 = vmatprep.subr.bf16.mxu1 %v21142_v55  ;;  %v21157_v60 = vld [vmem:[#allocation5 + $0xf44] ss:$16 sps:$4 sm:$0xff]   ;;  %v21160_v55 = vld [vmem:[#allocation5 + $0xf4c] ss:$16 sps:$4 sm:$0xff]  }
 0x2d5   : > { %4464 = vmatprep.mubr.bf16.mxu0 %v22420_v7  ;;  %5048 = vmatprep.mubr.bf16.mxu1 %v22420_v7  ;;  %v21158_v7 = vld [vmem:[#allocation5 + $0xf48] ss:$16 sps:$4 sm:$0xff]  }
 0x2d7   : > { %4447 = vmatpush1.bf16.msra.mxu0 %v21137_v33  ;;  %5031 = vmatpush1.bf16.msra.mxu1 %v21140_v40  ;;  %v21163_v33 = vld [vmem:[#allocation5 + $0xf64] ss:$16 sps:$4 sm:$0xff]   ;;  %v21166_v40 = vld [vmem:[#allocation5 + $0xf6c] ss:$16 sps:$4 sm:$0xff]  }
 0x2d8   : > { %4448 = vmatprep.subr.bf16.mxu0 %v21145_v24  ;;  %5032 = vmatprep.subr.bf16.mxu1 %v21148_v61  ;;  %v21161_v24 = vld [vmem:[#allocation5 + $0xf60] ss:$16 sps:$4 sm:$0xff]   ;;  %v21164_v61 = vld [vmem:[#allocation5 + $0xf68] ss:$16 sps:$4 sm:$0xff]  }
 0x2db   : > { %4449 = vmatpush1.bf16.msra.mxu0 %v21143_v31  ;;  %5033 = vmatpush1.bf16.msra.mxu1 %v21146_v3  ;;  %v21169_v31 = vld [vmem:[#allocation5 + $0xf84] ss:$16 sps:$4 sm:$0xff]   ;;  %v21172_v3 = vld [vmem:[#allocation5 + $0xf8c] ss:$16 sps:$4 sm:$0xff]  }
 0x2dc   : > { %4450 = vmatprep.subr.bf16.mxu0 %v21151_v13  ;;  %5034 = vmatprep.subr.bf16.mxu1 %v21154_v6  ;;  %v21167_v13 = vld [vmem:[#allocation5 + $0xf80] ss:$16 sps:$4 sm:$0xff]   ;;  %v21170_v6 = vld [vmem:[#allocation5 + $0xf88] ss:$16 sps:$4 sm:$0xff]  }
 0x2df   : > { %4451 = vmatpush1.bf16.msra.mxu0 %v21149_v54  ;;  %5035 = vmatpush1.bf16.msra.mxu1 %v21152_v42  ;;  %v21175_v54 = vld [vmem:[#allocation5 + $0xfa4] ss:$16 sps:$4 sm:$0xff]   ;;  %v21178_v42 = vld [vmem:[#allocation5 + $0xfac] ss:$16 sps:$4 sm:$0xff]  }
 0x2e0   : > { %4452 = vmatprep.subr.bf16.mxu0 %v21157_v60  ;;  %5036 = vmatprep.subr.bf16.mxu1 %v21160_v55  ;;  %v21173_v60 = vld [vmem:[#allocation5 + $0xfa0] ss:$16 sps:$4 sm:$0xff]   ;;  %v21176_v55 = vld [vmem:[#allocation5 + $0xfa8] ss:$16 sps:$4 sm:$0xff]  }
 0x2e3   : > { %4453 = vmatpush1.bf16.msra.mxu0 %v21155_v20  ;;  %5037 = vmatpush1.bf16.msra.mxu1 %v21158_v7  ;;  %v21181_v20 = vld [vmem:[#allocation5 + $0xfc4] ss:$16 sps:$4 sm:$0xff]   ;;  %v21184_v7 = vld [vmem:[#allocation5 + $0xfcc] ss:$16 sps:$4 sm:$0xff]  }
 0x2e4   : > { %4454 = vmatprep.subr.bf16.mxu0 %v21163_v33  ;;  %5038 = vmatprep.subr.bf16.mxu1 %v21166_v40  ;;  %v21179_v33 = vld [vmem:[#allocation5 + $0xfc0] ss:$16 sps:$4 sm:$0xff]   ;;  %v21182_v40 = vld [vmem:[#allocation5 + $0xfc8] ss:$16 sps:$4 sm:$0xff]  }
 0x2e7   : > { %4455 = vmatpush1.bf16.msra.mxu0 %v21161_v24  ;;  %5039 = vmatpush1.bf16.msra.mxu1 %v21164_v61  ;;  %v21187_v24 = vld [vmem:[#allocation5 + $0xfe4] ss:$16 sps:$4 sm:$0xff]   ;;  %v21190_v61 = vld [vmem:[#allocation5 + $0xfec] ss:$16 sps:$4 sm:$0xff]  }
 0x2e8   : > { %4456 = vmatprep.subr.bf16.mxu0 %v21169_v31  ;;  %5040 = vmatprep.subr.bf16.mxu1 %v21172_v3  ;;  %v21185_v31 = vld [vmem:[#allocation5 + $0xfe0] ss:$16 sps:$4 sm:$0xff]   ;;  %v21188_v3 = vld [vmem:[#allocation5 + $0xfe8] ss:$16 sps:$4 sm:$0xff]  }
 0x2eb   : > { %4457 = vmatpush1.bf16.msra.mxu0 %v21167_v13  ;;  %5041 = vmatpush1.bf16.msra.mxu1 %v21170_v6  ;;  %v466_v13 = vld [vmem:[%s22064_s3 + $0xb8] sm:$0xff] }
 0x2ec   : > { %4458 = vmatprep.subr.bf16.mxu0 %v21175_v54  ;;  %5042 = vmatprep.subr.bf16.mxu1 %v21178_v42  ;;  %v474_v6 = vld [vmem:[%s22064_s3 + $0xf8] sm:$0xff]  ;;  %v21196_v42 = vld [vmem:[#allocation8 + $0xc] ss:$16 sps:$4 sm:$0xff]  }
 0x2ed   : > { %v21193_v54 = vld [vmem:[#allocation8 + $0x4] ss:$16 sps:$4 sm:$0xff]  }
 0x2ef   : > { %4459 = vmatpush1.bf16.msra.mxu0 %v21173_v60  ;;  %5043 = vmatpush1.bf16.msra.mxu1 %v21176_v55  ;;  %v22430_v60 = vcombine.low %v22413_v21, %v22416_v46  ;;  %v22432_v55 = vcombine.high %v466_v13, %v474_v6  ;;  %v482_v21 = vld [vmem:[%s22064_s3 + $0x138] sm:$0xff] }
 0x2f0   : > { %4460 = vmatprep.subr.bf16.mxu0 %v21181_v20  ;;  %5044 = vmatprep.subr.bf16.mxu1 %v21184_v7  ;;  %v21191_v20 = vld [vmem:[#allocation8] ss:$16 sps:$4 sm:$0xff]   ;;  %v21194_v7 = vld [vmem:[#allocation8 + $0x8] ss:$16 sps:$4 sm:$0xff]  }
 0x2f1   : > { %23974 = vst [vmem:[#allocation61_spill] sm:$0xff] %v22430_v60  ;;  %23975 = vst [vmem:[#allocation62_spill] sm:$0xff] %v22432_v55  ;;  %v490_v46 = vld [vmem:[%s22064_s3 + $0x178] sm:$0xff] }
 0x2f3   : > { %4461 = vmatpush1.bf16.msra.mxu0 %v21179_v33  ;;  %5045 = vmatpush1.bf16.msra.mxu1 %v21182_v40  ;;  %v21199_v33 = vld [vmem:[#allocation8 + $0x24] ss:$16 sps:$4 sm:$0xff]   ;;  %v21202_v40 = vld [vmem:[#allocation8 + $0x2c] ss:$16 sps:$4 sm:$0xff]  }
 0x2f4   : > { %4462 = vmatprep.subr.bf16.mxu0 %v21187_v24  ;;  %5046 = vmatprep.subr.bf16.mxu1 %v21190_v61  ;;  %v21197_v24 = vld [vmem:[#allocation8 + $0x20] ss:$16 sps:$4 sm:$0xff]   ;;  %v21200_v61 = vld [vmem:[#allocation8 + $0x28] ss:$16 sps:$4 sm:$0xff]  }
 0x2f7   : > { %4463 = vmatpush1.bf16.msra.mxu0 %v21185_v31  ;;  %5047 = vmatpush1.bf16.msra.mxu1 %v21188_v3  ;;  %v21205_v31 = vld [vmem:[#allocation8 + $0x44] ss:$16 sps:$4 sm:$0xff]   ;;  %v21208_v3 = vld [vmem:[#allocation8 + $0x4c] ss:$16 sps:$4 sm:$0xff]  }
 0x2f8   : > { %5895 = vmatprep.subr.bf16.mxu0 %v21193_v54  ;;  %6041 = vmatprep.subr.bf16.mxu1 %v21196_v42  ;;  %v22440_v54 = vcombine.low %v466_v13, %v474_v6  ;;  %v22442_v42 = vcombine.high %v482_v21, %v490_v46  ;;  %v498_v13 = vld [vmem:[%s22064_s3 + $0x1b8] sm:$0xff] }
 0x2f9   : > { %v506_v6 = vld [vmem:[%s22064_s3 + $0x1f8] sm:$0xff] }
 0x2fa   : > { %4465 = vmatmul.mubr.bf16.vlgmr.msra.gmra.mrb[0].mxu0 %v22430_v60  ;;  %5049 = vmatmul.mubr.bf16.vlgmr.msra.gmra.mrb[0].mxu1 %v22430_v60  ;;  %23976 = vst [vmem:[#allocation63_spill] sm:$0xff] %v22440_v54  ;;  %23977 = vst [vmem:[#allocation64_spill] sm:$0xff] %v22442_v42  ;;  %v21203_v60 = vld [vmem:[#allocation8 + $0x40] ss:$16 sps:$4 sm:$0xff]  }
 0x2fb   : > { %4474 = vmatprep.mubr.bf16.mxu0 %v22432_v55  ;;  %5058 = vmatprep.mubr.bf16.mxu1 %v22432_v55  ;;  %v21206_v55 = vld [vmem:[#allocation8 + $0x48] ss:$16 sps:$4 sm:$0xff]  }
 0x2fc   : > { %5896 = vmatpush1.bf16.msra.mxu0 %v21191_v20  ;;  %6042 = vmatpush1.bf16.msra.mxu1 %v21194_v7  ;;  %v21211_v20 = vld [vmem:[#allocation8 + $0x64] ss:$16 sps:$4 sm:$0xff]   ;;  %v21214_v7 = vld [vmem:[#allocation8 + $0x6c] ss:$16 sps:$4 sm:$0xff]  }
 0x2fd   : > { %5897 = vmatprep.subr.bf16.mxu0 %v21199_v33  ;;  %6043 = vmatprep.subr.bf16.mxu1 %v21202_v40  ;;  %v21209_v33 = vld [vmem:[#allocation8 + $0x60] ss:$16 sps:$4 sm:$0xff]   ;;  %v21212_v40 = vld [vmem:[#allocation8 + $0x68] ss:$16 sps:$4 sm:$0xff]  }
 0x300   : > { %5898 = vmatpush1.bf16.msra.mxu0 %v21197_v24  ;;  %6044 = vmatpush1.bf16.msra.mxu1 %v21200_v61  ;;  %v21217_v24 = vld [vmem:[#allocation8 + $0x84] ss:$16 sps:$4 sm:$0xff]   ;;  %v21220_v61 = vld [vmem:[#allocation8 + $0x8c] ss:$16 sps:$4 sm:$0xff]  }
 0x301   : > { %5899 = vmatprep.subr.bf16.mxu0 %v21205_v31  ;;  %6045 = vmatprep.subr.bf16.mxu1 %v21208_v3  ;;  %v22450_v31 = vcombine.low %v482_v21, %v490_v46  ;;  %v22452_v3 = vcombine.high %v498_v13, %v506_v6  ;;  %v21229_v21 = vld [vmem:[#allocation8 + $0xc4] ss:$16 sps:$4 sm:$0xff]   ;;  %v21232_v46 = vld [vmem:[#allocation8 + $0xcc] ss:$16 sps:$4 sm:$0xff]  }
 0x302   : > { %4475 = vmatmul.mubr.bf16.gmra.mrb[4].mxu0 %v22440_v54  ;;  %5059 = vmatmul.mubr.bf16.gmra.mrb[4].mxu1 %v22440_v54  ;;  %v21215_v54 = vld [vmem:[#allocation8 + $0x80] ss:$16 sps:$4 sm:$0xff]  }
 0x303   : > { %4484 = vmatprep.mubr.bf16.mxu0 %v22442_v42  ;;  %5068 = vmatprep.mubr.bf16.mxu1 %v22442_v42  ;;  %23978 = vst [vmem:[#allocation65_spill] sm:$0xff] %v22450_v31  ;;  %23979 = vst [vmem:[#allocation66_spill] sm:$0xff] %v22452_v3  ;;  %v21223_v42 = vld [vmem:[#allocation8 + $0xa4] ss:$16 sps:$4 sm:$0xff]  }
 0x304   : > { %5900 = vmatpush1.bf16.msra.mxu0 %v21203_v60  ;;  %6046 = vmatpush1.bf16.msra.mxu1 %v21206_v55  ;;  %v21221_v60 = vld [vmem:[#allocation8 + $0xa0] ss:$16 sps:$4 sm:$0xff]   ;;  %v21224_v55 = vld [vmem:[#allocation8 + $0xa8] ss:$16 sps:$4 sm:$0xff]  }
 0x305   : > { %5901 = vmatprep.subr.bf16.mxu0 %v21211_v20  ;;  %6047 = vmatprep.subr.bf16.mxu1 %v21214_v7  ;;  %v22458_v20 = vcombine.low %v498_v13, %v506_v6  ;;  %v21227_v7 = vld [vmem:[#allocation8 + $0xc0] ss:$16 sps:$4 sm:$0xff]   ;;  %v21242_v6 = vld [vmem:[#allocation8 + $0x108] ss:$16 sps:$4 sm:$0xff]  }
 0x306   : > { %v21239_v13 = vld [vmem:[#allocation8 + $0x100] ss:$16 sps:$4 sm:$0xff]  }
 0x307   : > { %23980 = vst [vmem:[#allocation67_spill] sm:$0xff] %v22458_v20 }
 0x308   : > { %5902 = vmatpush1.bf16.msra.mxu0 %v21209_v33  ;;  %6048 = vmatpush1.bf16.msra.mxu1 %v21212_v40  ;;  %v21230_v33 = vld [vmem:[#allocation8 + $0xc8] ss:$16 sps:$4 sm:$0xff]   ;;  %v21235_v40 = vld [vmem:[#allocation8 + $0xe4] ss:$16 sps:$4 sm:$0xff]  }
 0x309   : > { %5903 = vmatprep.subr.bf16.mxu0 %v21217_v24  ;;  %6049 = vmatprep.subr.bf16.mxu1 %v21220_v61  ;;  %v21238_v24 = vld [vmem:[#allocation8 + $0xec] ss:$16 sps:$4 sm:$0xff]   ;;  %v21247_v61 = vld [vmem:[#allocation8 + $0x124] ss:$16 sps:$4 sm:$0xff]  }
 0x30a   : > { %4485 = vmatmul.mubr.bf16.gmra.mrb[8].mxu0 %v22450_v31  ;;  %5069 = vmatmul.mubr.bf16.gmra.mrb[8].mxu1 %v22450_v31 }
 0x30b   : > { %4494 = vmatprep.mubr.bf16.mxu0 %v22452_v3  ;;  %5078 = vmatprep.mubr.bf16.mxu1 %v22452_v3 }
 0x30c   : > { %5904 = vmatpush1.bf16.msra.mxu0 %v21215_v54  ;;  %6050 = vmatpush1.bf16.msra.mxu1 %v21218_v1  ;;  %v21233_v1 = vld [vmem:[#allocation8 + $0xe0] ss:$16 sps:$4 sm:$0xff]   ;;  %v21241_v54 = vld [vmem:[#allocation8 + $0x104] ss:$16 sps:$4 sm:$0xff]  }
 0x30d   : > { %5905 = vmatprep.subr.bf16.mxu0 %v21223_v42  ;;  %6051 = vmatprep.subr.bf16.mxu1 %v21226_v23  ;;  %v21236_v23 = vld [vmem:[#allocation8 + $0xe8] ss:$16 sps:$4 sm:$0xff]   ;;  %v21244_v42 = vld [vmem:[#allocation8 + $0x10c] ss:$16 sps:$4 sm:$0xff]  }
 0x310   : > { %5906 = vmatpush1.bf16.msra.mxu0 %v21221_v60  ;;  %6052 = vmatpush1.bf16.msra.mxu1 %v21224_v55  ;;  %v21250_v60 = vld [vmem:[#allocation8 + $0x12c] ss:$16 sps:$4 sm:$0xff]   ;;  %v21245_v55 = vld [vmem:[#allocation8 + $0x120] ss:$16 sps:$4 sm:$0xff]  }
 0x311   : > { %5907 = vmatprep.subr.bf16.mxu0 %v21229_v21  ;;  %6053 = vmatprep.subr.bf16.mxu1 %v21232_v46  ;;  %v21248_v21 = vld [vmem:[#allocation8 + $0x128] ss:$16 sps:$4 sm:$0xff]   ;;  %v21253_v46 = vld [vmem:[#allocation8 + $0x144] ss:$16 sps:$4 sm:$0xff]  }
 0x312   : > { %4495 = vmatmul.mubr.bf16.gmra.mrb[12].mxu0 %v22458_v20  ;;  %5079 = vmatmul.mubr.bf16.gmra.mrb[12].mxu1 %v22458_v20 }
 0x314   : > { %5908 = vmatpush1.bf16.msra.mxu0 %v21227_v7  ;;  %6054 = vmatpush1.bf16.msra.mxu1 %v21230_v33  ;;  %v21256_v7 = vld [vmem:[#allocation8 + $0x14c] ss:$16 sps:$4 sm:$0xff]   ;;  %v21251_v33 = vld [vmem:[#allocation8 + $0x140] ss:$16 sps:$4 sm:$0xff]  }
 0x315   : > { %5909 = vmatprep.subr.bf16.mxu0 %v21235_v40  ;;  %6055 = vmatprep.subr.bf16.mxu1 %v21238_v24  ;;  %v21254_v40 = vld [vmem:[#allocation8 + $0x148] ss:$16 sps:$4 sm:$0xff]   ;;  %v21259_v24 = vld [vmem:[#allocation8 + $0x164] ss:$16 sps:$4 sm:$0xff]  }
 0x318   : > { %5910 = vmatpush1.bf16.msra.mxu0 %v21233_v1  ;;  %6056 = vmatpush1.bf16.msra.mxu1 %v21236_v23  ;;  %v21262_v1 = vld [vmem:[#allocation8 + $0x16c] ss:$16 sps:$4 sm:$0xff]   ;;  %v21257_v23 = vld [vmem:[#allocation8 + $0x160] ss:$16 sps:$4 sm:$0xff]  }
 0x319   : > { %5911 = vmatprep.subr.bf16.mxu0 %v21241_v54  ;;  %6057 = vmatprep.subr.bf16.mxu1 %v21244_v42  ;;  %v21260_v54 = vld [vmem:[#allocation8 + $0x168] ss:$16 sps:$4 sm:$0xff]   ;;  %v21265_v42 = vld [vmem:[#allocation8 + $0x184] ss:$16 sps:$4 sm:$0xff]  }
 0x31c   : > { %5912 = vmatpush1.bf16.msra.mxu0 %v21239_v13  ;;  %6058 = vmatpush1.bf16.msra.mxu1 %v21242_v6  ;;  %v21268_v13 = vld [vmem:[#allocation8 + $0x18c] ss:$16 sps:$4 sm:$0xff]   ;;  %v21263_v6 = vld [vmem:[#allocation8 + $0x180] ss:$16 sps:$4 sm:$0xff]  }
 0x31d   : > { %5913 = vmatprep.subr.bf16.mxu0 %v21247_v61  ;;  %6059 = vmatprep.subr.bf16.mxu1 %v21250_v60  ;;  %v21266_v61 = vld [vmem:[#allocation8 + $0x188] ss:$16 sps:$4 sm:$0xff]   ;;  %v21271_v60 = vld [vmem:[#allocation8 + $0x1a4] ss:$16 sps:$4 sm:$0xff]  }
 0x320   : > { %5914 = vmatpush1.bf16.msra.mxu0 %v21245_v55  ;;  %6060 = vmatpush1.bf16.msra.mxu1 %v21248_v21  ;;  %v21274_v55 = vld [vmem:[#allocation8 + $0x1ac] ss:$16 sps:$4 sm:$0xff]   ;;  %v21269_v21 = vld [vmem:[#allocation8 + $0x1a0] ss:$16 sps:$4 sm:$0xff]  }
 0x321   : > { %5915 = vmatprep.subr.bf16.mxu0 %v21253_v46  ;;  %6061 = vmatprep.subr.bf16.mxu1 %v21256_v7  ;;  %v21272_v46 = vld [vmem:[#allocation8 + $0x1a8] ss:$16 sps:$4 sm:$0xff]   ;;  %v21277_v7 = vld [vmem:[#allocation8 + $0x1c4] ss:$16 sps:$4 sm:$0xff]  }
 0x324   : > { %5916 = vmatpush1.bf16.msra.mxu0 %v21251_v33  ;;  %6062 = vmatpush1.bf16.msra.mxu1 %v21254_v40  ;;  %v21280_v33 = vld [vmem:[#allocation8 + $0x1cc] ss:$16 sps:$4 sm:$0xff]   ;;  %v21275_v40 = vld [vmem:[#allocation8 + $0x1c0] ss:$16 sps:$4 sm:$0xff]  }
 0x325   : > { %5917 = vmatprep.subr.bf16.mxu0 %v21259_v24  ;;  %6063 = vmatprep.subr.bf16.mxu1 %v21262_v1  ;;  %v21278_v24 = vld [vmem:[#allocation8 + $0x1c8] ss:$16 sps:$4 sm:$0xff]   ;;  %v21283_v1 = vld [vmem:[#allocation8 + $0x1e4] ss:$16 sps:$4 sm:$0xff]  }
 0x328   : > { %5918 = vmatpush1.bf16.msra.mxu0 %v21257_v23  ;;  %6064 = vmatpush1.bf16.msra.mxu1 %v21260_v54  ;;  %v21286_v23 = vld [vmem:[#allocation8 + $0x1ec] ss:$16 sps:$4 sm:$0xff]   ;;  %v21281_v54 = vld [vmem:[#allocation8 + $0x1e0] ss:$16 sps:$4 sm:$0xff]  }
 0x329   : > { %5919 = vmatprep.subr.bf16.mxu0 %v21265_v42  ;;  %6065 = vmatprep.subr.bf16.mxu1 %v21268_v13  ;;  %v21284_v42 = vld [vmem:[#allocation8 + $0x1e8] ss:$16 sps:$4 sm:$0xff]   ;;  %v21289_v13 = vld [vmem:[#allocation8 + $0x204] ss:$16 sps:$4 sm:$0xff]  }
 0x32c   : > { %5920 = vmatpush1.bf16.msra.mxu0 %v21263_v6  ;;  %6066 = vmatpush1.bf16.msra.mxu1 %v21266_v61  ;;  %v21292_v6 = vld [vmem:[#allocation8 + $0x20c] ss:$16 sps:$4 sm:$0xff]   ;;  %v1021_v61 = vlaneseq }
 0x32d   : > { %5921 = vmatprep.subr.bf16.mxu0 %v21271_v60  ;;  %6067 = vmatprep.subr.bf16.mxu1 %v21274_v55 }
 0x32e   : > { %v22462_v60 = vshrl.u32 %v1021_v61, 7 }
 0x330   : > { %5922 = vmatpush1.bf16.msra.mxu0 %v21269_v21  ;;  %6068 = vmatpush1.bf16.msra.mxu1 %v21272_v46  ;;  %23981 = vst [vmem:[#allocation68_spill] sm:$0xff] %v22462_v60  ;;  %v22465_v55 = vsub.s32 0, %v22462_v60  ;;  %v22468_v21 = vsub.s32 2, %v22462_v60  ;;  %v1019_v46 = vld [vmem:[#allocation7] sm:$0xf] }
 0x331   : > { %5923 = vmatprep.subr.bf16.mxu0 %v21277_v7  ;;  %6069 = vmatprep.subr.bf16.mxu1 %v21280_v33  ;;  %v22471_v7 = vsub.s32 1, %v22462_v60  ;;  %v22474_v33 = vsub.s32 3, %v22462_v60 }
 0x332   : > { %23982 = vst [vmem:[#allocation69_spill] sm:$0xff] %v22465_v55  ;;  %23983 = vst [vmem:[#allocation70_spill] sm:$0xff] %v22468_v21 }
 0x333   : > { %23984 = vst [vmem:[#allocation71_spill] sm:$0xff] %v22471_v7  ;;  %23985 = vst [vmem:[#allocation72_spill] sm:$0xff] %v22474_v33 }
 0x334   : > { %5924 = vmatpush1.bf16.msra.mxu0 %v21275_v40  ;;  %6070 = vmatpush1.bf16.msra.mxu1 %v21278_v24  ;;  %v22477_v40 = vrot.slane %v1019_v46, %v22465_v55  ;;  %v22480_v24 = vrot.slane %v1019_v46, %v22468_v21 }
 0x335   : > { %5925 = vmatprep.subr.bf16.mxu0 %v21283_v1  ;;  %6071 = vmatprep.subr.bf16.mxu1 %v21286_v23 }
 0x338   : > { %5926 = vmatpush1.bf16.msra.mxu0 %v21281_v54  ;;  %6072 = vmatpush1.bf16.msra.mxu1 %v21284_v42  ;;  %v22483_v54 = vrot.slane %v1019_v46, %v22471_v7  ;;  %v22486_v42 = vrot.slane %v1019_v46, %v22474_v33 }
 0x339   : > { %5968 = vmatprep.subr.bf16.mxu0 %v21289_v13  ;;  %6114 = vmatprep.subr.bf16.mxu1 %v21292_v6 }
 0x3cd   : > { %v4466_v1 = vpop.f32.mrb[0].mxu0  ;;  %v5050_v23 = vpop.f32.mrb[0].mxu1 }
 0x3ce   : > { %v4468_v13 = vpop.f32.mrb[1].mxu0  ;;  %v5052_v6 = vpop.f32.mrb[1].mxu1  ;;  %v19386_v60 = vadd.f32 %v4466_v1, %v22477_v40  ;;  %v19402_v3 = vadd.f32 %v5050_v23, %v22480_v24  ;;  %v21287_v23 = vld [vmem:[#allocation8 + $0x200] ss:$16 sps:$4 sm:$0xff]  }
 0x3cf   : > { %v4470_v61 = vpop.f32.mrb[2].mxu0  ;;  %v5054_v20 = vpop.f32.mrb[2].mxu1  ;;  %v19387_v45 = vadd.f32 %v4468_v13, %v22483_v54  ;;  %v19403_v52 = vadd.f32 %v5052_v6, %v22486_v42 }
 0x3d0   : > { %v19388_v31 = vadd.f32 %v4470_v61, %v22477_v40  ;;  %v19404_v44 = vadd.f32 %v5054_v20, %v22480_v24  ;;  %v4472_v12 = vpop.f32.mrb[3].mxu0  ;;  %v5056_v8 = vpop.f32.mrb[3].mxu1  ;;  %v21290_v61 = vld [vmem:[#allocation8 + $0x208] ss:$16 sps:$4 sm:$0xff]   ;;  %v21298_v20 = vld [vmem:[#allocation8 + $0x22c] ss:$16 sps:$4 sm:$0xff]  }
 0x3d1   : > { %v19389_v46 = vadd.f32 %v4472_v12, %v22483_v54  ;;  %v19405_v36 = vadd.f32 %v5056_v8, %v22486_v42 }
 0x3d2   : > { %v5089_v25 = vpack.c.bf16 %v19388_v31, %v19386_v60  ;;  %v22496_v16 = vpack.c.bf16 %v19404_v44, %v19402_v3 }
 0x3d3   : > { %v5090_v1 = vpack.c.bf16 %v19389_v46, %v19387_v45  ;;  %v22498_v51 = vpack.c.bf16 %v19405_v36, %v19403_v52  ;;  %v21293_v36 = vld [vmem:[#allocation8 + $0x220] ss:$16 sps:$4 sm:$0xff]   ;;  %v21296_v52 = vld [vmem:[#allocation8 + $0x228] ss:$16 sps:$4 sm:$0xff]  }
 0x3d5   : > { %v4476_v35 = vpop.f32.mrb[4].mxu0  ;;  %v5060_v30 = vpop.f32.mrb[4].mxu1  ;;  %5927 = vmatprep.mubr.bf16.mxu0 %v5090_v1  ;;  %6073 = vmatprep.mubr.bf16.mxu1 %v5090_v1  ;;  %v21301_v1 = vld [vmem:[#allocation8 + $0x244] ss:$16 sps:$4 sm:$0xff]  }
 0x3d6   : > { %v4478_v13 = vpop.f32.mrb[5].mxu0  ;;  %v5062_v6 = vpop.f32.mrb[5].mxu1  ;;  %5928 = vmatmul.mubr.bf16.vlgmr.msra.gmra.mrb[16].mxu0 %v5089_v25  ;;  %6074 = vmatmul.mubr.bf16.vlgmr.msra.gmra.mrb[16].mxu1 %v5089_v25  ;;  %v19390_v8 = vadd.f32 %v4476_v35, %v22477_v40  ;;  %v19406_v44 = vadd.f32 %v5060_v30, %v22480_v24  ;;  %v21304_v25 = vld [vmem:[#allocation8 + $0x24c] ss:$16 sps:$4 sm:$0xff]  }
 0x3d7   : > { %5969 = vmatpush1.bf16.msra.mxu0 %v21287_v23  ;;  %6115 = vmatpush1.bf16.msra.mxu1 %v21290_v61  ;;  %v4480_v12 = vpop.f32.mrb[6].mxu0  ;;  %v5064_v45 = vpop.f32.mrb[6].mxu1  ;;  %v19391_v35 = vadd.f32 %v4478_v13, %v22483_v54  ;;  %v19407_v23 = vadd.f32 %v5062_v6, %v22486_v42  ;;  %v21310_v13 = vld [vmem:[#allocation8 + $0x26c] ss:$16 sps:$4 sm:$0xff]  }
 0x3d8   : > { %v19392_v31 = vadd.f32 %v4480_v12, %v22477_v40  ;;  %v19408_v3 = vadd.f32 %v5064_v45, %v22480_v24  ;;  %v4482_v60 = vpop.f32.mrb[7].mxu0  ;;  %v5066_v46 = vpop.f32.mrb[7].mxu1  ;;  %5970 = vmatprep.subr.bf16.mxu0 %v21295_v59  ;;  %6116 = vmatprep.subr.bf16.mxu1 %v21298_v20  ;;  %v21299_v59 = vld [vmem:[#allocation8 + $0x240] ss:$16 sps:$4 sm:$0xff]   ;;  %v21302_v20 = vld [vmem:[#allocation8 + $0x248] ss:$16 sps:$4 sm:$0xff]  }
 0x3d9   : > { %v19393_v61 = vadd.f32 %v4482_v60, %v22483_v54  ;;  %v19409_v15 = vadd.f32 %v5066_v46, %v22486_v42  ;;  %v21307_v45 = vld [vmem:[#allocation8 + $0x264] ss:$16 sps:$4 sm:$0xff]  }
 0x3da   : > { %v5093_v0 = vpack.c.bf16 %v19392_v31, %v19390_v8  ;;  %v22508_v30 = vpack.c.bf16 %v19408_v3, %v19406_v44  ;;  %v21308_v44 = vld [vmem:[#allocation8 + $0x268] ss:$16 sps:$4 sm:$0xff]  }
 0x3db   : > { %v5094_v12 = vpack.c.bf16 %v19393_v61, %v19391_v35  ;;  %v22510_v53 = vpack.c.bf16 %v19409_v15, %v19407_v23  ;;  %5971 = vmatpush1.bf16.msra.mxu0 %v21293_v36  ;;  %6117 = vmatpush1.bf16.msra.mxu1 %v21296_v52  ;;  %v21305_v52 = vld [vmem:[#allocation8 + $0x260] ss:$16 sps:$4 sm:$0xff]   ;;  %v21313_v23 = vld [vmem:[#allocation8 + $0x284] ss:$16 sps:$4 sm:$0xff]  }
 0x3dc   : > { %5972 = vmatprep.subr.bf16.mxu0 %v21301_v1  ;;  %6118 = vmatprep.subr.bf16.mxu1 %v21304_v25 }
 0x3dd   : > { %v4486_v37 = vpop.f32.mrb[8].mxu0  ;;  %v5070_v6 = vpop.f32.mrb[8].mxu1  ;;  %5937 = vmatprep.mubr.bf16.mxu0 %v5094_v12  ;;  %6083 = vmatprep.mubr.bf16.mxu1 %v5094_v12 }
 0x3de   : > { %v4488_v60 = vpop.f32.mrb[9].mxu0  ;;  %v5072_v46 = vpop.f32.mrb[9].mxu1  ;;  %5938 = vmatmul.mubr.bf16.gmra.mrb[20].mxu0 %v5093_v0  ;;  %6084 = vmatmul.mubr.bf16.gmra.mrb[20].mxu1 %v5093_v0  ;;  %v19394_v8 = vadd.f32 %v4486_v37, %v22477_v40  ;;  %v19410_v31 = vadd.f32 %v5070_v6, %v22480_v24  ;;  %v21316_v0 = vld [vmem:[#allocation8 + $0x28c] ss:$16 sps:$4 sm:$0xff]  }
 0x3df   : > { %5973 = vmatpush1.bf16.msra.mxu0 %v21299_v59  ;;  %6119 = vmatpush1.bf16.msra.mxu1 %v21302_v20  ;;  %v4490_v15 = vpop.f32.mrb[10].mxu0  ;;  %v5074_v36 = vpop.f32.mrb[10].mxu1  ;;  %v19395_v37 = vadd.f32 %v4488_v60, %v22483_v54  ;;  %v19411_v61 = vadd.f32 %v5072_v46, %v22486_v42  ;;  %v21322_v60 = vld [vmem:[#allocation8 + $0x2ac] ss:$16 sps:$4 sm:$0xff]  }
 0x3e0   : > { %v19396_v3 = vadd.f32 %v4490_v15, %v22477_v40  ;;  %v19412_v1 = vadd.f32 %v5074_v36, %v22480_v24  ;;  %v4492_v25 = vpop.f32.mrb[11].mxu0  ;;  %v5076_v35 = vpop.f32.mrb[11].mxu1  ;;  %5974 = vmatprep.subr.bf16.mxu0 %v21307_v45  ;;  %6120 = vmatprep.subr.bf16.mxu1 %v21310_v13  ;;  %v21311_v45 = vld [vmem:[#allocation8 + $0x280] ss:$16 sps:$4 sm:$0xff]   ;;  %v21314_v13 = vld [vmem:[#allocation8 + $0x288] ss:$16 sps:$4 sm:$0xff]  }
 0x3e1   : > { %v19397_v12 = vadd.f32 %v4492_v25, %v22483_v54  ;;  %v19413_v59 = vadd.f32 %v5076_v35, %v22486_v42  ;;  %v21319_v36 = vld [vmem:[#allocation8 + $0x2a4] ss:$16 sps:$4 sm:$0xff]  }
 0x3e2   : > { %v5097_v20 = vpack.c.bf16 %v19396_v3, %v19394_v8  ;;  %v22520_v6 = vpack.c.bf16 %v19412_v1, %v19410_v31  ;;  %v21317_v31 = vld [vmem:[#allocation8 + $0x2a0] ss:$16 sps:$4 sm:$0xff]   ;;  %v21320_v3 = vld [vmem:[#allocation8 + $0x2a8] ss:$16 sps:$4 sm:$0xff]  }
 0x3e3   : > { %v5098_v15 = vpack.c.bf16 %v19397_v12, %v19395_v37  ;;  %v22522_v26 = vpack.c.bf16 %v19413_v59, %v19411_v61  ;;  %5975 = vmatpush1.bf16.msra.mxu0 %v21305_v52  ;;  %6121 = vmatpush1.bf16.msra.mxu1 %v21308_v44  ;;  %v21325_v12 = vld [vmem:[#allocation8 + $0x2c4] ss:$16 sps:$4 sm:$0xff]   ;;  %v21328_v59 = vld [vmem:[#allocation8 + $0x2cc] ss:$16 sps:$4 sm:$0xff]  }
 0x3e4   : > { %5976 = vmatprep.subr.bf16.mxu0 %v21313_v23  ;;  %6122 = vmatprep.subr.bf16.mxu1 %v21316_v0 }
 0x3e5   : > { %v4496_v17 = vpop.f32.mrb[12].mxu0  ;;  %v5080_v46 = vpop.f32.mrb[12].mxu1  ;;  %5947 = vmatprep.mubr.bf16.mxu0 %v5098_v15  ;;  %6093 = vmatprep.mubr.bf16.mxu1 %v5098_v15 }
 0x3e6   : > { %v4498_v25 = vpop.f32.mrb[13].mxu0  ;;  %v5082_v35 = vpop.f32.mrb[13].mxu1  ;;  %5948 = vmatmul.mubr.bf16.gmra.mrb[24].mxu0 %v5097_v20  ;;  %6094 = vmatmul.mubr.bf16.gmra.mrb[24].mxu1 %v5097_v20  ;;  %v19398_v8 = vadd.f32 %v4496_v17, %v22477_v40  ;;  %v19414_v1 = vadd.f32 %v5080_v46, %v22480_v24 }
 0x3e7   : > { %5977 = vmatpush1.bf16.msra.mxu0 %v21311_v45  ;;  %6123 = vmatpush1.bf16.msra.mxu1 %v21314_v13  ;;  %v4500_v52 = vpop.f32.mrb[14].mxu0  ;;  %v5084_v44 = vpop.f32.mrb[14].mxu1  ;;  %v19399_v17 = vadd.f32 %v4498_v25, %v22483_v54  ;;  %v19415_v20 = vadd.f32 %v5082_v35, %v22486_v42  ;;  %v21334_v25 = vld [vmem:[#allocation8 + $0x2ec] ss:$16 sps:$4 sm:$0xff]   ;;  %v21337_v35 = vld [vmem:[#allocation8 + $0x304] ss:$16 sps:$4 sm:$0xff]  }
 0x3e8   : > { %v19400_v23 = vadd.f32 %v4500_v52, %v22477_v40  ;;  %v19416_v0 = vadd.f32 %v5084_v44, %v22480_v24  ;;  %v4502_v37 = vpop.f32.mrb[15].mxu0  ;;  %v5086_v61 = vpop.f32.mrb[15].mxu1  ;;  %5978 = vmatprep.subr.bf16.mxu0 %v21319_v36  ;;  %6124 = vmatprep.subr.bf16.mxu1 %v21322_v60  ;;  %v21323_v24 = vld [vmem:[#allocation8 + $0x2c0] ss:$16 sps:$4 sm:$0xff]   ;;  %v21326_v36 = vld [vmem:[#allocation8 + $0x2c8] ss:$16 sps:$4 sm:$0xff]  }
 0x3e9   : > { %v19401_v15 = vadd.f32 %v4502_v37, %v22483_v54  ;;  %v19417_v45 = vadd.f32 %v5086_v61, %v22486_v42  ;;  %v21331_v60 = vld [vmem:[#allocation8 + $0x2e4] ss:$16 sps:$4 sm:$0xff]   ;;  %v21329_v54 = vld [vmem:[#allocation8 + $0x2e0] ss:$16 sps:$4 sm:$0xff]   ;;  %v21332_v42 = vld [vmem:[#allocation8 + $0x2e8] ss:$16 sps:$4 sm:$0xff]  }
 0x3ea   : > { %v5101_v13 = vpack.c.bf16 %v19400_v23, %v19398_v8  ;;  %v22532_v46 = vpack.c.bf16 %v19416_v0, %v19414_v1  ;;  %v21340_v8 = vld [vmem:[#allocation8 + $0x30c] ss:$16 sps:$4 sm:$0xff]   ;;  %v21335_v44 = vld [vmem:[#allocation8 + $0x300] ss:$16 sps:$4 sm:$0xff]   ;;  %v21344_v0 = vld [vmem:[#allocation8 + $0x328] ss:$16 sps:$4 sm:$0xff]  }
 0x3eb   : > { %v5102_v40 = vpack.c.bf16 %v19401_v15, %v19399_v17  ;;  %v22534_v52 = vpack.c.bf16 %v19417_v45, %v19415_v20  ;;  %5979 = vmatpush1.bf16.msra.mxu0 %v21317_v31  ;;  %6125 = vmatpush1.bf16.msra.mxu1 %v21320_v3  ;;  %v21338_v31 = vld [vmem:[#allocation8 + $0x308] ss:$16 sps:$4 sm:$0xff]   ;;  %v21343_v3 = vld [vmem:[#allocation8 + $0x324] ss:$16 sps:$4 sm:$0xff]   ;;  %v21346_v1 = vld [vmem:[#allocation8 + $0x32c] ss:$16 sps:$4 sm:$0xff]  }
 0x3ec   : > { %5980 = vmatprep.subr.bf16.mxu0 %v21325_v12  ;;  %6126 = vmatprep.subr.bf16.mxu1 %v21328_v59  ;;  %v21341_v23 = vld [vmem:[#allocation8 + $0x320] ss:$16 sps:$4 sm:$0xff]   ;;  %v21349_v37 = vld [vmem:[#allocation8 + $0x344] ss:$16 sps:$4 sm:$0xff]   ;;  %v21350_v12 = vld [vmem:[#allocation8 + $0x348] ss:$16 sps:$4 sm:$0xff]  }
 0x3ed   : > { %5957 = vmatprep.mubr.bf16.mxu0 %v5102_v40  ;;  %6103 = vmatprep.mubr.bf16.mxu1 %v5102_v40  ;;  %v21347_v61 = vld [vmem:[#allocation8 + $0x340] ss:$16 sps:$4 sm:$0xff]   ;;  %v21355_v59 = vld [vmem:[#allocation8 + $0x364] ss:$16 sps:$4 sm:$0xff]   ;;  %v21358_v17 = vld [vmem:[#allocation8 + $0x36c] ss:$16 sps:$4 sm:$0xff]  }
 0x3ee   : > { %5958 = vmatmul.mubr.bf16.gmra.mrb[28].mxu0 %v5101_v13  ;;  %6104 = vmatmul.mubr.bf16.gmra.mrb[28].mxu1 %v5101_v13  ;;  %v21353_v20 = vld [vmem:[#allocation8 + $0x360] ss:$16 sps:$4 sm:$0xff]   ;;  %v21356_v15 = vld [vmem:[#allocation8 + $0x368] ss:$16 sps:$4 sm:$0xff]   ;;  %v21361_v45 = vld [vmem:[#allocation8 + $0x384] ss:$16 sps:$4 sm:$0xff]  }
 0x3ef   : > { %5981 = vmatpush1.bf16.msra.mxu0 %v21323_v24  ;;  %6127 = vmatpush1.bf16.msra.mxu1 %v21326_v36  ;;  %v21364_v13 = vld [vmem:[#allocation8 + $0x38c] ss:$16 sps:$4 sm:$0xff]   ;;  %v21359_v40 = vld [vmem:[#allocation8 + $0x380] ss:$16 sps:$4 sm:$0xff]   ;;  %v21362_v24 = vld [vmem:[#allocation8 + $0x388] ss:$16 sps:$4 sm:$0xff]  }
 0x3f0   : > { %6000 = vmatprep.mubr.bf16.mxu0 %v22498_v51  ;;  %6146 = vmatprep.mubr.bf16.mxu1 %v22498_v51  ;;  %v21352_v51 = vld [vmem:[#allocation8 + $0x34c] ss:$16 sps:$4 sm:$0xff]   ;;  %v21367_v36 = vld [vmem:[#allocation8 + $0x3a4] ss:$16 sps:$4 sm:$0xff]  }
 0x3f1   : > { %5982 = vmatprep.subr.bf16.mxu0 %v21331_v60  ;;  %6128 = vmatprep.subr.bf16.mxu1 %v21334_v25  ;;  %v21370_v60 = vld [vmem:[#allocation8 + $0x3ac] ss:$16 sps:$4 sm:$0xff]   ;;  %v21365_v25 = vld [vmem:[#allocation8 + $0x3a0] ss:$16 sps:$4 sm:$0xff]  }
 0x3f3   : > { %5983 = vmatpush1.bf16.msra.mxu0 %v21329_v54  ;;  %6129 = vmatpush1.bf16.msra.mxu1 %v21332_v42  ;;  %v21368_v54 = vld [vmem:[#allocation8 + $0x3a8] ss:$16 sps:$4 sm:$0xff]   ;;  %v21373_v42 = vld [vmem:[#allocation8 + $0x3c4] ss:$16 sps:$4 sm:$0xff]  }
 0x3f4   : > { %5984 = vmatprep.subr.bf16.mxu0 %v21337_v35  ;;  %6130 = vmatprep.subr.bf16.mxu1 %v21340_v8  ;;  %v21376_v35 = vld [vmem:[#allocation8 + $0x3cc] ss:$16 sps:$4 sm:$0xff]   ;;  %v21371_v8 = vld [vmem:[#allocation8 + $0x3c0] ss:$16 sps:$4 sm:$0xff]  }
 0x3f7   : > { %5985 = vmatpush1.bf16.msra.mxu0 %v21335_v44  ;;  %6131 = vmatpush1.bf16.msra.mxu1 %v21338_v31  ;;  %v21374_v44 = vld [vmem:[#allocation8 + $0x3c8] ss:$16 sps:$4 sm:$0xff]   ;;  %v21379_v31 = vld [vmem:[#allocation8 + $0x3e4] ss:$16 sps:$4 sm:$0xff]  }
 0x3f8   : > { %5986 = vmatprep.subr.bf16.mxu0 %v21343_v3  ;;  %6132 = vmatprep.subr.bf16.mxu1 %v21346_v1  ;;  %v21382_v3 = vld [vmem:[#allocation8 + $0x3ec] ss:$16 sps:$4 sm:$0xff]   ;;  %v6203_v1 = vld [vmem:[#allocation11] sm:$0xff] }
 0x3fb   : > { %5987 = vmatpush1.bf16.msra.mxu0 %v21341_v23  ;;  %6133 = vmatpush1.bf16.msra.mxu1 %v21344_v0  ;;  %v6207_v23 = vld [vmem:[#allocation11 + $0x20] sm:$0xff]  ;;  %v6204_v0 = vld [vmem:[#allocation11 + $0x8] sm:$0xff] }
 0x3fc   : > { %5988 = vmatprep.subr.bf16.mxu0 %v21349_v37  ;;  %6134 = vmatprep.subr.bf16.mxu1 %v21352_v51  ;;  %v6208_v37 = vld [vmem:[#allocation11 + $0x28] sm:$0xff] }
 0x3fd   : > { %v21377_v51 = vld [vmem:[#allocation8 + $0x3e0] ss:$16 sps:$4 sm:$0xff]  }
 0x3ff   : > { %5989 = vmatpush1.bf16.msra.mxu0 %v21347_v61  ;;  %6135 = vmatpush1.bf16.msra.mxu1 %v21350_v12  ;;  %v21380_v61 = vld [vmem:[#allocation8 + $0x3e8] ss:$16 sps:$4 sm:$0xff]   ;;  %v18100_v12 = vcombine.high %v6203_v1, %v6207_v23 }
 0x400   : > { %5990 = vmatprep.subr.bf16.mxu0 %v21355_v59  ;;  %6136 = vmatprep.subr.bf16.mxu1 %v21358_v17  ;;  %v18102_v59 = vcombine.high %v6204_v0, %v6208_v37  ;;  %v6211_v17 = vld [vmem:[#allocation11 + $0x40] sm:$0xff] }
 0x403   : > { %5991 = vmatpush1.bf16.msra.mxu0 %v21353_v20  ;;  %6137 = vmatpush1.bf16.msra.mxu1 %v21356_v15  ;;  %v6215_v20 = vld [vmem:[#allocation11 + $0x60] sm:$0xff]  ;;  %v6212_v15 = vld [vmem:[#allocation11 + $0x48] sm:$0xff] }
 0x404   : > { %5992 = vmatprep.subr.bf16.mxu0 %v21361_v45  ;;  %6138 = vmatprep.subr.bf16.mxu1 %v21364_v13  ;;  %v6216_v45 = vld [vmem:[#allocation11 + $0x68] sm:$0xff]  ;;  %v18099_v13 = vcombine.low %v6203_v1, %v6207_v23  ;;  %v6231_v1 = vld [vmem:[#allocation11 + $0xe0] sm:$0xff] }
 0x405   : > { %v6228_v23 = vld [vmem:[#allocation11 + $0xc8] sm:$0xff] }
 0x407   : > { %5993 = vmatpush1.bf16.msra.mxu0 %v21359_v40  ;;  %6139 = vmatpush1.bf16.msra.mxu1 %v21362_v24  ;;  %v18101_v40 = vcombine.low %v6204_v0, %v6208_v37  ;;  %v18108_v24 = vcombine.high %v6211_v17, %v6215_v20  ;;  %v6232_v0 = vld [vmem:[#allocation11 + $0xe8] sm:$0xff] }
 0x408   : > { %5994 = vmatprep.subr.bf16.mxu0 %v21367_v36  ;;  %6140 = vmatprep.subr.bf16.mxu1 %v21370_v60  ;;  %v18110_v36 = vcombine.high %v6212_v15, %v6216_v45  ;;  %v6219_v60 = vld [vmem:[#allocation11 + $0x80] sm:$0xff] }
 0x40b   : > { %5995 = vmatpush1.bf16.msra.mxu0 %v21365_v25  ;;  %6141 = vmatpush1.bf16.msra.mxu1 %v21368_v54  ;;  %v6223_v25 = vld [vmem:[#allocation11 + $0xa0] sm:$0xff]  ;;  %v6220_v54 = vld [vmem:[#allocation11 + $0x88] sm:$0xff] }
 0x40c   : > { %5996 = vmatprep.subr.bf16.mxu0 %v21373_v42  ;;  %6142 = vmatprep.subr.bf16.mxu1 %v21376_v35  ;;  %v6224_v42 = vld [vmem:[#allocation11 + $0xa8] sm:$0xff]  ;;  %v18107_v35 = vcombine.low %v6211_v17, %v6215_v20 }
 0x40d   : > { %v18117_v37 = vcombine.low %v6220_v54, %v6224_v42  ;;  %v6240_v17 = vld [vmem:[#allocation11 + $0x128] sm:$0xff] }
 0x40f   : > { %5997 = vmatpush1.bf16.msra.mxu0 %v21371_v8  ;;  %6143 = vmatpush1.bf16.msra.mxu1 %v21374_v44  ;;  %v18109_v8 = vcombine.low %v6212_v15, %v6216_v45  ;;  %v18116_v44 = vcombine.high %v6219_v60, %v6223_v25  ;;  %v18125_v15 = vcombine.low %v6228_v23, %v6232_v0 }
 0x410   : > { %5998 = vmatprep.subr.bf16.mxu0 %v21379_v31  ;;  %6144 = vmatprep.subr.bf16.mxu1 %v21382_v3  ;;  %v18118_v31 = vcombine.high %v6220_v54, %v6224_v42  ;;  %v6227_v3 = vld [vmem:[#allocation11 + $0xc0] sm:$0xff] }
 0x411   : > { %v18123_v20 = vcombine.low %v6227_v3, %v6231_v1  ;;  %v6251_v42 = vld [vmem:[#allocation11 + $0x180] sm:$0xff] }
 0x413   : > { %5999 = vmatpush1.bf16.msra.mxu0 %v21377_v51  ;;  %6145 = vmatpush1.bf16.msra.mxu1 %v21380_v61  ;;  %v18124_v51 = vcombine.high %v6227_v3, %v6231_v1  ;;  %v6235_v61 = vld [vmem:[#allocation11 + $0x100] sm:$0xff] }
 0x414   : > { %7781 = vmatprep.subr.bf16.mxu0 %v18100_v12  ;;  %7927 = vmatprep.subr.bf16.mxu1 %v18102_v59  ;;  %v6239_v12 = vld [vmem:[#allocation11 + $0x120] sm:$0xff]  ;;  %v6236_v59 = vld [vmem:[#allocation11 + $0x108] sm:$0xff] }
 0x415   : > { %v18132_v45 = vcombine.high %v6235_v61, %v6239_v12 }
 0x416   : > { %6001 = vmatmul.mubr.bf16.vlgmr.msra.gmra.mrb[16].mxu0 %v22496_v16  ;;  %6147 = vmatmul.mubr.bf16.vlgmr.msra.gmra.mrb[16].mxu1 %v22496_v16  ;;  %v18115_v16 = vcombine.low %v6219_v60, %v6223_v25  ;;  %v6248_v60 = vld [vmem:[#allocation11 + $0x168] sm:$0xff]  ;;  %v18133_v25 = vcombine.low %v6236_v59, %v6240_v17 }
 0x417   : > { %6010 = vmatprep.mubr.bf16.mxu0 %v22510_v53  ;;  %6156 = vmatprep.mubr.bf16.mxu1 %v22510_v53  ;;  %v18126_v53 = vcombine.high %v6228_v23, %v6232_v0  ;;  %v6259_v0 = vld [vmem:[#allocation11 + $0x1c0] sm:$0xff] }
 0x418   : > { %7782 = vmatpush1.bf16.msra.mxu0 %v18099_v13  ;;  %7928 = vmatpush1.bf16.msra.mxu1 %v18101_v40  ;;  %v18134_v13 = vcombine.high %v6236_v59, %v6240_v17  ;;  %v6243_v40 = vld [vmem:[#allocation11 + $0x140] sm:$0xff]  ;;  %v6268_v17 = vld [vmem:[#allocation11 + $0x208] sm:$0xff] }
 0x419   : > { %7783 = vmatprep.subr.bf16.mxu0 %v18108_v24  ;;  %7929 = vmatprep.subr.bf16.mxu1 %v18110_v36  ;;  %v6247_v24 = vld [vmem:[#allocation11 + $0x160] sm:$0xff]  ;;  %v6244_v36 = vld [vmem:[#allocation11 + $0x148] sm:$0xff] }
 0x41a   : > { %v18140_v54 = vcombine.high %v6243_v40, %v6247_v24  ;;  %v18141_v3 = vcombine.low %v6244_v36, %v6248_v60  ;;  %v6271_v59 = vld [vmem:[#allocation11 + $0x220] sm:$0xff] }
 0x41c   : > { %7784 = vmatpush1.bf16.msra.mxu0 %v18107_v35  ;;  %7930 = vmatpush1.bf16.msra.mxu1 %v18109_v8  ;;  %v6255_v35 = vld [vmem:[#allocation11 + $0x1a0] sm:$0xff]  ;;  %v6252_v8 = vld [vmem:[#allocation11 + $0x188] sm:$0xff] }
 0x41d   : > { %7785 = vmatprep.subr.bf16.mxu0 %v18116_v44  ;;  %7931 = vmatprep.subr.bf16.mxu1 %v18118_v31  ;;  %v6256_v44 = vld [vmem:[#allocation11 + $0x1a8] sm:$0xff]  ;;  %v18139_v31 = vcombine.low %v6243_v40, %v6247_v24  ;;  %v18148_v1 = vcombine.high %v6251_v42, %v6255_v35  ;;  %v6275_v24 = vld [vmem:[#allocation11 + $0x240] sm:$0xff] }
 0x41e   : > { %6011 = vmatmul.mubr.bf16.gmra.mrb[20].mxu0 %v22508_v30  ;;  %6157 = vmatmul.mubr.bf16.gmra.mrb[20].mxu1 %v22508_v30  ;;  %v18131_v30 = vcombine.low %v6235_v61, %v6239_v12  ;;  %v18150_v23 = vcombine.high %v6252_v8, %v6256_v44  ;;  %v6267_v12 = vld [vmem:[#allocation11 + $0x200] sm:$0xff] }
 0x41f   : > { %6020 = vmatprep.mubr.bf16.mxu0 %v22522_v26  ;;  %6166 = vmatprep.mubr.bf16.mxu1 %v22522_v26  ;;  %v18142_v26 = vcombine.high %v6244_v36, %v6248_v60  ;;  %v6279_v36 = vld [vmem:[#allocation11 + $0x260] sm:$0xff]  ;;  %v6276_v60 = vld [vmem:[#allocation11 + $0x248] sm:$0xff] }
 0x420   : > { %7786 = vmatpush1.bf16.msra.mxu0 %v18115_v16  ;;  %7932 = vmatpush1.bf16.msra.mxu1 %v18117_v37  ;;  %v6263_v16 = vld [vmem:[#allocation11 + $0x1e0] sm:$0xff]  ;;  %v6260_v37 = vld [vmem:[#allocation11 + $0x1c8] sm:$0xff] }
 0x421   : > { %7787 = vmatprep.subr.bf16.mxu0 %v18124_v51  ;;  %7933 = vmatprep.subr.bf16.mxu1 %v18126_v53  ;;  %v6264_v51 = vld [vmem:[#allocation11 + $0x1e8] sm:$0xff]  ;;  %v18149_v53 = vcombine.low %v6252_v8, %v6256_v44  ;;  %v18156_v61 = vcombine.high %v6259_v0, %v6263_v16 }
 0x422   : > { %v6284_v8 = vld [vmem:[#allocation11 + $0x288] sm:$0xff] }
 0x423   : > { %v6288_v44 = vld [vmem:[#allocation11 + $0x2a8] sm:$0xff] }
 0x424   : > { %7788 = vmatpush1.bf16.msra.mxu0 %v18123_v20  ;;  %7934 = vmatpush1.bf16.msra.mxu1 %v18125_v15  ;;  %v6272_v20 = vld [vmem:[#allocation11 + $0x228] sm:$0xff]  ;;  %v18155_v15 = vcombine.low %v6259_v0, %v6263_v16  ;;  %v6291_v0 = vld [vmem:[#allocation11 + $0x2c0] sm:$0xff] }
 0x425   : > { %7789 = vmatprep.subr.bf16.mxu0 %v18132_v45  ;;  %7935 = vmatprep.subr.bf16.mxu1 %v18134_v13  ;;  %v18157_v45 = vcombine.low %v6260_v37, %v6264_v51  ;;  %v18164_v13 = vcombine.high %v6267_v12, %v6271_v59  ;;  %v18166_v40 = vcombine.high %v6268_v17, %v6272_v20  ;;  %v6295_v16 = vld [vmem:[#allocation11 + $0x2e0] sm:$0xff] }
 0x426   : > { %6021 = vmatmul.mubr.bf16.gmra.mrb[24].mxu0 %v22520_v6  ;;  %6167 = vmatmul.mubr.bf16.gmra.mrb[24].mxu1 %v22520_v6  ;;  %v18147_v6 = vcombine.low %v6251_v42, %v6255_v35  ;;  %v6283_v42 = vld [vmem:[#allocation11 + $0x280] sm:$0xff] }
 0x427   : > { %6030 = vmatprep.mubr.bf16.mxu0 %v22534_v52  ;;  %6176 = vmatprep.mubr.bf16.mxu1 %v22534_v52  ;;  %v18158_v52 = vcombine.high %v6260_v37, %v6264_v51  ;;  %v6287_v35 = vld [vmem:[#allocation11 + $0x2a0] sm:$0xff]  ;;  %v6292_v37 = vld [vmem:[#allocation11 + $0x2c8] sm:$0xff] }
 0x428   : > { %7790 = vmatpush1.bf16.msra.mxu0 %v18131_v30  ;;  %7936 = vmatpush1.bf16.msra.mxu1 %v18133_v25  ;;  %v6280_v30 = vld [vmem:[#allocation11 + $0x268] sm:$0xff]  ;;  %v18163_v25 = vcombine.low %v6267_v12, %v6271_v59  ;;  %v6299_v12 = vld [vmem:[#allocation11 + $0x300] sm:$0xff] }
 0x429   : > { %7791 = vmatprep.subr.bf16.mxu0 %v18140_v54  ;;  %7937 = vmatprep.subr.bf16.mxu1 %v18142_v26  ;;  %v18165_v54 = vcombine.low %v6268_v17, %v6272_v20  ;;  %v18174_v26 = vcombine.high %v6276_v60, %v6280_v30  ;;  %v6296_v51 = vld [vmem:[#allocation11 + $0x2e8] sm:$0xff]  ;;  %v6303_v59 = vld [vmem:[#allocation11 + $0x320] sm:$0xff] }
 0x42a   : > { %v6300_v17 = vld [vmem:[#allocation11 + $0x308] sm:$0xff] }
 0x42b   : > { %v6304_v20 = vld [vmem:[#allocation11 + $0x328] sm:$0xff] }
 0x42c   : > { %7792 = vmatpush1.bf16.msra.mxu0 %v18139_v31  ;;  %7938 = vmatpush1.bf16.msra.mxu1 %v18141_v3  ;;  %v18171_v31 = vcombine.low %v6275_v24, %v6279_v36  ;;  %v18173_v3 = vcombine.low %v6276_v60, %v6280_v30  ;;  %v6308_v60 = vld [vmem:[#allocation11 + $0x348] sm:$0xff] }
 0x42d   : > { %7793 = vmatprep.subr.bf16.mxu0 %v18148_v1  ;;  %7939 = vmatprep.subr.bf16.mxu1 %v18150_v23  ;;  %v18180_v1 = vcombine.high %v6283_v42, %v6287_v35  ;;  %v18182_v23 = vcombine.high %v6284_v8, %v6288_v44  ;;  %v6312_v30 = vld [vmem:[#allocation11 + $0x368] sm:$0xff] }
 0x42e   : > { %6031 = vmatmul.mubr.bf16.gmra.mrb[28].mxu0 %v22532_v46  ;;  %6177 = vmatmul.mubr.bf16.gmra.mrb[28].mxu1 %v22532_v46  ;;  %v18172_v46 = vcombine.high %v6275_v24, %v6279_v36  ;;  %v6307_v24 = vld [vmem:[#allocation11 + $0x340] sm:$0xff] }
 0x42f   : > { %v6311_v36 = vld [vmem:[#allocation11 + $0x360] sm:$0xff] }
 0x430   : > { %7794 = vmatpush1.bf16.msra.mxu0 %v18147_v6  ;;  %7940 = vmatpush1.bf16.msra.mxu1 %v18149_v53  ;;  %v18179_v6 = vcombine.low %v6283_v42, %v6287_v35  ;;  %v18181_v53 = vcombine.low %v6284_v8, %v6288_v44  ;;  %v18203_v42 = vcombine.low %v6307_v24, %v6311_v36  ;;  %v6315_v8 = vld [vmem:[#allocation11 + $0x380] sm:$0xff] }
 0x431   : > { %7795 = vmatprep.subr.bf16.mxu0 %v18156_v61  ;;  %7941 = vmatprep.subr.bf16.mxu1 %v18158_v52  ;;  %v18188_v61 = vcombine.high %v6291_v0, %v6295_v16  ;;  %v18190_v52 = vcombine.high %v6292_v37, %v6296_v51  ;;  %v18205_v35 = vcombine.low %v6308_v60, %v6312_v30  ;;  %v6319_v44 = vld [vmem:[#allocation11 + $0x3a0] sm:$0xff] }
 0x434   : > { %7796 = vmatpush1.bf16.msra.mxu0 %v18155_v15  ;;  %7942 = vmatpush1.bf16.msra.mxu1 %v18157_v45  ;;  %v18187_v15 = vcombine.low %v6291_v0, %v6295_v16  ;;  %v18189_v45 = vcombine.low %v6292_v37, %v6296_v51  ;;  %v6323_v37 = vld [vmem:[#allocation11 + $0x3c0] sm:$0xff] }
 0x435   : > { %7797 = vmatprep.subr.bf16.mxu0 %v18164_v13  ;;  %7943 = vmatprep.subr.bf16.mxu1 %v18166_v40  ;;  %v18196_v13 = vcombine.high %v6299_v12, %v6303_v59  ;;  %v18198_v40 = vcombine.high %v6300_v17, %v6304_v20  ;;  %v6327_v51 = vld [vmem:[#allocation11 + $0x3e0] sm:$0xff] }
 0x438   : > { %7798 = vmatpush1.bf16.msra.mxu0 %v18163_v25  ;;  %7944 = vmatpush1.bf16.msra.mxu1 %v18165_v54  ;;  %v18195_v25 = vcombine.low %v6299_v12, %v6303_v59  ;;  %v18197_v54 = vcombine.low %v6300_v17, %v6304_v20  ;;  %v6331_v17 = vld [vmem:[#allocation11 + $0x400] sm:$0xff] }
 0x439   : > { %7799 = vmatprep.subr.bf16.mxu0 %v18172_v46  ;;  %7945 = vmatprep.subr.bf16.mxu1 %v18174_v26  ;;  %v18204_v46 = vcombine.high %v6307_v24, %v6311_v36  ;;  %v18206_v26 = vcombine.high %v6308_v60, %v6312_v30  ;;  %v6335_v20 = vld [vmem:[#allocation11 + $0x420] sm:$0xff]  ;;  %v5233_v60 = vld [vmem:[#allocation10] sm:$0xf] }
 0x43a   : > { %v22553_v30 = vrot.slane %v5233_v60, %v22465_v55 }
 0x43c   : > { %7800 = vmatpush1.bf16.msra.mxu0 %v18171_v31  ;;  %7946 = vmatpush1.bf16.msra.mxu1 %v18173_v3  ;;  %v6316_v31 = vld [vmem:[#allocation11 + $0x388] sm:$0xff]  ;;  %v18212_v3 = vcombine.high %v6315_v8, %v6319_v44 }
 0x43d   : > { %7801 = vmatprep.subr.bf16.mxu0 %v18180_v1  ;;  %7947 = vmatprep.subr.bf16.mxu1 %v18182_v23  ;;  %v6320_v1 = vld [vmem:[#allocation11 + $0x3a8] sm:$0xff]  ;;  %v18211_v23 = vcombine.low %v6315_v8, %v6319_v44 }
 0x43e   : > { %v18213_v0 = vcombine.low %v6316_v31, %v6320_v1  ;;  %v18214_v16 = vcombine.high %v6316_v31, %v6320_v1 }
 0x440   : > { %7802 = vmatpush1.bf16.msra.mxu0 %v18179_v6  ;;  %7948 = vmatpush1.bf16.msra.mxu1 %v18181_v53  ;;  %v6324_v6 = vld [vmem:[#allocation11 + $0x3c8] sm:$0xff]  ;;  %v18220_v53 = vcombine.high %v6323_v37, %v6327_v51 }
 0x441   : > { %7803 = vmatprep.subr.bf16.mxu0 %v18188_v61  ;;  %7949 = vmatprep.subr.bf16.mxu1 %v18190_v52  ;;  %v6328_v61 = vld [vmem:[#allocation11 + $0x3e8] sm:$0xff]  ;;  %v18219_v52 = vcombine.low %v6323_v37, %v6327_v51  ;;  %v6339_v51 = vld [vmem:[#allocation11 + $0x440] sm:$0xff] }
 0x442   : > { %v18221_v12 = vcombine.low %v6324_v6, %v6328_v61  ;;  %v18222_v59 = vcombine.high %v6324_v6, %v6328_v61 }
 0x444   : > { %7804 = vmatpush1.bf16.msra.mxu0 %v18187_v15  ;;  %7950 = vmatpush1.bf16.msra.mxu1 %v18189_v45  ;;  %v6332_v15 = vld [vmem:[#allocation11 + $0x408] sm:$0xff]  ;;  %v18228_v45 = vcombine.high %v6331_v17, %v6335_v20 }
 0x445   : > { %7805 = vmatprep.subr.bf16.mxu0 %v18196_v13  ;;  %7951 = vmatprep.subr.bf16.mxu1 %v18198_v40  ;;  %v6336_v13 = vld [vmem:[#allocation11 + $0x428] sm:$0xff]  ;;  %v18227_v40 = vcombine.low %v6331_v17, %v6335_v20 }
 0x446   : > { %v18229_v24 = vcombine.low %v6332_v15, %v6336_v13  ;;  %v18230_v36 = vcombine.high %v6332_v15, %v6336_v13  ;;  %v6344_v17 = vld [vmem:[#allocation11 + $0x468] sm:$0xff] }
 0x448   : > { %7806 = vmatpush1.bf16.msra.mxu0 %v18195_v25  ;;  %7952 = vmatpush1.bf16.msra.mxu1 %v18197_v54  ;;  %v22556_v25 = vrot.slane %v5233_v60, %v22468_v21 }
 0x449   : > { %7807 = vmatprep.subr.bf16.mxu0 %v18204_v46  ;;  %7953 = vmatprep.subr.bf16.mxu1 %v18206_v26  ;;  %v22559_v26 = vrot.slane %v5233_v60, %v22471_v7 }
 0x44c   : > { %7808 = vmatpush1.bf16.msra.mxu0 %v18203_v42  ;;  %7954 = vmatpush1.bf16.msra.mxu1 %v18205_v35  ;;  %v22562_v42 = vrot.slane %v5233_v60, %v22474_v33 }
 0x44d   : > { %7809 = vmatprep.subr.bf16.mxu0 %v18212_v3  ;;  %7955 = vmatprep.subr.bf16.mxu1 %v18214_v16 }
 0x450   : > { %7810 = vmatpush1.bf16.msra.mxu0 %v18211_v23  ;;  %7956 = vmatpush1.bf16.msra.mxu1 %v18213_v0 }
 0x451   : > { %7811 = vmatprep.subr.bf16.mxu0 %v18220_v53  ;;  %7957 = vmatprep.subr.bf16.mxu1 %v18222_v59  ;;  %v6340_v59 = vld [vmem:[#allocation11 + $0x448] sm:$0xff] }
 0x454   : > { %7812 = vmatpush1.bf16.msra.mxu0 %v18219_v52  ;;  %7958 = vmatpush1.bf16.msra.mxu1 %v18221_v12  ;;  %v6343_v12 = vld [vmem:[#allocation11 + $0x460] sm:$0xff] }
 0x455   : > { %7854 = vmatprep.subr.bf16.mxu0 %v18228_v45  ;;  %8000 = vmatprep.subr.bf16.mxu1 %v18230_v36  ;;  %v22580_v36 = vld [vmem:[#allocation11 + $0x480] sm:$0xff]  ;;  %v18236_v60 = vcombine.high %v6339_v51, %v6343_v12 }
 0x4e9   : > { %v6002_v54 = vpop.f32.mrb[16].mxu0  ;;  %v6148_v46 = vpop.f32.mrb[16].mxu1 }
 0x4ea   : > { %v6004_v35 = vpop.f32.mrb[17].mxu0  ;;  %v6150_v8 = vpop.f32.mrb[17].mxu1  ;;  %v19418_v3 = vadd.f32 %v6002_v54, %v22553_v30  ;;  %v19434_v1 = vadd.f32 %v6148_v46, %v22556_v25  ;;  %v18238_v54 = vcombine.high %v6340_v59, %v6344_v17  ;;  %v6351_v46 = vld [vmem:[#allocation11 + $0x4a0] sm:$0xff] }
 0x4eb   : > { %v6006_v44 = vpop.f32.mrb[18].mxu0  ;;  %v6152_v31 = vpop.f32.mrb[18].mxu1  ;;  %v19419_v6 = vadd.f32 %v6004_v35, %v22559_v26  ;;  %v19435_v53 = vadd.f32 %v6150_v8, %v22562_v42  ;;  %v6348_v35 = vld [vmem:[#allocation11 + $0x488] sm:$0xff] }
 0x4ec   : > { %v19420_v23 = vadd.f32 %v6006_v44, %v22553_v30  ;;  %v19436_v0 = vadd.f32 %v6152_v31, %v22556_v25  ;;  %v6008_v16 = vpop.f32.mrb[19].mxu0  ;;  %v6154_v37 = vpop.f32.mrb[19].mxu1  ;;  %v6352_v8 = vld [vmem:[#allocation11 + $0x4a8] sm:$0xff] }
 0x4ed   : > { %v19421_v61 = vadd.f32 %v6008_v16, %v22559_v26  ;;  %v19437_v52 = vadd.f32 %v6154_v37, %v22562_v42 }
 0x4ee   : > { %v22572_v20 = vpack.c.bf16 %v19420_v23, %v19418_v3  ;;  %v22574_v15 = vpack.c.bf16 %v19436_v0, %v19434_v1  ;;  %v18235_v23 = vcombine.low %v6339_v51, %v6343_v12  ;;  %v18237_v0 = vcombine.low %v6340_v59, %v6344_v17  ;;  %v6355_v51 = vld [vmem:[#allocation11 + $0x4c0] sm:$0xff] }
 0x4ef   : > { %v22576_v45 = vpack.c.bf16 %v19421_v61, %v19419_v6  ;;  %v22578_v13 = vpack.c.bf16 %v19437_v52, %v19435_v53  ;;  %v18244_v53 = vcombine.high %v22580_v36, %v6351_v46  ;;  %v18246_v61 = vcombine.high %v6348_v35, %v6352_v8  ;;  %v6359_v17 = vld [vmem:[#allocation11 + $0x4e0] sm:$0xff] }
 0x4f1   : > { %v6012_v44 = vpop.f32.mrb[20].mxu0  ;;  %v6158_v31 = vpop.f32.mrb[20].mxu1  ;;  %7813 = vmatprep.mubr.bf16.mxu0 %v22576_v45  ;;  %7959 = vmatprep.mubr.bf16.mxu1 %v22576_v45 }
 0x4f2   : > { %v6014_v3 = vpop.f32.mrb[21].mxu0  ;;  %v6160_v1 = vpop.f32.mrb[21].mxu1  ;;  %7814 = vmatmul.mubr.bf16.vlgmr.msra.gmra.mrb[32].mxu0 %v22572_v20  ;;  %7960 = vmatmul.mubr.bf16.vlgmr.msra.gmra.mrb[32].mxu1 %v22572_v20  ;;  %v19422_v16 = vadd.f32 %v6012_v44, %v22553_v30  ;;  %v19438_v52 = vadd.f32 %v6158_v31, %v22556_v25  ;;  %v6356_v44 = vld [vmem:[#allocation11 + $0x4c8] sm:$0xff] }
 0x4f3   : > { %7855 = vmatpush1.bf16.msra.mxu0 %v18227_v40  ;;  %8001 = vmatpush1.bf16.msra.mxu1 %v18229_v24  ;;  %v6016_v37 = vpop.f32.mrb[22].mxu0  ;;  %v6162_v6 = vpop.f32.mrb[22].mxu1  ;;  %v19423_v12 = vadd.f32 %v6014_v3, %v22559_v26  ;;  %v19439_v40 = vadd.f32 %v6160_v1, %v22562_v42  ;;  %v6360_v31 = vld [vmem:[#allocation11 + $0x4e8] sm:$0xff]  ;;  %v18245_v3 = vcombine.low %v6348_v35, %v6352_v8  ;;  %v22604_v1 = vld [vmem:[#allocation11 + $0x500] sm:$0xff] }
 0x4f4   : > { %v19424_v33 = vadd.f32 %v6016_v37, %v22553_v30  ;;  %v19440_v7 = vadd.f32 %v6162_v6, %v22556_v25  ;;  %v6018_v21 = vpop.f32.mrb[23].mxu0  ;;  %v6164_v55 = vpop.f32.mrb[23].mxu1  ;;  %7856 = vmatprep.subr.bf16.mxu0 %v18236_v60  ;;  %8002 = vmatprep.subr.bf16.mxu1 %v18238_v54  ;;  %v18243_v6 = vcombine.low %v22580_v36, %v6351_v46 }
 0x4f5   : > { %v19425_v24 = vadd.f32 %v6018_v21, %v22559_v26  ;;  %v19441_v59 = vadd.f32 %v6164_v55, %v22562_v42  ;;  %v18252_v55 = vcombine.high %v6355_v51, %v6359_v17  ;;  %v18254_v21 = vcombine.high %v6356_v44, %v6360_v31 }
 0x4f6   : > { %v22595_v10 = vpack.c.bf16 %v19424_v33, %v19422_v16  ;;  %v22597_v37 = vpack.c.bf16 %v19440_v7, %v19438_v52  ;;  %v6364_v33 = vld [vmem:[#allocation11 + $0x508] sm:$0xff]  ;;  %v18251_v35 = vcombine.low %v6355_v51, %v6359_v17  ;;  %v18253_v8 = vcombine.low %v6356_v44, %v6360_v31  ;;  %v6371_v51 = vld [vmem:[#allocation11 + $0x540] sm:$0xff] }
 0x4f7   : > { %v22600_v60 = vpack.c.bf16 %v19425_v24, %v19423_v12  ;;  %v22602_v54 = vpack.c.bf16 %v19441_v59, %v19439_v40  ;;  %7857 = vmatpush1.bf16.msra.mxu0 %v18235_v23  ;;  %8003 = vmatpush1.bf16.msra.mxu1 %v18237_v0  ;;  %v6368_v16 = vld [vmem:[#allocation11 + $0x528] sm:$0xff] }
 0x4f8   : > { %7858 = vmatprep.subr.bf16.mxu0 %v18244_v53  ;;  %8004 = vmatprep.subr.bf16.mxu1 %v18246_v61  ;;  %v18260_v61 = vcombine.high %v22604_v1, %v6367_v2  ;;  %v18262_v12 = vcombine.high %v6364_v33, %v6368_v16 }
 0x4f9   : > { %v6022_v7 = vpop.f32.mrb[24].mxu0  ;;  %v6168_v52 = vpop.f32.mrb[24].mxu1  ;;  %7823 = vmatprep.mubr.bf16.mxu0 %v22600_v60  ;;  %7969 = vmatprep.mubr.bf16.mxu1 %v22600_v60 }
 0x4fa   : > { %v6024_v36 = vpop.f32.mrb[25].mxu0  ;;  %v6170_v46 = vpop.f32.mrb[25].mxu1  ;;  %7824 = vmatmul.mubr.bf16.gmra.mrb[36].mxu0 %v22595_v10  ;;  %7970 = vmatmul.mubr.bf16.gmra.mrb[36].mxu1 %v22595_v10  ;;  %v19426_v23 = vadd.f32 %v6022_v7, %v22553_v30  ;;  %v19442_v40 = vadd.f32 %v6168_v52, %v22556_v25  ;;  %v6372_v7 = vld [vmem:[#allocation11 + $0x548] sm:$0xff] }
 0x4fb   : > { %7859 = vmatpush1.bf16.msra.mxu0 %v18243_v6  ;;  %8005 = vmatpush1.bf16.msra.mxu1 %v18245_v3  ;;  %v6026_v0 = vpop.f32.mrb[26].mxu0  ;;  %v6172_v53 = vpop.f32.mrb[26].mxu1  ;;  %v19427_v17 = vadd.f32 %v6024_v36, %v22559_v26  ;;  %v19443_v44 = vadd.f32 %v6170_v46, %v22562_v42  ;;  %v6375_v3 = vld [vmem:[#allocation11 + $0x560] sm:$0xff]  ;;  %v6376_v52 = vld [vmem:[#allocation11 + $0x568] sm:$0xff]  ;;  %v18261_v36 = vcombine.low %v6364_v33, %v6368_v16 }
 0x4fc   : > { %v19428_v24 = vadd.f32 %v6026_v0, %v22553_v30  ;;  %v19444_v59 = vadd.f32 %v6172_v53, %v22556_v25  ;;  %v6028_v58 = vpop.f32.mrb[27].mxu0  ;;  %v6174_v57 = vpop.f32.mrb[27].mxu1  ;;  %7860 = vmatprep.subr.bf16.mxu0 %v18252_v55  ;;  %8006 = vmatprep.subr.bf16.mxu1 %v18254_v21  ;;  %v18259_v53 = vcombine.low %v22604_v1, %v6367_v2  ;;  %v6379_v46 = vld [vmem:[#allocation11 + $0x580] sm:$0xff] }
 0x4fd   : > { %v19429_v31 = vadd.f32 %v6028_v58, %v22559_v26  ;;  %v19445_v6 = vadd.f32 %v6174_v57, %v22562_v42  ;;  %v18268_v57 = vcombine.high %v6371_v51, %v6375_v3  ;;  %v18270_v58 = vcombine.high %v6372_v7, %v6376_v52 }
 0x4fe   : > { %v22619_v47 = vpack.c.bf16 %v19428_v24, %v19426_v23  ;;  %v22621_v0 = vpack.c.bf16 %v19444_v59, %v19442_v40  ;;  %v6384_v23 = vld [vmem:[#allocation11 + $0x5a8] sm:$0xff]  ;;  %v18267_v33 = vcombine.low %v6371_v51, %v6375_v3  ;;  %v18269_v16 = vcombine.low %v6372_v7, %v6376_v52 }
 0x4ff   : > { %v22624_v55 = vpack.c.bf16 %v19429_v31, %v19427_v17  ;;  %v22626_v21 = vpack.c.bf16 %v19445_v6, %v19443_v44  ;;  %7861 = vmatpush1.bf16.msra.mxu0 %v18251_v35  ;;  %8007 = vmatpush1.bf16.msra.mxu1 %v18253_v8  ;;  %v18278_v59 = vcombine.high %v6380_v32, %v6384_v23 }
 0x500   : > { %7862 = vmatprep.subr.bf16.mxu0 %v18260_v61  ;;  %8008 = vmatprep.subr.bf16.mxu1 %v18262_v12  ;;  %v18276_v12 = vcombine.high %v6379_v46, %v6383_v39 }
 0x501   : > { %v6032_v24 = vpop.f32.mrb[28].mxu0  ;;  %v6178_v40 = vpop.f32.mrb[28].mxu1  ;;  %7833 = vmatprep.mubr.bf16.mxu0 %v22624_v55  ;;  %7979 = vmatprep.mubr.bf16.mxu1 %v22624_v55 }
 0x502   : > { %v6034_v2 = vpop.f32.mrb[29].mxu0  ;;  %v6180_v1 = vpop.f32.mrb[29].mxu1  ;;  %7834 = vmatmul.mubr.bf16.gmra.mrb[40].mxu0 %v22619_v47  ;;  %7980 = vmatmul.mubr.bf16.gmra.mrb[40].mxu1 %v22619_v47  ;;  %v19430_v35 = vadd.f32 %v6032_v24, %v22553_v30  ;;  %v19446_v17 = vadd.f32 %v6178_v40, %v22556_v25  ;;  %v6391_v40 = vld [vmem:[#allocation11 + $0x5e0] sm:$0xff] }
 0x503   : > { %7863 = vmatpush1.bf16.msra.mxu0 %v18259_v53  ;;  %8009 = vmatpush1.bf16.msra.mxu1 %v18261_v36  ;;  %v6036_v8 = vpop.f32.mrb[30].mxu0  ;;  %v6182_v61 = vpop.f32.mrb[30].mxu1  ;;  %v19431_v51 = vadd.f32 %v6034_v2, %v22559_v26  ;;  %v19447_v3 = vadd.f32 %v6180_v1, %v22562_v42  ;;  %v6387_v53 = vld [vmem:[#allocation11 + $0x5c0] sm:$0xff]  ;;  %v6400_v2 = vld [vmem:[#allocation11 + $0x628] sm:$0xff] }
 0x504   : > { %v19432_v44 = vadd.f32 %v6036_v8, %v22553_v30  ;;  %v19448_v31 = vadd.f32 %v6182_v61, %v22556_v25  ;;  %v6038_v6 = vpop.f32.mrb[31].mxu0  ;;  %v6184_v22 = vpop.f32.mrb[31].mxu1  ;;  %7864 = vmatprep.subr.bf16.mxu0 %v18268_v57  ;;  %8010 = vmatprep.subr.bf16.mxu1 %v18270_v58  ;;  %v18275_v30 = vcombine.low %v6379_v46, %v6383_v39  ;;  %v6388_v25 = vld [vmem:[#allocation11 + $0x5c8] sm:$0xff]  ;;  %v6399_v39 = vld [vmem:[#allocation11 + $0x620] sm:$0xff] }
 0x505   : > { %v19433_v7 = vadd.f32 %v6038_v6, %v22559_v26  ;;  %v19449_v52 = vadd.f32 %v6184_v22, %v22562_v42  ;;  %v6392_v8 = vld [vmem:[#allocation11 + $0x5e8] sm:$0xff]  ;;  %v18277_v58 = vcombine.low %v6380_v32, %v6384_v23  ;;  %v6395_v26 = vld [vmem:[#allocation11 + $0x600] sm:$0xff]  ;;  %v18284_v22 = vcombine.high %v6387_v53, %v6391_v40 }
 0x506   : > { %v22640_v36 = vpack.c.bf16 %v19432_v44, %v19430_v35  ;;  %v22642_v24 = vpack.c.bf16 %v19448_v31, %v19446_v17  ;;  %v18286_v42 = vcombine.high %v6388_v25, %v6392_v8  ;;  %v6396_v46 = vld [vmem:[#allocation11 + $0x608] sm:$0xff]  ;;  %v18283_v1 = vcombine.low %v6387_v53, %v6391_v40  ;;  %v6407_v35 = vld [vmem:[#allocation11 + $0x660] sm:$0xff] }
 0x507   : > { %v22644_v61 = vpack.c.bf16 %v19433_v7, %v19431_v51  ;;  %v22646_v57 = vpack.c.bf16 %v19449_v52, %v19447_v3  ;;  %7865 = vmatpush1.bf16.msra.mxu0 %v18267_v33  ;;  %8011 = vmatpush1.bf16.msra.mxu1 %v18269_v16  ;;  %v18285_v32 = vcombine.low %v6388_v25, %v6392_v8  ;;  %v6403_v16 = vld [vmem:[#allocation11 + $0x640] sm:$0xff]  ;;  %v6412_v7 = vld [vmem:[#allocation11 + $0x688] sm:$0xff] }
 0x508   : > { %7866 = vmatprep.subr.bf16.mxu0 %v18276_v12  ;;  %8012 = vmatprep.subr.bf16.mxu1 %v18278_v59  ;;  %v18292_v23 = vcombine.high %v6395_v26, %v6399_v39  ;;  %v18294_v33 = vcombine.high %v6396_v46, %v6400_v2  ;;  %v6404_v12 = vld [vmem:[#allocation11 + $0x648] sm:$0xff]  ;;  %v18291_v17 = vcombine.low %v6395_v26, %v6399_v39  ;;  %v6411_v51 = vld [vmem:[#allocation11 + $0x680] sm:$0xff] }
 0x509   : > { %7843 = vmatprep.mubr.bf16.mxu0 %v22644_v61  ;;  %7989 = vmatprep.mubr.bf16.mxu1 %v22644_v61  ;;  %v6408_v59 = vld [vmem:[#allocation11 + $0x668] sm:$0xff]  ;;  %v18293_v44 = vcombine.low %v6396_v46, %v6400_v2  ;;  %v18300_v31 = vcombine.high %v6403_v16, %v6407_v35  ;;  %v6415_v3 = vld [vmem:[#allocation11 + $0x6a0] sm:$0xff]  ;;  %v18299_v53 = vcombine.low %v6403_v16, %v6407_v35 }
 0x50a   : > { %7844 = vmatmul.mubr.bf16.gmra.mrb[44].mxu0 %v22640_v36  ;;  %7990 = vmatmul.mubr.bf16.gmra.mrb[44].mxu1 %v22640_v36  ;;  %v18302_v6 = vcombine.high %v6404_v12, %v6408_v59  ;;  %v6416_v52 = vld [vmem:[#allocation11 + $0x6a8] sm:$0xff]  ;;  %v18308_v40 = vcombine.high %v6411_v51, %v6415_v3  ;;  %v6419_v8 = vld [vmem:[#allocation11 + $0x6c0] sm:$0xff] }
 0x50b   : > { %7867 = vmatpush1.bf16.msra.mxu0 %v18275_v30  ;;  %8013 = vmatpush1.bf16.msra.mxu1 %v18277_v58  ;;  %v18301_v30 = vcombine.low %v6404_v12, %v6408_v59  ;;  %v18310_v25 = vcombine.high %v6412_v7, %v6416_v52  ;;  %v6423_v58 = vld [vmem:[#allocation11 + $0x6e0] sm:$0xff]  ;;  %v6420_v26 = vld [vmem:[#allocation11 + $0x6c8] sm:$0xff]  ;;  %v18309_v39 = vcombine.low %v6412_v7, %v6416_v52 }
 0x50c   : > { %7886 = vmatprep.mubr.bf16.mxu0 %v22578_v13  ;;  %8032 = vmatprep.mubr.bf16.mxu1 %v22578_v13  ;;  %v18316_v46 = vcombine.high %v6419_v8, %v6423_v58  ;;  %v18315_v16 = vcombine.low %v6419_v8, %v6423_v58 }
 0x50d   : > { %7868 = vmatprep.subr.bf16.mxu0 %v18284_v22  ;;  %8014 = vmatprep.subr.bf16.mxu1 %v18286_v42  ;;  %v6424_v22 = vld [vmem:[#allocation11 + $0x6e8] sm:$0xff]  ;;  %v18307_v42 = vcombine.low %v6411_v51, %v6415_v3 }
 0x50e   : > { %v18318_v2 = vcombine.high %v6420_v26, %v6424_v22  ;;  %v18317_v35 = vcombine.low %v6420_v26, %v6424_v22 }
 0x50f   : > { %7869 = vmatpush1.bf16.msra.mxu0 %v18283_v1  ;;  %8015 = vmatpush1.bf16.msra.mxu1 %v18285_v32  ;;  %v6427_v1 = vld [vmem:[#allocation11 + $0x700] sm:$0xff] }
 0x510   : > { %7870 = vmatprep.subr.bf16.mxu0 %v18292_v23  ;;  %8016 = vmatprep.subr.bf16.mxu1 %v18294_v33  ;;  %v6431_v32 = vld [vmem:[#allocation11 + $0x720] sm:$0xff]  ;;  %v6428_v23 = vld [vmem:[#allocation11 + $0x708] sm:$0xff] }
 0x511   : > { %v6432_v33 = vld [vmem:[#allocation11 + $0x728] sm:$0xff]  ;;  %v18324_v12 = vcombine.high %v6427_v1, %v6431_v32  ;;  %v18323_v51 = vcombine.low %v6427_v1, %v6431_v32 }
 0x512   : > { %v18326_v59 = vcombine.high %v6428_v23, %v6432_v33  ;;  %v18325_v3 = vcombine.low %v6428_v23, %v6432_v33 }
 0x513   : > { %7871 = vmatpush1.bf16.msra.mxu0 %v18291_v17  ;;  %8017 = vmatpush1.bf16.msra.mxu1 %v18293_v44  ;;  %v6435_v17 = vld [vmem:[#allocation11 + $0x740] sm:$0xff] }
 0x514   : > { %7872 = vmatprep.subr.bf16.mxu0 %v18300_v31  ;;  %8018 = vmatprep.subr.bf16.mxu1 %v18302_v6  ;;  %v6439_v44 = vld [vmem:[#allocation11 + $0x760] sm:$0xff]  ;;  %v6436_v31 = vld [vmem:[#allocation11 + $0x748] sm:$0xff] }
 0x515   : > { %v6440_v6 = vld [vmem:[#allocation11 + $0x768] sm:$0xff]  ;;  %v18332_v7 = vcombine.high %v6435_v17, %v6439_v44  ;;  %v18331_v8 = vcombine.low %v6435_v17, %v6439_v44 }
 0x516   : > { %v18334_v52 = vcombine.high %v6436_v31, %v6440_v6  ;;  %v18333_v58 = vcombine.low %v6436_v31, %v6440_v6 }
 0x517   : > { %7873 = vmatpush1.bf16.msra.mxu0 %v18299_v53  ;;  %8019 = vmatpush1.bf16.msra.mxu1 %v18301_v30  ;;  %v6443_v53 = vld [vmem:[#allocation11 + $0x780] sm:$0xff] }
 0x518   : > { %7874 = vmatprep.subr.bf16.mxu0 %v18308_v40  ;;  %8020 = vmatprep.subr.bf16.mxu1 %v18310_v25  ;;  %v6447_v30 = vld [vmem:[#allocation11 + $0x7a0] sm:$0xff]  ;;  %v6444_v40 = vld [vmem:[#allocation11 + $0x788] sm:$0xff] }
 0x519   : > { %v6448_v25 = vld [vmem:[#allocation11 + $0x7a8] sm:$0xff]  ;;  %v18340_v26 = vcombine.high %v6443_v53, %v6447_v30  ;;  %v18339_v1 = vcombine.low %v6443_v53, %v6447_v30 }
 0x51a   : > { %v18342_v22 = vcombine.high %v6444_v40, %v6448_v25  ;;  %v18341_v32 = vcombine.low %v6444_v40, %v6448_v25 }
 0x51b   : > { %7875 = vmatpush1.bf16.msra.mxu0 %v18307_v42  ;;  %8021 = vmatpush1.bf16.msra.mxu1 %v18309_v39  ;;  %v6451_v42 = vld [vmem:[#allocation11 + $0x7c0] sm:$0xff] }
 0x51c   : > { %7876 = vmatprep.subr.bf16.mxu0 %v18316_v46  ;;  %8022 = vmatprep.subr.bf16.mxu1 %v18318_v2  ;;  %v6455_v39 = vld [vmem:[#allocation11 + $0x7e0] sm:$0xff]  ;;  %v6452_v46 = vld [vmem:[#allocation11 + $0x7c8] sm:$0xff] }
 0x51d   : > { %v6456_v2 = vld [vmem:[#allocation11 + $0x7e8] sm:$0xff]  ;;  %v18348_v23 = vcombine.high %v6451_v42, %v6455_v39  ;;  %v18347_v17 = vcombine.low %v6451_v42, %v6455_v39 }
 0x51e   : > { %v18350_v33 = vcombine.high %v6452_v46, %v6456_v2  ;;  %v18349_v44 = vcombine.low %v6452_v46, %v6456_v2 }
 0x51f   : > { %7877 = vmatpush1.bf16.msra.mxu0 %v18315_v16  ;;  %8023 = vmatpush1.bf16.msra.mxu1 %v18317_v35  ;;  %v6205_v16 = vld [vmem:[#allocation11 + $0x10] sm:$0xff] }
 0x520   : > { %7878 = vmatprep.subr.bf16.mxu0 %v18324_v12  ;;  %8024 = vmatprep.subr.bf16.mxu1 %v18326_v59  ;;  %v6209_v35 = vld [vmem:[#allocation11 + $0x30] sm:$0xff]  ;;  %v6206_v12 = vld [vmem:[#allocation11 + $0x18] sm:$0xff] }
 0x521   : > { %v6210_v59 = vld [vmem:[#allocation11 + $0x38] sm:$0xff]  ;;  %v18104_v31 = vcombine.high %v6205_v16, %v6209_v35  ;;  %v18103_v53 = vcombine.low %v6205_v16, %v6209_v35 }
 0x522   : > { %v18106_v6 = vcombine.high %v6206_v12, %v6210_v59  ;;  %v18105_v30 = vcombine.low %v6206_v12, %v6210_v59 }
 0x523   : > { %7879 = vmatpush1.bf16.msra.mxu0 %v18323_v51  ;;  %8025 = vmatpush1.bf16.msra.mxu1 %v18325_v3  ;;  %v6213_v51 = vld [vmem:[#allocation11 + $0x50] sm:$0xff] }
 0x524   : > { %7880 = vmatprep.subr.bf16.mxu0 %v18332_v7  ;;  %8026 = vmatprep.subr.bf16.mxu1 %v18334_v52  ;;  %v6217_v3 = vld [vmem:[#allocation11 + $0x70] sm:$0xff]  ;;  %v6214_v7 = vld [vmem:[#allocation11 + $0x58] sm:$0xff] }
 0x525   : > { %v6218_v52 = vld [vmem:[#allocation11 + $0x78] sm:$0xff]  ;;  %v18112_v40 = vcombine.high %v6213_v51, %v6217_v3  ;;  %v18111_v42 = vcombine.low %v6213_v51, %v6217_v3 }
 0x526   : > { %v18114_v25 = vcombine.high %v6214_v7, %v6218_v52  ;;  %v18113_v39 = vcombine.low %v6214_v7, %v6218_v52 }
 0x527   : > { %7881 = vmatpush1.bf16.msra.mxu0 %v18331_v8  ;;  %8027 = vmatpush1.bf16.msra.mxu1 %v18333_v58  ;;  %v6221_v8 = vld [vmem:[#allocation11 + $0x90] sm:$0xff] }
 0x528   : > { %7882 = vmatprep.subr.bf16.mxu0 %v18340_v26  ;;  %8028 = vmatprep.subr.bf16.mxu1 %v18342_v22  ;;  %v6225_v58 = vld [vmem:[#allocation11 + $0xb0] sm:$0xff]  ;;  %v6222_v26 = vld [vmem:[#allocation11 + $0x98] sm:$0xff] }
 0x529   : > { %v6226_v22 = vld [vmem:[#allocation11 + $0xb8] sm:$0xff]  ;;  %v18120_v46 = vcombine.high %v6221_v8, %v6225_v58  ;;  %v18119_v16 = vcombine.low %v6221_v8, %v6225_v58 }
 0x52a   : > { %v18122_v2 = vcombine.high %v6222_v26, %v6226_v22  ;;  %v18121_v35 = vcombine.low %v6222_v26, %v6226_v22 }
 0x52b   : > { %7883 = vmatpush1.bf16.msra.mxu0 %v18339_v1  ;;  %8029 = vmatpush1.bf16.msra.mxu1 %v18341_v32  ;;  %v6229_v1 = vld [vmem:[#allocation11 + $0xd0] sm:$0xff] }
 0x52c   : > { %7884 = vmatprep.subr.bf16.mxu0 %v18348_v23  ;;  %8030 = vmatprep.subr.bf16.mxu1 %v18350_v33  ;;  %v6233_v32 = vld [vmem:[#allocation11 + $0xf0] sm:$0xff]  ;;  %v6230_v23 = vld [vmem:[#allocation11 + $0xd8] sm:$0xff] }
 0x52d   : > { %v6234_v33 = vld [vmem:[#allocation11 + $0xf8] sm:$0xff]  ;;  %v18128_v12 = vcombine.high %v6229_v1, %v6233_v32  ;;  %v18127_v51 = vcombine.low %v6229_v1, %v6233_v32 }
 0x52e   : > { %v18130_v59 = vcombine.high %v6230_v23, %v6234_v33  ;;  %v18129_v3 = vcombine.low %v6230_v23, %v6234_v33 }
 0x52f   : > { %7885 = vmatpush1.bf16.msra.mxu0 %v18347_v17  ;;  %8031 = vmatpush1.bf16.msra.mxu1 %v18349_v44  ;;  %v6237_v17 = vld [vmem:[#allocation11 + $0x110] sm:$0xff] }
 0x530   : > { %8073 = vmatprep.subr.bf16.mxu0 %v18104_v31  ;;  %8219 = vmatprep.subr.bf16.mxu1 %v18106_v6  ;;  %v6241_v44 = vld [vmem:[#allocation11 + $0x130] sm:$0xff]  ;;  %v6238_v31 = vld [vmem:[#allocation11 + $0x118] sm:$0xff] }
 0x531   : > { %v6242_v6 = vld [vmem:[#allocation11 + $0x138] sm:$0xff]  ;;  %v18136_v7 = vcombine.high %v6237_v17, %v6241_v44  ;;  %v18135_v8 = vcombine.low %v6237_v17, %v6241_v44 }
 0x532   : > { %7887 = vmatmul.mubr.bf16.vlgmr.msra.gmra.mrb[32].mxu0 %v22574_v15  ;;  %8033 = vmatmul.mubr.bf16.vlgmr.msra.gmra.mrb[32].mxu1 %v22574_v15  ;;  %v18138_v52 = vcombine.high %v6238_v31, %v6242_v6  ;;  %v18137_v58 = vcombine.low %v6238_v31, %v6242_v6 }
 0x533   : > { %7896 = vmatprep.mubr.bf16.mxu0 %v22602_v54  ;;  %8042 = vmatprep.mubr.bf16.mxu1 %v22602_v54 }
 0x534   : > { %8074 = vmatpush1.bf16.msra.mxu0 %v18103_v53  ;;  %8220 = vmatpush1.bf16.msra.mxu1 %v18105_v30  ;;  %v6245_v53 = vld [vmem:[#allocation11 + $0x150] sm:$0xff] }
 0x535   : > { %8075 = vmatprep.subr.bf16.mxu0 %v18112_v40  ;;  %8221 = vmatprep.subr.bf16.mxu1 %v18114_v25  ;;  %v6249_v30 = vld [vmem:[#allocation11 + $0x170] sm:$0xff]  ;;  %v6246_v40 = vld [vmem:[#allocation11 + $0x158] sm:$0xff] }
 0x536   : > { %v6250_v25 = vld [vmem:[#allocation11 + $0x178] sm:$0xff]  ;;  %v18144_v26 = vcombine.high %v6245_v53, %v6249_v30  ;;  %v18143_v1 = vcombine.low %v6245_v53, %v6249_v30 }
 0x537   : > { %v18146_v22 = vcombine.high %v6246_v40, %v6250_v25  ;;  %v18145_v32 = vcombine.low %v6246_v40, %v6250_v25 }
 0x538   : > { %8076 = vmatpush1.bf16.msra.mxu0 %v18111_v42  ;;  %8222 = vmatpush1.bf16.msra.mxu1 %v18113_v39  ;;  %v6253_v42 = vld [vmem:[#allocation11 + $0x190] sm:$0xff] }
 0x539   : > { %8077 = vmatprep.subr.bf16.mxu0 %v18120_v46  ;;  %8223 = vmatprep.subr.bf16.mxu1 %v18122_v2  ;;  %v6257_v39 = vld [vmem:[#allocation11 + $0x1b0] sm:$0xff]  ;;  %v6254_v46 = vld [vmem:[#allocation11 + $0x198] sm:$0xff] }
 0x53a   : > { %7897 = vmatmul.mubr.bf16.gmra.mrb[36].mxu0 %v22597_v37  ;;  %8043 = vmatmul.mubr.bf16.gmra.mrb[36].mxu1 %v22597_v37  ;;  %v6258_v2 = vld [vmem:[#allocation11 + $0x1b8] sm:$0xff]  ;;  %v18152_v23 = vcombine.high %v6253_v42, %v6257_v39  ;;  %v18151_v17 = vcombine.low %v6253_v42, %v6257_v39 }
 0x53b   : > { %7906 = vmatprep.mubr.bf16.mxu0 %v22626_v21  ;;  %8052 = vmatprep.mubr.bf16.mxu1 %v22626_v21  ;;  %v18154_v33 = vcombine.high %v6254_v46, %v6258_v2  ;;  %v18153_v44 = vcombine.low %v6254_v46, %v6258_v2  ;;  %v6285_v2 = vld [vmem:[#allocation11 + $0x290] sm:$0xff] }
 0x53c   : > { %8078 = vmatpush1.bf16.msra.mxu0 %v18119_v16  ;;  %8224 = vmatpush1.bf16.msra.mxu1 %v18121_v35  ;;  %v6261_v16 = vld [vmem:[#allocation11 + $0x1d0] sm:$0xff] }
 0x53d   : > { %8079 = vmatprep.subr.bf16.mxu0 %v18128_v12  ;;  %8225 = vmatprep.subr.bf16.mxu1 %v18130_v59  ;;  %v6265_v35 = vld [vmem:[#allocation11 + $0x1f0] sm:$0xff]  ;;  %v6262_v12 = vld [vmem:[#allocation11 + $0x1d8] sm:$0xff] }
 0x53e   : > { %v6266_v59 = vld [vmem:[#allocation11 + $0x1f8] sm:$0xff]  ;;  %v18160_v31 = vcombine.high %v6261_v16, %v6265_v35  ;;  %v18159_v53 = vcombine.low %v6261_v16, %v6265_v35 }
 0x53f   : > { %v18162_v6 = vcombine.high %v6262_v12, %v6266_v59  ;;  %v18161_v30 = vcombine.low %v6262_v12, %v6266_v59  ;;  %v6293_v59 = vld [vmem:[#allocation11 + $0x2d0] sm:$0xff] }
 0x540   : > { %8080 = vmatpush1.bf16.msra.mxu0 %v18127_v51  ;;  %8226 = vmatpush1.bf16.msra.mxu1 %v18129_v3  ;;  %v6269_v51 = vld [vmem:[#allocation11 + $0x210] sm:$0xff] }
 0x541   : > { %8081 = vmatprep.subr.bf16.mxu0 %v18136_v7  ;;  %8227 = vmatprep.subr.bf16.mxu1 %v18138_v52  ;;  %v6273_v3 = vld [vmem:[#allocation11 + $0x230] sm:$0xff]  ;;  %v6270_v7 = vld [vmem:[#allocation11 + $0x218] sm:$0xff] }
 0x542   : > { %7907 = vmatmul.mubr.bf16.gmra.mrb[40].mxu0 %v22621_v0  ;;  %8053 = vmatmul.mubr.bf16.gmra.mrb[40].mxu1 %v22621_v0  ;;  %v6274_v52 = vld [vmem:[#allocation11 + $0x238] sm:$0xff]  ;;  %v18168_v40 = vcombine.high %v6269_v51, %v6273_v3  ;;  %v18167_v42 = vcombine.low %v6269_v51, %v6273_v3 }
 0x543   : > { %7916 = vmatprep.mubr.bf16.mxu0 %v22646_v57  ;;  %8062 = vmatprep.mubr.bf16.mxu1 %v22646_v57  ;;  %v18170_v25 = vcombine.high %v6270_v7, %v6274_v52  ;;  %v18169_v39 = vcombine.low %v6270_v7, %v6274_v52  ;;  %v6301_v52 = vld [vmem:[#allocation11 + $0x310] sm:$0xff] }
 0x544   : > { %8082 = vmatpush1.bf16.msra.mxu0 %v18135_v8  ;;  %8228 = vmatpush1.bf16.msra.mxu1 %v18137_v58  ;;  %v6277_v8 = vld [vmem:[#allocation11 + $0x250] sm:$0xff] }
 0x545   : > { %8083 = vmatprep.subr.bf16.mxu0 %v18144_v26  ;;  %8229 = vmatprep.subr.bf16.mxu1 %v18146_v22  ;;  %v6281_v58 = vld [vmem:[#allocation11 + $0x270] sm:$0xff]  ;;  %v6278_v26 = vld [vmem:[#allocation11 + $0x258] sm:$0xff] }
 0x546   : > { %v6282_v22 = vld [vmem:[#allocation11 + $0x278] sm:$0xff]  ;;  %v18176_v46 = vcombine.high %v6277_v8, %v6281_v58 }
 0x547   : > { %v18177_v16 = vcombine.low %v6278_v26, %v6282_v22 }
 0x548   : > { %8084 = vmatpush1.bf16.msra.mxu0 %v18143_v1  ;;  %8230 = vmatpush1.bf16.msra.mxu1 %v18145_v32  ;;  %v6289_v1 = vld [vmem:[#allocation11 + $0x2b0] sm:$0xff]  ;;  %v6286_v32 = vld [vmem:[#allocation11 + $0x298] sm:$0xff] }
 0x549   : > { %8085 = vmatprep.subr.bf16.mxu0 %v18152_v23  ;;  %8231 = vmatprep.subr.bf16.mxu1 %v18154_v33  ;;  %v6290_v23 = vld [vmem:[#allocation11 + $0x2b8] sm:$0xff]  ;;  %v18175_v33 = vcombine.low %v6277_v8, %v6281_v58  ;;  %v18184_v35 = vcombine.high %v6285_v2, %v6289_v1 }
 0x54a   : > { %7917 = vmatmul.mubr.bf16.gmra.mrb[44].mxu0 %v22642_v24  ;;  %8063 = vmatmul.mubr.bf16.gmra.mrb[44].mxu1 %v22642_v24  ;;  %v18186_v12 = vcombine.high %v6286_v32, %v6290_v23  ;;  %v18185_v51 = vcombine.low %v6286_v32, %v6290_v23  ;;  %v6317_v23 = vld [vmem:[#allocation11 + $0x390] sm:$0xff] }
 0x54b   : > { %8105 = vmatprep.mubr.bf16.mxu0 %v22576_v45  ;;  %8251 = vmatprep.mubr.bf16.mxu1 %v22576_v45  ;;  %v18178_v45 = vcombine.high %v6278_v26, %v6282_v22  ;;  %v6309_v22 = vld [vmem:[#allocation11 + $0x350] sm:$0xff] }
 0x54c   : > { %8086 = vmatpush1.bf16.msra.mxu0 %v18151_v17  ;;  %8232 = vmatpush1.bf16.msra.mxu1 %v18153_v44  ;;  %v6297_v17 = vld [vmem:[#allocation11 + $0x2f0] sm:$0xff]  ;;  %v6294_v44 = vld [vmem:[#allocation11 + $0x2d8] sm:$0xff] }
 0x54d   : > { %8087 = vmatprep.subr.bf16.mxu0 %v18160_v31  ;;  %8233 = vmatprep.subr.bf16.mxu1 %v18162_v6  ;;  %v6298_v31 = vld [vmem:[#allocation11 + $0x2f8] sm:$0xff]  ;;  %v18183_v6 = vcombine.low %v6285_v2, %v6289_v1  ;;  %v18192_v3 = vcombine.high %v6293_v59, %v6297_v17 }
 0x54e   : > { %v18194_v7 = vcombine.high %v6294_v44, %v6298_v31  ;;  %v18193_v8 = vcombine.low %v6294_v44, %v6298_v31  ;;  %v6325_v31 = vld [vmem:[#allocation11 + $0x3d0] sm:$0xff] }
 0x550   : > { %8088 = vmatpush1.bf16.msra.mxu0 %v18159_v53  ;;  %8234 = vmatpush1.bf16.msra.mxu1 %v18161_v30  ;;  %v6305_v53 = vld [vmem:[#allocation11 + $0x330] sm:$0xff]  ;;  %v6302_v30 = vld [vmem:[#allocation11 + $0x318] sm:$0xff] }
 0x551   : > { %8089 = vmatprep.subr.bf16.mxu0 %v18168_v40  ;;  %8235 = vmatprep.subr.bf16.mxu1 %v18170_v25  ;;  %v6306_v40 = vld [vmem:[#allocation11 + $0x338] sm:$0xff]  ;;  %v18191_v25 = vcombine.low %v6293_v59, %v6297_v17  ;;  %v18200_v58 = vcombine.high %v6301_v52, %v6305_v53 }
 0x552   : > { %v18202_v26 = vcombine.high %v6302_v30, %v6306_v40  ;;  %v18201_v2 = vcombine.low %v6302_v30, %v6306_v40  ;;  %v6333_v40 = vld [vmem:[#allocation11 + $0x410] sm:$0xff] }
 0x554   : > { %8090 = vmatpush1.bf16.msra.mxu0 %v18167_v42  ;;  %8236 = vmatpush1.bf16.msra.mxu1 %v18169_v39  ;;  %v6313_v42 = vld [vmem:[#allocation11 + $0x370] sm:$0xff]  ;;  %v6310_v39 = vld [vmem:[#allocation11 + $0x358] sm:$0xff] }
 0x555   : > { %8091 = vmatprep.subr.bf16.mxu0 %v18176_v46  ;;  %8237 = vmatprep.subr.bf16.mxu1 %v18178_v45  ;;  %v6314_v46 = vld [vmem:[#allocation11 + $0x378] sm:$0xff]  ;;  %v18199_v45 = vcombine.low %v6301_v52, %v6305_v53  ;;  %v18208_v1 = vcombine.high %v6309_v22, %v6313_v42 }
 0x556   : > { %v18210_v32 = vcombine.high %v6310_v39, %v6314_v46  ;;  %v18209_v59 = vcombine.low %v6310_v39, %v6314_v46  ;;  %v6341_v46 = vld [vmem:[#allocation11 + $0x450] sm:$0xff] }
 0x558   : > { %8092 = vmatpush1.bf16.msra.mxu0 %v18175_v33  ;;  %8238 = vmatpush1.bf16.msra.mxu1 %v18177_v16  ;;  %v6321_v33 = vld [vmem:[#allocation11 + $0x3b0] sm:$0xff]  ;;  %v6318_v16 = vld [vmem:[#allocation11 + $0x398] sm:$0xff] }
 0x559   : > { %8093 = vmatprep.subr.bf16.mxu0 %v18184_v35  ;;  %8239 = vmatprep.subr.bf16.mxu1 %v18186_v12  ;;  %v6322_v35 = vld [vmem:[#allocation11 + $0x3b8] sm:$0xff]  ;;  %v18207_v12 = vcombine.low %v6309_v22, %v6313_v42  ;;  %v18216_v17 = vcombine.high %v6317_v23, %v6321_v33 }
 0x55a   : > { %v18218_v44 = vcombine.high %v6318_v16, %v6322_v35  ;;  %v18217_v52 = vcombine.low %v6318_v16, %v6322_v35  ;;  %v6349_v35 = vld [vmem:[#allocation11 + $0x490] sm:$0xff] }
 0x55c   : > { %8094 = vmatpush1.bf16.msra.mxu0 %v18183_v6  ;;  %8240 = vmatpush1.bf16.msra.mxu1 %v18185_v51  ;;  %v6329_v6 = vld [vmem:[#allocation11 + $0x3f0] sm:$0xff]  ;;  %v6326_v51 = vld [vmem:[#allocation11 + $0x3d8] sm:$0xff] }
 0x55d   : > { %8095 = vmatprep.subr.bf16.mxu0 %v18192_v3  ;;  %8241 = vmatprep.subr.bf16.mxu1 %v18194_v7  ;;  %v6330_v3 = vld [vmem:[#allocation11 + $0x3f8] sm:$0xff]  ;;  %v18215_v7 = vcombine.low %v6317_v23, %v6321_v33  ;;  %v18224_v53 = vcombine.high %v6325_v31, %v6329_v6 }
 0x55e   : > { %v18226_v30 = vcombine.high %v6326_v51, %v6330_v3  ;;  %v18225_v22 = vcombine.low %v6326_v51, %v6330_v3  ;;  %v6357_v3 = vld [vmem:[#allocation11 + $0x4d0] sm:$0xff] }
 0x560   : > { %8096 = vmatpush1.bf16.msra.mxu0 %v18191_v25  ;;  %8242 = vmatpush1.bf16.msra.mxu1 %v18193_v8  ;;  %v6337_v25 = vld [vmem:[#allocation11 + $0x430] sm:$0xff]  ;;  %v6334_v8 = vld [vmem:[#allocation11 + $0x418] sm:$0xff] }
 0x561   : > { %8097 = vmatprep.subr.bf16.mxu0 %v18200_v58  ;;  %8243 = vmatprep.subr.bf16.mxu1 %v18202_v26  ;;  %v6338_v58 = vld [vmem:[#allocation11 + $0x438] sm:$0xff]  ;;  %v18223_v26 = vcombine.low %v6325_v31, %v6329_v6  ;;  %v18232_v42 = vcombine.high %v6333_v40, %v6337_v25 }
 0x562   : > { %v18234_v39 = vcombine.high %v6334_v8, %v6338_v58  ;;  %v18233_v23 = vcombine.low %v6334_v8, %v6338_v58  ;;  %v6365_v8 = vld [vmem:[#allocation11 + $0x510] sm:$0xff]  ;;  %v6366_v58 = vld [vmem:[#allocation11 + $0x518] sm:$0xff] }
 0x564   : > { %8098 = vmatpush1.bf16.msra.mxu0 %v18199_v45  ;;  %8244 = vmatpush1.bf16.msra.mxu1 %v18201_v2  ;;  %v6345_v45 = vld [vmem:[#allocation11 + $0x470] sm:$0xff]  ;;  %v6342_v2 = vld [vmem:[#allocation11 + $0x458] sm:$0xff] }
 0x565   : > { %8099 = vmatprep.subr.bf16.mxu0 %v18208_v1  ;;  %8245 = vmatprep.subr.bf16.mxu1 %v18210_v32  ;;  %v6346_v1 = vld [vmem:[#allocation11 + $0x478] sm:$0xff]  ;;  %v18231_v32 = vcombine.low %v6333_v40, %v6337_v25  ;;  %v18240_v33 = vcombine.high %v6341_v46, %v6345_v45 }
 0x566   : > { %v18242_v16 = vcombine.high %v6342_v2, %v6346_v1  ;;  %v18241_v31 = vcombine.low %v6342_v2, %v6346_v1  ;;  %v6377_v2 = vld [vmem:[#allocation11 + $0x570] sm:$0xff]  ;;  %v6374_v1 = vld [vmem:[#allocation11 + $0x558] sm:$0xff] }
 0x568   : > { %8100 = vmatpush1.bf16.msra.mxu0 %v18207_v12  ;;  %8246 = vmatpush1.bf16.msra.mxu1 %v18209_v59  ;;  %v6353_v12 = vld [vmem:[#allocation11 + $0x4b0] sm:$0xff]  ;;  %v6350_v59 = vld [vmem:[#allocation11 + $0x498] sm:$0xff] }
 0x569   : > { %8101 = vmatprep.subr.bf16.mxu0 %v18216_v17  ;;  %8247 = vmatprep.subr.bf16.mxu1 %v18218_v44  ;;  %v6354_v17 = vld [vmem:[#allocation11 + $0x4b8] sm:$0xff]  ;;  %v18239_v44 = vcombine.low %v6341_v46, %v6345_v45  ;;  %v18248_v6 = vcombine.high %v6349_v35, %v6353_v12  ;;  %v6373_v45 = vld [vmem:[#allocation11 + $0x550] sm:$0xff] }
 0x56a   : > { %v18250_v51 = vcombine.high %v6350_v59, %v6354_v17 }
 0x56c   : > { %8102 = vmatpush1.bf16.msra.mxu0 %v18215_v7  ;;  %8248 = vmatpush1.bf16.msra.mxu1 %v18217_v52  ;;  %v6361_v7 = vld [vmem:[#allocation11 + $0x4f0] sm:$0xff]  ;;  %v6358_v52 = vld [vmem:[#allocation11 + $0x4d8] sm:$0xff] }
 0x56d   : > { %8103 = vmatprep.subr.bf16.mxu0 %v18224_v53  ;;  %8249 = vmatprep.subr.bf16.mxu1 %v18226_v30  ;;  %v6362_v53 = vld [vmem:[#allocation11 + $0x4f8] sm:$0xff]  ;;  %v18249_v30 = vcombine.low %v6350_v59, %v6354_v17  ;;  %v18256_v40 = vcombine.high %v6357_v3, %v6361_v7  ;;  %v18271_v17 = vcombine.low %v6373_v45, %v6377_v2 }
 0x56e   : > { %v18258_v25 = vcombine.high %v6358_v52, %v6362_v53  ;;  %v6386_v59 = vld [vmem:[#allocation11 + $0x5b8] sm:$0xff] }
 0x570   : > { %8104 = vmatpush1.bf16.msra.mxu0 %v18223_v26  ;;  %8250 = vmatpush1.bf16.msra.mxu1 %v18225_v22  ;;  %v6370_v26 = vld [vmem:[#allocation11 + $0x538] sm:$0xff]  ;;  %v18255_v22 = vcombine.low %v6357_v3, %v6361_v7  ;;  %v6393_v3 = vld [vmem:[#allocation11 + $0x5f0] sm:$0xff] }
 0x571   : > { %8146 = vmatprep.subr.bf16.mxu0 %v18232_v42  ;;  %8292 = vmatprep.subr.bf16.mxu1 %v18234_v39  ;;  %v18257_v42 = vcombine.low %v6358_v52, %v6362_v53  ;;  %v18266_v46 = vcombine.high %v6366_v58, %v6370_v26  ;;  %v6390_v7 = vld [vmem:[#allocation11 + $0x5d8] sm:$0xff] }
 0x572   : > { %v6394_v52 = vld [vmem:[#allocation11 + $0x5f8] sm:$0xff] }
 0x573   : > { %8106 = vmatmul.mubr.bf16.vlgmr.msra.gmra.mrb[48].mxu0 %v22572_v20  ;;  %8252 = vmatmul.mubr.bf16.vlgmr.msra.gmra.mrb[48].mxu1 %v22572_v20  ;;  %v18247_v20 = vcombine.low %v6349_v35, %v6353_v12  ;;  %v6381_v35 = vld [vmem:[#allocation11 + $0x590] sm:$0xff]  ;;  %v6382_v12 = vld [vmem:[#allocation11 + $0x598] sm:$0xff] }
 0x574   : > { %8115 = vmatprep.mubr.bf16.mxu0 %v22600_v60  ;;  %8147 = vmatpush1.bf16.msra.mxu0 %v18231_v32  ;;  %v6378_v32 = vld [vmem:[#allocation11 + $0x578] sm:$0xff]  ;;  %v18281_v53 = vcombine.low %v6382_v12, %v6386_v59 }
 0x575   : > { %8261 = vmatprep.mubr.bf16.mxu1 %v22600_v60  ;;  %8293 = vmatpush1.bf16.msra.mxu1 %v18233_v23  ;;  %v6369_v60 = vld [vmem:[#allocation11 + $0x530] sm:$0xff]  ;;  %v18265_v23 = vcombine.low %v6366_v58, %v6370_v26  ;;  %v18289_v58 = vcombine.low %v6390_v7, %v6394_v52 }
 0x576   : > { %8148 = vmatprep.subr.bf16.mxu0 %v18240_v33  ;;  %8294 = vmatprep.subr.bf16.mxu1 %v18242_v16  ;;  %v18264_v39 = vcombine.high %v6365_v8, %v6369_v60  ;;  %v18272_v33 = vcombine.high %v6373_v45, %v6377_v2  ;;  %v18274_v16 = vcombine.high %v6374_v1, %v6378_v32  ;;  %v6410_v45 = vld [vmem:[#allocation11 + $0x678] sm:$0xff] }
 0x578   : > { %8149 = vmatpush1.bf16.msra.mxu0 %v18239_v44  ;;  %v18273_v44 = vcombine.low %v6374_v1, %v6378_v32 }
 0x579   : > { %8295 = vmatpush1.bf16.msra.mxu1 %v18241_v31  ;;  %8150 = vmatprep.subr.bf16.mxu0 %v18248_v6  ;;  %v18282_v6 = vcombine.high %v6382_v12, %v6386_v59  ;;  %v6421_v59 = vld [vmem:[#allocation11 + $0x6d0] sm:$0xff] }
 0x57a   : > { %8296 = vmatprep.subr.bf16.mxu1 %v18250_v51  ;;  %v6389_v51 = vld [vmem:[#allocation11 + $0x5d0] sm:$0xff] }
 0x57b   : > { %8116 = vmatmul.mubr.bf16.gmra.mrb[52].mxu0 %v22595_v10  ;;  %8262 = vmatmul.mubr.bf16.gmra.mrb[52].mxu1 %v22595_v10  ;;  %v18263_v10 = vcombine.low %v6365_v8, %v6369_v60  ;;  %v6402_v8 = vld [vmem:[#allocation11 + $0x638] sm:$0xff]  ;;  %v18287_v60 = vcombine.low %v6389_v51, %v6393_v3 }
 0x57c   : > { %8125 = vmatprep.mubr.bf16.mxu0 %v22624_v55  ;;  %8151 = vmatpush1.bf16.msra.mxu0 %v18247_v20  ;;  %v18288_v20 = vcombine.high %v6389_v51, %v6393_v3 }
 0x57d   : > { %8271 = vmatprep.mubr.bf16.mxu1 %v22624_v55  ;;  %8297 = vmatpush1.bf16.msra.mxu1 %v18249_v30  ;;  %v6385_v55 = vld [vmem:[#allocation11 + $0x5b0] sm:$0xff]  ;;  %v18290_v30 = vcombine.high %v6390_v7, %v6394_v52 }
 0x57e   : > { %8152 = vmatprep.subr.bf16.mxu0 %v18256_v40  ;;  %8298 = vmatprep.subr.bf16.mxu1 %v18258_v25  ;;  %v18280_v31 = vcombine.high %v6381_v35, %v6385_v55  ;;  %v6397_v40 = vld [vmem:[#allocation11 + $0x610] sm:$0xff]  ;;  %v6398_v25 = vld [vmem:[#allocation11 + $0x618] sm:$0xff] }
 0x57f   : > { %v18297_v2 = vcombine.low %v6398_v25, %v6402_v8  ;;  %v6429_v52 = vld [vmem:[#allocation11 + $0x710] sm:$0xff] }
 0x580   : > { %8153 = vmatpush1.bf16.msra.mxu0 %v18255_v22  ;;  %v18298_v22 = vcombine.high %v6398_v25, %v6402_v8  ;;  %v6437_v8 = vld [vmem:[#allocation11 + $0x750] sm:$0xff] }
 0x581   : > { %8299 = vmatpush1.bf16.msra.mxu1 %v18257_v42  ;;  %8154 = vmatprep.subr.bf16.mxu0 %v18264_v39  ;;  %v6405_v42 = vld [vmem:[#allocation11 + $0x650] sm:$0xff] }
 0x582   : > { %8300 = vmatprep.subr.bf16.mxu1 %v18266_v46  ;;  %v6409_v39 = vld [vmem:[#allocation11 + $0x670] sm:$0xff]  ;;  %v6406_v46 = vld [vmem:[#allocation11 + $0x658] sm:$0xff] }
 0x583   : > { %8126 = vmatmul.mubr.bf16.gmra.mrb[56].mxu0 %v22619_v47  ;;  %8272 = vmatmul.mubr.bf16.gmra.mrb[56].mxu1 %v22619_v47  ;;  %v18279_v47 = vcombine.low %v6381_v35, %v6385_v55  ;;  %v18304_v1 = vcombine.high %v6405_v42, %v6409_v39  ;;  %v18306_v32 = vcombine.high %v6406_v46, %v6410_v45 }
 0x584   : > { %8135 = vmatprep.mubr.bf16.mxu0 %v22644_v61  ;;  %8155 = vmatpush1.bf16.msra.mxu0 %v18263_v10  ;;  %v6413_v10 = vld [vmem:[#allocation11 + $0x690] sm:$0xff]  ;;  %v18305_v35 = vcombine.low %v6406_v46, %v6410_v45 }
 0x585   : > { %8281 = vmatprep.mubr.bf16.mxu1 %v22644_v61  ;;  %8301 = vmatpush1.bf16.msra.mxu1 %v18265_v23  ;;  %v6401_v61 = vld [vmem:[#allocation11 + $0x630] sm:$0xff] }
 0x586   : > { %8156 = vmatprep.subr.bf16.mxu0 %v18272_v33  ;;  %8302 = vmatprep.subr.bf16.mxu1 %v18274_v16  ;;  %v18296_v26 = vcombine.high %v6397_v40, %v6401_v61  ;;  %v6417_v23 = vld [vmem:[#allocation11 + $0x6b0] sm:$0xff]  ;;  %v6418_v33 = vld [vmem:[#allocation11 + $0x6b8] sm:$0xff]  ;;  %v18303_v16 = vcombine.low %v6405_v42, %v6409_v39 }
 0x587   : > { %v18312_v55 = vcombine.high %v6413_v10, %v6417_v23  ;;  %v6445_v45 = vld [vmem:[#allocation11 + $0x790] sm:$0xff] }
 0x588   : > { %8157 = vmatpush1.bf16.msra.mxu0 %v18271_v17  ;;  %v6425_v17 = vld [vmem:[#allocation11 + $0x6f0] sm:$0xff] }
 0x589   : > { %8303 = vmatpush1.bf16.msra.mxu1 %v18273_v44  ;;  %8158 = vmatprep.subr.bf16.mxu0 %v18280_v31  ;;  %v6422_v44 = vld [vmem:[#allocation11 + $0x6d8] sm:$0xff]  ;;  %v18320_v3 = vcombine.high %v6421_v59, %v6425_v17 }
 0x58a   : > { %8304 = vmatprep.subr.bf16.mxu1 %v18282_v6  ;;  %v6426_v31 = vld [vmem:[#allocation11 + $0x6f8] sm:$0xff]  ;;  %v18311_v6 = vcombine.low %v6413_v10, %v6417_v23 }
 0x58b   : > { %8136 = vmatmul.mubr.bf16.gmra.mrb[60].mxu0 %v22640_v36  ;;  %8282 = vmatmul.mubr.bf16.gmra.mrb[60].mxu1 %v22640_v36  ;;  %v18295_v36 = vcombine.low %v6397_v40, %v6401_v61  ;;  %v18322_v7 = vcombine.high %v6422_v44, %v6426_v31  ;;  %v18321_v40 = vcombine.low %v6422_v44, %v6426_v31  ;;  %v8429_v31 = vld [vmem:[#allocation14] sm:$0xff] }
 0x58c   : > { %8159 = vmatpush1.bf16.msra.mxu0 %v18279_v47  ;;  %8178 = vmatprep.mubr.bf16.mxu0 %v22578_v13  ;;  %v6433_v47 = vld [vmem:[#allocation11 + $0x730] sm:$0xff] }
 0x58d   : > { %8305 = vmatpush1.bf16.msra.mxu1 %v18281_v53  ;;  %8324 = vmatprep.mubr.bf16.mxu1 %v22578_v13  ;;  %v6414_v13 = vld [vmem:[#allocation11 + $0x698] sm:$0xff]  ;;  %v18328_v61 = vcombine.high %v6429_v52, %v6433_v47 }
 0x58e   : > { %8160 = vmatprep.subr.bf16.mxu0 %v18288_v20  ;;  %8306 = vmatprep.subr.bf16.mxu1 %v18290_v30  ;;  %v18314_v12 = vcombine.high %v6414_v13, %v6418_v33  ;;  %v18313_v51 = vcombine.low %v6414_v13, %v6418_v33  ;;  %v6430_v53 = vld [vmem:[#allocation11 + $0x718] sm:$0xff]  ;;  %v18319_v30 = vcombine.low %v6421_v59, %v6425_v17  ;;  %v6453_v33 = vld [vmem:[#allocation11 + $0x7d0] sm:$0xff] }
 0x58f   : > { %v6434_v20 = vld [vmem:[#allocation11 + $0x738] sm:$0xff] }
 0x590   : > { %8161 = vmatpush1.bf16.msra.mxu0 %v18287_v60  ;;  %v18330_v25 = vcombine.high %v6430_v53, %v6434_v20  ;;  %v6441_v60 = vld [vmem:[#allocation11 + $0x770] sm:$0xff]  ;;  %v18329_v42 = vcombine.low %v6430_v53, %v6434_v20  ;;  %v8437_v20 = vld [vmem:[#allocation14 + $0x40] sm:$0xff] }
 0x591   : > { %8307 = vmatpush1.bf16.msra.mxu1 %v18289_v58  ;;  %8162 = vmatprep.subr.bf16.mxu0 %v18296_v26  ;;  %v6438_v58 = vld [vmem:[#allocation11 + $0x758] sm:$0xff]  ;;  %v18336_v39 = vcombine.high %v6437_v8, %v6441_v60 }
 0x592   : > { %8308 = vmatprep.subr.bf16.mxu1 %v18298_v22  ;;  %v6442_v26 = vld [vmem:[#allocation11 + $0x778] sm:$0xff]  ;;  %v18327_v22 = vcombine.low %v6429_v52, %v6433_v47 }
 0x593   : > { %v18338_v46 = vcombine.high %v6438_v58, %v6442_v26  ;;  %v18337_v10 = vcombine.low %v6438_v58, %v6442_v26  ;;  %v8445_v26 = vld [vmem:[#allocation14 + $0x80] sm:$0xff] }
 0x594   : > { %8163 = vmatpush1.bf16.msra.mxu0 %v18295_v36  ;;  %v6449_v36 = vld [vmem:[#allocation11 + $0x7b0] sm:$0xff] }
 0x595   : > { %8309 = vmatpush1.bf16.msra.mxu1 %v18297_v2  ;;  %8164 = vmatprep.subr.bf16.mxu0 %v18304_v1  ;;  %v6446_v2 = vld [vmem:[#allocation11 + $0x798] sm:$0xff]  ;;  %v18344_v23 = vcombine.high %v6445_v45, %v6449_v36 }
 0x596   : > { %8310 = vmatprep.subr.bf16.mxu1 %v18306_v32  ;;  %v6450_v1 = vld [vmem:[#allocation11 + $0x7b8] sm:$0xff]  ;;  %v18335_v32 = vcombine.low %v6437_v8, %v6441_v60 }
 0x597   : > { %v18346_v13 = vcombine.high %v6446_v2, %v6450_v1  ;;  %v18345_v59 = vcombine.low %v6446_v2, %v6450_v1  ;;  %v8453_v1 = vld [vmem:[#allocation14 + $0xc0] sm:$0xff] }
 0x598   : > { %8165 = vmatpush1.bf16.msra.mxu0 %v18303_v16  ;;  %v6457_v16 = vld [vmem:[#allocation11 + $0x7f0] sm:$0xff] }
 0x599   : > { %8311 = vmatpush1.bf16.msra.mxu1 %v18305_v35  ;;  %8166 = vmatprep.subr.bf16.mxu0 %v18312_v55  ;;  %v6454_v35 = vld [vmem:[#allocation11 + $0x7d8] sm:$0xff]  ;;  %v18352_v17 = vcombine.high %v6453_v33, %v6457_v16 }
 0x59a   : > { %8312 = vmatprep.subr.bf16.mxu1 %v18314_v12  ;;  %v6458_v55 = vld [vmem:[#allocation11 + $0x7f8] sm:$0xff]  ;;  %v18343_v12 = vcombine.low %v6445_v45, %v6449_v36 }
 0x59b   : > { %v18354_v44 = vcombine.high %v6454_v35, %v6458_v55  ;;  %v18353_v52 = vcombine.low %v6454_v35, %v6458_v55  ;;  %v8465_v35 = vld [vmem:[#allocation14 + $0x120] sm:$0xff]  ;;  %v8462_v55 = vld [vmem:[#allocation14 + $0x108] sm:$0xff] }
 0x59c   : > { %8167 = vmatpush1.bf16.msra.mxu0 %v18311_v6  ;;  %v8433_v6 = vld [vmem:[#allocation14 + $0x20] sm:$0xff] }
 0x59d   : > { %8313 = vmatpush1.bf16.msra.mxu1 %v18313_v51  ;;  %8168 = vmatprep.subr.bf16.mxu0 %v18320_v3  ;;  %v8430_v51 = vld [vmem:[#allocation14 + $0x8] sm:$0xff]  ;;  %v18356_v47 = vcombine.high %v8429_v31, %v8433_v6 }
 0x59e   : > { %8314 = vmatprep.subr.bf16.mxu1 %v18322_v7  ;;  %v8434_v3 = vld [vmem:[#allocation14 + $0x28] sm:$0xff]  ;;  %v18351_v7 = vcombine.low %v6453_v33, %v6457_v16  ;;  %v8461_v16 = vld [vmem:[#allocation14 + $0x100] sm:$0xff] }
 0x59f   : > { %v18358_v53 = vcombine.high %v8430_v51, %v8434_v3  ;;  %v18357_v8 = vcombine.low %v8430_v51, %v8434_v3  ;;  %v8473_v51 = vld [vmem:[#allocation14 + $0x160] sm:$0xff]  ;;  %v8470_v3 = vld [vmem:[#allocation14 + $0x148] sm:$0xff] }
 0x5a0   : > { %8169 = vmatpush1.bf16.msra.mxu0 %v18319_v30  ;;  %v8441_v30 = vld [vmem:[#allocation14 + $0x60] sm:$0xff] }
 0x5a1   : > { %8315 = vmatpush1.bf16.msra.mxu1 %v18321_v40  ;;  %8170 = vmatprep.subr.bf16.mxu0 %v18328_v61  ;;  %v8438_v40 = vld [vmem:[#allocation14 + $0x48] sm:$0xff]  ;;  %v18364_v60 = vcombine.high %v8437_v20, %v8441_v30 }
 0x5a2   : > { %8316 = vmatprep.subr.bf16.mxu1 %v18330_v25  ;;  %v8442_v61 = vld [vmem:[#allocation14 + $0x68] sm:$0xff]  ;;  %v18355_v25 = vcombine.low %v8429_v31, %v8433_v6  ;;  %v8469_v6 = vld [vmem:[#allocation14 + $0x140] sm:$0xff] }
 0x5a3   : > { %v18366_v58 = vcombine.high %v8438_v40, %v8442_v61  ;;  %v18365_v45 = vcombine.low %v8438_v40, %v8442_v61  ;;  %v8482_v40 = vld [vmem:[#allocation14 + $0x1a8] sm:$0xff]  ;;  %v18395_v61 = vcombine.low %v8469_v6, %v8473_v51 }
 0x5a4   : > { %8171 = vmatpush1.bf16.msra.mxu0 %v18327_v22  ;;  %v8449_v22 = vld [vmem:[#allocation14 + $0xa0] sm:$0xff] }
 0x5a5   : > { %8317 = vmatpush1.bf16.msra.mxu1 %v18329_v42  ;;  %8172 = vmatprep.subr.bf16.mxu0 %v18336_v39  ;;  %v8446_v42 = vld [vmem:[#allocation14 + $0x88] sm:$0xff]  ;;  %v18372_v36 = vcombine.high %v8445_v26, %v8449_v22 }
 0x5a6   : > { %8318 = vmatprep.subr.bf16.mxu1 %v18338_v46  ;;  %v8450_v39 = vld [vmem:[#allocation14 + $0xa8] sm:$0xff]  ;;  %v18363_v46 = vcombine.low %v8437_v20, %v8441_v30  ;;  %v8481_v20 = vld [vmem:[#allocation14 + $0x1a0] sm:$0xff] }
 0x5a7   : > { %v18374_v2 = vcombine.high %v8446_v42, %v8450_v39  ;;  %v8478_v30 = vld [vmem:[#allocation14 + $0x188] sm:$0xff] }
 0x5a8   : > { %8173 = vmatpush1.bf16.msra.mxu0 %v18335_v32  ;;  %v8457_v32 = vld [vmem:[#allocation14 + $0xe0] sm:$0xff] }
 0x5a9   : > { %8319 = vmatpush1.bf16.msra.mxu1 %v18337_v10  ;;  %8174 = vmatprep.subr.bf16.mxu0 %v18344_v23  ;;  %v8454_v10 = vld [vmem:[#allocation14 + $0xc8] sm:$0xff]  ;;  %v18380_v33 = vcombine.high %v8453_v1, %v8457_v32 }
 0x5aa   : > { %8320 = vmatprep.subr.bf16.mxu1 %v18346_v13  ;;  %v8458_v23 = vld [vmem:[#allocation14 + $0xe8] sm:$0xff]  ;;  %v18373_v13 = vcombine.low %v8446_v42, %v8450_v39  ;;  %v18405_v39 = vcombine.low %v8478_v30, %v8482_v40 }
 0x5ab   : > { %v8490_v42 = vld [vmem:[#allocation14 + $0x1e8] sm:$0xff] }
 0x5ac   : > { %8175 = vmatpush1.bf16.msra.mxu0 %v18343_v12  ;;  %v8466_v12 = vld [vmem:[#allocation14 + $0x128] sm:$0xff] }
 0x5ad   : > { %8321 = vmatpush1.bf16.msra.mxu1 %v18345_v59  ;;  %8176 = vmatprep.subr.bf16.mxu0 %v18352_v17  ;;  %v18379_v59 = vcombine.low %v8453_v1, %v8457_v32  ;;  %v18381_v17 = vcombine.low %v8454_v10, %v8458_v23  ;;  %v18390_v31 = vcombine.high %v8462_v55, %v8466_v12  ;;  %v8498_v1 = vld [vmem:[#allocation14 + $0x228] sm:$0xff] }
 0x5ae   : > { %8322 = vmatprep.subr.bf16.mxu1 %v18354_v44  ;;  %v18388_v44 = vcombine.high %v8461_v16, %v8465_v35 }
 0x5b0   : > { %8177 = vmatpush1.bf16.msra.mxu0 %v18351_v7  ;;  %v8474_v7 = vld [vmem:[#allocation14 + $0x168] sm:$0xff] }
 0x5b1   : > { %8323 = vmatpush1.bf16.msra.mxu1 %v18353_v52  ;;  %14573 = vmatprep.subr.bf16.mxu0 %v18356_v47  ;;  %v18389_v52 = vcombine.low %v8462_v55, %v8466_v12  ;;  %v18396_v47 = vcombine.high %v8469_v6, %v8473_v51 }
 0x5b2   : > { %15157 = vmatprep.subr.bf16.mxu1 %v18358_v53  ;;  %v8477_v53 = vld [vmem:[#allocation14 + $0x180] sm:$0xff] }
 0x5b3   : > { %8179 = vmatmul.mubr.bf16.vlgmr.msra.gmra.mrb[48].mxu0 %v22574_v15 }
 0x5b4   : > { %8325 = vmatmul.mubr.bf16.vlgmr.msra.gmra.mrb[48].mxu1 %v22574_v15  ;;  %8188 = vmatprep.mubr.bf16.mxu0 %v22602_v54  ;;  %v18371_v15 = vcombine.low %v8445_v26, %v8449_v22  ;;  %v8489_v26 = vld [vmem:[#allocation14 + $0x1e0] sm:$0xff]  ;;  %v8486_v22 = vld [vmem:[#allocation14 + $0x1c8] sm:$0xff] }
 0x5b5   : > { %8334 = vmatprep.mubr.bf16.mxu1 %v22602_v54  ;;  %14574 = vmatpush1.bf16.msra.mxu0 %v18355_v25  ;;  %v18382_v54 = vcombine.high %v8454_v10, %v8458_v23  ;;  %v18397_v25 = vcombine.low %v8470_v3, %v8474_v7  ;;  %v18413_v10 = vcombine.low %v8486_v22, %v8490_v42 }
 0x5b6   : > { %15158 = vmatpush1.bf16.msra.mxu1 %v18357_v8  ;;  %14575 = vmatprep.subr.bf16.mxu0 %v18364_v60  ;;  %v18404_v8 = vcombine.high %v8477_v53, %v8481_v20  ;;  %v18406_v60 = vcombine.high %v8478_v30, %v8482_v40 }
 0x5b7   : > { %15159 = vmatprep.subr.bf16.mxu1 %v18366_v58  ;;  %v8485_v58 = vld [vmem:[#allocation14 + $0x1c0] sm:$0xff] }
 0x5b8   : > { %v18411_v32 = vcombine.low %v8485_v58, %v8489_v26 }
 0x5b9   : > { %14576 = vmatpush1.bf16.msra.mxu0 %v18363_v46  ;;  %v18412_v46 = vcombine.high %v8485_v58, %v8489_v26 }
 0x5ba   : > { %15160 = vmatpush1.bf16.msra.mxu1 %v18365_v45  ;;  %14577 = vmatprep.subr.bf16.mxu0 %v18372_v36  ;;  %v8493_v45 = vld [vmem:[#allocation14 + $0x200] sm:$0xff] }
 0x5bb   : > { %8189 = vmatmul.mubr.bf16.gmra.mrb[52].mxu0 %v22597_v37  ;;  %15161 = vmatprep.subr.bf16.mxu1 %v18374_v2  ;;  %v8497_v36 = vld [vmem:[#allocation14 + $0x220] sm:$0xff]  ;;  %v8494_v2 = vld [vmem:[#allocation14 + $0x208] sm:$0xff] }
 0x5bc   : > { %8335 = vmatmul.mubr.bf16.gmra.mrb[52].mxu1 %v22597_v37  ;;  %8198 = vmatprep.mubr.bf16.mxu0 %v22626_v21  ;;  %v18387_v37 = vcombine.low %v8461_v16, %v8465_v35  ;;  %v18420_v23 = vcombine.high %v8493_v45, %v8497_v36  ;;  %v8506_v16 = vld [vmem:[#allocation14 + $0x268] sm:$0xff]  ;;  %v18421_v35 = vcombine.low %v8494_v2, %v8498_v1 }
 0x5bd   : > { %8344 = vmatprep.mubr.bf16.mxu1 %v22626_v21  ;;  %14578 = vmatpush1.bf16.msra.mxu0 %v18371_v15  ;;  %v18398_v21 = vcombine.high %v8470_v3, %v8474_v7  ;;  %v18422_v15 = vcombine.high %v8494_v2, %v8498_v1 }
 0x5be   : > { %15162 = vmatpush1.bf16.msra.mxu1 %v18373_v13  ;;  %14579 = vmatprep.subr.bf16.mxu0 %v18380_v33  ;;  %v8501_v13 = vld [vmem:[#allocation14 + $0x240] sm:$0xff] }
 0x5bf   : > { %15163 = vmatprep.subr.bf16.mxu1 %v18382_v54  ;;  %v8505_v33 = vld [vmem:[#allocation14 + $0x260] sm:$0xff]  ;;  %v8502_v54 = vld [vmem:[#allocation14 + $0x248] sm:$0xff] }
 0x5c0   : > { %v18428_v55 = vcombine.high %v8501_v13, %v8505_v33  ;;  %v18430_v12 = vcombine.high %v8502_v54, %v8506_v16  ;;  %v18427_v6 = vcombine.low %v8501_v13, %v8505_v33  ;;  %v18429_v51 = vcombine.low %v8502_v54, %v8506_v16 }
 0x5c1   : > { %14580 = vmatpush1.bf16.msra.mxu0 %v18379_v59  ;;  %v8509_v59 = vld [vmem:[#allocation14 + $0x280] sm:$0xff] }
 0x5c2   : > { %15164 = vmatpush1.bf16.msra.mxu1 %v18381_v17  ;;  %14581 = vmatprep.subr.bf16.mxu0 %v18388_v44  ;;  %v8513_v17 = vld [vmem:[#allocation14 + $0x2a0] sm:$0xff]  ;;  %v8510_v44 = vld [vmem:[#allocation14 + $0x288] sm:$0xff] }
 0x5c3   : > { %8199 = vmatmul.mubr.bf16.gmra.mrb[56].mxu0 %v22621_v0  ;;  %15165 = vmatprep.subr.bf16.mxu1 %v18390_v31  ;;  %v8514_v31 = vld [vmem:[#allocation14 + $0x2a8] sm:$0xff]  ;;  %v18436_v3 = vcombine.high %v8509_v59, %v8513_v17 }
 0x5c4   : > { %8345 = vmatmul.mubr.bf16.gmra.mrb[56].mxu1 %v22621_v0  ;;  %8208 = vmatprep.mubr.bf16.mxu0 %v22646_v57  ;;  %v18403_v0 = vcombine.low %v8477_v53, %v8481_v20  ;;  %v18438_v7 = vcombine.high %v8510_v44, %v8514_v31  ;;  %v18435_v53 = vcombine.low %v8509_v59, %v8513_v17 }
 0x5c5   : > { %8354 = vmatprep.mubr.bf16.mxu1 %v22646_v57  ;;  %14582 = vmatpush1.bf16.msra.mxu0 %v18387_v37  ;;  %v18414_v57 = vcombine.high %v8486_v22, %v8490_v42  ;;  %v8517_v37 = vld [vmem:[#allocation14 + $0x2c0] sm:$0xff]  ;;  %v18437_v20 = vcombine.low %v8510_v44, %v8514_v31 }
 0x5c6   : > { %15166 = vmatpush1.bf16.msra.mxu1 %v18389_v52  ;;  %14583 = vmatprep.subr.bf16.mxu0 %v18396_v47  ;;  %v8521_v52 = vld [vmem:[#allocation14 + $0x2e0] sm:$0xff]  ;;  %v8518_v47 = vld [vmem:[#allocation14 + $0x2c8] sm:$0xff] }
 0x5c7   : > { %15167 = vmatprep.subr.bf16.mxu1 %v18398_v21  ;;  %v8522_v21 = vld [vmem:[#allocation14 + $0x2e8] sm:$0xff]  ;;  %v18444_v30 = vcombine.high %v8517_v37, %v8521_v52  ;;  %v18443_v58 = vcombine.low %v8517_v37, %v8521_v52 }
 0x5c8   : > { %v18446_v40 = vcombine.high %v8518_v47, %v8522_v21  ;;  %v18445_v26 = vcombine.low %v8518_v47, %v8522_v21 }
 0x5c9   : > { %14584 = vmatpush1.bf16.msra.mxu0 %v18395_v61  ;;  %v8525_v61 = vld [vmem:[#allocation14 + $0x300] sm:$0xff] }
 0x5ca   : > { %15168 = vmatpush1.bf16.msra.mxu1 %v18397_v25  ;;  %14585 = vmatprep.subr.bf16.mxu0 %v18404_v8  ;;  %v8529_v25 = vld [vmem:[#allocation14 + $0x320] sm:$0xff]  ;;  %v8526_v8 = vld [vmem:[#allocation14 + $0x308] sm:$0xff] }
 0x5cb   : > { %8209 = vmatmul.mubr.bf16.gmra.mrb[60].mxu0 %v22642_v24  ;;  %15169 = vmatprep.subr.bf16.mxu1 %v18406_v60  ;;  %v8530_v60 = vld [vmem:[#allocation14 + $0x328] sm:$0xff]  ;;  %v18452_v22 = vcombine.high %v8525_v61, %v8529_v25 }
 0x5cc   : > { %8355 = vmatmul.mubr.bf16.gmra.mrb[60].mxu1 %v22642_v24  ;;  %14605 = vmatprep.mubr.bf16.mxu0 %v22088_v50  ;;  %v18419_v24 = vcombine.low %v8493_v45, %v8497_v36  ;;  %v18454_v42 = vcombine.high %v8526_v8, %v8530_v60  ;;  %v18451_v45 = vcombine.low %v8525_v61, %v8529_v25 }
 0x5cd   : > { %14586 = vmatpush1.bf16.msra.mxu0 %v18403_v0  ;;  %15189 = vmatprep.mubr.bf16.mxu1 %v22088_v50  ;;  %v8533_v0 = vld [vmem:[#allocation14 + $0x340] sm:$0xff]  ;;  %v18453_v36 = vcombine.low %v8526_v8, %v8530_v60 }
 0x5ce   : > { %15170 = vmatpush1.bf16.msra.mxu1 %v18405_v39  ;;  %14587 = vmatprep.subr.bf16.mxu0 %v18412_v46  ;;  %v8537_v39 = vld [vmem:[#allocation14 + $0x360] sm:$0xff]  ;;  %v8534_v46 = vld [vmem:[#allocation14 + $0x348] sm:$0xff] }
 0x5cf   : > { %15171 = vmatprep.subr.bf16.mxu1 %v18414_v57  ;;  %v8538_v57 = vld [vmem:[#allocation14 + $0x368] sm:$0xff]  ;;  %v18460_v2 = vcombine.high %v8533_v0, %v8537_v39  ;;  %v18459_v13 = vcombine.low %v8533_v0, %v8537_v39 }
 0x5d0   : > { %v18462_v1 = vcombine.high %v8534_v46, %v8538_v57  ;;  %v18461_v33 = vcombine.low %v8534_v46, %v8538_v57 }
 0x5d1   : > { %14588 = vmatpush1.bf16.msra.mxu0 %v18411_v32  ;;  %v8541_v32 = vld [vmem:[#allocation14 + $0x380] sm:$0xff] }
 0x5d2   : > { %15172 = vmatpush1.bf16.msra.mxu1 %v18413_v10  ;;  %14589 = vmatprep.subr.bf16.mxu0 %v18420_v23  ;;  %v8545_v10 = vld [vmem:[#allocation14 + $0x3a0] sm:$0xff]  ;;  %v8542_v23 = vld [vmem:[#allocation14 + $0x388] sm:$0xff] }
 0x5d3   : > { %15173 = vmatprep.subr.bf16.mxu1 %v18422_v15  ;;  %v8546_v15 = vld [vmem:[#allocation14 + $0x3a8] sm:$0xff]  ;;  %v18468_v54 = vcombine.high %v8541_v32, %v8545_v10  ;;  %v18467_v59 = vcombine.low %v8541_v32, %v8545_v10 }
 0x5d4   : > { %v18470_v16 = vcombine.high %v8542_v23, %v8546_v15  ;;  %v18469_v17 = vcombine.low %v8542_v23, %v8546_v15 }
 0x5d5   : > { %14590 = vmatpush1.bf16.msra.mxu0 %v18419_v24  ;;  %v8549_v24 = vld [vmem:[#allocation14 + $0x3c0] sm:$0xff] }
 0x5d6   : > { %15174 = vmatpush1.bf16.msra.mxu1 %v18421_v35  ;;  %14591 = vmatprep.subr.bf16.mxu0 %v18428_v55  ;;  %v8553_v35 = vld [vmem:[#allocation14 + $0x3e0] sm:$0xff]  ;;  %v8550_v55 = vld [vmem:[#allocation14 + $0x3c8] sm:$0xff] }
 0x5d7   : > { %15175 = vmatprep.subr.bf16.mxu1 %v18430_v12  ;;  %v8554_v12 = vld [vmem:[#allocation14 + $0x3e8] sm:$0xff]  ;;  %v18476_v44 = vcombine.high %v8549_v24, %v8553_v35  ;;  %v18475_v37 = vcombine.low %v8549_v24, %v8553_v35 }
 0x5d8   : > { %v18478_v31 = vcombine.high %v8550_v55, %v8554_v12  ;;  %v18477_v52 = vcombine.low %v8550_v55, %v8554_v12 }
 0x5d9   : > { %14592 = vmatpush1.bf16.msra.mxu0 %v18427_v6  ;;  %v8557_v6 = vld [vmem:[#allocation14 + $0x400] sm:$0xff] }
 0x5da   : > { %15176 = vmatpush1.bf16.msra.mxu1 %v18429_v51  ;;  %14593 = vmatprep.subr.bf16.mxu0 %v18436_v3  ;;  %v8561_v51 = vld [vmem:[#allocation14 + $0x420] sm:$0xff]  ;;  %v8558_v3 = vld [vmem:[#allocation14 + $0x408] sm:$0xff] }
 0x5db   : > { %15177 = vmatprep.subr.bf16.mxu1 %v18438_v7  ;;  %v8562_v7 = vld [vmem:[#allocation14 + $0x428] sm:$0xff]  ;;  %v18484_v47 = vcombine.high %v8557_v6, %v8561_v51  ;;  %v18483_v61 = vcombine.low %v8557_v6, %v8561_v51 }
 0x5dc   : > { %v18486_v21 = vcombine.high %v8558_v3, %v8562_v7  ;;  %v18485_v25 = vcombine.low %v8558_v3, %v8562_v7 }
 0x5dd   : > { %14594 = vmatpush1.bf16.msra.mxu0 %v18435_v53  ;;  %v8565_v53 = vld [vmem:[#allocation14 + $0x440] sm:$0xff] }
 0x5de   : > { %15178 = vmatpush1.bf16.msra.mxu1 %v18437_v20  ;;  %14595 = vmatprep.subr.bf16.mxu0 %v18444_v30  ;;  %v8569_v20 = vld [vmem:[#allocation14 + $0x460] sm:$0xff]  ;;  %v8566_v30 = vld [vmem:[#allocation14 + $0x448] sm:$0xff] }
 0x5df   : > { %15179 = vmatprep.subr.bf16.mxu1 %v18446_v40  ;;  %v8570_v40 = vld [vmem:[#allocation14 + $0x468] sm:$0xff]  ;;  %v18492_v8 = vcombine.high %v8565_v53, %v8569_v20  ;;  %v18491_v0 = vcombine.low %v8565_v53, %v8569_v20 }
 0x5e0   : > { %v18494_v60 = vcombine.high %v8566_v30, %v8570_v40  ;;  %v18493_v39 = vcombine.low %v8566_v30, %v8570_v40 }
 0x5e1   : > { %14596 = vmatpush1.bf16.msra.mxu0 %v18443_v58  ;;  %v8573_v58 = vld [vmem:[#allocation14 + $0x480] sm:$0xff] }
 0x5e2   : > { %15180 = vmatpush1.bf16.msra.mxu1 %v18445_v26  ;;  %14597 = vmatprep.subr.bf16.mxu0 %v18452_v22  ;;  %v8577_v26 = vld [vmem:[#allocation14 + $0x4a0] sm:$0xff]  ;;  %v8574_v22 = vld [vmem:[#allocation14 + $0x488] sm:$0xff] }
 0x5e3   : > { %15181 = vmatprep.subr.bf16.mxu1 %v18454_v42  ;;  %v8578_v42 = vld [vmem:[#allocation14 + $0x4a8] sm:$0xff]  ;;  %v18500_v46 = vcombine.high %v8573_v58, %v8577_v26  ;;  %v18499_v32 = vcombine.low %v8573_v58, %v8577_v26 }
 0x5e4   : > { %v18502_v57 = vcombine.high %v8574_v22, %v8578_v42  ;;  %v18501_v10 = vcombine.low %v8574_v22, %v8578_v42  ;;  %v8613_v22 = vld [vmem:[#allocation14 + $0x5c0] sm:$0xff] }
 0x5e5   : > { %14598 = vmatpush1.bf16.msra.mxu0 %v18451_v45  ;;  %v8581_v45 = vld [vmem:[#allocation14 + $0x4c0] sm:$0xff] }
 0x5e6   : > { %15182 = vmatpush1.bf16.msra.mxu1 %v18453_v36  ;;  %14599 = vmatprep.subr.bf16.mxu0 %v18460_v2  ;;  %v8585_v36 = vld [vmem:[#allocation14 + $0x4e0] sm:$0xff]  ;;  %v8582_v2 = vld [vmem:[#allocation14 + $0x4c8] sm:$0xff] }
 0x5e7   : > { %15183 = vmatprep.subr.bf16.mxu1 %v18462_v1  ;;  %v8586_v1 = vld [vmem:[#allocation14 + $0x4e8] sm:$0xff]  ;;  %v18508_v23 = vcombine.high %v8581_v45, %v8585_v36  ;;  %v18507_v24 = vcombine.low %v8581_v45, %v8585_v36  ;;  %v8617_v42 = vld [vmem:[#allocation14 + $0x5e0] sm:$0xff] }
 0x5e8   : > { %v18510_v15 = vcombine.high %v8582_v2, %v8586_v1  ;;  %v18509_v35 = vcombine.low %v8582_v2, %v8586_v1  ;;  %v18540_v2 = vcombine.high %v8613_v22, %v8617_v42 }
 0x5e9   : > { %14600 = vmatpush1.bf16.msra.mxu0 %v18459_v13  ;;  %v8589_v13 = vld [vmem:[#allocation14 + $0x500] sm:$0xff] }
 0x5ea   : > { %15184 = vmatpush1.bf16.msra.mxu1 %v18461_v33  ;;  %14601 = vmatprep.subr.bf16.mxu0 %v18468_v54  ;;  %v8593_v33 = vld [vmem:[#allocation14 + $0x520] sm:$0xff]  ;;  %v8590_v54 = vld [vmem:[#allocation14 + $0x508] sm:$0xff] }
 0x5eb   : > { %15185 = vmatprep.subr.bf16.mxu1 %v18470_v16  ;;  %v8594_v16 = vld [vmem:[#allocation14 + $0x528] sm:$0xff]  ;;  %v18516_v55 = vcombine.high %v8589_v13, %v8593_v33  ;;  %v18515_v6 = vcombine.low %v8589_v13, %v8593_v33 }
 0x5ec   : > { %v18518_v12 = vcombine.high %v8590_v54, %v8594_v16  ;;  %v18517_v51 = vcombine.low %v8590_v54, %v8594_v16  ;;  %v18539_v54 = vcombine.low %v8613_v22, %v8617_v42 }
 0x5ed   : > { %14602 = vmatpush1.bf16.msra.mxu0 %v18467_v59  ;;  %v8597_v59 = vld [vmem:[#allocation14 + $0x540] sm:$0xff] }
 0x5ee   : > { %15186 = vmatpush1.bf16.msra.mxu1 %v18469_v17  ;;  %14603 = vmatprep.subr.bf16.mxu0 %v18476_v44  ;;  %v8601_v17 = vld [vmem:[#allocation14 + $0x560] sm:$0xff]  ;;  %v8598_v44 = vld [vmem:[#allocation14 + $0x548] sm:$0xff] }
 0x5ef   : > { %15187 = vmatprep.subr.bf16.mxu1 %v18478_v31  ;;  %v8602_v31 = vld [vmem:[#allocation14 + $0x568] sm:$0xff]  ;;  %v18524_v3 = vcombine.high %v8597_v59, %v8601_v17  ;;  %v18523_v30 = vcombine.low %v8597_v59, %v8601_v17 }
 0x5f0   : > { %v18526_v7 = vcombine.high %v8598_v44, %v8602_v31 }
 0x5f1   : > { %14604 = vmatpush1.bf16.msra.mxu0 %v18475_v37  ;;  %v8605_v37 = vld [vmem:[#allocation14 + $0x580] sm:$0xff] }
 0x5f2   : > { %15188 = vmatpush1.bf16.msra.mxu1 %v18477_v52  ;;  %14646 = vmatprep.subr.bf16.mxu0 %v18484_v47  ;;  %v8609_v52 = vld [vmem:[#allocation14 + $0x5a0] sm:$0xff]  ;;  %v8606_v47 = vld [vmem:[#allocation14 + $0x588] sm:$0xff] }
 0x5f3   : > { %15230 = vmatprep.subr.bf16.mxu1 %v18486_v21  ;;  %v8610_v21 = vld [vmem:[#allocation14 + $0x5a8] sm:$0xff]  ;;  %v18531_v45 = vcombine.low %v8605_v37, %v8609_v52 }
 0x5f4   : > { %14606 = vmatmul.mubr.bf16.vlgmr.msra.gmra.mrb[64].mxu0 %v22092_v5  ;;  %v18534_v26 = vcombine.high %v8606_v47, %v8610_v21  ;;  %v18533_v36 = vcombine.low %v8606_v47, %v8610_v21 }
 0x5f5   : > { %14647 = vmatpush1.bf16.msra.mxu0 %v18483_v61  ;;  %15190 = vmatmul.mubr.bf16.vlgmr.msra.gmra.mrb[64].mxu1 %v22092_v5 }
 0x5f6   : > { %15231 = vmatpush1.bf16.msra.mxu1 %v18485_v25  ;;  %14648 = vmatprep.subr.bf16.mxu0 %v18492_v8  ;;  %v18525_v25 = vcombine.low %v8598_v44, %v8602_v31  ;;  %v18532_v8 = vcombine.high %v8605_v37, %v8609_v52  ;;  %v8629_v44 = vld [vmem:[#allocation14 + $0x640] sm:$0xff] }
 0x5f7   : > { %15232 = vmatprep.subr.bf16.mxu1 %v18494_v60  ;;  %14615 = vmatprep.mubr.bf16.mxu0 %v22098_v18  ;;  %v8633_v31 = vld [vmem:[#allocation14 + $0x660] sm:$0xff] }
 0x5f8   : > { %15199 = vmatprep.mubr.bf16.mxu1 %v22098_v18  ;;  %v18556_v47 = vcombine.high %v8629_v44, %v8633_v31 }
 0x5f9   : > { %14649 = vmatpush1.bf16.msra.mxu0 %v18491_v0 }
 0x5fa   : > { %15233 = vmatpush1.bf16.msra.mxu1 %v18493_v39  ;;  %14650 = vmatprep.subr.bf16.mxu0 %v18500_v46  ;;  %v8614_v46 = vld [vmem:[#allocation14 + $0x5c8] sm:$0xff] }
 0x5fb   : > { %15234 = vmatprep.subr.bf16.mxu1 %v18502_v57  ;;  %v8618_v57 = vld [vmem:[#allocation14 + $0x5e8] sm:$0xff] }
 0x5fc   : > { %14616 = vmatmul.mubr.bf16.gmra.mrb[68].mxu0 %v22100_v19  ;;  %v18542_v1 = vcombine.high %v8614_v46, %v8618_v57 }
 0x5fd   : > { %14651 = vmatpush1.bf16.msra.mxu0 %v18499_v32  ;;  %15200 = vmatmul.mubr.bf16.gmra.mrb[68].mxu1 %v22100_v19  ;;  %v8621_v32 = vld [vmem:[#allocation14 + $0x600] sm:$0xff] }
 0x5fe   : > { %15235 = vmatpush1.bf16.msra.mxu1 %v18501_v10  ;;  %14652 = vmatprep.subr.bf16.mxu0 %v18508_v23  ;;  %v8625_v10 = vld [vmem:[#allocation14 + $0x620] sm:$0xff]  ;;  %v8622_v23 = vld [vmem:[#allocation14 + $0x608] sm:$0xff] }
 0x5ff   : > { %15236 = vmatprep.subr.bf16.mxu1 %v18510_v15  ;;  %14625 = vmatprep.mubr.bf16.mxu0 %v22108_v28  ;;  %v8626_v15 = vld [vmem:[#allocation14 + $0x628] sm:$0xff]  ;;  %v18547_v37 = vcombine.low %v8621_v32, %v8625_v10 }
 0x600   : > { %15209 = vmatprep.mubr.bf16.mxu1 %v22108_v28  ;;  %v18550_v17 = vcombine.high %v8622_v23, %v8626_v15  ;;  %v18549_v52 = vcombine.low %v8622_v23, %v8626_v15  ;;  %v8645_v23 = vld [vmem:[#allocation14 + $0x6c0] sm:$0xff] }
 0x601   : > { %14653 = vmatpush1.bf16.msra.mxu0 %v18507_v24  ;;  %v8649_v15 = vld [vmem:[#allocation14 + $0x6e0] sm:$0xff] }
 0x602   : > { %15237 = vmatpush1.bf16.msra.mxu1 %v18509_v35  ;;  %14654 = vmatprep.subr.bf16.mxu0 %v18516_v55  ;;  %v18541_v35 = vcombine.low %v8614_v46, %v8618_v57  ;;  %v18548_v55 = vcombine.high %v8621_v32, %v8625_v10  ;;  %v18555_v46 = vcombine.low %v8629_v44, %v8633_v31 }
 0x603   : > { %15238 = vmatprep.subr.bf16.mxu1 %v18518_v12 }
 0x604   : > { %14626 = vmatmul.mubr.bf16.gmra.mrb[72].mxu0 %v22112_v29 }
 0x605   : > { %14655 = vmatpush1.bf16.msra.mxu0 %v18515_v6  ;;  %v22711_v53 = vpop.f32.mrb[32].mxu0  ;;  %v22713_v20 = vpop.f32.mrb[32].mxu1  ;;  %15210 = vmatmul.mubr.bf16.gmra.mrb[72].mxu1 %v22112_v29 }
 0x606   : > { %15239 = vmatpush1.bf16.msra.mxu1 %v18517_v51  ;;  %v22716_v40 = vpop.f32.mrb[33].mxu0  ;;  %v22718_v61 = vpop.f32.mrb[33].mxu1  ;;  %14656 = vmatprep.subr.bf16.mxu0 %v18524_v3  ;;  %v8630_v3 = vld [vmem:[#allocation14 + $0x648] sm:$0xff] }
 0x607   : > { %15240 = vmatprep.subr.bf16.mxu1 %v18526_v7  ;;  %v22720_v60 = vpop.f32.mrb[34].mxu0  ;;  %v22722_v58 = vpop.f32.mrb[34].mxu1  ;;  %14635 = vmatprep.mubr.bf16.mxu0 %v22118_v38  ;;  %v8634_v7 = vld [vmem:[#allocation14 + $0x668] sm:$0xff] }
 0x608   : > { %v22725_v0 = vpop.f32.mrb[35].mxu0  ;;  %v22727_v39 = vpop.f32.mrb[35].mxu1  ;;  %15219 = vmatprep.mubr.bf16.mxu1 %v22118_v38  ;;  %v18558_v21 = vcombine.high %v8630_v3, %v8634_v7 }
 0x609   : > { %14657 = vmatpush1.bf16.msra.mxu0 %v18523_v30  ;;  %v8637_v30 = vld [vmem:[#allocation14 + $0x680] sm:$0xff] }
 0x60a   : > { %15241 = vmatpush1.bf16.msra.mxu1 %v18525_v25  ;;  %14658 = vmatprep.subr.bf16.mxu0 %v18532_v8  ;;  %v8641_v25 = vld [vmem:[#allocation14 + $0x6a0] sm:$0xff]  ;;  %v8638_v8 = vld [vmem:[#allocation14 + $0x688] sm:$0xff] }
 0x60b   : > { %15242 = vmatprep.subr.bf16.mxu1 %v18534_v26  ;;  %v8642_v26 = vld [vmem:[#allocation14 + $0x6a8] sm:$0xff]  ;;  %v18563_v44 = vcombine.low %v8637_v30, %v8641_v25 }
 0x60c   : > { %14636 = vmatmul.mubr.bf16.gmra.mrb[76].mxu0 %v22122_v43  ;;  %v18566_v10 = vcombine.high %v8638_v8, %v8642_v26  ;;  %v18565_v31 = vcombine.low %v8638_v8, %v8642_v26 }
 0x60d   : > { %14659 = vmatpush1.bf16.msra.mxu0 %v18531_v45  ;;  %v22731_v13 = vpop.f32.mrb[36].mxu0  ;;  %v22733_v33 = vpop.f32.mrb[36].mxu1  ;;  %15220 = vmatmul.mubr.bf16.gmra.mrb[76].mxu1 %v22122_v43 }
 0x60e   : > { %15243 = vmatpush1.bf16.msra.mxu1 %v18533_v36  ;;  %v22736_v16 = vpop.f32.mrb[37].mxu0  ;;  %v22738_v24 = vpop.f32.mrb[37].mxu1  ;;  %14660 = vmatprep.subr.bf16.mxu0 %v18540_v2  ;;  %v18557_v36 = vcombine.low %v8630_v3, %v8634_v7  ;;  %v18564_v2 = vcombine.high %v8637_v30, %v8641_v25  ;;  %v18572_v3 = vcombine.high %v8645_v23, %v8649_v15 }
 0x60f   : > { %15244 = vmatprep.subr.bf16.mxu1 %v18542_v1  ;;  %v22740_v12 = vpop.f32.mrb[38].mxu0  ;;  %v22742_v59 = vpop.f32.mrb[38].mxu1  ;;  %14678 = vmatprep.mubr.bf16.mxu0 %v22132_v48 }
 0x610   : > { %v22745_v6 = vpop.f32.mrb[39].mxu0  ;;  %v22747_v51 = vpop.f32.mrb[39].mxu1  ;;  %15262 = vmatprep.mubr.bf16.mxu1 %v22132_v48 }
 0x611   : > { %14661 = vmatpush1.bf16.msra.mxu0 %v18539_v54 }
 0x612   : > { %15245 = vmatpush1.bf16.msra.mxu1 %v18541_v35  ;;  %14662 = vmatprep.subr.bf16.mxu0 %v18548_v55  ;;  %v8646_v55 = vld [vmem:[#allocation14 + $0x6c8] sm:$0xff] }
 0x613   : > { %15246 = vmatprep.subr.bf16.mxu1 %v18550_v17  ;;  %v8650_v17 = vld [vmem:[#allocation14 + $0x6e8] sm:$0xff] }
 0x614   : > { %v18574_v7 = vcombine.high %v8646_v55, %v8650_v17  ;;  %v18573_v25 = vcombine.low %v8646_v55, %v8650_v17 }
 0x615   : > { %14663 = vmatpush1.bf16.msra.mxu0 %v18547_v37  ;;  %v22750_v22 = vpop.f32.mrb[40].mxu0  ;;  %v22752_v42 = vpop.f32.mrb[40].mxu1  ;;  %v8653_v37 = vld [vmem:[#allocation14 + $0x700] sm:$0xff] }
 0x616   : > { %15247 = vmatpush1.bf16.msra.mxu1 %v18549_v52  ;;  %v22754_v57 = vpop.f32.mrb[41].mxu0  ;;  %v22756_v45 = vpop.f32.mrb[41].mxu1  ;;  %14664 = vmatprep.subr.bf16.mxu0 %v18556_v47  ;;  %v8657_v52 = vld [vmem:[#allocation14 + $0x720] sm:$0xff]  ;;  %v8654_v47 = vld [vmem:[#allocation14 + $0x708] sm:$0xff] }
 0x617   : > { %23986 = vst [vmem:[#allocation73_spill] sm:$0xff] %v22756_v45  ;;  %15248 = vmatprep.subr.bf16.mxu1 %v18558_v21  ;;  %v22758_v1 = vpop.f32.mrb[42].mxu0  ;;  %v22760_v32 = vpop.f32.mrb[42].mxu1  ;;  %v8658_v21 = vld [vmem:[#allocation14 + $0x728] sm:$0xff]  ;;  %v18580_v8 = vcombine.high %v8653_v37, %v8657_v52 }
 0x618   : > { %23987 = vst [vmem:[#allocation74_spill] sm:$0xff] %v22758_v1  ;;  %23988 = vst [vmem:[#allocation75_spill] sm:$0xff] %v22760_v32  ;;  %v22762_v54 = vpop.f32.mrb[43].mxu0  ;;  %v22764_v35 = vpop.f32.mrb[43].mxu1  ;;  %v18581_v55 = vcombine.low %v8654_v47, %v8658_v21  ;;  %v24010_v45 = vld [vmem:[#allocation27_spill] sm:$0xff] }
 0x619   : > { %23989 = vst [vmem:[#allocation76_spill] sm:$0xff] %v22762_v54  ;;  %23990 = vst [vmem:[#allocation77_spill] sm:$0xff] %v22764_v35  ;;  %14665 = vmatpush1.bf16.msra.mxu0 %v18555_v46  ;;  %v18571_v35 = vcombine.low %v8645_v23, %v8649_v15  ;;  %v8662_v23 = vld [vmem:[#allocation14 + $0x748] sm:$0xff] }
 0x61a   : > { %15249 = vmatpush1.bf16.msra.mxu1 %v18557_v36  ;;  %14666 = vmatprep.subr.bf16.mxu0 %v18564_v2  ;;  %v18582_v36 = vcombine.high %v8654_v47, %v8658_v21  ;;  %v8661_v2 = vld [vmem:[#allocation14 + $0x740] sm:$0xff]  ;;  %v8666_v15 = vld [vmem:[#allocation14 + $0x768] sm:$0xff] }
 0x61b   : > { %15250 = vmatprep.subr.bf16.mxu1 %v18566_v10  ;;  %v8665_v10 = vld [vmem:[#allocation14 + $0x760] sm:$0xff] }
 0x61c   : > { %v18588_v17 = vcombine.high %v8661_v2, %v8665_v10 }
 0x61d   : > { %14667 = vmatpush1.bf16.msra.mxu0 %v18563_v44  ;;  %v22766_v32 = vpop.f32.mrb[44].mxu0  ;;  %v22768_v54 = vpop.f32.mrb[44].mxu1 }
 0x61e   : > { %23991 = vst [vmem:[#allocation78_spill] sm:$0xff] %v22766_v32  ;;  %23992 = vst [vmem:[#allocation79_spill] sm:$0xff] %v22768_v54  ;;  %15251 = vmatpush1.bf16.msra.mxu1 %v18565_v31  ;;  %v22770_v1 = vpop.f32.mrb[45].mxu0  ;;  %v22772_v30 = vpop.f32.mrb[45].mxu1  ;;  %14668 = vmatprep.subr.bf16.mxu0 %v18572_v3  ;;  %v18579_v31 = vcombine.low %v8653_v37, %v8657_v52  ;;  %v18590_v3 = vcombine.high %v8662_v23, %v8666_v15  ;;  %v8681_v37 = vld [vmem:[#allocation14 + $0x7e0] sm:$0xff]  ;;  %v8678_v52 = vld [vmem:[#allocation14 + $0x7c8] sm:$0xff] }
 0x61f   : > { %23993 = vst [vmem:[#allocation80_spill] sm:$0xff] %v22770_v1  ;;  %23994 = vst [vmem:[#allocation81_spill] sm:$0xff] %v22772_v30  ;;  %15252 = vmatprep.subr.bf16.mxu1 %v18574_v7  ;;  %v22774_v26 = vpop.f32.mrb[46].mxu0  ;;  %v22776_v46 = vpop.f32.mrb[46].mxu1  ;;  %v8669_v7 = vld [vmem:[#allocation14 + $0x780] sm:$0xff]  ;;  %v8674_v30 = vld [vmem:[#allocation14 + $0x7a8] sm:$0xff]  ;;  %v18587_v1 = vcombine.low %v8661_v2, %v8665_v10 }
 0x620   : > { %23995 = vst [vmem:[#allocation82_spill] sm:$0xff] %v22774_v26  ;;  %23996 = vst [vmem:[#allocation83_spill] sm:$0xff] %v22776_v46  ;;  %v22778_v44 = vpop.f32.mrb[47].mxu0  ;;  %v22780_v54 = vpop.f32.mrb[47].mxu1  ;;  %v8673_v26 = vld [vmem:[#allocation14 + $0x7a0] sm:$0xff]  ;;  %v8670_v46 = vld [vmem:[#allocation14 + $0x788] sm:$0xff] }
 0x621   : > { %23997 = vst [vmem:[#allocation84_spill] sm:$0xff] %v22778_v44  ;;  %23998 = vst [vmem:[#allocation85_spill] sm:$0xff] %v22780_v54  ;;  %14669 = vmatpush1.bf16.msra.mxu0 %v18571_v35  ;;  %v18589_v44 = vcombine.low %v8662_v23, %v8666_v15  ;;  %v18596_v54 = vcombine.high %v8669_v7, %v8673_v26  ;;  %v18598_v32 = vcombine.high %v8670_v46, %v8674_v30  ;;  %v8677_v35 = vld [vmem:[#allocation14 + $0x7c0] sm:$0xff]  ;;  %v8686_v10 = vld [vmem:[#allocation14 + $0x808] sm:$0xff] }
 0x622   : > { %15253 = vmatpush1.bf16.msra.mxu1 %v18573_v25  ;;  %14670 = vmatprep.subr.bf16.mxu0 %v18580_v8  ;;  %v8682_v25 = vld [vmem:[#allocation14 + $0x7e8] sm:$0xff]  ;;  %v18595_v47 = vcombine.low %v8669_v7, %v8673_v26  ;;  %v18597_v21 = vcombine.low %v8670_v46, %v8674_v30  ;;  %v18604_v8 = vcombine.high %v8677_v35, %v8681_v37  ;;  %v8689_v2 = vld [vmem:[#allocation14 + $0x820] sm:$0xff] }
 0x623   : > { %15254 = vmatprep.subr.bf16.mxu1 %v18582_v36  ;;  %v18606_v36 = vcombine.high %v8678_v52, %v8682_v25  ;;  %v18603_v23 = vcombine.low %v8677_v35, %v8681_v37  ;;  %v18605_v15 = vcombine.low %v8678_v52, %v8682_v25  ;;  %v8697_v26 = vld [vmem:[#allocation14 + $0x860] sm:$0xff]  ;;  %v8702_v37 = vld [vmem:[#allocation14 + $0x888] sm:$0xff] }
 0x624   : > { %v8705_v35 = vld [vmem:[#allocation14 + $0x8a0] sm:$0xff]  ;;  %v8706_v52 = vld [vmem:[#allocation14 + $0x8a8] sm:$0xff] }
 0x625   : > { %14671 = vmatpush1.bf16.msra.mxu0 %v18579_v31  ;;  %v8685_v31 = vld [vmem:[#allocation14 + $0x800] sm:$0xff] }
 0x626   : > { %15255 = vmatpush1.bf16.msra.mxu1 %v18581_v55  ;;  %14672 = vmatprep.subr.bf16.mxu0 %v18588_v17  ;;  %v8690_v55 = vld [vmem:[#allocation14 + $0x828] sm:$0xff]  ;;  %v18612_v17 = vcombine.high %v8685_v31, %v8689_v2  ;;  %v18611_v30 = vcombine.low %v8685_v31, %v8689_v2  ;;  %v8709_v31 = vld [vmem:[#allocation14 + $0x8c0] sm:$0xff] }
 0x627   : > { %15256 = vmatprep.subr.bf16.mxu1 %v18590_v3  ;;  %v18614_v3 = vcombine.high %v8686_v10, %v8690_v55  ;;  %v8713_v2 = vld [vmem:[#allocation14 + $0x8e0] sm:$0xff] }
 0x629   : > { %14673 = vmatpush1.bf16.msra.mxu0 %v18587_v1  ;;  %v8693_v1 = vld [vmem:[#allocation14 + $0x840] sm:$0xff] }
 0x62a   : > { %15257 = vmatpush1.bf16.msra.mxu1 %v18589_v44  ;;  %14674 = vmatprep.subr.bf16.mxu0 %v18596_v54  ;;  %v8694_v44 = vld [vmem:[#allocation14 + $0x848] sm:$0xff]  ;;  %v18620_v46 = vcombine.high %v8693_v1, %v8697_v26  ;;  %v18619_v25 = vcombine.low %v8693_v1, %v8697_v26  ;;  %v8717_v1 = vld [vmem:[#allocation14 + $0x900] sm:$0xff] }
 0x62b   : > { %15258 = vmatprep.subr.bf16.mxu1 %v18598_v32  ;;  %v8698_v54 = vld [vmem:[#allocation14 + $0x868] sm:$0xff]  ;;  %v18613_v32 = vcombine.low %v8686_v10, %v8690_v55  ;;  %v8721_v26 = vld [vmem:[#allocation14 + $0x920] sm:$0xff] }
 0x62c   : > { %v18622_v7 = vcombine.high %v8694_v44, %v8698_v54  ;;  %v8710_v10 = vld [vmem:[#allocation14 + $0x8c8] sm:$0xff] }
 0x62d   : > { %14675 = vmatpush1.bf16.msra.mxu0 %v18595_v47  ;;  %v8701_v47 = vld [vmem:[#allocation14 + $0x880] sm:$0xff]  ;;  %v8714_v55 = vld [vmem:[#allocation14 + $0x8e8] sm:$0xff] }
 0x62e   : > { %15259 = vmatpush1.bf16.msra.mxu1 %v18597_v21  ;;  %14676 = vmatprep.subr.bf16.mxu0 %v18604_v8  ;;  %v18621_v21 = vcombine.low %v8694_v44, %v8698_v54  ;;  %v18628_v8 = vcombine.high %v8701_v47, %v8705_v35  ;;  %v8718_v44 = vld [vmem:[#allocation14 + $0x908] sm:$0xff] }
 0x62f   : > { %15260 = vmatprep.subr.bf16.mxu1 %v18606_v36  ;;  %v18630_v36 = vcombine.high %v8702_v37, %v8706_v52  ;;  %v8722_v54 = vld [vmem:[#allocation14 + $0x928] sm:$0xff] }
 0x631   : > { %14677 = vmatpush1.bf16.msra.mxu0 %v18603_v23  ;;  %v18627_v23 = vcombine.low %v8701_v47, %v8705_v35  ;;  %v8725_v47 = vld [vmem:[#allocation14 + $0x940] sm:$0xff] }
 0x632   : > { %15261 = vmatpush1.bf16.msra.mxu1 %v18605_v15  ;;  %14719 = vmatprep.subr.bf16.mxu0 %v18612_v17  ;;  %v18629_v15 = vcombine.low %v8702_v37, %v8706_v52  ;;  %v18636_v17 = vcombine.high %v8709_v31, %v8713_v2  ;;  %v8729_v35 = vld [vmem:[#allocation14 + $0x960] sm:$0xff]  ;;  %v8726_v37 = vld [vmem:[#allocation14 + $0x948] sm:$0xff] }
 0x633   : > { %15303 = vmatprep.subr.bf16.mxu1 %v18614_v3  ;;  %v18638_v3 = vcombine.high %v8710_v10, %v8714_v55  ;;  %v8730_v52 = vld [vmem:[#allocation14 + $0x968] sm:$0xff] }
 0x634   : > { %14679 = vmatmul.mubr.bf16.vlgmr.msra.gmra.mrb[64].mxu0 %v22140_v27 }
 0x635   : > { %14720 = vmatpush1.bf16.msra.mxu0 %v18611_v30  ;;  %15263 = vmatmul.mubr.bf16.vlgmr.msra.gmra.mrb[64].mxu1 %v22140_v27  ;;  %v18635_v30 = vcombine.low %v8709_v31, %v8713_v2  ;;  %v8733_v31 = vld [vmem:[#allocation14 + $0x980] sm:$0xff] }
 0x636   : > { %15304 = vmatpush1.bf16.msra.mxu1 %v18613_v32  ;;  %14721 = vmatprep.subr.bf16.mxu0 %v18620_v46  ;;  %v18637_v32 = vcombine.low %v8710_v10, %v8714_v55  ;;  %v18644_v46 = vcombine.high %v8717_v1, %v8721_v26  ;;  %v8737_v2 = vld [vmem:[#allocation14 + $0x9a0] sm:$0xff]  ;;  %v8734_v10 = vld [vmem:[#allocation14 + $0x988] sm:$0xff] }
 0x637   : > { %15305 = vmatprep.subr.bf16.mxu1 %v18622_v7  ;;  %14688 = vmatprep.mubr.bf16.mxu0 %v22144_v34  ;;  %v18646_v7 = vcombine.high %v8718_v44, %v8722_v54  ;;  %v8738_v55 = vld [vmem:[#allocation14 + $0x9a8] sm:$0xff] }
 0x638   : > { %15272 = vmatprep.mubr.bf16.mxu1 %v22144_v34 }
 0x639   : > { %14722 = vmatpush1.bf16.msra.mxu0 %v18619_v25  ;;  %v18643_v25 = vcombine.low %v8717_v1, %v8721_v26  ;;  %v8741_v1 = vld [vmem:[#allocation14 + $0x9c0] sm:$0xff] }
 0x63a   : > { %15306 = vmatpush1.bf16.msra.mxu1 %v18621_v21  ;;  %14723 = vmatprep.subr.bf16.mxu0 %v18628_v8  ;;  %v18645_v21 = vcombine.low %v8718_v44, %v8722_v54  ;;  %v18652_v8 = vcombine.high %v8725_v47, %v8729_v35  ;;  %v8745_v26 = vld [vmem:[#allocation14 + $0x9e0] sm:$0xff]  ;;  %v8742_v44 = vld [vmem:[#allocation14 + $0x9c8] sm:$0xff] }
 0x63b   : > { %15307 = vmatprep.subr.bf16.mxu1 %v18630_v36  ;;  %v18654_v36 = vcombine.high %v8726_v37, %v8730_v52  ;;  %v8746_v54 = vld [vmem:[#allocation14 + $0x9e8] sm:$0xff] }
 0x63c   : > { %14689 = vmatmul.mubr.bf16.gmra.mrb[68].mxu0 %v22151_v41 }
 0x63d   : > { %14724 = vmatpush1.bf16.msra.mxu0 %v18627_v23  ;;  %15273 = vmatmul.mubr.bf16.gmra.mrb[68].mxu1 %v22151_v41  ;;  %v18651_v23 = vcombine.low %v8725_v47, %v8729_v35  ;;  %v8749_v47 = vld [vmem:[#allocation14 + $0xa00] sm:$0xff] }
 0x63e   : > { %15308 = vmatpush1.bf16.msra.mxu1 %v18629_v15  ;;  %14725 = vmatprep.subr.bf16.mxu0 %v18636_v17  ;;  %v18653_v15 = vcombine.low %v8726_v37, %v8730_v52  ;;  %v18660_v17 = vcombine.high %v8733_v31, %v8737_v2  ;;  %v8753_v35 = vld [vmem:[#allocation14 + $0xa20] sm:$0xff]  ;;  %v8750_v37 = vld [vmem:[#allocation14 + $0xa08] sm:$0xff] }
 0x63f   : > { %15309 = vmatprep.subr.bf16.mxu1 %v18638_v3  ;;  %14698 = vmatprep.mubr.bf16.mxu0 %v22154_v49  ;;  %v18662_v3 = vcombine.high %v8734_v10, %v8738_v55  ;;  %v8754_v52 = vld [vmem:[#allocation14 + $0xa28] sm:$0xff] }
 0x640   : > { %15282 = vmatprep.mubr.bf16.mxu1 %v22154_v49 }
 0x641   : > { %14726 = vmatpush1.bf16.msra.mxu0 %v18635_v30  ;;  %v18659_v30 = vcombine.low %v8733_v31, %v8737_v2  ;;  %v8757_v31 = vld [vmem:[#allocation14 + $0xa40] sm:$0xff] }
 0x642   : > { %15310 = vmatpush1.bf16.msra.mxu1 %v18637_v32  ;;  %14727 = vmatprep.subr.bf16.mxu0 %v18644_v46  ;;  %v18661_v32 = vcombine.low %v8734_v10, %v8738_v55  ;;  %v18668_v46 = vcombine.high %v8741_v1, %v8745_v26  ;;  %v8761_v2 = vld [vmem:[#allocation14 + $0xa60] sm:$0xff]  ;;  %v8758_v10 = vld [vmem:[#allocation14 + $0xa48] sm:$0xff] }
 0x643   : > { %15311 = vmatprep.subr.bf16.mxu1 %v18646_v7  ;;  %v18670_v7 = vcombine.high %v8742_v44, %v8746_v54  ;;  %v8762_v55 = vld [vmem:[#allocation14 + $0xa68] sm:$0xff] }
 0x644   : > { %14699 = vmatmul.mubr.bf16.gmra.mrb[72].mxu0 %v22161_v56 }
 0x645   : > { %14728 = vmatpush1.bf16.msra.mxu0 %v18643_v25  ;;  %15283 = vmatmul.mubr.bf16.gmra.mrb[72].mxu1 %v22161_v56  ;;  %v18667_v25 = vcombine.low %v8741_v1, %v8745_v26  ;;  %v8765_v1 = vld [vmem:[#allocation14 + $0xa80] sm:$0xff] }
 0x646   : > { %15312 = vmatpush1.bf16.msra.mxu1 %v18645_v21  ;;  %14729 = vmatprep.subr.bf16.mxu0 %v18652_v8  ;;  %v18669_v21 = vcombine.low %v8742_v44, %v8746_v54  ;;  %v18676_v8 = vcombine.high %v8749_v47, %v8753_v35  ;;  %v8769_v26 = vld [vmem:[#allocation14 + $0xaa0] sm:$0xff]  ;;  %v8766_v44 = vld [vmem:[#allocation14 + $0xa88] sm:$0xff] }
 0x647   : > { %15313 = vmatprep.subr.bf16.mxu1 %v18654_v36  ;;  %14708 = vmatprep.mubr.bf16.mxu0 %v22164_v62  ;;  %v18678_v36 = vcombine.high %v8750_v37, %v8754_v52  ;;  %v8770_v54 = vld [vmem:[#allocation14 + $0xaa8] sm:$0xff] }
 0x648   : > { %15292 = vmatprep.mubr.bf16.mxu1 %v22164_v62 }
 0x649   : > { %14730 = vmatpush1.bf16.msra.mxu0 %v18651_v23  ;;  %v18675_v23 = vcombine.low %v8749_v47, %v8753_v35  ;;  %v8777_v47 = vld [vmem:[#allocation14 + $0xae0] sm:$0xff]  ;;  %v8774_v35 = vld [vmem:[#allocation14 + $0xac8] sm:$0xff] }
 0x64a   : > { %15314 = vmatpush1.bf16.msra.mxu1 %v18653_v15  ;;  %14731 = vmatprep.subr.bf16.mxu0 %v18660_v17  ;;  %v18677_v15 = vcombine.low %v8750_v37, %v8754_v52  ;;  %v18684_v17 = vcombine.high %v8757_v31, %v8761_v2  ;;  %v18691_v37 = vcombine.low %v8765_v1, %v8769_v26 }
 0x64b   : > { %15315 = vmatprep.subr.bf16.mxu1 %v18662_v3  ;;  %v18686_v3 = vcombine.high %v8758_v10, %v8762_v55  ;;  %v18693_v52 = vcombine.low %v8766_v44, %v8770_v54 }
 0x64c   : > { %14709 = vmatmul.mubr.bf16.gmra.mrb[76].mxu0 %v22173_v4 }
 0x64d   : > { %14732 = vmatpush1.bf16.msra.mxu0 %v18659_v30  ;;  %15293 = vmatmul.mubr.bf16.gmra.mrb[76].mxu1 %v22173_v4  ;;  %v18683_v30 = vcombine.low %v8757_v31, %v8761_v2  ;;  %v8785_v31 = vld [vmem:[#allocation14 + $0xb20] sm:$0xff]  ;;  %v8782_v2 = vld [vmem:[#allocation14 + $0xb08] sm:$0xff] }
 0x64e   : > { %15316 = vmatpush1.bf16.msra.mxu1 %v18661_v32  ;;  %14733 = vmatprep.subr.bf16.mxu0 %v18668_v46  ;;  %v18685_v32 = vcombine.low %v8758_v10, %v8762_v55  ;;  %v18692_v46 = vcombine.high %v8765_v1, %v8769_v26  ;;  %v8793_v1 = vld [vmem:[#allocation14 + $0xb60] sm:$0xff]  ;;  %v8790_v26 = vld [vmem:[#allocation14 + $0xb48] sm:$0xff] }
 0x64f   : > { %15317 = vmatprep.subr.bf16.mxu1 %v18670_v7  ;;  %14751 = vmatprep.mubr.bf16.mxu0 %v22180_v11  ;;  %v18694_v7 = vcombine.high %v8766_v44, %v8770_v54 }
 0x650   : > { %15335 = vmatprep.mubr.bf16.mxu1 %v22180_v11 }
 0x651   : > { %14734 = vmatpush1.bf16.msra.mxu0 %v18667_v25  ;;  %v8773_v25 = vld [vmem:[#allocation14 + $0xac0] sm:$0xff] }
 0x652   : > { %15318 = vmatpush1.bf16.msra.mxu1 %v18669_v21  ;;  %14735 = vmatprep.subr.bf16.mxu0 %v18676_v8  ;;  %v8778_v21 = vld [vmem:[#allocation14 + $0xae8] sm:$0xff]  ;;  %v18700_v8 = vcombine.high %v8773_v25, %v8777_v47  ;;  %v18699_v10 = vcombine.low %v8773_v25, %v8777_v47  ;;  %v8801_v25 = vld [vmem:[#allocation14 + $0xba0] sm:$0xff] }
 0x653   : > { %15319 = vmatprep.subr.bf16.mxu1 %v18678_v36  ;;  %v18702_v36 = vcombine.high %v8774_v35, %v8778_v21  ;;  %v18701_v55 = vcombine.low %v8774_v35, %v8778_v21  ;;  %v8798_v47 = vld [vmem:[#allocation14 + $0xb88] sm:$0xff] }
 0x655   : > { %14736 = vmatpush1.bf16.msra.mxu0 %v18675_v23  ;;  %v8781_v23 = vld [vmem:[#allocation14 + $0xb00] sm:$0xff] }
 0x656   : > { %15320 = vmatpush1.bf16.msra.mxu1 %v18677_v15  ;;  %14737 = vmatprep.subr.bf16.mxu0 %v18684_v17  ;;  %v8786_v15 = vld [vmem:[#allocation14 + $0xb28] sm:$0xff]  ;;  %v18708_v17 = vcombine.high %v8781_v23, %v8785_v31  ;;  %v18707_v44 = vcombine.low %v8781_v23, %v8785_v31  ;;  %v8809_v23 = vld [vmem:[#allocation14 + $0xbe0] sm:$0xff] }
 0x657   : > { %15321 = vmatprep.subr.bf16.mxu1 %v18686_v3  ;;  %v18710_v3 = vcombine.high %v8782_v2, %v8786_v15  ;;  %v18709_v54 = vcombine.low %v8782_v2, %v8786_v15  ;;  %v8806_v31 = vld [vmem:[#allocation14 + $0xbc8] sm:$0xff] }
 0x659   : > { %14738 = vmatpush1.bf16.msra.mxu0 %v18683_v30  ;;  %v8789_v30 = vld [vmem:[#allocation14 + $0xb40] sm:$0xff] }
 0x65a   : > { %15322 = vmatpush1.bf16.msra.mxu1 %v18685_v32  ;;  %14739 = vmatprep.subr.bf16.mxu0 %v18692_v46  ;;  %v8794_v32 = vld [vmem:[#allocation14 + $0xb68] sm:$0xff]  ;;  %v18716_v46 = vcombine.high %v8789_v30, %v8793_v1  ;;  %v18715_v35 = vcombine.low %v8789_v30, %v8793_v1  ;;  %v8817_v30 = vld [vmem:[#allocation14 + $0xc20] sm:$0xff] }
 0x65b   : > { %15323 = vmatprep.subr.bf16.mxu1 %v18694_v7  ;;  %v18718_v7 = vcombine.high %v8790_v26, %v8794_v32  ;;  %v18717_v21 = vcombine.low %v8790_v26, %v8794_v32  ;;  %v8814_v1 = vld [vmem:[#allocation14 + $0xc08] sm:$0xff] }
 0x65d   : > { %14740 = vmatpush1.bf16.msra.mxu0 %v18691_v37  ;;  %v8797_v37 = vld [vmem:[#allocation14 + $0xb80] sm:$0xff] }
 0x65e   : > { %15324 = vmatpush1.bf16.msra.mxu1 %v18693_v52  ;;  %14741 = vmatprep.subr.bf16.mxu0 %v18700_v8  ;;  %v8802_v52 = vld [vmem:[#allocation14 + $0xba8] sm:$0xff]  ;;  %v18724_v8 = vcombine.high %v8797_v37, %v8801_v25  ;;  %v18723_v2 = vcombine.low %v8797_v37, %v8801_v25  ;;  %v8825_v37 = vld [vmem:[#allocation14 + $0xc60] sm:$0xff] }
 0x65f   : > { %15325 = vmatprep.subr.bf16.mxu1 %v18702_v36  ;;  %v18726_v36 = vcombine.high %v8798_v47, %v8802_v52  ;;  %v18725_v15 = vcombine.low %v8798_v47, %v8802_v52  ;;  %v8822_v25 = vld [vmem:[#allocation14 + $0xc48] sm:$0xff] }
 0x661   : > { %14742 = vmatpush1.bf16.msra.mxu0 %v18699_v10  ;;  %v8805_v10 = vld [vmem:[#allocation14 + $0xbc0] sm:$0xff] }
 0x662   : > { %15326 = vmatpush1.bf16.msra.mxu1 %v18701_v55  ;;  %14743 = vmatprep.subr.bf16.mxu0 %v18708_v17  ;;  %v8810_v55 = vld [vmem:[#allocation14 + $0xbe8] sm:$0xff]  ;;  %v18732_v17 = vcombine.high %v8805_v10, %v8809_v23  ;;  %v18731_v26 = vcombine.low %v8805_v10, %v8809_v23  ;;  %v8833_v10 = vld [vmem:[#allocation14 + $0xca0] sm:$0xff] }
 0x663   : > { %15327 = vmatprep.subr.bf16.mxu1 %v18710_v3  ;;  %v18734_v3 = vcombine.high %v8806_v31, %v8810_v55  ;;  %v18733_v32 = vcombine.low %v8806_v31, %v8810_v55  ;;  %v8830_v23 = vld [vmem:[#allocation14 + $0xc88] sm:$0xff] }
 0x664   : > { %v8834_v31 = vld [vmem:[#allocation14 + $0xca8] sm:$0xff] }
 0x665   : > { %14744 = vmatpush1.bf16.msra.mxu0 %v18707_v44  ;;  %v8813_v44 = vld [vmem:[#allocation14 + $0xc00] sm:$0xff] }
 0x666   : > { %15328 = vmatpush1.bf16.msra.mxu1 %v18709_v54  ;;  %14745 = vmatprep.subr.bf16.mxu0 %v18716_v46  ;;  %v8818_v54 = vld [vmem:[#allocation14 + $0xc28] sm:$0xff]  ;;  %v18740_v46 = vcombine.high %v8813_v44, %v8817_v30  ;;  %v18739_v47 = vcombine.low %v8813_v44, %v8817_v30  ;;  %v8837_v44 = vld [vmem:[#allocation14 + $0xcc0] sm:$0xff] }
 0x667   : > { %15329 = vmatprep.subr.bf16.mxu1 %v18718_v7  ;;  %v18742_v7 = vcombine.high %v8814_v1, %v8818_v54  ;;  %v18741_v52 = vcombine.low %v8814_v1, %v8818_v54  ;;  %v8841_v30 = vld [vmem:[#allocation14 + $0xce0] sm:$0xff]  ;;  %v8838_v1 = vld [vmem:[#allocation14 + $0xcc8] sm:$0xff] }
 0x668   : > { %v8842_v54 = vld [vmem:[#allocation14 + $0xce8] sm:$0xff] }
 0x669   : > { %14746 = vmatpush1.bf16.msra.mxu0 %v18715_v35  ;;  %v8821_v35 = vld [vmem:[#allocation14 + $0xc40] sm:$0xff] }
 0x66a   : > { %15330 = vmatpush1.bf16.msra.mxu1 %v18717_v21  ;;  %14747 = vmatprep.subr.bf16.mxu0 %v18724_v8  ;;  %v8826_v21 = vld [vmem:[#allocation14 + $0xc68] sm:$0xff]  ;;  %v18748_v8 = vcombine.high %v8821_v35, %v8825_v37  ;;  %v18747_v55 = vcombine.low %v8821_v35, %v8825_v37  ;;  %v8845_v35 = vld [vmem:[#allocation14 + $0xd00] sm:$0xff] }
 0x66b   : > { %15331 = vmatprep.subr.bf16.mxu1 %v18726_v36  ;;  %v18750_v36 = vcombine.high %v8822_v25, %v8826_v21  ;;  %v8849_v37 = vld [vmem:[#allocation14 + $0xd20] sm:$0xff] }
 0x66d   : > { %14748 = vmatpush1.bf16.msra.mxu0 %v18723_v2  ;;  %v8829_v2 = vld [vmem:[#allocation14 + $0xc80] sm:$0xff] }
 0x66e   : > { %15332 = vmatpush1.bf16.msra.mxu1 %v18725_v15  ;;  %14749 = vmatprep.subr.bf16.mxu0 %v18732_v17  ;;  %v18749_v15 = vcombine.low %v8822_v25, %v8826_v21  ;;  %v18756_v17 = vcombine.high %v8829_v2, %v8833_v10  ;;  %v8846_v25 = vld [vmem:[#allocation14 + $0xd08] sm:$0xff] }
 0x66f   : > { %15333 = vmatprep.subr.bf16.mxu1 %v18734_v3  ;;  %v18758_v3 = vcombine.high %v8830_v23, %v8834_v31  ;;  %v8850_v21 = vld [vmem:[#allocation14 + $0xd28] sm:$0xff] }
 0x671   : > { %14750 = vmatpush1.bf16.msra.mxu0 %v18731_v26  ;;  %v18755_v26 = vcombine.low %v8829_v2, %v8833_v10  ;;  %v8853_v2 = vld [vmem:[#allocation14 + $0xd40] sm:$0xff] }
 0x672   : > { %15334 = vmatpush1.bf16.msra.mxu1 %v18733_v32  ;;  %14792 = vmatprep.subr.bf16.mxu0 %v18740_v46  ;;  %v18757_v32 = vcombine.low %v8830_v23, %v8834_v31  ;;  %v18764_v46 = vcombine.high %v8837_v44, %v8841_v30  ;;  %v8857_v10 = vld [vmem:[#allocation14 + $0xd60] sm:$0xff]  ;;  %v23999_v23 = vld [vmem:[#allocation24_spill] sm:$0xff]  ;;  %v8854_v31 = vld [vmem:[#allocation14 + $0xd48] sm:$0xff] }
 0x673   : > { %15376 = vmatprep.subr.bf16.mxu1 %v18742_v7  ;;  %v18766_v7 = vcombine.high %v8838_v1, %v8842_v54 }
 0x674   : > { %14752 = vmatmul.mubr.bf16.vlgmr.msra.gmra.mrb[64].mxu0 %v22189_v63 }
 0x675   : > { %14793 = vmatpush1.bf16.msra.mxu0 %v18739_v47  ;;  %15336 = vmatmul.mubr.bf16.vlgmr.msra.gmra.mrb[64].mxu1 %v22189_v63  ;;  %v18763_v47 = vcombine.low %v8837_v44, %v8841_v30  ;;  %v8861_v30 = vld [vmem:[#allocation14 + $0xd80] sm:$0xff] }
 0x676   : > { %15377 = vmatpush1.bf16.msra.mxu1 %v18741_v52  ;;  %14794 = vmatprep.subr.bf16.mxu0 %v18748_v8  ;;  %v18765_v52 = vcombine.low %v8838_v1, %v8842_v54  ;;  %v18772_v8 = vcombine.high %v8845_v35, %v8849_v37  ;;  %v8865_v1 = vld [vmem:[#allocation14 + $0xda0] sm:$0xff]  ;;  %v8862_v54 = vld [vmem:[#allocation14 + $0xd88] sm:$0xff] }
 0x677   : > { %15378 = vmatprep.subr.bf16.mxu1 %v18750_v36  ;;  %14761 = vmatprep.mubr.bf16.mxu0 %v22192_v9  ;;  %v18774_v36 = vcombine.high %v8846_v25, %v8850_v21 }
 0x678   : > { %15345 = vmatprep.mubr.bf16.mxu1 %v22192_v9 }
 0x679   : > { %14795 = vmatpush1.bf16.msra.mxu0 %v18747_v55  ;;  %v8858_v55 = vld [vmem:[#allocation14 + $0xd68] sm:$0xff] }
 0x67a   : > { %15379 = vmatpush1.bf16.msra.mxu1 %v18749_v15  ;;  %14796 = vmatprep.subr.bf16.mxu0 %v18756_v17  ;;  %v18771_v15 = vcombine.low %v8845_v35, %v8849_v37  ;;  %v18773_v17 = vcombine.low %v8846_v25, %v8850_v21  ;;  %v18782_v44 = vcombine.high %v8854_v31, %v8858_v55 }
 0x67b   : > { %15380 = vmatprep.subr.bf16.mxu1 %v18758_v3  ;;  %v18780_v3 = vcombine.high %v8853_v2, %v8857_v10  ;;  %v18781_v35 = vcombine.low %v8854_v31, %v8858_v55  ;;  %v18788_v37 = vcombine.high %v8861_v30, %v8865_v1 }
 0x67c   : > { %14762 = vmatmul.mubr.bf16.gmra.mrb[68].mxu0 %v22199_v14 }
 0x67d   : > { %14797 = vmatpush1.bf16.msra.mxu0 %v18755_v26  ;;  %15346 = vmatmul.mubr.bf16.gmra.mrb[68].mxu1 %v22199_v14  ;;  %v8866_v26 = vld [vmem:[#allocation14 + $0xda8] sm:$0xff] }
 0x67e   : > { %15381 = vmatpush1.bf16.msra.mxu1 %v18757_v32  ;;  %14798 = vmatprep.subr.bf16.mxu0 %v18764_v46  ;;  %v24000_v32 = vld [vmem:[#allocation25_spill] sm:$0xff]  ;;  %v18779_v46 = vcombine.low %v8853_v2, %v8857_v10  ;;  %v8870_v10 = vld [vmem:[#allocation14 + $0xdc8] sm:$0xff] }
 0x67f   : > { %15382 = vmatprep.subr.bf16.mxu1 %v18766_v7  ;;  %14771 = vmatprep.mubr.bf16.mxu0 %v23999_v23 }
 0x680   : > { %15355 = vmatprep.mubr.bf16.mxu1 %v23999_v23  ;;  %v8882_v23 = vld [vmem:[#allocation14 + $0xe28] sm:$0xff] }
 0x681   : > { %14799 = vmatpush1.bf16.msra.mxu0 %v18763_v47  ;;  %v18790_v47 = vcombine.high %v8862_v54, %v8866_v26 }
 0x682   : > { %15383 = vmatpush1.bf16.msra.mxu1 %v18765_v52  ;;  %14800 = vmatprep.subr.bf16.mxu0 %v18772_v8  ;;  %v8869_v52 = vld [vmem:[#allocation14 + $0xdc0] sm:$0xff] }
 0x683   : > { %15384 = vmatprep.subr.bf16.mxu1 %v18774_v36  ;;  %v8873_v8 = vld [vmem:[#allocation14 + $0xde0] sm:$0xff] }
 0x684   : > { %14772 = vmatmul.mubr.bf16.gmra.mrb[72].mxu0 %v24000_v32  ;;  %v24004_v36 = vld [vmem:[#allocation26_spill] sm:$0xff] }
 0x685   : > { %14801 = vmatpush1.bf16.msra.mxu0 %v18771_v15  ;;  %15356 = vmatmul.mubr.bf16.gmra.mrb[72].mxu1 %v24000_v32  ;;  %v8878_v32 = vld [vmem:[#allocation14 + $0xe08] sm:$0xff] }
 0x686   : > { %15385 = vmatpush1.bf16.msra.mxu1 %v18773_v17  ;;  %v22808_v7 = vpop.f32.mrb[48].mxu0  ;;  %14802 = vmatprep.subr.bf16.mxu0 %v18780_v3  ;;  %v8874_v17 = vld [vmem:[#allocation14 + $0xde8] sm:$0xff]  ;;  %v18787_v3 = vcombine.low %v8861_v30, %v8865_v1 }
 0x687   : > { %24001 = vst [vmem:[#allocation86_spill] sm:$0xff] %v22808_v7  ;;  %v22810_v25 = vpop.f32.mrb[48].mxu1  ;;  %v22812_v21 = vpop.f32.mrb[49].mxu0  ;;  %15386 = vmatprep.subr.bf16.mxu1 %v18782_v44  ;;  %14781 = vmatprep.mubr.bf16.mxu0 %v24004_v36  ;;  %v8877_v7 = vld [vmem:[#allocation14 + $0xe00] sm:$0xff]  ;;  %v18797_v1 = vcombine.low %v8870_v10, %v8874_v17 }
 0x688   : > { %24002 = vst [vmem:[#allocation87_spill] sm:$0xff] %v22810_v25  ;;  %24003 = vst [vmem:[#allocation88_spill] sm:$0xff] %v22812_v21  ;;  %v22815_v15 = vpop.f32.mrb[49].mxu1  ;;  %v22817_v2 = vpop.f32.mrb[50].mxu0  ;;  %15365 = vmatprep.mubr.bf16.mxu1 %v24004_v36  ;;  %v18789_v21 = vcombine.low %v8862_v54, %v8866_v26  ;;  %v18796_v25 = vcombine.high %v8869_v52, %v8873_v8 }
 0x689   : > { %24005 = vst [vmem:[#allocation26_spill] sm:$0xff] %v22815_v15  ;;  %24006 = vst [vmem:[#allocation89_spill] sm:$0xff] %v22817_v2  ;;  %v22820_v31 = vpop.f32.mrb[50].mxu1  ;;  %14803 = vmatpush1.bf16.msra.mxu0 %v18779_v46  ;;  %v22822_v55 = vpop.f32.mrb[51].mxu0  ;;  %v18798_v15 = vcombine.high %v8870_v10, %v8874_v17  ;;  %v8881_v2 = vld [vmem:[#allocation14 + $0xe20] sm:$0xff] }
 0x68a   : > { %24007 = vst [vmem:[#allocation90_spill] sm:$0xff] %v22820_v31  ;;  %24008 = vst [vmem:[#allocation91_spill] sm:$0xff] %v22822_v55  ;;  %15387 = vmatpush1.bf16.msra.mxu1 %v18781_v35  ;;  %v22824_v44 = vpop.f32.mrb[51].mxu1  ;;  %14804 = vmatprep.subr.bf16.mxu0 %v18788_v37  ;;  %v18795_v31 = vcombine.low %v8869_v52, %v8873_v8  ;;  %v18804_v46 = vcombine.high %v8877_v7, %v8881_v2  ;;  %v8885_v37 = vld [vmem:[#allocation14 + $0xe40] sm:$0xff]  ;;  %v8890_v8 = vld [vmem:[#allocation14 + $0xe68] sm:$0xff] }
 0x68b   : > { %24009 = vst [vmem:[#allocation92_spill] sm:$0xff] %v22824_v44  ;;  %15388 = vmatprep.subr.bf16.mxu1 %v18790_v47  ;;  %v18806_v35 = vcombine.high %v8878_v32, %v8882_v23  ;;  %v8889_v47 = vld [vmem:[#allocation14 + $0xe60] sm:$0xff]  ;;  %v24014_v44 = vld [vmem:[#allocation28_spill] sm:$0xff]  ;;  %v18803_v17 = vcombine.low %v8877_v7, %v8881_v2  ;;  %v8894_v55 = vld [vmem:[#allocation14 + $0xe88] sm:$0xff] }
 0x68c   : > { %14782 = vmatmul.mubr.bf16.gmra.mrb[76].mxu0 %v24010_v45 }
 0x68d   : > { %14805 = vmatpush1.bf16.msra.mxu0 %v18787_v3  ;;  %15366 = vmatmul.mubr.bf16.gmra.mrb[76].mxu1 %v24010_v45  ;;  %v8898_v45 = vld [vmem:[#allocation14 + $0xea8] sm:$0xff] }
 0x68e   : > { %15389 = vmatpush1.bf16.msra.mxu1 %v18789_v21  ;;  %v22828_v30 = vpop.f32.mrb[52].mxu0  ;;  %14806 = vmatprep.subr.bf16.mxu0 %v18796_v25  ;;  %v8886_v21 = vld [vmem:[#allocation14 + $0xe48] sm:$0xff] }
 0x68f   : > { %24011 = vst [vmem:[#allocation93_spill] sm:$0xff] %v22828_v30  ;;  %v22830_v54 = vpop.f32.mrb[52].mxu1  ;;  %v22832_v26 = vpop.f32.mrb[53].mxu0  ;;  %15390 = vmatprep.subr.bf16.mxu1 %v18798_v15  ;;  %14824 = vmatprep.mubr.bf16.mxu0 %v24014_v44  ;;  %v8893_v30 = vld [vmem:[#allocation14 + $0xe80] sm:$0xff] }
 0x690   : > { %24012 = vst [vmem:[#allocation94_spill] sm:$0xff] %v22830_v54  ;;  %24013 = vst [vmem:[#allocation95_spill] sm:$0xff] %v22832_v26  ;;  %v22835_v3 = vpop.f32.mrb[53].mxu1  ;;  %v22837_v52 = vpop.f32.mrb[54].mxu0  ;;  %15408 = vmatprep.mubr.bf16.mxu1 %v24014_v44  ;;  %v18805_v26 = vcombine.low %v8878_v32, %v8882_v23  ;;  %v18812_v54 = vcombine.high %v8885_v37, %v8889_v47  ;;  %v18811_v44 = vcombine.low %v8885_v37, %v8889_v47  ;;  %v8901_v32 = vld [vmem:[#allocation14 + $0xec0] sm:$0xff]  ;;  %v8906_v37 = vld [vmem:[#allocation14 + $0xee8] sm:$0xff] }
 0x691   : > { %24015 = vst [vmem:[#allocation96_spill] sm:$0xff] %v22835_v3  ;;  %24016 = vst [vmem:[#allocation97_spill] sm:$0xff] %v22837_v52  ;;  %v22840_v25 = vpop.f32.mrb[54].mxu1  ;;  %14807 = vmatpush1.bf16.msra.mxu0 %v18795_v31  ;;  %v22842_v10 = vpop.f32.mrb[55].mxu0  ;;  %v18814_v3 = vcombine.high %v8886_v21, %v8890_v8  ;;  %v8897_v52 = vld [vmem:[#allocation14 + $0xea0] sm:$0xff]  ;;  %v18813_v31 = vcombine.low %v8886_v21, %v8890_v8  ;;  %v18822_v23 = vcombine.high %v8894_v55, %v8898_v45 }
 0x692   : > { %24017 = vst [vmem:[#allocation98_spill] sm:$0xff] %v22840_v25  ;;  %24018 = vst [vmem:[#allocation99_spill] sm:$0xff] %v22842_v10  ;;  %15391 = vmatpush1.bf16.msra.mxu1 %v18797_v1  ;;  %v22844_v15 = vpop.f32.mrb[55].mxu1  ;;  %14808 = vmatprep.subr.bf16.mxu0 %v18804_v46  ;;  %v18820_v7 = vcombine.high %v8893_v30, %v8897_v52  ;;  %v8905_v46 = vld [vmem:[#allocation14 + $0xee0] sm:$0xff]  ;;  %v18819_v47 = vcombine.low %v8893_v30, %v8897_v52 }
 0x693   : > { %24019 = vst [vmem:[#allocation100_spill] sm:$0xff] %v22844_v15  ;;  %15392 = vmatprep.subr.bf16.mxu1 %v18806_v35  ;;  %v18828_v8 = vcombine.high %v8901_v32, %v8905_v46  ;;  %v18827_v10 = vcombine.low %v8901_v32, %v8905_v46  ;;  %v8922_v32 = vld [vmem:[#allocation14 + $0xf68] sm:$0xff] }
 0x695   : > { %14809 = vmatpush1.bf16.msra.mxu0 %v18803_v17  ;;  %v8902_v17 = vld [vmem:[#allocation14 + $0xec8] sm:$0xff] }
 0x696   : > { %15393 = vmatpush1.bf16.msra.mxu1 %v18805_v26  ;;  %v22846_v25 = vpop.f32.mrb[56].mxu0  ;;  %14810 = vmatprep.subr.bf16.mxu0 %v18812_v54 }
 0x697   : > { %24020 = vst [vmem:[#allocation101_spill] sm:$0xff] %v22846_v25  ;;  %v22848_v2 = vpop.f32.mrb[56].mxu1  ;;  %v22850_v1 = vpop.f32.mrb[57].mxu0  ;;  %15394 = vmatprep.subr.bf16.mxu1 %v18814_v3  ;;  %v18821_v3 = vcombine.low %v8894_v55, %v8898_v45  ;;  %v8910_v25 = vld [vmem:[#allocation14 + $0xf08] sm:$0xff]  ;;  %v8917_v55 = vld [vmem:[#allocation14 + $0xf40] sm:$0xff] }
 0x698   : > { %24021 = vst [vmem:[#allocation102_spill] sm:$0xff] %v22848_v2  ;;  %24022 = vst [vmem:[#allocation103_spill] sm:$0xff] %v22850_v1  ;;  %v22852_v35 = vpop.f32.mrb[57].mxu1  ;;  %v22854_v15 = vpop.f32.mrb[58].mxu0  ;;  %v18830_v1 = vcombine.high %v8902_v17, %v8906_v37  ;;  %v8909_v2 = vld [vmem:[#allocation14 + $0xf00] sm:$0xff] }
 0x699   : > { %24023 = vst [vmem:[#allocation104_spill] sm:$0xff] %v22852_v35  ;;  %24024 = vst [vmem:[#allocation105_spill] sm:$0xff] %v22854_v15  ;;  %v22856_v26 = vpop.f32.mrb[58].mxu1  ;;  %14811 = vmatpush1.bf16.msra.mxu0 %v18811_v44  ;;  %v22858_v54 = vpop.f32.mrb[59].mxu0  ;;  %v8913_v35 = vld [vmem:[#allocation14 + $0xf20] sm:$0xff]  ;;  %v8914_v15 = vld [vmem:[#allocation14 + $0xf28] sm:$0xff]  ;;  %v18829_v44 = vcombine.low %v8902_v17, %v8906_v37 }
 0x69a   : > { %24025 = vst [vmem:[#allocation106_spill] sm:$0xff] %v22856_v26  ;;  %24026 = vst [vmem:[#allocation107_spill] sm:$0xff] %v22858_v54  ;;  %15395 = vmatpush1.bf16.msra.mxu1 %v18813_v31  ;;  %v22860_v21 = vpop.f32.mrb[59].mxu1  ;;  %14812 = vmatprep.subr.bf16.mxu0 %v18820_v7  ;;  %v18836_v30 = vcombine.high %v8909_v2, %v8913_v35  ;;  %v18838_v45 = vcombine.high %v8910_v25, %v8914_v15  ;;  %v8921_v7 = vld [vmem:[#allocation14 + $0xf60] sm:$0xff] }
 0x69b   : > { %24027 = vst [vmem:[#allocation108_spill] sm:$0xff] %v22860_v21  ;;  %15396 = vmatprep.subr.bf16.mxu1 %v18822_v23  ;;  %v18835_v17 = vcombine.low %v8909_v2, %v8913_v35  ;;  %v18843_v54 = vcombine.low %v8917_v55, %v8921_v7  ;;  %v8933_v35 = vld [vmem:[#allocation14 + $0xfc0] sm:$0xff] }
 0x69d   : > { %14813 = vmatpush1.bf16.msra.mxu0 %v18819_v47  ;;  %v8918_v47 = vld [vmem:[#allocation14 + $0xf48] sm:$0xff] }
 0x69e   : > { %15397 = vmatpush1.bf16.msra.mxu1 %v18821_v3  ;;  %v22862_v26 = vpop.f32.mrb[60].mxu0  ;;  %14814 = vmatprep.subr.bf16.mxu0 %v18828_v8  ;;  %v18844_v8 = vcombine.high %v8917_v55, %v8921_v7  ;;  %v8945_v55 = vld [vmem:[#allocation14 + $0x1020] sm:$0xff]  ;;  %v8942_v7 = vld [vmem:[#allocation14 + $0x1008] sm:$0xff] }
 0x69f   : > { %24028 = vst [vmem:[#allocation109_spill] sm:$0xff] %v22862_v26  ;;  %v22864_v52 = vpop.f32.mrb[60].mxu1  ;;  %v22866_v31 = vpop.f32.mrb[61].mxu0  ;;  %15398 = vmatprep.subr.bf16.mxu1 %v18830_v1  ;;  %v18837_v1 = vcombine.low %v8910_v25, %v8914_v15  ;;  %v8926_v26 = vld [vmem:[#allocation14 + $0xf88] sm:$0xff] }
 0x6a0   : > { %24029 = vst [vmem:[#allocation110_spill] sm:$0xff] %v22864_v52  ;;  %24030 = vst [vmem:[#allocation111_spill] sm:$0xff] %v22866_v31  ;;  %v22868_v23 = vpop.f32.mrb[61].mxu1  ;;  %v22870_v21 = vpop.f32.mrb[62].mxu0  ;;  %v18846_v31 = vcombine.high %v8918_v47, %v8922_v32  ;;  %v8925_v52 = vld [vmem:[#allocation14 + $0xf80] sm:$0xff] }
 0x6a1   : > { %24031 = vst [vmem:[#allocation112_spill] sm:$0xff] %v22868_v23  ;;  %24032 = vst [vmem:[#allocation113_spill] sm:$0xff] %v22870_v21  ;;  %v22872_v46 = vpop.f32.mrb[62].mxu1  ;;  %14815 = vmatpush1.bf16.msra.mxu0 %v18827_v10  ;;  %v22874_v3 = vpop.f32.mrb[63].mxu0  ;;  %v8929_v23 = vld [vmem:[#allocation14 + $0xfa0] sm:$0xff]  ;;  %v8930_v21 = vld [vmem:[#allocation14 + $0xfa8] sm:$0xff]  ;;  %v18845_v10 = vcombine.low %v8918_v47, %v8922_v32 }
 0x6a2   : > { %24033 = vst [vmem:[#allocation114_spill] sm:$0xff] %v22872_v46  ;;  %24034 = vst [vmem:[#allocation115_spill] sm:$0xff] %v22874_v3  ;;  %15399 = vmatpush1.bf16.msra.mxu1 %v18829_v44  ;;  %v22876_v37 = vpop.f32.mrb[63].mxu1  ;;  %14816 = vmatprep.subr.bf16.mxu0 %v18836_v30  ;;  %v18852_v46 = vcombine.high %v8925_v52, %v8929_v23  ;;  %v18854_v2 = vcombine.high %v8926_v26, %v8930_v21  ;;  %v8937_v44 = vld [vmem:[#allocation14 + $0xfe0] sm:$0xff]  ;;  %v8938_v30 = vld [vmem:[#allocation14 + $0xfe8] sm:$0xff] }
 0x6a3   : > { %24035 = vst [vmem:[#allocation116_spill] sm:$0xff] %v22876_v37  ;;  %15400 = vmatprep.subr.bf16.mxu1 %v18838_v45  ;;  %v8934_v37 = vld [vmem:[#allocation14 + $0xfc8] sm:$0xff]  ;;  %v18851_v25 = vcombine.low %v8925_v52, %v8929_v23  ;;  %v18853_v15 = vcombine.low %v8926_v26, %v8930_v21  ;;  %v18860_v45 = vcombine.high %v8933_v35, %v8937_v44  ;;  %v8953_v52 = vld [vmem:[#allocation14 + $0x1060] sm:$0xff] }
 0x6a4   : > { %v18862_v3 = vcombine.high %v8934_v37, %v8938_v30  ;;  %v18859_v47 = vcombine.low %v8933_v35, %v8937_v44  ;;  %v8950_v23 = vld [vmem:[#allocation14 + $0x1048] sm:$0xff]  ;;  %v8961_v35 = vld [vmem:[#allocation14 + $0x10a0] sm:$0xff]  ;;  %v24036_v44 = vld [vmem:[#allocation29_spill] sm:$0xff] }
 0x6a5   : > { %14817 = vmatpush1.bf16.msra.mxu0 %v18835_v17  ;;  %v8941_v17 = vld [vmem:[#allocation14 + $0x1000] sm:$0xff] }
 0x6a6   : > { %15401 = vmatpush1.bf16.msra.mxu1 %v18837_v1  ;;  %14818 = vmatprep.subr.bf16.mxu0 %v18844_v8  ;;  %v8946_v1 = vld [vmem:[#allocation14 + $0x1028] sm:$0xff]  ;;  %v18868_v32 = vcombine.high %v8941_v17, %v8945_v55  ;;  %v18867_v26 = vcombine.low %v8941_v17, %v8945_v55  ;;  %v8965_v55 = vld [vmem:[#allocation14 + $0x10c0] sm:$0xff] }
 0x6a7   : > { %15402 = vmatprep.subr.bf16.mxu1 %v18846_v31  ;;  %v18861_v31 = vcombine.low %v8934_v37, %v8938_v30  ;;  %v18870_v8 = vcombine.high %v8942_v7, %v8946_v1  ;;  %v18869_v21 = vcombine.low %v8942_v7, %v8946_v1  ;;  %v8958_v37 = vld [vmem:[#allocation14 + $0x1088] sm:$0xff]  ;;  %v8969_v7 = vld [vmem:[#allocation14 + $0x10e0] sm:$0xff] }
 0x6a8   : > { %v8962_v30 = vld [vmem:[#allocation14 + $0x10a8] sm:$0xff]  ;;  %v24037_v1 = vld [vmem:[#allocation30_spill] sm:$0xff] }
 0x6a9   : > { %14819 = vmatpush1.bf16.msra.mxu0 %v18843_v54  ;;  %v8949_v54 = vld [vmem:[#allocation14 + $0x1040] sm:$0xff]  ;;  %v18886_v17 = vcombine.high %v8958_v37, %v8962_v30 }
 0x6aa   : > { %15403 = vmatpush1.bf16.msra.mxu1 %v18845_v10  ;;  %14820 = vmatprep.subr.bf16.mxu0 %v18852_v46  ;;  %v8954_v46 = vld [vmem:[#allocation14 + $0x1068] sm:$0xff]  ;;  %v18876_v10 = vcombine.high %v8949_v54, %v8953_v52 }
 0x6ab   : > { %15404 = vmatprep.subr.bf16.mxu1 %v18854_v2  ;;  %v18878_v2 = vcombine.high %v8950_v23, %v8954_v46 }
 0x6ad   : > { %14821 = vmatpush1.bf16.msra.mxu0 %v18851_v25  ;;  %v8957_v25 = vld [vmem:[#allocation14 + $0x1080] sm:$0xff] }
 0x6ae   : > { %15405 = vmatpush1.bf16.msra.mxu1 %v18853_v15  ;;  %14822 = vmatprep.subr.bf16.mxu0 %v18860_v45  ;;  %v18877_v15 = vcombine.low %v8950_v23, %v8954_v46  ;;  %v18884_v45 = vcombine.high %v8957_v25, %v8961_v35  ;;  %v8973_v23 = vld [vmem:[#allocation14 + $0x1100] sm:$0xff] }
 0x6af   : > { %15406 = vmatprep.subr.bf16.mxu1 %v18862_v3  ;;  %v18875_v3 = vcombine.low %v8949_v54, %v8953_v52  ;;  %v18892_v54 = vcombine.high %v8965_v55, %v8969_v7  ;;  %v8977_v46 = vld [vmem:[#allocation14 + $0x1120] sm:$0xff] }
 0x6b1   : > { %14823 = vmatpush1.bf16.msra.mxu0 %v18859_v47  ;;  %v8966_v47 = vld [vmem:[#allocation14 + $0x10c8] sm:$0xff] }
 0x6b2   : > { %15407 = vmatpush1.bf16.msra.mxu1 %v18861_v31  ;;  %14865 = vmatprep.subr.bf16.mxu0 %v18868_v32  ;;  %v8970_v31 = vld [vmem:[#allocation14 + $0x10e8] sm:$0xff]  ;;  %v18883_v32 = vcombine.low %v8957_v25, %v8961_v35  ;;  %v18900_v25 = vcombine.high %v8973_v23, %v8977_v46 }
 0x6b3   : > { %15449 = vmatprep.subr.bf16.mxu1 %v18870_v8  ;;  %v18885_v8 = vcombine.low %v8958_v37, %v8962_v30  ;;  %v18894_v52 = vcombine.high %v8966_v47, %v8970_v31  ;;  %v8981_v37 = vld [vmem:[#allocation14 + $0x1140] sm:$0xff] }
 0x6b4   : > { %14825 = vmatmul.mubr.bf16.vlgmr.msra.gmra.mrb[64].mxu0 %v24036_v44  ;;  %v8985_v30 = vld [vmem:[#allocation14 + $0x1160] sm:$0xff] }
 0x6b5   : > { %14866 = vmatpush1.bf16.msra.mxu0 %v18867_v26  ;;  %15409 = vmatmul.mubr.bf16.vlgmr.msra.gmra.mrb[64].mxu1 %v24036_v44  ;;  %v8974_v26 = vld [vmem:[#allocation14 + $0x1108] sm:$0xff] }
 0x6b6   : > { %15450 = vmatpush1.bf16.msra.mxu1 %v18869_v21  ;;  %14867 = vmatprep.subr.bf16.mxu0 %v18876_v10  ;;  %v8978_v21 = vld [vmem:[#allocation14 + $0x1128] sm:$0xff] }
 0x6b7   : > { %15451 = vmatprep.subr.bf16.mxu1 %v18878_v2  ;;  %14834 = vmatprep.mubr.bf16.mxu0 %v24037_v1  ;;  %v24038_v10 = vld [vmem:[#allocation31_spill] sm:$0xff]  ;;  %v18891_v2 = vcombine.low %v8965_v55, %v8969_v7  ;;  %v18902_v35 = vcombine.high %v8974_v26, %v8978_v21  ;;  %v18901_v55 = vcombine.low %v8974_v26, %v8978_v21  ;;  %v8997_v26 = vld [vmem:[#allocation14 + $0x11c0] sm:$0xff] }
 0x6b8   : > { %15418 = vmatprep.mubr.bf16.mxu1 %v24037_v1  ;;  %v18899_v1 = vcombine.low %v8973_v23, %v8977_v46  ;;  %v18908_v7 = vcombine.high %v8981_v37, %v8985_v30  ;;  %v9001_v21 = vld [vmem:[#allocation14 + $0x11e0] sm:$0xff] }
 0x6b9   : > { %14868 = vmatpush1.bf16.msra.mxu0 %v18875_v3  ;;  %v18893_v3 = vcombine.low %v8966_v47, %v8970_v31  ;;  %v8989_v47 = vld [vmem:[#allocation14 + $0x1180] sm:$0xff] }
 0x6ba   : > { %15452 = vmatpush1.bf16.msra.mxu1 %v18877_v15  ;;  %14869 = vmatprep.subr.bf16.mxu0 %v18884_v45  ;;  %v24039_v15 = vld [vmem:[#allocation32_spill] sm:$0xff]  ;;  %v8982_v45 = vld [vmem:[#allocation14 + $0x1148] sm:$0xff]  ;;  %v8993_v31 = vld [vmem:[#allocation14 + $0x11a0] sm:$0xff] }
 0x6bb   : > { %15453 = vmatprep.subr.bf16.mxu1 %v18886_v17  ;;  %v8986_v17 = vld [vmem:[#allocation14 + $0x1168] sm:$0xff]  ;;  %v18916_v23 = vcombine.high %v8989_v47, %v8993_v31 }
 0x6bc   : > { %14835 = vmatmul.mubr.bf16.gmra.mrb[68].mxu0 %v24038_v10 }
 0x6bd   : > { %14870 = vmatpush1.bf16.msra.mxu0 %v18883_v32  ;;  %15419 = vmatmul.mubr.bf16.gmra.mrb[68].mxu1 %v24038_v10  ;;  %v18910_v32 = vcombine.high %v8982_v45, %v8986_v17  ;;  %v18907_v10 = vcombine.low %v8981_v37, %v8985_v30  ;;  %v18924_v37 = vcombine.high %v8997_v26, %v9001_v21 }
 0x6be   : > { %15454 = vmatpush1.bf16.msra.mxu1 %v18885_v8  ;;  %14871 = vmatprep.subr.bf16.mxu0 %v18892_v54  ;;  %v8990_v8 = vld [vmem:[#allocation14 + $0x1188] sm:$0xff] }
 0x6bf   : > { %15455 = vmatprep.subr.bf16.mxu1 %v18894_v52  ;;  %14844 = vmatprep.mubr.bf16.mxu0 %v24039_v15  ;;  %v8994_v54 = vld [vmem:[#allocation14 + $0x11a8] sm:$0xff]  ;;  %v24040_v52 = vld [vmem:[#allocation33_spill] sm:$0xff] }
 0x6c0   : > { %15428 = vmatprep.mubr.bf16.mxu1 %v24039_v15  ;;  %v18918_v46 = vcombine.high %v8990_v8, %v8994_v54  ;;  %v18915_v15 = vcombine.low %v8989_v47, %v8993_v31 }
 0x6c1   : > { %14872 = vmatpush1.bf16.msra.mxu0 %v18891_v2  ;;  %v18909_v2 = vcombine.low %v8982_v45, %v8986_v17  ;;  %v9005_v45 = vld [vmem:[#allocation14 + $0x1200] sm:$0xff] }
 0x6c2   : > { %15456 = vmatpush1.bf16.msra.mxu1 %v18893_v3  ;;  %14873 = vmatprep.subr.bf16.mxu0 %v18900_v25  ;;  %v24041_v3 = vld [vmem:[#allocation34_spill] sm:$0xff]  ;;  %v8998_v25 = vld [vmem:[#allocation14 + $0x11c8] sm:$0xff] }
 0x6c3   : > { %15457 = vmatprep.subr.bf16.mxu1 %v18902_v35  ;;  %v9002_v35 = vld [vmem:[#allocation14 + $0x11e8] sm:$0xff]  ;;  %v9009_v17 = vld [vmem:[#allocation14 + $0x1220] sm:$0xff] }
 0x6c4   : > { %14845 = vmatmul.mubr.bf16.gmra.mrb[72].mxu0 %v24040_v52  ;;  %v18926_v30 = vcombine.high %v8998_v25, %v9002_v35  ;;  %v18932_v47 = vcombine.high %v9005_v45, %v9009_v17 }
 0x6c5   : > { %14874 = vmatpush1.bf16.msra.mxu0 %v18899_v1  ;;  %15429 = vmatmul.mubr.bf16.gmra.mrb[72].mxu1 %v24040_v52  ;;  %v18917_v1 = vcombine.low %v8990_v8, %v8994_v54  ;;  %v18923_v52 = vcombine.low %v8997_v26, %v9001_v21  ;;  %v9013_v8 = vld [vmem:[#allocation14 + $0x1240] sm:$0xff] }
 0x6c6   : > { %15458 = vmatpush1.bf16.msra.mxu1 %v18901_v55  ;;  %14875 = vmatprep.subr.bf16.mxu0 %v18908_v7  ;;  %v9006_v55 = vld [vmem:[#allocation14 + $0x1208] sm:$0xff]  ;;  %v9017_v54 = vld [vmem:[#allocation14 + $0x1260] sm:$0xff] }
 0x6c7   : > { %15459 = vmatprep.subr.bf16.mxu1 %v18910_v32  ;;  %14854 = vmatprep.mubr.bf16.mxu0 %v24041_v3  ;;  %v9010_v7 = vld [vmem:[#allocation14 + $0x1228] sm:$0xff]  ;;  %v18940_v26 = vcombine.high %v9013_v8, %v9017_v54 }
 0x6c8   : > { %15438 = vmatprep.mubr.bf16.mxu1 %v24041_v3  ;;  %v24042_v32 = vld [vmem:[#allocation35_spill] sm:$0xff]  ;;  %v18934_v31 = vcombine.high %v9006_v55, %v9010_v7  ;;  %v18931_v3 = vcombine.low %v9005_v45, %v9009_v17  ;;  %v9033_v45 = vld [vmem:[#allocation14 + $0x12e0] sm:$0xff] }
 0x6c9   : > { %14876 = vmatpush1.bf16.msra.mxu0 %v18907_v10  ;;  %v18925_v10 = vcombine.low %v8998_v25, %v9002_v35  ;;  %v9021_v25 = vld [vmem:[#allocation14 + $0x1280] sm:$0xff]  ;;  %v9030_v17 = vld [vmem:[#allocation14 + $0x12c8] sm:$0xff] }
 0x6ca   : > { %15460 = vmatpush1.bf16.msra.mxu1 %v18909_v2  ;;  %14877 = vmatprep.subr.bf16.mxu0 %v18916_v23  ;;  %v24043_v2 = vld [vmem:[#allocation36_spill] sm:$0xff]  ;;  %v9014_v23 = vld [vmem:[#allocation14 + $0x1248] sm:$0xff]  ;;  %v9025_v35 = vld [vmem:[#allocation14 + $0x12a0] sm:$0xff] }
 0x6cb   : > { %15461 = vmatprep.subr.bf16.mxu1 %v18918_v46  ;;  %v9018_v46 = vld [vmem:[#allocation14 + $0x1268] sm:$0xff]  ;;  %v18948_v44 = vcombine.high %v9021_v25, %v9025_v35 }
 0x6cc   : > { %14855 = vmatmul.mubr.bf16.gmra.mrb[76].mxu0 %v24042_v32  ;;  %v18942_v21 = vcombine.high %v9014_v23, %v9018_v46 }
 0x6cd   : > { %14878 = vmatpush1.bf16.msra.mxu0 %v18915_v15  ;;  %15439 = vmatmul.mubr.bf16.gmra.mrb[76].mxu1 %v24042_v32  ;;  %v18933_v15 = vcombine.low %v9006_v55, %v9010_v7  ;;  %v18941_v32 = vcombine.low %v9014_v23, %v9018_v46  ;;  %v18947_v55 = vcombine.low %v9021_v25, %v9025_v35  ;;  %v9049_v25 = vld [vmem:[#allocation14 + $0x1360] sm:$0xff] }
 0x6ce   : > { %15462 = vmatpush1.bf16.msra.mxu1 %v18917_v1  ;;  %14879 = vmatprep.subr.bf16.mxu0 %v18924_v37  ;;  %v9022_v1 = vld [vmem:[#allocation14 + $0x1288] sm:$0xff] }
 0x6cf   : > { %15463 = vmatprep.subr.bf16.mxu1 %v18926_v30  ;;  %14897 = vmatprep.mubr.bf16.mxu0 %v24043_v2  ;;  %v9026_v37 = vld [vmem:[#allocation14 + $0x12a8] sm:$0xff]  ;;  %v18939_v30 = vcombine.low %v9013_v8, %v9017_v54  ;;  %v9041_v8 = vld [vmem:[#allocation14 + $0x1320] sm:$0xff] }
 0x6d0   : > { %15481 = vmatprep.mubr.bf16.mxu1 %v24043_v2  ;;  %v18950_v2 = vcombine.high %v9022_v1, %v9026_v37  ;;  %v18949_v7 = vcombine.low %v9022_v1, %v9026_v37  ;;  %v9038_v54 = vld [vmem:[#allocation14 + $0x1308] sm:$0xff] }
 0x6d1   : > { %14880 = vmatpush1.bf16.msra.mxu0 %v18923_v52  ;;  %v9029_v52 = vld [vmem:[#allocation14 + $0x12c0] sm:$0xff] }
 0x6d2   : > { %15464 = vmatpush1.bf16.msra.mxu1 %v18925_v10  ;;  %14881 = vmatprep.subr.bf16.mxu0 %v18932_v47  ;;  %v9034_v10 = vld [vmem:[#allocation14 + $0x12e8] sm:$0xff]  ;;  %v18956_v47 = vcombine.high %v9029_v52, %v9033_v45  ;;  %v18955_v23 = vcombine.low %v9029_v52, %v9033_v45  ;;  %v9057_v52 = vld [vmem:[#allocation14 + $0x13a0] sm:$0xff] }
 0x6d3   : > { %15465 = vmatprep.subr.bf16.mxu1 %v18934_v31  ;;  %v18958_v31 = vcombine.high %v9030_v17, %v9034_v10  ;;  %v18957_v46 = vcombine.low %v9030_v17, %v9034_v10  ;;  %v9054_v45 = vld [vmem:[#allocation14 + $0x1388] sm:$0xff] }
 0x6d5   : > { %14882 = vmatpush1.bf16.msra.mxu0 %v18931_v3  ;;  %v9037_v3 = vld [vmem:[#allocation14 + $0x1300] sm:$0xff] }
 0x6d6   : > { %15466 = vmatpush1.bf16.msra.mxu1 %v18933_v15  ;;  %14883 = vmatprep.subr.bf16.mxu0 %v18940_v26  ;;  %v9042_v15 = vld [vmem:[#allocation14 + $0x1328] sm:$0xff]  ;;  %v18964_v26 = vcombine.high %v9037_v3, %v9041_v8  ;;  %v18963_v35 = vcombine.low %v9037_v3, %v9041_v8  ;;  %v9065_v3 = vld [vmem:[#allocation14 + $0x13e0] sm:$0xff] }
 0x6d7   : > { %15467 = vmatprep.subr.bf16.mxu1 %v18942_v21  ;;  %v18966_v21 = vcombine.high %v9038_v54, %v9042_v15  ;;  %v9062_v8 = vld [vmem:[#allocation14 + $0x13c8] sm:$0xff] }
 0x6d9   : > { %14884 = vmatpush1.bf16.msra.mxu0 %v18939_v30  ;;  %v9045_v30 = vld [vmem:[#allocation14 + $0x1340] sm:$0xff] }
 0x6da   : > { %15468 = vmatpush1.bf16.msra.mxu1 %v18941_v32  ;;  %14885 = vmatprep.subr.bf16.mxu0 %v18948_v44  ;;  %v9046_v32 = vld [vmem:[#allocation14 + $0x1348] sm:$0xff]  ;;  %v18972_v1 = vcombine.high %v9045_v30, %v9049_v25  ;;  %v18971_v17 = vcombine.low %v9045_v30, %v9049_v25  ;;  %v9073_v30 = vld [vmem:[#allocation14 + $0x1420] sm:$0xff] }
 0x6db   : > { %15469 = vmatprep.subr.bf16.mxu1 %v18950_v2  ;;  %v9050_v44 = vld [vmem:[#allocation14 + $0x1368] sm:$0xff]  ;;  %v18965_v2 = vcombine.low %v9038_v54, %v9042_v15 }
 0x6dc   : > { %v18974_v37 = vcombine.high %v9046_v32, %v9050_v44  ;;  %v18973_v10 = vcombine.low %v9046_v32, %v9050_v44  ;;  %v9070_v25 = vld [vmem:[#allocation14 + $0x1408] sm:$0xff] }
 0x6dd   : > { %14886 = vmatpush1.bf16.msra.mxu0 %v18947_v55  ;;  %v9053_v55 = vld [vmem:[#allocation14 + $0x1380] sm:$0xff] }
 0x6de   : > { %15470 = vmatpush1.bf16.msra.mxu1 %v18949_v7  ;;  %14887 = vmatprep.subr.bf16.mxu0 %v18956_v47  ;;  %v9058_v7 = vld [vmem:[#allocation14 + $0x13a8] sm:$0xff]  ;;  %v18980_v47 = vcombine.high %v9053_v55, %v9057_v52  ;;  %v18979_v54 = vcombine.low %v9053_v55, %v9057_v52  ;;  %v9081_v55 = vld [vmem:[#allocation14 + $0x1460] sm:$0xff] }
 0x6df   : > { %15471 = vmatprep.subr.bf16.mxu1 %v18958_v31  ;;  %v18982_v31 = vcombine.high %v9054_v45, %v9058_v7  ;;  %v18981_v15 = vcombine.low %v9054_v45, %v9058_v7  ;;  %v9078_v52 = vld [vmem:[#allocation14 + $0x1448] sm:$0xff] }
 0x6e1   : > { %14888 = vmatpush1.bf16.msra.mxu0 %v18955_v23  ;;  %v9061_v23 = vld [vmem:[#allocation14 + $0x13c0] sm:$0xff] }
 0x6e2   : > { %15472 = vmatpush1.bf16.msra.mxu1 %v18957_v46  ;;  %14889 = vmatprep.subr.bf16.mxu0 %v18964_v26  ;;  %v9066_v46 = vld [vmem:[#allocation14 + $0x13e8] sm:$0xff]  ;;  %v18988_v26 = vcombine.high %v9061_v23, %v9065_v3  ;;  %v18987_v32 = vcombine.low %v9061_v23, %v9065_v3  ;;  %v9089_v23 = vld [vmem:[#allocation14 + $0x14a0] sm:$0xff]  ;;  %v24044_v3 = vld [vmem:[#allocation37_spill] sm:$0xff] }
 0x6e3   : > { %15473 = vmatprep.subr.bf16.mxu1 %v18966_v21  ;;  %v18990_v21 = vcombine.high %v9062_v8, %v9066_v46  ;;  %v18989_v44 = vcombine.low %v9062_v8, %v9066_v46  ;;  %v9086_v8 = vld [vmem:[#allocation14 + $0x1488] sm:$0xff] }
 0x6e4   : > { %v9090_v46 = vld [vmem:[#allocation14 + $0x14a8] sm:$0xff] }
 0x6e5   : > { %14890 = vmatpush1.bf16.msra.mxu0 %v18963_v35  ;;  %v9069_v35 = vld [vmem:[#allocation14 + $0x1400] sm:$0xff] }
 0x6e6   : > { %15474 = vmatpush1.bf16.msra.mxu1 %v18965_v2  ;;  %14891 = vmatprep.subr.bf16.mxu0 %v18972_v1  ;;  %v9074_v2 = vld [vmem:[#allocation14 + $0x1428] sm:$0xff]  ;;  %v18996_v1 = vcombine.high %v9069_v35, %v9073_v30  ;;  %v18995_v45 = vcombine.low %v9069_v35, %v9073_v30  ;;  %v19014_v35 = vcombine.high %v9086_v8, %v9090_v46  ;;  %v9093_v30 = vld [vmem:[#allocation14 + $0x14c0] sm:$0xff] }
 0x6e7   : > { %15475 = vmatprep.subr.bf16.mxu1 %v18974_v37  ;;  %v18998_v37 = vcombine.high %v9070_v25, %v9074_v2  ;;  %v18997_v7 = vcombine.low %v9070_v25, %v9074_v2  ;;  %v9097_v25 = vld [vmem:[#allocation14 + $0x14e0] sm:$0xff] }
 0x6e8   : > { %v24045_v2 = vld [vmem:[#allocation38_spill] sm:$0xff] }
 0x6e9   : > { %14892 = vmatpush1.bf16.msra.mxu0 %v18971_v17  ;;  %v9077_v17 = vld [vmem:[#allocation14 + $0x1440] sm:$0xff] }
 0x6ea   : > { %15476 = vmatpush1.bf16.msra.mxu1 %v18973_v10  ;;  %14893 = vmatprep.subr.bf16.mxu0 %v18980_v47  ;;  %v9082_v10 = vld [vmem:[#allocation14 + $0x1468] sm:$0xff]  ;;  %v19004_v47 = vcombine.high %v9077_v17, %v9081_v55 }
 0x6eb   : > { %15477 = vmatprep.subr.bf16.mxu1 %v18982_v31  ;;  %v19006_v31 = vcombine.high %v9078_v52, %v9082_v10 }
 0x6ed   : > { %14894 = vmatpush1.bf16.msra.mxu0 %v18979_v54  ;;  %v9085_v54 = vld [vmem:[#allocation14 + $0x1480] sm:$0xff] }
 0x6ee   : > { %15478 = vmatpush1.bf16.msra.mxu1 %v18981_v15  ;;  %14895 = vmatprep.subr.bf16.mxu0 %v18988_v26  ;;  %v19003_v15 = vcombine.low %v9077_v17, %v9081_v55  ;;  %v19005_v26 = vcombine.low %v9078_v52, %v9082_v10  ;;  %v19020_v17 = vcombine.high %v9093_v30, %v9097_v25  ;;  %v9101_v52 = vld [vmem:[#allocation14 + $0x1500] sm:$0xff] }
 0x6ef   : > { %15479 = vmatprep.subr.bf16.mxu1 %v18990_v21  ;;  %v19012_v21 = vcombine.high %v9085_v54, %v9089_v23  ;;  %v9105_v10 = vld [vmem:[#allocation14 + $0x1520] sm:$0xff] }
 0x6f1   : > { %14896 = vmatpush1.bf16.msra.mxu0 %v18987_v32  ;;  %v9094_v32 = vld [vmem:[#allocation14 + $0x14c8] sm:$0xff] }
 0x6f2   : > { %15480 = vmatpush1.bf16.msra.mxu1 %v18989_v44  ;;  %14938 = vmatprep.subr.bf16.mxu0 %v18996_v1  ;;  %v9098_v44 = vld [vmem:[#allocation14 + $0x14e8] sm:$0xff]  ;;  %v19011_v1 = vcombine.low %v9085_v54, %v9089_v23  ;;  %v19028_v54 = vcombine.high %v9101_v52, %v9105_v10 }
 0x6f3   : > { %15522 = vmatprep.subr.bf16.mxu1 %v18998_v37  ;;  %v19013_v37 = vcombine.low %v9086_v8, %v9090_v46  ;;  %v19022_v55 = vcombine.high %v9094_v32, %v9098_v44  ;;  %v9109_v8 = vld [vmem:[#allocation14 + $0x1540] sm:$0xff] }
 0x6f4   : > { %14898 = vmatmul.mubr.bf16.vlgmr.msra.gmra.mrb[64].mxu0 %v24044_v3  ;;  %v9113_v46 = vld [vmem:[#allocation14 + $0x1560] sm:$0xff] }
 0x6f5   : > { %14939 = vmatpush1.bf16.msra.mxu0 %v18995_v45  ;;  %15482 = vmatmul.mubr.bf16.vlgmr.msra.gmra.mrb[64].mxu1 %v24044_v3  ;;  %v9102_v45 = vld [vmem:[#allocation14 + $0x1508] sm:$0xff] }
 0x6f6   : > { %15523 = vmatpush1.bf16.msra.mxu1 %v18997_v7  ;;  %14940 = vmatprep.subr.bf16.mxu0 %v19004_v47  ;;  %v9106_v7 = vld [vmem:[#allocation14 + $0x1528] sm:$0xff] }
 0x6f7   : > { %15524 = vmatprep.subr.bf16.mxu1 %v19006_v31  ;;  %14907 = vmatprep.mubr.bf16.mxu0 %v24045_v2  ;;  %v24046_v47 = vld [vmem:[#allocation39_spill] sm:$0xff]  ;;  %v19019_v31 = vcombine.low %v9093_v30, %v9097_v25  ;;  %v19030_v23 = vcombine.high %v9102_v45, %v9106_v7  ;;  %v19029_v30 = vcombine.low %v9102_v45, %v9106_v7  ;;  %v9125_v45 = vld [vmem:[#allocation14 + $0x15c0] sm:$0xff] }
 0x6f8   : > { %15491 = vmatprep.mubr.bf16.mxu1 %v24045_v2  ;;  %v19027_v2 = vcombine.low %v9101_v52, %v9105_v10  ;;  %v19036_v25 = vcombine.high %v9109_v8, %v9113_v46  ;;  %v9129_v7 = vld [vmem:[#allocation14 + $0x15e0] sm:$0xff] }
 0x6f9   : > { %14941 = vmatpush1.bf16.msra.mxu0 %v19003_v15  ;;  %v19021_v15 = vcombine.low %v9094_v32, %v9098_v44  ;;  %v9117_v32 = vld [vmem:[#allocation14 + $0x1580] sm:$0xff] }
 0x6fa   : > { %15525 = vmatpush1.bf16.msra.mxu1 %v19005_v26  ;;  %14942 = vmatprep.subr.bf16.mxu0 %v19012_v21  ;;  %v24047_v26 = vld [vmem:[#allocation40_spill] sm:$0xff]  ;;  %v9110_v21 = vld [vmem:[#allocation14 + $0x1548] sm:$0xff]  ;;  %v9121_v44 = vld [vmem:[#allocation14 + $0x15a0] sm:$0xff] }
 0x6fb   : > { %15526 = vmatprep.subr.bf16.mxu1 %v19014_v35  ;;  %v9114_v35 = vld [vmem:[#allocation14 + $0x1568] sm:$0xff]  ;;  %v19044_v52 = vcombine.high %v9117_v32, %v9121_v44 }
 0x6fc   : > { %14908 = vmatmul.mubr.bf16.gmra.mrb[68].mxu0 %v24046_v47 }
 0x6fd   : > { %14943 = vmatpush1.bf16.msra.mxu0 %v19011_v1  ;;  %15492 = vmatmul.mubr.bf16.gmra.mrb[68].mxu1 %v24046_v47  ;;  %v19038_v1 = vcombine.high %v9110_v21, %v9114_v35  ;;  %v19035_v47 = vcombine.low %v9109_v8, %v9113_v46  ;;  %v19052_v8 = vcombine.high %v9125_v45, %v9129_v7 }
 0x6fe   : > { %15527 = vmatpush1.bf16.msra.mxu1 %v19013_v37  ;;  %14944 = vmatprep.subr.bf16.mxu0 %v19020_v17  ;;  %v9118_v37 = vld [vmem:[#allocation14 + $0x1588] sm:$0xff] }
 0x6ff   : > { %15528 = vmatprep.subr.bf16.mxu1 %v19022_v55  ;;  %14917 = vmatprep.mubr.bf16.mxu0 %v24047_v26  ;;  %v9122_v17 = vld [vmem:[#allocation14 + $0x15a8] sm:$0xff]  ;;  %v24048_v55 = vld [vmem:[#allocation41_spill] sm:$0xff] }
 0x700   : > { %15501 = vmatprep.mubr.bf16.mxu1 %v24047_v26  ;;  %v19046_v10 = vcombine.high %v9118_v37, %v9122_v17  ;;  %v19043_v26 = vcombine.low %v9117_v32, %v9121_v44 }
 0x701   : > { %14945 = vmatpush1.bf16.msra.mxu0 %v19019_v31  ;;  %v19037_v31 = vcombine.low %v9110_v21, %v9114_v35  ;;  %v9133_v21 = vld [vmem:[#allocation14 + $0x1600] sm:$0xff] }
 0x702   : > { %15529 = vmatpush1.bf16.msra.mxu1 %v19021_v15  ;;  %14946 = vmatprep.subr.bf16.mxu0 %v19028_v54  ;;  %v24049_v15 = vld [vmem:[#allocation42_spill] sm:$0xff]  ;;  %v9126_v54 = vld [vmem:[#allocation14 + $0x15c8] sm:$0xff] }
 0x703   : > { %15530 = vmatprep.subr.bf16.mxu1 %v19030_v23  ;;  %v9130_v23 = vld [vmem:[#allocation14 + $0x15e8] sm:$0xff]  ;;  %v9137_v35 = vld [vmem:[#allocation14 + $0x1620] sm:$0xff] }
 0x704   : > { %14918 = vmatmul.mubr.bf16.gmra.mrb[72].mxu0 %v24048_v55  ;;  %v19054_v46 = vcombine.high %v9126_v54, %v9130_v23  ;;  %v19060_v32 = vcombine.high %v9133_v21, %v9137_v35 }
 0x705   : > { %14947 = vmatpush1.bf16.msra.mxu0 %v19027_v2  ;;  %15502 = vmatmul.mubr.bf16.gmra.mrb[72].mxu1 %v24048_v55  ;;  %v19045_v2 = vcombine.low %v9118_v37, %v9122_v17  ;;  %v19051_v55 = vcombine.low %v9125_v45, %v9129_v7  ;;  %v9141_v37 = vld [vmem:[#allocation14 + $0x1640] sm:$0xff] }
 0x706   : > { %15531 = vmatpush1.bf16.msra.mxu1 %v19029_v30  ;;  %14948 = vmatprep.subr.bf16.mxu0 %v19036_v25  ;;  %v9134_v30 = vld [vmem:[#allocation14 + $0x1608] sm:$0xff]  ;;  %v9145_v17 = vld [vmem:[#allocation14 + $0x1660] sm:$0xff] }
 0x707   : > { %15532 = vmatprep.subr.bf16.mxu1 %v19038_v1  ;;  %14927 = vmatprep.mubr.bf16.mxu0 %v24049_v15  ;;  %v9138_v25 = vld [vmem:[#allocation14 + $0x1628] sm:$0xff]  ;;  %v19068_v45 = vcombine.high %v9141_v37, %v9145_v17 }
 0x708   : > { %15511 = vmatprep.mubr.bf16.mxu1 %v24049_v15  ;;  %v24050_v1 = vld [vmem:[#allocation43_spill] sm:$0xff]  ;;  %v19062_v44 = vcombine.high %v9134_v30, %v9138_v25  ;;  %v19059_v15 = vcombine.low %v9133_v21, %v9137_v35  ;;  %v9161_v21 = vld [vmem:[#allocation14 + $0x16e0] sm:$0xff] }
 0x709   : > { %14949 = vmatpush1.bf16.msra.mxu0 %v19035_v47  ;;  %v19053_v47 = vcombine.low %v9126_v54, %v9130_v23  ;;  %v9149_v54 = vld [vmem:[#allocation14 + $0x1680] sm:$0xff]  ;;  %v9158_v35 = vld [vmem:[#allocation14 + $0x16c8] sm:$0xff] }
 0x70a   : > { %15533 = vmatpush1.bf16.msra.mxu1 %v19037_v31  ;;  %14950 = vmatprep.subr.bf16.mxu0 %v19044_v52  ;;  %v24051_v31 = vld [vmem:[#allocation44_spill] sm:$0xff]  ;;  %v9142_v52 = vld [vmem:[#allocation14 + $0x1648] sm:$0xff]  ;;  %v9153_v23 = vld [vmem:[#allocation14 + $0x16a0] sm:$0xff] }
 0x70b   : > { %15534 = vmatprep.subr.bf16.mxu1 %v19046_v10  ;;  %v9146_v10 = vld [vmem:[#allocation14 + $0x1668] sm:$0xff]  ;;  %v19076_v3 = vcombine.high %v9149_v54, %v9153_v23 }
 0x70c   : > { %14928 = vmatmul.mubr.bf16.gmra.mrb[76].mxu0 %v24050_v1  ;;  %v19070_v7 = vcombine.high %v9142_v52, %v9146_v10 }
 0x70d   : > { %14951 = vmatpush1.bf16.msra.mxu0 %v19043_v26  ;;  %15512 = vmatmul.mubr.bf16.gmra.mrb[76].mxu1 %v24050_v1  ;;  %v19061_v26 = vcombine.low %v9134_v30, %v9138_v25  ;;  %v19069_v1 = vcombine.low %v9142_v52, %v9146_v10  ;;  %v19075_v30 = vcombine.low %v9149_v54, %v9153_v23  ;;  %v9177_v54 = vld [vmem:[#allocation14 + $0x1760] sm:$0xff] }
 0x70e   : > { %15535 = vmatpush1.bf16.msra.mxu1 %v19045_v2  ;;  %14952 = vmatprep.subr.bf16.mxu0 %v19052_v8  ;;  %v9150_v2 = vld [vmem:[#allocation14 + $0x1688] sm:$0xff] }
 0x70f   : > { %15536 = vmatprep.subr.bf16.mxu1 %v19054_v46  ;;  %14970 = vmatprep.mubr.bf16.mxu0 %v24051_v31  ;;  %v9154_v8 = vld [vmem:[#allocation14 + $0x16a8] sm:$0xff]  ;;  %v19067_v46 = vcombine.low %v9141_v37, %v9145_v17  ;;  %v9169_v37 = vld [vmem:[#allocation14 + $0x1720] sm:$0xff] }
 0x710   : > { %15554 = vmatprep.mubr.bf16.mxu1 %v24051_v31  ;;  %v19078_v31 = vcombine.high %v9150_v2, %v9154_v8  ;;  %v19077_v25 = vcombine.low %v9150_v2, %v9154_v8  ;;  %v9166_v17 = vld [vmem:[#allocation14 + $0x1708] sm:$0xff] }
 0x711   : > { %14953 = vmatpush1.bf16.msra.mxu0 %v19051_v55  ;;  %v9157_v55 = vld [vmem:[#allocation14 + $0x16c0] sm:$0xff] }
 0x712   : > { %15537 = vmatpush1.bf16.msra.mxu1 %v19053_v47  ;;  %14954 = vmatprep.subr.bf16.mxu0 %v19060_v32  ;;  %v9162_v47 = vld [vmem:[#allocation14 + $0x16e8] sm:$0xff]  ;;  %v19084_v32 = vcombine.high %v9157_v55, %v9161_v21  ;;  %v19083_v52 = vcombine.low %v9157_v55, %v9161_v21  ;;  %v9185_v55 = vld [vmem:[#allocation14 + $0x17a0] sm:$0xff] }
 0x713   : > { %15538 = vmatprep.subr.bf16.mxu1 %v19062_v44  ;;  %v19086_v44 = vcombine.high %v9158_v35, %v9162_v47  ;;  %v19085_v10 = vcombine.low %v9158_v35, %v9162_v47  ;;  %v9182_v21 = vld [vmem:[#allocation14 + $0x1788] sm:$0xff] }
 0x715   : > { %14955 = vmatpush1.bf16.msra.mxu0 %v19059_v15  ;;  %v9165_v15 = vld [vmem:[#allocation14 + $0x1700] sm:$0xff] }
 0x716   : > { %15539 = vmatpush1.bf16.msra.mxu1 %v19061_v26  ;;  %14956 = vmatprep.subr.bf16.mxu0 %v19068_v45  ;;  %v9170_v26 = vld [vmem:[#allocation14 + $0x1728] sm:$0xff]  ;;  %v19092_v45 = vcombine.high %v9165_v15, %v9169_v37  ;;  %v19091_v23 = vcombine.low %v9165_v15, %v9169_v37  ;;  %v9193_v15 = vld [vmem:[#allocation14 + $0x17e0] sm:$0xff] }
 0x717   : > { %15540 = vmatprep.subr.bf16.mxu1 %v19070_v7  ;;  %v19094_v7 = vcombine.high %v9166_v17, %v9170_v26  ;;  %v9190_v37 = vld [vmem:[#allocation14 + $0x17c8] sm:$0xff] }
 0x719   : > { %14957 = vmatpush1.bf16.msra.mxu0 %v19067_v46  ;;  %v9173_v46 = vld [vmem:[#allocation14 + $0x1740] sm:$0xff] }
 0x71a   : > { %15541 = vmatpush1.bf16.msra.mxu1 %v19069_v1  ;;  %14958 = vmatprep.subr.bf16.mxu0 %v19076_v3  ;;  %v9174_v1 = vld [vmem:[#allocation14 + $0x1748] sm:$0xff]  ;;  %v19100_v2 = vcombine.high %v9173_v46, %v9177_v54  ;;  %v19099_v35 = vcombine.low %v9173_v46, %v9177_v54  ;;  %v9201_v46 = vld [vmem:[#allocation14 + $0x1820] sm:$0xff] }
 0x71b   : > { %15542 = vmatprep.subr.bf16.mxu1 %v19078_v31  ;;  %v9178_v3 = vld [vmem:[#allocation14 + $0x1768] sm:$0xff]  ;;  %v19093_v31 = vcombine.low %v9166_v17, %v9170_v26 }
 0x71c   : > { %v19102_v8 = vcombine.high %v9174_v1, %v9178_v3  ;;  %v19101_v47 = vcombine.low %v9174_v1, %v9178_v3  ;;  %v9198_v54 = vld [vmem:[#allocation14 + $0x1808] sm:$0xff] }
 0x71d   : > { %14959 = vmatpush1.bf16.msra.mxu0 %v19075_v30  ;;  %v9181_v30 = vld [vmem:[#allocation14 + $0x1780] sm:$0xff] }
 0x71e   : > { %15543 = vmatpush1.bf16.msra.mxu1 %v19077_v25  ;;  %14960 = vmatprep.subr.bf16.mxu0 %v19084_v32  ;;  %v9186_v25 = vld [vmem:[#allocation14 + $0x17a8] sm:$0xff]  ;;  %v19108_v32 = vcombine.high %v9181_v30, %v9185_v55  ;;  %v19107_v17 = vcombine.low %v9181_v30, %v9185_v55  ;;  %v9209_v30 = vld [vmem:[#allocation14 + $0x1860] sm:$0xff] }
 0x71f   : > { %15544 = vmatprep.subr.bf16.mxu1 %v19086_v44  ;;  %v19110_v44 = vcombine.high %v9182_v21, %v9186_v25  ;;  %v19109_v26 = vcombine.low %v9182_v21, %v9186_v25  ;;  %v9206_v55 = vld [vmem:[#allocation14 + $0x1848] sm:$0xff] }
 0x721   : > { %14961 = vmatpush1.bf16.msra.mxu0 %v19083_v52  ;;  %v9189_v52 = vld [vmem:[#allocation14 + $0x17c0] sm:$0xff] }
 0x722   : > { %15545 = vmatpush1.bf16.msra.mxu1 %v19085_v10  ;;  %14962 = vmatprep.subr.bf16.mxu0 %v19092_v45  ;;  %v9194_v10 = vld [vmem:[#allocation14 + $0x17e8] sm:$0xff]  ;;  %v19116_v45 = vcombine.high %v9189_v52, %v9193_v15  ;;  %v19115_v1 = vcombine.low %v9189_v52, %v9193_v15  ;;  %v9217_v52 = vld [vmem:[#allocation14 + $0x18a0] sm:$0xff]  ;;  %v24052_v15 = vld [vmem:[#allocation45_spill] sm:$0xff] }
 0x723   : > { %15546 = vmatprep.subr.bf16.mxu1 %v19094_v7  ;;  %v19118_v7 = vcombine.high %v9190_v37, %v9194_v10  ;;  %v19117_v3 = vcombine.low %v9190_v37, %v9194_v10  ;;  %v9214_v37 = vld [vmem:[#allocation14 + $0x1888] sm:$0xff] }
 0x724   : > { %v9218_v10 = vld [vmem:[#allocation14 + $0x18a8] sm:$0xff] }
 0x725   : > { %14963 = vmatpush1.bf16.msra.mxu0 %v19091_v23  ;;  %v9197_v23 = vld [vmem:[#allocation14 + $0x1800] sm:$0xff] }
 0x726   : > { %15547 = vmatpush1.bf16.msra.mxu1 %v19093_v31  ;;  %14964 = vmatprep.subr.bf16.mxu0 %v19100_v2  ;;  %v9202_v31 = vld [vmem:[#allocation14 + $0x1828] sm:$0xff]  ;;  %v19124_v2 = vcombine.high %v9197_v23, %v9201_v46  ;;  %v19123_v21 = vcombine.low %v9197_v23, %v9201_v46  ;;  %v19142_v23 = vcombine.high %v9214_v37, %v9218_v10  ;;  %v9221_v46 = vld [vmem:[#allocation14 + $0x18c0] sm:$0xff] }
 0x727   : > { %15548 = vmatprep.subr.bf16.mxu1 %v19102_v8  ;;  %v19126_v8 = vcombine.high %v9198_v54, %v9202_v31  ;;  %v19125_v25 = vcombine.low %v9198_v54, %v9202_v31  ;;  %v9225_v54 = vld [vmem:[#allocation14 + $0x18e0] sm:$0xff] }
 0x728   : > { %v24053_v31 = vld [vmem:[#allocation46_spill] sm:$0xff] }
 0x729   : > { %14965 = vmatpush1.bf16.msra.mxu0 %v19099_v35  ;;  %v9205_v35 = vld [vmem:[#allocation14 + $0x1840] sm:$0xff] }
 0x72a   : > { %15549 = vmatpush1.bf16.msra.mxu1 %v19101_v47  ;;  %14966 = vmatprep.subr.bf16.mxu0 %v19108_v32  ;;  %v9210_v47 = vld [vmem:[#allocation14 + $0x1868] sm:$0xff]  ;;  %v19132_v32 = vcombine.high %v9205_v35, %v9209_v30 }
 0x72b   : > { %15550 = vmatprep.subr.bf16.mxu1 %v19110_v44  ;;  %v19134_v44 = vcombine.high %v9206_v55, %v9210_v47 }
 0x72d   : > { %14967 = vmatpush1.bf16.msra.mxu0 %v19107_v17  ;;  %v9213_v17 = vld [vmem:[#allocation14 + $0x1880] sm:$0xff] }
 0x72e   : > { %15551 = vmatpush1.bf16.msra.mxu1 %v19109_v26  ;;  %14968 = vmatprep.subr.bf16.mxu0 %v19116_v45  ;;  %v19131_v26 = vcombine.low %v9205_v35, %v9209_v30  ;;  %v19133_v45 = vcombine.low %v9206_v55, %v9210_v47  ;;  %v19148_v35 = vcombine.high %v9221_v46, %v9225_v54  ;;  %v9229_v55 = vld [vmem:[#allocation14 + $0x1900] sm:$0xff] }
 0x72f   : > { %15552 = vmatprep.subr.bf16.mxu1 %v19118_v7  ;;  %v19140_v7 = vcombine.high %v9213_v17, %v9217_v52  ;;  %v9233_v47 = vld [vmem:[#allocation14 + $0x1920] sm:$0xff] }
 0x731   : > { %14969 = vmatpush1.bf16.msra.mxu0 %v19115_v1  ;;  %v9222_v1 = vld [vmem:[#allocation14 + $0x18c8] sm:$0xff] }
 0x732   : > { %15553 = vmatpush1.bf16.msra.mxu1 %v19117_v3  ;;  %15011 = vmatprep.subr.bf16.mxu0 %v19124_v2  ;;  %v9226_v3 = vld [vmem:[#allocation14 + $0x18e8] sm:$0xff]  ;;  %v19139_v2 = vcombine.low %v9213_v17, %v9217_v52  ;;  %v19156_v17 = vcombine.high %v9229_v55, %v9233_v47 }
 0x733   : > { %15595 = vmatprep.subr.bf16.mxu1 %v19126_v8  ;;  %v19141_v8 = vcombine.low %v9214_v37, %v9218_v10  ;;  %v19150_v30 = vcombine.high %v9222_v1, %v9226_v3  ;;  %v9237_v37 = vld [vmem:[#allocation14 + $0x1940] sm:$0xff] }
 0x734   : > { %14971 = vmatmul.mubr.bf16.vlgmr.msra.gmra.mrb[64].mxu0 %v24052_v15  ;;  %v9241_v10 = vld [vmem:[#allocation14 + $0x1960] sm:$0xff] }
 0x735   : > { %15012 = vmatpush1.bf16.msra.mxu0 %v19123_v21  ;;  %15555 = vmatmul.mubr.bf16.vlgmr.msra.gmra.mrb[64].mxu1 %v24052_v15  ;;  %v9230_v21 = vld [vmem:[#allocation14 + $0x1908] sm:$0xff] }
 0x736   : > { %15596 = vmatpush1.bf16.msra.mxu1 %v19125_v25  ;;  %15013 = vmatprep.subr.bf16.mxu0 %v19132_v32  ;;  %v9234_v25 = vld [vmem:[#allocation14 + $0x1928] sm:$0xff] }
 0x737   : > { %15597 = vmatprep.subr.bf16.mxu1 %v19134_v44  ;;  %14980 = vmatprep.mubr.bf16.mxu0 %v24053_v31  ;;  %v24054_v32 = vld [vmem:[#allocation47_spill] sm:$0xff]  ;;  %v19147_v44 = vcombine.low %v9221_v46, %v9225_v54  ;;  %v19158_v52 = vcombine.high %v9230_v21, %v9234_v25  ;;  %v19157_v46 = vcombine.low %v9230_v21, %v9234_v25  ;;  %v9253_v21 = vld [vmem:[#allocation14 + $0x19c0] sm:$0xff] }
 0x738   : > { %15564 = vmatprep.mubr.bf16.mxu1 %v24053_v31  ;;  %v19155_v31 = vcombine.low %v9229_v55, %v9233_v47  ;;  %v19164_v54 = vcombine.high %v9237_v37, %v9241_v10  ;;  %v9257_v25 = vld [vmem:[#allocation14 + $0x19e0] sm:$0xff] }
 0x739   : > { %15014 = vmatpush1.bf16.msra.mxu0 %v19131_v26  ;;  %v19149_v26 = vcombine.low %v9222_v1, %v9226_v3  ;;  %v9245_v1 = vld [vmem:[#allocation14 + $0x1980] sm:$0xff] }
 0x73a   : > { %15598 = vmatpush1.bf16.msra.mxu1 %v19133_v45  ;;  %15015 = vmatprep.subr.bf16.mxu0 %v19140_v7  ;;  %v24055_v45 = vld [vmem:[#allocation48_spill] sm:$0xff]  ;;  %v9238_v7 = vld [vmem:[#allocation14 + $0x1948] sm:$0xff]  ;;  %v9249_v3 = vld [vmem:[#allocation14 + $0x19a0] sm:$0xff] }
 0x73b   : > { %15599 = vmatprep.subr.bf16.mxu1 %v19142_v23  ;;  %v9242_v23 = vld [vmem:[#allocation14 + $0x1968] sm:$0xff]  ;;  %v19172_v55 = vcombine.high %v9245_v1, %v9249_v3 }
 0x73c   : > { %14981 = vmatmul.mubr.bf16.gmra.mrb[68].mxu0 %v24054_v32 }
 0x73d   : > { %15016 = vmatpush1.bf16.msra.mxu0 %v19139_v2  ;;  %15565 = vmatmul.mubr.bf16.gmra.mrb[68].mxu1 %v24054_v32  ;;  %v19166_v2 = vcombine.high %v9238_v7, %v9242_v23  ;;  %v19163_v32 = vcombine.low %v9237_v37, %v9241_v10  ;;  %v19180_v37 = vcombine.high %v9253_v21, %v9257_v25 }
 0x73e   : > { %15600 = vmatpush1.bf16.msra.mxu1 %v19141_v8  ;;  %15017 = vmatprep.subr.bf16.mxu0 %v19148_v35  ;;  %v9246_v8 = vld [vmem:[#allocation14 + $0x1988] sm:$0xff] }
 0x73f   : > { %15601 = vmatprep.subr.bf16.mxu1 %v19150_v30  ;;  %14990 = vmatprep.mubr.bf16.mxu0 %v24055_v45  ;;  %v9250_v35 = vld [vmem:[#allocation14 + $0x19a8] sm:$0xff]  ;;  %v24056_v30 = vld [vmem:[#allocation49_spill] sm:$0xff] }
 0x740   : > { %15574 = vmatprep.mubr.bf16.mxu1 %v24055_v45  ;;  %v19174_v47 = vcombine.high %v9246_v8, %v9250_v35  ;;  %v19171_v45 = vcombine.low %v9245_v1, %v9249_v3 }
 0x741   : > { %15018 = vmatpush1.bf16.msra.mxu0 %v19147_v44  ;;  %v19165_v44 = vcombine.low %v9238_v7, %v9242_v23  ;;  %v9261_v7 = vld [vmem:[#allocation14 + $0x1a00] sm:$0xff] }
 0x742   : > { %15602 = vmatpush1.bf16.msra.mxu1 %v19149_v26  ;;  %15019 = vmatprep.subr.bf16.mxu0 %v19156_v17  ;;  %v24057_v26 = vld [vmem:[#allocation50_spill] sm:$0xff]  ;;  %v9254_v17 = vld [vmem:[#allocation14 + $0x19c8] sm:$0xff] }
 0x743   : > { %15603 = vmatprep.subr.bf16.mxu1 %v19158_v52  ;;  %v9258_v52 = vld [vmem:[#allocation14 + $0x19e8] sm:$0xff]  ;;  %v9265_v23 = vld [vmem:[#allocation14 + $0x1a20] sm:$0xff] }
 0x744   : > { %14991 = vmatmul.mubr.bf16.gmra.mrb[72].mxu0 %v24056_v30  ;;  %v19182_v10 = vcombine.high %v9254_v17, %v9258_v52  ;;  %v19188_v1 = vcombine.high %v9261_v7, %v9265_v23 }
 0x745   : > { %15020 = vmatpush1.bf16.msra.mxu0 %v19155_v31  ;;  %15575 = vmatmul.mubr.bf16.gmra.mrb[72].mxu1 %v24056_v30  ;;  %v19173_v31 = vcombine.low %v9246_v8, %v9250_v35  ;;  %v19179_v30 = vcombine.low %v9253_v21, %v9257_v25  ;;  %v9269_v8 = vld [vmem:[#allocation14 + $0x1a40] sm:$0xff] }
 0x746   : > { %15604 = vmatpush1.bf16.msra.mxu1 %v19157_v46  ;;  %15021 = vmatprep.subr.bf16.mxu0 %v19164_v54  ;;  %v9262_v46 = vld [vmem:[#allocation14 + $0x1a08] sm:$0xff]  ;;  %v9273_v35 = vld [vmem:[#allocation14 + $0x1a60] sm:$0xff] }
 0x747   : > { %15605 = vmatprep.subr.bf16.mxu1 %v19166_v2  ;;  %15000 = vmatprep.mubr.bf16.mxu0 %v24057_v26  ;;  %v9266_v54 = vld [vmem:[#allocation14 + $0x1a28] sm:$0xff]  ;;  %v19196_v21 = vcombine.high %v9269_v8, %v9273_v35 }
 0x748   : > { %15584 = vmatprep.mubr.bf16.mxu1 %v24057_v26  ;;  %v24058_v2 = vld [vmem:[#allocation51_spill] sm:$0xff]  ;;  %v19190_v3 = vcombine.high %v9262_v46, %v9266_v54  ;;  %v19187_v26 = vcombine.low %v9261_v7, %v9265_v23  ;;  %v9289_v7 = vld [vmem:[#allocation14 + $0x1ae0] sm:$0xff] }
 0x749   : > { %15022 = vmatpush1.bf16.msra.mxu0 %v19163_v32  ;;  %v19181_v32 = vcombine.low %v9254_v17, %v9258_v52  ;;  %v9277_v17 = vld [vmem:[#allocation14 + $0x1a80] sm:$0xff]  ;;  %v9286_v23 = vld [vmem:[#allocation14 + $0x1ac8] sm:$0xff] }
 0x74a   : > { %15606 = vmatpush1.bf16.msra.mxu1 %v19165_v44  ;;  %15023 = vmatprep.subr.bf16.mxu0 %v19172_v55  ;;  %v24059_v44 = vld [vmem:[#allocation52_spill] sm:$0xff]  ;;  %v9270_v55 = vld [vmem:[#allocation14 + $0x1a48] sm:$0xff]  ;;  %v9281_v52 = vld [vmem:[#allocation14 + $0x1aa0] sm:$0xff] }
 0x74b   : > { %15607 = vmatprep.subr.bf16.mxu1 %v19174_v47  ;;  %v9274_v47 = vld [vmem:[#allocation14 + $0x1a68] sm:$0xff]  ;;  %v19204_v15 = vcombine.high %v9277_v17, %v9281_v52 }
 0x74c   : > { %15001 = vmatmul.mubr.bf16.gmra.mrb[76].mxu0 %v24058_v2  ;;  %v19198_v25 = vcombine.high %v9270_v55, %v9274_v47 }
 0x74d   : > { %15024 = vmatpush1.bf16.msra.mxu0 %v19171_v45  ;;  %15585 = vmatmul.mubr.bf16.gmra.mrb[76].mxu1 %v24058_v2  ;;  %v19189_v45 = vcombine.low %v9262_v46, %v9266_v54  ;;  %v19197_v2 = vcombine.low %v9270_v55, %v9274_v47  ;;  %v19203_v46 = vcombine.low %v9277_v17, %v9281_v52  ;;  %v9305_v17 = vld [vmem:[#allocation14 + $0x1b60] sm:$0xff] }
 0x74e   : > { %15608 = vmatpush1.bf16.msra.mxu1 %v19173_v31  ;;  %15025 = vmatprep.subr.bf16.mxu0 %v19180_v37  ;;  %v9278_v31 = vld [vmem:[#allocation14 + $0x1a88] sm:$0xff] }
 0x74f   : > { %15609 = vmatprep.subr.bf16.mxu1 %v19182_v10  ;;  %15043 = vmatprep.mubr.bf16.mxu0 %v24059_v44  ;;  %v9282_v37 = vld [vmem:[#allocation14 + $0x1aa8] sm:$0xff]  ;;  %v19195_v10 = vcombine.low %v9269_v8, %v9273_v35  ;;  %v9297_v8 = vld [vmem:[#allocation14 + $0x1b20] sm:$0xff] }
 0x750   : > { %15627 = vmatprep.mubr.bf16.mxu1 %v24059_v44  ;;  %v19206_v44 = vcombine.high %v9278_v31, %v9282_v37  ;;  %v19205_v54 = vcombine.low %v9278_v31, %v9282_v37  ;;  %v9294_v35 = vld [vmem:[#allocation14 + $0x1b08] sm:$0xff] }
 0x751   : > { %15026 = vmatpush1.bf16.msra.mxu0 %v19179_v30  ;;  %v9285_v30 = vld [vmem:[#allocation14 + $0x1ac0] sm:$0xff] }
 0x752   : > { %15610 = vmatpush1.bf16.msra.mxu1 %v19181_v32  ;;  %15027 = vmatprep.subr.bf16.mxu0 %v19188_v1  ;;  %v9290_v32 = vld [vmem:[#allocation14 + $0x1ae8] sm:$0xff]  ;;  %v19212_v1 = vcombine.high %v9285_v30, %v9289_v7  ;;  %v19211_v55 = vcombine.low %v9285_v30, %v9289_v7  ;;  %v9313_v30 = vld [vmem:[#allocation14 + $0x1ba0] sm:$0xff] }
 0x753   : > { %15611 = vmatprep.subr.bf16.mxu1 %v19190_v3  ;;  %v19214_v3 = vcombine.high %v9286_v23, %v9290_v32  ;;  %v19213_v47 = vcombine.low %v9286_v23, %v9290_v32  ;;  %v9310_v7 = vld [vmem:[#allocation14 + $0x1b88] sm:$0xff] }
 0x755   : > { %15028 = vmatpush1.bf16.msra.mxu0 %v19187_v26  ;;  %v9293_v26 = vld [vmem:[#allocation14 + $0x1b00] sm:$0xff] }
 0x756   : > { %15612 = vmatpush1.bf16.msra.mxu1 %v19189_v45  ;;  %15029 = vmatprep.subr.bf16.mxu0 %v19196_v21  ;;  %v9298_v45 = vld [vmem:[#allocation14 + $0x1b28] sm:$0xff]  ;;  %v19220_v21 = vcombine.high %v9293_v26, %v9297_v8  ;;  %v19219_v52 = vcombine.low %v9293_v26, %v9297_v8  ;;  %v9321_v26 = vld [vmem:[#allocation14 + $0x1be0] sm:$0xff] }
 0x757   : > { %15613 = vmatprep.subr.bf16.mxu1 %v19198_v25  ;;  %v19222_v25 = vcombine.high %v9294_v35, %v9298_v45  ;;  %v9318_v8 = vld [vmem:[#allocation14 + $0x1bc8] sm:$0xff] }
 0x759   : > { %15030 = vmatpush1.bf16.msra.mxu0 %v19195_v10  ;;  %v9301_v10 = vld [vmem:[#allocation14 + $0x1b40] sm:$0xff] }
 0x75a   : > { %15614 = vmatpush1.bf16.msra.mxu1 %v19197_v2  ;;  %15031 = vmatprep.subr.bf16.mxu0 %v19204_v15  ;;  %v9302_v2 = vld [vmem:[#allocation14 + $0x1b48] sm:$0xff]  ;;  %v19228_v31 = vcombine.high %v9301_v10, %v9305_v17  ;;  %v19227_v23 = vcombine.low %v9301_v10, %v9305_v17  ;;  %v9329_v10 = vld [vmem:[#allocation14 + $0x1c20] sm:$0xff] }
 0x75b   : > { %15615 = vmatprep.subr.bf16.mxu1 %v19206_v44  ;;  %v9306_v15 = vld [vmem:[#allocation14 + $0x1b68] sm:$0xff]  ;;  %v19221_v44 = vcombine.low %v9294_v35, %v9298_v45 }
 0x75c   : > { %v19230_v37 = vcombine.high %v9302_v2, %v9306_v15  ;;  %v19229_v32 = vcombine.low %v9302_v2, %v9306_v15  ;;  %v9326_v17 = vld [vmem:[#allocation14 + $0x1c08] sm:$0xff] }
 0x75d   : > { %15032 = vmatpush1.bf16.msra.mxu0 %v19203_v46  ;;  %v9309_v46 = vld [vmem:[#allocation14 + $0x1b80] sm:$0xff] }
 0x75e   : > { %15616 = vmatpush1.bf16.msra.mxu1 %v19205_v54  ;;  %15033 = vmatprep.subr.bf16.mxu0 %v19212_v1  ;;  %v9314_v54 = vld [vmem:[#allocation14 + $0x1ba8] sm:$0xff]  ;;  %v19236_v1 = vcombine.high %v9309_v46, %v9313_v30  ;;  %v19235_v35 = vcombine.low %v9309_v46, %v9313_v30  ;;  %v9337_v46 = vld [vmem:[#allocation14 + $0x1c60] sm:$0xff] }
 0x75f   : > { %15617 = vmatprep.subr.bf16.mxu1 %v19214_v3  ;;  %v19238_v3 = vcombine.high %v9310_v7, %v9314_v54  ;;  %v19237_v45 = vcombine.low %v9310_v7, %v9314_v54  ;;  %v9334_v30 = vld [vmem:[#allocation14 + $0x1c48] sm:$0xff] }
 0x761   : > { %15034 = vmatpush1.bf16.msra.mxu0 %v19211_v55  ;;  %v9317_v55 = vld [vmem:[#allocation14 + $0x1bc0] sm:$0xff] }
 0x762   : > { %15618 = vmatpush1.bf16.msra.mxu1 %v19213_v47  ;;  %15035 = vmatprep.subr.bf16.mxu0 %v19220_v21  ;;  %v9322_v47 = vld [vmem:[#allocation14 + $0x1be8] sm:$0xff]  ;;  %v19244_v21 = vcombine.high %v9317_v55, %v9321_v26  ;;  %v19243_v2 = vcombine.low %v9317_v55, %v9321_v26  ;;  %v9345_v55 = vld [vmem:[#allocation14 + $0x1ca0] sm:$0xff]  ;;  %v24060_v26 = vld [vmem:[#allocation53_spill] sm:$0xff] }
 0x763   : > { %15619 = vmatprep.subr.bf16.mxu1 %v19222_v25  ;;  %v19246_v25 = vcombine.high %v9318_v8, %v9322_v47  ;;  %v19245_v15 = vcombine.low %v9318_v8, %v9322_v47  ;;  %v9342_v8 = vld [vmem:[#allocation14 + $0x1c88] sm:$0xff] }
 0x764   : > { %v9346_v47 = vld [vmem:[#allocation14 + $0x1ca8] sm:$0xff] }
 0x765   : > { %15036 = vmatpush1.bf16.msra.mxu0 %v19219_v52  ;;  %v9325_v52 = vld [vmem:[#allocation14 + $0x1c00] sm:$0xff] }
 0x766   : > { %15620 = vmatpush1.bf16.msra.mxu1 %v19221_v44  ;;  %15037 = vmatprep.subr.bf16.mxu0 %v19228_v31  ;;  %v9330_v44 = vld [vmem:[#allocation14 + $0x1c28] sm:$0xff]  ;;  %v19252_v31 = vcombine.high %v9325_v52, %v9329_v10  ;;  %v19251_v7 = vcombine.low %v9325_v52, %v9329_v10  ;;  %v19270_v52 = vcombine.high %v9342_v8, %v9346_v47  ;;  %v9349_v10 = vld [vmem:[#allocation14 + $0x1cc0] sm:$0xff] }
 0x767   : > { %15621 = vmatprep.subr.bf16.mxu1 %v19230_v37  ;;  %v19254_v37 = vcombine.high %v9326_v17, %v9330_v44  ;;  %v19253_v54 = vcombine.low %v9326_v17, %v9330_v44  ;;  %v9353_v17 = vld [vmem:[#allocation14 + $0x1ce0] sm:$0xff] }
 0x768   : > { %v24061_v44 = vld [vmem:[#allocation54_spill] sm:$0xff] }
 0x769   : > { %15038 = vmatpush1.bf16.msra.mxu0 %v19227_v23  ;;  %v9333_v23 = vld [vmem:[#allocation14 + $0x1c40] sm:$0xff] }
 0x76a   : > { %15622 = vmatpush1.bf16.msra.mxu1 %v19229_v32  ;;  %15039 = vmatprep.subr.bf16.mxu0 %v19236_v1  ;;  %v9338_v32 = vld [vmem:[#allocation14 + $0x1c68] sm:$0xff]  ;;  %v19260_v1 = vcombine.high %v9333_v23, %v9337_v46 }
 0x76b   : > { %15623 = vmatprep.subr.bf16.mxu1 %v19238_v3  ;;  %v19262_v3 = vcombine.high %v9334_v30, %v9338_v32 }
 0x76d   : > { %15040 = vmatpush1.bf16.msra.mxu0 %v19235_v35  ;;  %v9341_v35 = vld [vmem:[#allocation14 + $0x1c80] sm:$0xff] }
 0x76e   : > { %15624 = vmatpush1.bf16.msra.mxu1 %v19237_v45  ;;  %15041 = vmatprep.subr.bf16.mxu0 %v19244_v21  ;;  %v19259_v45 = vcombine.low %v9333_v23, %v9337_v46  ;;  %v19261_v21 = vcombine.low %v9334_v30, %v9338_v32  ;;  %v19276_v23 = vcombine.high %v9349_v10, %v9353_v17  ;;  %v9357_v30 = vld [vmem:[#allocation14 + $0x1d00] sm:$0xff] }
 0x76f   : > { %15625 = vmatprep.subr.bf16.mxu1 %v19246_v25  ;;  %v19268_v25 = vcombine.high %v9341_v35, %v9345_v55  ;;  %v9361_v32 = vld [vmem:[#allocation14 + $0x1d20] sm:$0xff] }
 0x771   : > { %15042 = vmatpush1.bf16.msra.mxu0 %v19243_v2  ;;  %v9350_v2 = vld [vmem:[#allocation14 + $0x1cc8] sm:$0xff] }
 0x772   : > { %15626 = vmatpush1.bf16.msra.mxu1 %v19245_v15  ;;  %15084 = vmatprep.subr.bf16.mxu0 %v19252_v31  ;;  %v9354_v15 = vld [vmem:[#allocation14 + $0x1ce8] sm:$0xff]  ;;  %v19267_v31 = vcombine.low %v9341_v35, %v9345_v55  ;;  %v19284_v35 = vcombine.high %v9357_v30, %v9361_v32 }
 0x773   : > { %15668 = vmatprep.subr.bf16.mxu1 %v19254_v37  ;;  %v19269_v37 = vcombine.low %v9342_v8, %v9346_v47  ;;  %v19278_v46 = vcombine.high %v9350_v2, %v9354_v15  ;;  %v9365_v8 = vld [vmem:[#allocation14 + $0x1d40] sm:$0xff] }
 0x774   : > { %15044 = vmatmul.mubr.bf16.vlgmr.msra.gmra.mrb[64].mxu0 %v24060_v26  ;;  %v9369_v47 = vld [vmem:[#allocation14 + $0x1d60] sm:$0xff] }
 0x775   : > { %15085 = vmatpush1.bf16.msra.mxu0 %v19251_v7  ;;  %15628 = vmatmul.mubr.bf16.vlgmr.msra.gmra.mrb[64].mxu1 %v24060_v26  ;;  %v9358_v7 = vld [vmem:[#allocation14 + $0x1d08] sm:$0xff] }
 0x776   : > { %15669 = vmatpush1.bf16.msra.mxu1 %v19253_v54  ;;  %15086 = vmatprep.subr.bf16.mxu0 %v19260_v1  ;;  %v9362_v54 = vld [vmem:[#allocation14 + $0x1d28] sm:$0xff] }
 0x777   : > { %15670 = vmatprep.subr.bf16.mxu1 %v19262_v3  ;;  %15053 = vmatprep.mubr.bf16.mxu0 %v24061_v44  ;;  %v24062_v1 = vld [vmem:[#allocation55_spill] sm:$0xff]  ;;  %v19275_v3 = vcombine.low %v9349_v10, %v9353_v17  ;;  %v19286_v55 = vcombine.high %v9358_v7, %v9362_v54  ;;  %v19285_v10 = vcombine.low %v9358_v7, %v9362_v54  ;;  %v9381_v7 = vld [vmem:[#allocation14 + $0x1dc0] sm:$0xff] }
 0x778   : > { %15637 = vmatprep.mubr.bf16.mxu1 %v24061_v44  ;;  %v19283_v44 = vcombine.low %v9357_v30, %v9361_v32  ;;  %v19292_v17 = vcombine.high %v9365_v8, %v9369_v47  ;;  %v9385_v54 = vld [vmem:[#allocation14 + $0x1de0] sm:$0xff] }
 0x779   : > { %15087 = vmatpush1.bf16.msra.mxu0 %v19259_v45  ;;  %v19277_v45 = vcombine.low %v9350_v2, %v9354_v15  ;;  %v9373_v2 = vld [vmem:[#allocation14 + $0x1d80] sm:$0xff] }
 0x77a   : > { %15671 = vmatpush1.bf16.msra.mxu1 %v19261_v21  ;;  %15088 = vmatprep.subr.bf16.mxu0 %v19268_v25  ;;  %v24063_v21 = vld [vmem:[#allocation56_spill] sm:$0xff]  ;;  %v9366_v25 = vld [vmem:[#allocation14 + $0x1d48] sm:$0xff]  ;;  %v9377_v15 = vld [vmem:[#allocation14 + $0x1da0] sm:$0xff] }
 0x77b   : > { %15672 = vmatprep.subr.bf16.mxu1 %v19270_v52  ;;  %v9370_v52 = vld [vmem:[#allocation14 + $0x1d68] sm:$0xff]  ;;  %v19300_v30 = vcombine.high %v9373_v2, %v9377_v15 }
 0x77c   : > { %15054 = vmatmul.mubr.bf16.gmra.mrb[68].mxu0 %v24062_v1 }
 0x77d   : > { %15089 = vmatpush1.bf16.msra.mxu0 %v19267_v31  ;;  %15638 = vmatmul.mubr.bf16.gmra.mrb[68].mxu1 %v24062_v1  ;;  %v19294_v31 = vcombine.high %v9366_v25, %v9370_v52  ;;  %v19291_v1 = vcombine.low %v9365_v8, %v9369_v47  ;;  %v19308_v8 = vcombine.high %v9381_v7, %v9385_v54 }
 0x77e   : > { %15673 = vmatpush1.bf16.msra.mxu1 %v19269_v37  ;;  %15090 = vmatprep.subr.bf16.mxu0 %v19276_v23  ;;  %v9374_v37 = vld [vmem:[#allocation14 + $0x1d88] sm:$0xff] }
 0x77f   : > { %15674 = vmatprep.subr.bf16.mxu1 %v19278_v46  ;;  %15063 = vmatprep.mubr.bf16.mxu0 %v24063_v21  ;;  %v9378_v23 = vld [vmem:[#allocation14 + $0x1da8] sm:$0xff]  ;;  %v24064_v46 = vld [vmem:[#allocation57_spill] sm:$0xff] }
 0x780   : > { %15647 = vmatprep.mubr.bf16.mxu1 %v24063_v21  ;;  %v19302_v32 = vcombine.high %v9374_v37, %v9378_v23  ;;  %v19299_v21 = vcombine.low %v9373_v2, %v9377_v15 }
 0x781   : > { %15091 = vmatpush1.bf16.msra.mxu0 %v19275_v3  ;;  %v19293_v3 = vcombine.low %v9366_v25, %v9370_v52  ;;  %v9389_v25 = vld [vmem:[#allocation14 + $0x1e00] sm:$0xff] }
 0x782   : > { %15675 = vmatpush1.bf16.msra.mxu1 %v19277_v45  ;;  %15092 = vmatprep.subr.bf16.mxu0 %v19284_v35  ;;  %v24065_v45 = vld [vmem:[#allocation58_spill] sm:$0xff]  ;;  %v9382_v35 = vld [vmem:[#allocation14 + $0x1dc8] sm:$0xff] }
 0x783   : > { %15676 = vmatprep.subr.bf16.mxu1 %v19286_v55  ;;  %v9386_v55 = vld [vmem:[#allocation14 + $0x1de8] sm:$0xff]  ;;  %v9393_v52 = vld [vmem:[#allocation14 + $0x1e20] sm:$0xff] }
 0x784   : > { %15064 = vmatmul.mubr.bf16.gmra.mrb[72].mxu0 %v24064_v46  ;;  %v19310_v47 = vcombine.high %v9382_v35, %v9386_v55  ;;  %v19316_v2 = vcombine.high %v9389_v25, %v9393_v52 }
 0x785   : > { %15093 = vmatpush1.bf16.msra.mxu0 %v19283_v44  ;;  %15648 = vmatmul.mubr.bf16.gmra.mrb[72].mxu1 %v24064_v46  ;;  %v19301_v44 = vcombine.low %v9374_v37, %v9378_v23  ;;  %v19307_v46 = vcombine.low %v9381_v7, %v9385_v54  ;;  %v9397_v37 = vld [vmem:[#allocation14 + $0x1e40] sm:$0xff] }
 0x786   : > { %15677 = vmatpush1.bf16.msra.mxu1 %v19285_v10  ;;  %15094 = vmatprep.subr.bf16.mxu0 %v19292_v17  ;;  %v9390_v10 = vld [vmem:[#allocation14 + $0x1e08] sm:$0xff]  ;;  %v9401_v23 = vld [vmem:[#allocation14 + $0x1e60] sm:$0xff] }
 0x787   : > { %15678 = vmatprep.subr.bf16.mxu1 %v19294_v31  ;;  %15073 = vmatprep.mubr.bf16.mxu0 %v24065_v45  ;;  %v9394_v17 = vld [vmem:[#allocation14 + $0x1e28] sm:$0xff]  ;;  %v19324_v7 = vcombine.high %v9397_v37, %v9401_v23 }
 0x788   : > { %15657 = vmatprep.mubr.bf16.mxu1 %v24065_v45  ;;  %v24066_v31 = vld [vmem:[#allocation59_spill] sm:$0xff]  ;;  %v19318_v15 = vcombine.high %v9390_v10, %v9394_v17  ;;  %v19315_v45 = vcombine.low %v9389_v25, %v9393_v52  ;;  %v9417_v25 = vld [vmem:[#allocation14 + $0x1ee0] sm:$0xff] }
 0x789   : > { %15095 = vmatpush1.bf16.msra.mxu0 %v19291_v1  ;;  %v19309_v1 = vcombine.low %v9382_v35, %v9386_v55  ;;  %v9405_v35 = vld [vmem:[#allocation14 + $0x1e80] sm:$0xff]  ;;  %v9414_v52 = vld [vmem:[#allocation14 + $0x1ec8] sm:$0xff] }
 0x78a   : > { %15679 = vmatpush1.bf16.msra.mxu1 %v19293_v3  ;;  %15096 = vmatprep.subr.bf16.mxu0 %v19300_v30  ;;  %v24067_v3 = vld [vmem:[#allocation60_spill] sm:$0xff]  ;;  %v9398_v30 = vld [vmem:[#allocation14 + $0x1e48] sm:$0xff]  ;;  %v9409_v55 = vld [vmem:[#allocation14 + $0x1ea0] sm:$0xff] }
 0x78b   : > { %15680 = vmatprep.subr.bf16.mxu1 %v19302_v32  ;;  %v9402_v32 = vld [vmem:[#allocation14 + $0x1e68] sm:$0xff]  ;;  %v19332_v26 = vcombine.high %v9405_v35, %v9409_v55 }
 0x78c   : > { %15074 = vmatmul.mubr.bf16.gmra.mrb[76].mxu0 %v24066_v31  ;;  %v19326_v54 = vcombine.high %v9398_v30, %v9402_v32 }
 0x78d   : > { %15097 = vmatpush1.bf16.msra.mxu0 %v19299_v21  ;;  %15658 = vmatmul.mubr.bf16.gmra.mrb[76].mxu1 %v24066_v31  ;;  %v19317_v21 = vcombine.low %v9390_v10, %v9394_v17  ;;  %v19325_v31 = vcombine.low %v9398_v30, %v9402_v32  ;;  %v19331_v10 = vcombine.low %v9405_v35, %v9409_v55  ;;  %v9433_v35 = vld [vmem:[#allocation14 + $0x1f60] sm:$0xff] }
 0x78e   : > { %15681 = vmatpush1.bf16.msra.mxu1 %v19301_v44  ;;  %15098 = vmatprep.subr.bf16.mxu0 %v19308_v8  ;;  %v9406_v44 = vld [vmem:[#allocation14 + $0x1e88] sm:$0xff] }
 0x78f   : > { %15682 = vmatprep.subr.bf16.mxu1 %v19310_v47  ;;  %15116 = vmatprep.mubr.bf16.mxu0 %v24067_v3  ;;  %v9410_v8 = vld [vmem:[#allocation14 + $0x1ea8] sm:$0xff]  ;;  %v19323_v47 = vcombine.low %v9397_v37, %v9401_v23  ;;  %v9425_v37 = vld [vmem:[#allocation14 + $0x1f20] sm:$0xff] }
 0x790   : > { %15700 = vmatprep.mubr.bf16.mxu1 %v24067_v3  ;;  %v19334_v3 = vcombine.high %v9406_v44, %v9410_v8  ;;  %v19333_v17 = vcombine.low %v9406_v44, %v9410_v8  ;;  %v9422_v23 = vld [vmem:[#allocation14 + $0x1f08] sm:$0xff] }
 0x791   : > { %15099 = vmatpush1.bf16.msra.mxu0 %v19307_v46  ;;  %v9413_v46 = vld [vmem:[#allocation14 + $0x1ec0] sm:$0xff] }
 0x792   : > { %15683 = vmatpush1.bf16.msra.mxu1 %v19309_v1  ;;  %15100 = vmatprep.subr.bf16.mxu0 %v19316_v2  ;;  %v9418_v1 = vld [vmem:[#allocation14 + $0x1ee8] sm:$0xff]  ;;  %v19340_v2 = vcombine.high %v9413_v46, %v9417_v25  ;;  %v19339_v30 = vcombine.low %v9413_v46, %v9417_v25  ;;  %v9441_v46 = vld [vmem:[#allocation14 + $0x1fa0] sm:$0xff] }
 0x793   : > { %15684 = vmatprep.subr.bf16.mxu1 %v19318_v15  ;;  %v19342_v15 = vcombine.high %v9414_v52, %v9418_v1  ;;  %v19341_v32 = vcombine.low %v9414_v52, %v9418_v1  ;;  %v9438_v25 = vld [vmem:[#allocation14 + $0x1f88] sm:$0xff] }
 0x795   : > { %15101 = vmatpush1.bf16.msra.mxu0 %v19315_v45  ;;  %v9421_v45 = vld [vmem:[#allocation14 + $0x1f00] sm:$0xff] }
 0x796   : > { %15685 = vmatpush1.bf16.msra.mxu1 %v19317_v21  ;;  %15102 = vmatprep.subr.bf16.mxu0 %v19324_v7  ;;  %v9426_v21 = vld [vmem:[#allocation14 + $0x1f28] sm:$0xff]  ;;  %v19348_v7 = vcombine.high %v9421_v45, %v9425_v37  ;;  %v19347_v55 = vcombine.low %v9421_v45, %v9425_v37  ;;  %v9449_v45 = vld [vmem:[#allocation14 + $0x1fe0] sm:$0xff] }
 0x797   : > { %15686 = vmatprep.subr.bf16.mxu1 %v19326_v54  ;;  %v19350_v54 = vcombine.high %v9422_v23, %v9426_v21  ;;  %v9446_v37 = vld [vmem:[#allocation14 + $0x1fc8] sm:$0xff] }
 0x799   : > { %15103 = vmatpush1.bf16.msra.mxu0 %v19323_v47  ;;  %v9429_v47 = vld [vmem:[#allocation14 + $0x1f40] sm:$0xff] }
 0x79a   : > { %15687 = vmatpush1.bf16.msra.mxu1 %v19325_v31  ;;  %15104 = vmatprep.subr.bf16.mxu0 %v19332_v26  ;;  %v9430_v31 = vld [vmem:[#allocation14 + $0x1f48] sm:$0xff]  ;;  %v19356_v44 = vcombine.high %v9429_v47, %v9433_v35  ;;  %v19355_v52 = vcombine.low %v9429_v47, %v9433_v35  ;;  %v8435_v47 = vld [vmem:[#allocation14 + $0x30] sm:$0xff]  ;;  %v8432_v35 = vld [vmem:[#allocation14 + $0x18] sm:$0xff] }
 0x79b   : > { %15688 = vmatprep.subr.bf16.mxu1 %v19334_v3  ;;  %v9434_v26 = vld [vmem:[#allocation14 + $0x1f68] sm:$0xff]  ;;  %v19349_v3 = vcombine.low %v9422_v23, %v9426_v21 }
 0x79c   : > { %v19358_v8 = vcombine.high %v9430_v31, %v9434_v26  ;;  %v19357_v1 = vcombine.low %v9430_v31, %v9434_v26 }
 0x79d   : > { %15105 = vmatpush1.bf16.msra.mxu0 %v19331_v10  ;;  %v9437_v10 = vld [vmem:[#allocation14 + $0x1f80] sm:$0xff] }
 0x79e   : > { %15689 = vmatpush1.bf16.msra.mxu1 %v19333_v17  ;;  %15106 = vmatprep.subr.bf16.mxu0 %v19340_v2  ;;  %v9442_v17 = vld [vmem:[#allocation14 + $0x1fa8] sm:$0xff]  ;;  %v19364_v2 = vcombine.high %v9437_v10, %v9441_v46  ;;  %v19363_v23 = vcombine.low %v9437_v10, %v9441_v46  ;;  %v8443_v10 = vld [vmem:[#allocation14 + $0x70] sm:$0xff]  ;;  %v8440_v46 = vld [vmem:[#allocation14 + $0x58] sm:$0xff] }
 0x79f   : > { %15690 = vmatprep.subr.bf16.mxu1 %v19342_v15  ;;  %v19366_v15 = vcombine.high %v9438_v25, %v9442_v17  ;;  %v19365_v21 = vcombine.low %v9438_v25, %v9442_v17 }
 0x7a1   : > { %15107 = vmatpush1.bf16.msra.mxu0 %v19339_v30  ;;  %v9445_v30 = vld [vmem:[#allocation14 + $0x1fc0] sm:$0xff] }
 0x7a2   : > { %15691 = vmatpush1.bf16.msra.mxu1 %v19341_v32  ;;  %15108 = vmatprep.subr.bf16.mxu0 %v19348_v7  ;;  %v9450_v32 = vld [vmem:[#allocation14 + $0x1fe8] sm:$0xff]  ;;  %v19372_v7 = vcombine.high %v9445_v30, %v9449_v45  ;;  %v19371_v31 = vcombine.low %v9445_v30, %v9449_v45  ;;  %v8451_v30 = vld [vmem:[#allocation14 + $0xb0] sm:$0xff]  ;;  %v24068_v45 = vld [vmem:[#allocation61_spill] sm:$0xff] }
 0x7a3   : > { %15692 = vmatprep.subr.bf16.mxu1 %v19350_v54  ;;  %v19374_v54 = vcombine.high %v9446_v37, %v9450_v32  ;;  %v19373_v26 = vcombine.low %v9446_v37, %v9450_v32  ;;  %v8448_v37 = vld [vmem:[#allocation14 + $0x98] sm:$0xff] }
 0x7a4   : > { %v8452_v32 = vld [vmem:[#allocation14 + $0xb8] sm:$0xff] }
 0x7a5   : > { %15109 = vmatpush1.bf16.msra.mxu0 %v19347_v55  ;;  %v8431_v55 = vld [vmem:[#allocation14 + $0x10] sm:$0xff] }
 0x7a6   : > { %15693 = vmatpush1.bf16.msra.mxu1 %v19349_v3  ;;  %15110 = vmatprep.subr.bf16.mxu0 %v19356_v44  ;;  %v8436_v3 = vld [vmem:[#allocation14 + $0x38] sm:$0xff]  ;;  %v18360_v44 = vcombine.high %v8431_v55, %v8435_v47  ;;  %v18359_v25 = vcombine.low %v8431_v55, %v8435_v47  ;;  %v24069_v55 = vld [vmem:[#allocation62_spill] sm:$0xff]  ;;  %v18378_v47 = vcombine.high %v8448_v37, %v8452_v32 }
 0x7a7   : > { %15694 = vmatprep.subr.bf16.mxu1 %v19358_v8  ;;  %v18362_v8 = vcombine.high %v8432_v35, %v8436_v3  ;;  %v18361_v17 = vcombine.low %v8432_v35, %v8436_v3  ;;  %v8455_v35 = vld [vmem:[#allocation14 + $0xd0] sm:$0xff] }
 0x7a8   : > { %v8459_v3 = vld [vmem:[#allocation14 + $0xf0] sm:$0xff] }
 0x7a9   : > { %15111 = vmatpush1.bf16.msra.mxu0 %v19355_v52  ;;  %v8439_v52 = vld [vmem:[#allocation14 + $0x50] sm:$0xff] }
 0x7aa   : > { %15695 = vmatpush1.bf16.msra.mxu1 %v19357_v1  ;;  %15112 = vmatprep.subr.bf16.mxu0 %v19364_v2  ;;  %v8444_v1 = vld [vmem:[#allocation14 + $0x78] sm:$0xff]  ;;  %v18368_v2 = vcombine.high %v8439_v52, %v8443_v10 }
 0x7ab   : > { %15696 = vmatprep.subr.bf16.mxu1 %v19366_v15  ;;  %v18370_v15 = vcombine.high %v8440_v46, %v8444_v1 }
 0x7ad   : > { %15113 = vmatpush1.bf16.msra.mxu0 %v19363_v23  ;;  %v8447_v23 = vld [vmem:[#allocation14 + $0x90] sm:$0xff] }
 0x7ae   : > { %15697 = vmatpush1.bf16.msra.mxu1 %v19365_v21  ;;  %15114 = vmatprep.subr.bf16.mxu0 %v19372_v7  ;;  %v18367_v21 = vcombine.low %v8439_v52, %v8443_v10  ;;  %v18369_v7 = vcombine.low %v8440_v46, %v8444_v1  ;;  %v18384_v52 = vcombine.high %v8455_v35, %v8459_v3  ;;  %v8463_v46 = vld [vmem:[#allocation14 + $0x110] sm:$0xff] }
 0x7af   : > { %15698 = vmatprep.subr.bf16.mxu1 %v19374_v54  ;;  %v18376_v54 = vcombine.high %v8447_v23, %v8451_v30  ;;  %v8467_v1 = vld [vmem:[#allocation14 + $0x130] sm:$0xff] }
 0x7b1   : > { %15115 = vmatpush1.bf16.msra.mxu0 %v19371_v31  ;;  %v8456_v31 = vld [vmem:[#allocation14 + $0xd8] sm:$0xff] }
 0x7b2   : > { %15699 = vmatpush1.bf16.msra.mxu1 %v19373_v26  ;;  %15741 = vmatprep.subr.bf16.mxu0 %v18360_v44  ;;  %v8460_v26 = vld [vmem:[#allocation14 + $0xf8] sm:$0xff]  ;;  %v18375_v44 = vcombine.low %v8447_v23, %v8451_v30  ;;  %v18392_v23 = vcombine.high %v8463_v46, %v8467_v1  ;;  %v24071_v30 = vld [vmem:[#allocation64_spill] sm:$0xff] }
 0x7b3   : > { %16325 = vmatprep.subr.bf16.mxu1 %v18362_v8  ;;  %v18377_v8 = vcombine.low %v8448_v37, %v8452_v32  ;;  %v18386_v10 = vcombine.high %v8456_v31, %v8460_v26  ;;  %v8471_v32 = vld [vmem:[#allocation14 + $0x150] sm:$0xff] }
 0x7b4   : > { %15117 = vmatmul.mubr.bf16.vlgmr.msra.gmra.mrb[64].mxu0 %v24068_v45 }
 0x7b5   : > { %15701 = vmatmul.mubr.bf16.vlgmr.msra.gmra.mrb[64].mxu1 %v24068_v45  ;;  %15742 = vmatpush1.bf16.msra.mxu0 %v18359_v25  ;;  %v24070_v25 = vld [vmem:[#allocation63_spill] sm:$0xff] }
 0x7b6   : > { %16326 = vmatpush1.bf16.msra.mxu1 %v18361_v17  ;;  %15743 = vmatprep.subr.bf16.mxu0 %v18368_v2  ;;  %v8464_v17 = vld [vmem:[#allocation14 + $0x118] sm:$0xff] }
 0x7b7   : > { %16327 = vmatprep.subr.bf16.mxu1 %v18370_v15  ;;  %15126 = vmatprep.mubr.bf16.mxu0 %v24069_v55  ;;  %v8468_v2 = vld [vmem:[#allocation14 + $0x138] sm:$0xff]  ;;  %v18383_v15 = vcombine.low %v8455_v35, %v8459_v3 }
 0x7b8   : > { %15710 = vmatprep.mubr.bf16.mxu1 %v24069_v55  ;;  %v18394_v37 = vcombine.high %v8464_v17, %v8468_v2  ;;  %v18391_v55 = vcombine.low %v8463_v46, %v8467_v1  ;;  %v24073_v1 = vld [vmem:[#allocation66_spill] sm:$0xff] }
 0x7b9   : > { %15744 = vmatpush1.bf16.msra.mxu0 %v18367_v21  ;;  %v18385_v21 = vcombine.low %v8456_v31, %v8460_v26  ;;  %v8479_v31 = vld [vmem:[#allocation14 + $0x190] sm:$0xff] }
 0x7ba   : > { %16328 = vmatpush1.bf16.msra.mxu1 %v18369_v7  ;;  %15745 = vmatprep.subr.bf16.mxu0 %v18376_v54  ;;  %v8475_v7 = vld [vmem:[#allocation14 + $0x170] sm:$0xff]  ;;  %v8472_v54 = vld [vmem:[#allocation14 + $0x158] sm:$0xff] }
 0x7bb   : > { %16329 = vmatprep.subr.bf16.mxu1 %v18378_v47  ;;  %v8476_v47 = vld [vmem:[#allocation14 + $0x178] sm:$0xff]  ;;  %v18400_v35 = vcombine.high %v8471_v32, %v8475_v7  ;;  %v8483_v26 = vld [vmem:[#allocation14 + $0x1b0] sm:$0xff] }
 0x7bc   : > { %15127 = vmatmul.mubr.bf16.gmra.mrb[68].mxu0 %v24070_v25  ;;  %v18402_v3 = vcombine.high %v8472_v54, %v8476_v47  ;;  %v18408_v46 = vcombine.high %v8479_v31, %v8483_v26 }
 0x7bd   : > { %15711 = vmatmul.mubr.bf16.gmra.mrb[68].mxu1 %v24070_v25  ;;  %15746 = vmatpush1.bf16.msra.mxu0 %v18375_v44  ;;  %v18393_v44 = vcombine.low %v8464_v17, %v8468_v2  ;;  %v8487_v2 = vld [vmem:[#allocation14 + $0x1d0] sm:$0xff]  ;;  %v18407_v25 = vcombine.low %v8479_v31, %v8483_v26 }
 0x7be   : > { %16330 = vmatpush1.bf16.msra.mxu1 %v18377_v8  ;;  %15747 = vmatprep.subr.bf16.mxu0 %v18384_v52  ;;  %v24072_v8 = vld [vmem:[#allocation65_spill] sm:$0xff] }
 0x7bf   : > { %16331 = vmatprep.subr.bf16.mxu1 %v18386_v10  ;;  %15136 = vmatprep.mubr.bf16.mxu0 %v24071_v30  ;;  %v8480_v52 = vld [vmem:[#allocation14 + $0x198] sm:$0xff] }
 0x7c0   : > { %15720 = vmatprep.mubr.bf16.mxu1 %v24071_v30  ;;  %v8484_v10 = vld [vmem:[#allocation14 + $0x1b8] sm:$0xff]  ;;  %v18399_v30 = vcombine.low %v8471_v32, %v8475_v7 }
 0x7c1   : > { %15748 = vmatpush1.bf16.msra.mxu0 %v18383_v15  ;;  %v18401_v15 = vcombine.low %v8472_v54, %v8476_v47  ;;  %v18410_v17 = vcombine.high %v8480_v52, %v8484_v10  ;;  %v8495_v54 = vld [vmem:[#allocation14 + $0x210] sm:$0xff] }
 0x7c2   : > { %16332 = vmatpush1.bf16.msra.mxu1 %v18385_v21  ;;  %15749 = vmatprep.subr.bf16.mxu0 %v18392_v23  ;;  %v8491_v21 = vld [vmem:[#allocation14 + $0x1f0] sm:$0xff]  ;;  %v8488_v23 = vld [vmem:[#allocation14 + $0x1d8] sm:$0xff] }
 0x7c3   : > { %16333 = vmatprep.subr.bf16.mxu1 %v18394_v37  ;;  %v8492_v37 = vld [vmem:[#allocation14 + $0x1f8] sm:$0xff]  ;;  %v18416_v32 = vcombine.high %v8487_v2, %v8491_v21  ;;  %v8499_v47 = vld [vmem:[#allocation14 + $0x230] sm:$0xff] }
 0x7c4   : > { %15137 = vmatmul.mubr.bf16.gmra.mrb[72].mxu0 %v24072_v8  ;;  %v18418_v7 = vcombine.high %v8488_v23, %v8492_v37  ;;  %v18424_v31 = vcombine.high %v8495_v54, %v8499_v47 }
 0x7c5   : > { %15721 = vmatmul.mubr.bf16.gmra.mrb[72].mxu1 %v24072_v8  ;;  %15750 = vmatpush1.bf16.msra.mxu0 %v18391_v55  ;;  %v18409_v55 = vcombine.low %v8480_v52, %v8484_v10  ;;  %v8503_v52 = vld [vmem:[#allocation14 + $0x250] sm:$0xff] }
 0x7c6   : > { %16334 = vmatpush1.bf16.msra.mxu1 %v18393_v44  ;;  %15751 = vmatprep.subr.bf16.mxu0 %v18400_v35  ;;  %v24074_v44 = vld [vmem:[#allocation67_spill] sm:$0xff]  ;;  %v8496_v35 = vld [vmem:[#allocation14 + $0x218] sm:$0xff]  ;;  %v8507_v10 = vld [vmem:[#allocation14 + $0x270] sm:$0xff] }
 0x7c7   : > { %16335 = vmatprep.subr.bf16.mxu1 %v18402_v3  ;;  %15146 = vmatprep.mubr.bf16.mxu0 %v24073_v1  ;;  %v8500_v3 = vld [vmem:[#allocation14 + $0x238] sm:$0xff] }
 0x7c8   : > { %15730 = vmatprep.mubr.bf16.mxu1 %v24073_v1  ;;  %v18415_v1 = vcombine.low %v8487_v2, %v8491_v21  ;;  %v18426_v26 = vcombine.high %v8496_v35, %v8500_v3  ;;  %v18432_v2 = vcombine.high %v8503_v52, %v8507_v10 }
 0x7c9   : > { %15752 = vmatpush1.bf16.msra.mxu0 %v18399_v30  ;;  %v18417_v30 = vcombine.low %v8488_v23, %v8492_v37  ;;  %v8511_v23 = vld [vmem:[#allocation14 + $0x290] sm:$0xff] }
 0x7ca   : > { %16336 = vmatpush1.bf16.msra.mxu1 %v18401_v15  ;;  %15753 = vmatprep.subr.bf16.mxu0 %v18408_v46  ;;  %v8504_v15 = vld [vmem:[#allocation14 + $0x258] sm:$0xff]  ;;  %v8515_v37 = vld [vmem:[#allocation14 + $0x2b0] sm:$0xff] }
 0x7cb   : > { %16337 = vmatprep.subr.bf16.mxu1 %v18410_v17  ;;  %v8508_v46 = vld [vmem:[#allocation14 + $0x278] sm:$0xff]  ;;  %v18423_v17 = vcombine.low %v8495_v54, %v8499_v47  ;;  %v18440_v8 = vcombine.high %v8511_v23, %v8515_v37  ;;  %v8523_v54 = vld [vmem:[#allocation14 + $0x2f0] sm:$0xff] }
 0x7cc   : > { %15147 = vmatmul.mubr.bf16.gmra.mrb[76].mxu0 %v24074_v44  ;;  %v18434_v21 = vcombine.high %v8504_v15, %v8508_v46  ;;  %v8520_v47 = vld [vmem:[#allocation14 + $0x2d8] sm:$0xff] }
 0x7cd   : > { %15731 = vmatmul.mubr.bf16.gmra.mrb[76].mxu1 %v24074_v44  ;;  %15754 = vmatpush1.bf16.msra.mxu0 %v18407_v25  ;;  %v18425_v25 = vcombine.low %v8496_v35, %v8500_v3  ;;  %v18433_v44 = vcombine.low %v8504_v15, %v8508_v46  ;;  %v18439_v35 = vcombine.low %v8511_v23, %v8515_v37  ;;  %v8539_v23 = vld [vmem:[#allocation14 + $0x370] sm:$0xff] }
 0x7ce   : > { %16338 = vmatpush1.bf16.msra.mxu1 %v18409_v55  ;;  %15755 = vmatprep.subr.bf16.mxu0 %v18416_v32  ;;  %v8512_v55 = vld [vmem:[#allocation14 + $0x298] sm:$0xff] }
 0x7cf   : > { %16339 = vmatprep.subr.bf16.mxu1 %v18418_v7  ;;  %15773 = vmatprep.mubr.bf16.mxu0 %v22088_v50  ;;  %v8516_v32 = vld [vmem:[#allocation14 + $0x2b8] sm:$0xff]  ;;  %v18431_v7 = vcombine.low %v8503_v52, %v8507_v10  ;;  %v8531_v52 = vld [vmem:[#allocation14 + $0x330] sm:$0xff] }
 0x7d0   : > { %16357 = vmatprep.mubr.bf16.mxu1 %v22088_v50  ;;  %v18442_v50 = vcombine.high %v8512_v55, %v8516_v32  ;;  %v18441_v3 = vcombine.low %v8512_v55, %v8516_v32  ;;  %v8528_v10 = vld [vmem:[#allocation14 + $0x318] sm:$0xff] }
 0x7d1   : > { %15756 = vmatpush1.bf16.msra.mxu0 %v18415_v1  ;;  %v8519_v1 = vld [vmem:[#allocation14 + $0x2d0] sm:$0xff] }
 0x7d2   : > { %16340 = vmatpush1.bf16.msra.mxu1 %v18417_v30  ;;  %15757 = vmatprep.subr.bf16.mxu0 %v18424_v31  ;;  %v8524_v30 = vld [vmem:[#allocation14 + $0x2f8] sm:$0xff]  ;;  %v18448_v31 = vcombine.high %v8519_v1, %v8523_v54  ;;  %v18447_v15 = vcombine.low %v8519_v1, %v8523_v54  ;;  %v8547_v1 = vld [vmem:[#allocation14 + $0x3b0] sm:$0xff] }
 0x7d3   : > { %16341 = vmatprep.subr.bf16.mxu1 %v18426_v26  ;;  %v18450_v26 = vcombine.high %v8520_v47, %v8524_v30  ;;  %v18449_v46 = vcombine.low %v8520_v47, %v8524_v30  ;;  %v8544_v54 = vld [vmem:[#allocation14 + $0x398] sm:$0xff] }
 0x7d5   : > { %15758 = vmatpush1.bf16.msra.mxu0 %v18423_v17  ;;  %v8527_v17 = vld [vmem:[#allocation14 + $0x310] sm:$0xff] }
 0x7d6   : > { %16342 = vmatpush1.bf16.msra.mxu1 %v18425_v25  ;;  %15759 = vmatprep.subr.bf16.mxu0 %v18432_v2  ;;  %v8532_v25 = vld [vmem:[#allocation14 + $0x338] sm:$0xff]  ;;  %v18456_v2 = vcombine.high %v8527_v17, %v8531_v52  ;;  %v18455_v37 = vcombine.low %v8527_v17, %v8531_v52  ;;  %v8555_v17 = vld [vmem:[#allocation14 + $0x3f0] sm:$0xff] }
 0x7d7   : > { %16343 = vmatprep.subr.bf16.mxu1 %v18434_v21  ;;  %v18458_v21 = vcombine.high %v8528_v10, %v8532_v25  ;;  %v18457_v55 = vcombine.low %v8528_v10, %v8532_v25  ;;  %v8552_v52 = vld [vmem:[#allocation14 + $0x3d8] sm:$0xff] }
 0x7d9   : > { %15760 = vmatpush1.bf16.msra.mxu0 %v18431_v7  ;;  %v8535_v7 = vld [vmem:[#allocation14 + $0x350] sm:$0xff] }
 0x7da   : > { %16344 = vmatpush1.bf16.msra.mxu1 %v18433_v44  ;;  %15761 = vmatprep.subr.bf16.mxu0 %v18440_v8  ;;  %v8536_v44 = vld [vmem:[#allocation14 + $0x358] sm:$0xff]  ;;  %v18464_v32 = vcombine.high %v8535_v7, %v8539_v23  ;;  %v18463_v47 = vcombine.low %v8535_v7, %v8539_v23  ;;  %v8563_v7 = vld [vmem:[#allocation14 + $0x430] sm:$0xff] }
 0x7db   : > { %16345 = vmatprep.subr.bf16.mxu1 %v18442_v50  ;;  %v8540_v8 = vld [vmem:[#allocation14 + $0x378] sm:$0xff] }
 0x7dc   : > { %v18466_v50 = vcombine.high %v8536_v44, %v8540_v8  ;;  %v18465_v30 = vcombine.low %v8536_v44, %v8540_v8  ;;  %v8560_v23 = vld [vmem:[#allocation14 + $0x418] sm:$0xff] }
 0x7dd   : > { %15762 = vmatpush1.bf16.msra.mxu0 %v18439_v35  ;;  %v8543_v35 = vld [vmem:[#allocation14 + $0x390] sm:$0xff] }
 0x7de   : > { %16346 = vmatpush1.bf16.msra.mxu1 %v18441_v3  ;;  %15763 = vmatprep.subr.bf16.mxu0 %v18448_v31  ;;  %v8548_v3 = vld [vmem:[#allocation14 + $0x3b8] sm:$0xff]  ;;  %v18472_v31 = vcombine.high %v8543_v35, %v8547_v1  ;;  %v18471_v10 = vcombine.low %v8543_v35, %v8547_v1  ;;  %v8571_v35 = vld [vmem:[#allocation14 + $0x470] sm:$0xff] }
 0x7df   : > { %16347 = vmatprep.subr.bf16.mxu1 %v18450_v26  ;;  %v18474_v26 = vcombine.high %v8544_v54, %v8548_v3  ;;  %v18473_v25 = vcombine.low %v8544_v54, %v8548_v3  ;;  %v8568_v1 = vld [vmem:[#allocation14 + $0x458] sm:$0xff] }
 0x7e1   : > { %15764 = vmatpush1.bf16.msra.mxu0 %v18447_v15  ;;  %v8551_v15 = vld [vmem:[#allocation14 + $0x3d0] sm:$0xff] }
 0x7e2   : > { %16348 = vmatpush1.bf16.msra.mxu1 %v18449_v46  ;;  %15765 = vmatprep.subr.bf16.mxu0 %v18456_v2  ;;  %v8556_v46 = vld [vmem:[#allocation14 + $0x3f8] sm:$0xff]  ;;  %v18480_v2 = vcombine.high %v8551_v15, %v8555_v17  ;;  %v18479_v44 = vcombine.low %v8551_v15, %v8555_v17  ;;  %v8579_v15 = vld [vmem:[#allocation14 + $0x4b0] sm:$0xff] }
 0x7e3   : > { %16349 = vmatprep.subr.bf16.mxu1 %v18458_v21  ;;  %v18482_v21 = vcombine.high %v8552_v52, %v8556_v46  ;;  %v18481_v8 = vcombine.low %v8552_v52, %v8556_v46  ;;  %v8576_v17 = vld [vmem:[#allocation14 + $0x498] sm:$0xff] }
 0x7e4   : > { %v8580_v52 = vld [vmem:[#allocation14 + $0x4b8] sm:$0xff] }
 0x7e5   : > { %15766 = vmatpush1.bf16.msra.mxu0 %v18455_v37  ;;  %v8559_v37 = vld [vmem:[#allocation14 + $0x410] sm:$0xff] }
 0x7e6   : > { %16350 = vmatpush1.bf16.msra.mxu1 %v18457_v55  ;;  %15767 = vmatprep.subr.bf16.mxu0 %v18464_v32  ;;  %v8564_v55 = vld [vmem:[#allocation14 + $0x438] sm:$0xff]  ;;  %v18488_v32 = vcombine.high %v8559_v37, %v8563_v7  ;;  %v18487_v54 = vcombine.low %v8559_v37, %v8563_v7  ;;  %v8583_v37 = vld [vmem:[#allocation14 + $0x4d0] sm:$0xff] }
 0x7e7   : > { %16351 = vmatprep.subr.bf16.mxu1 %v18466_v50  ;;  %v18490_v50 = vcombine.high %v8560_v23, %v8564_v55  ;;  %v18489_v3 = vcombine.low %v8560_v23, %v8564_v55  ;;  %v8587_v7 = vld [vmem:[#allocation14 + $0x4f0] sm:$0xff]  ;;  %v8584_v23 = vld [vmem:[#allocation14 + $0x4d8] sm:$0xff] }
 0x7e8   : > { %v8588_v55 = vld [vmem:[#allocation14 + $0x4f8] sm:$0xff] }
 0x7e9   : > { %15768 = vmatpush1.bf16.msra.mxu0 %v18463_v47  ;;  %v8567_v47 = vld [vmem:[#allocation14 + $0x450] sm:$0xff] }
 0x7ea   : > { %16352 = vmatpush1.bf16.msra.mxu1 %v18465_v30  ;;  %15769 = vmatprep.subr.bf16.mxu0 %v18472_v31  ;;  %v8572_v30 = vld [vmem:[#allocation14 + $0x478] sm:$0xff]  ;;  %v18496_v31 = vcombine.high %v8567_v47, %v8571_v35  ;;  %v18495_v46 = vcombine.low %v8567_v47, %v8571_v35  ;;  %v8595_v47 = vld [vmem:[#allocation14 + $0x530] sm:$0xff] }
 0x7eb   : > { %16353 = vmatprep.subr.bf16.mxu1 %v18474_v26  ;;  %v18498_v26 = vcombine.high %v8568_v1, %v8572_v30  ;;  %v8592_v35 = vld [vmem:[#allocation14 + $0x518] sm:$0xff] }
 0x7ed   : > { %15770 = vmatpush1.bf16.msra.mxu0 %v18471_v10  ;;  %v8575_v10 = vld [vmem:[#allocation14 + $0x490] sm:$0xff] }
 0x7ee   : > { %16354 = vmatpush1.bf16.msra.mxu1 %v18473_v25  ;;  %15771 = vmatprep.subr.bf16.mxu0 %v18480_v2  ;;  %v18497_v25 = vcombine.low %v8568_v1, %v8572_v30  ;;  %v18504_v2 = vcombine.high %v8575_v10, %v8579_v15  ;;  %v8596_v1 = vld [vmem:[#allocation14 + $0x538] sm:$0xff]  ;;  %v18511_v30 = vcombine.low %v8583_v37, %v8587_v7 }
 0x7ef   : > { %16355 = vmatprep.subr.bf16.mxu1 %v18482_v21  ;;  %v18506_v21 = vcombine.high %v8576_v17, %v8580_v52 }
 0x7f1   : > { %15772 = vmatpush1.bf16.msra.mxu0 %v18479_v44  ;;  %v18503_v44 = vcombine.low %v8575_v10, %v8579_v15  ;;  %v8600_v10 = vld [vmem:[#allocation14 + $0x558] sm:$0xff] }
 0x7f2   : > { %16356 = vmatpush1.bf16.msra.mxu1 %v18481_v8  ;;  %15814 = vmatprep.subr.bf16.mxu0 %v18488_v32  ;;  %v18512_v8 = vcombine.high %v8583_v37, %v8587_v7  ;;  %v18514_v32 = vcombine.high %v8584_v23, %v8588_v55  ;;  %v8604_v15 = vld [vmem:[#allocation14 + $0x578] sm:$0xff] }
 0x7f3   : > { %16398 = vmatprep.subr.bf16.mxu1 %v18490_v50  ;;  %v8591_v50 = vld [vmem:[#allocation14 + $0x510] sm:$0xff]  ;;  %v8612_v37 = vld [vmem:[#allocation14 + $0x5b8] sm:$0xff] }
 0x7f4   : > { %15774 = vmatmul.mubr.bf16.vlgmr.msra.gmra.mrb[80].mxu0 %v22092_v5 }
 0x7f5   : > { %15815 = vmatpush1.bf16.msra.mxu0 %v18487_v54  ;;  %16358 = vmatmul.mubr.bf16.vlgmr.msra.gmra.mrb[80].mxu1 %v22092_v5  ;;  %v18505_v5 = vcombine.low %v8576_v17, %v8580_v52  ;;  %v18520_v54 = vcombine.high %v8591_v50, %v8595_v47  ;;  %v18519_v17 = vcombine.low %v8591_v50, %v8595_v47 }
 0x7f6   : > { %16399 = vmatpush1.bf16.msra.mxu1 %v18489_v3  ;;  %15816 = vmatprep.subr.bf16.mxu0 %v18496_v31  ;;  %v18522_v3 = vcombine.high %v8592_v35, %v8596_v1  ;;  %v8599_v31 = vld [vmem:[#allocation14 + $0x550] sm:$0xff]  ;;  %v18521_v52 = vcombine.low %v8592_v35, %v8596_v1 }
 0x7f7   : > { %16400 = vmatprep.subr.bf16.mxu1 %v18498_v26  ;;  %15783 = vmatprep.mubr.bf16.mxu0 %v22098_v18  ;;  %v8603_v26 = vld [vmem:[#allocation14 + $0x570] sm:$0xff] }
 0x7f8   : > { %16367 = vmatprep.mubr.bf16.mxu1 %v22098_v18  ;;  %v18513_v18 = vcombine.low %v8584_v23, %v8588_v55  ;;  %v18527_v7 = vcombine.low %v8599_v31, %v8603_v26  ;;  %v8623_v1 = vld [vmem:[#allocation14 + $0x610] sm:$0xff] }
 0x7f9   : > { %15817 = vmatpush1.bf16.msra.mxu0 %v18495_v46  ;;  %v18530_v46 = vcombine.high %v8600_v10, %v8604_v15 }
 0x7fa   : > { %16401 = vmatpush1.bf16.msra.mxu1 %v18497_v25  ;;  %15818 = vmatprep.subr.bf16.mxu0 %v18504_v2  ;;  %v8607_v25 = vld [vmem:[#allocation14 + $0x590] sm:$0xff] }
 0x7fb   : > { %16402 = vmatprep.subr.bf16.mxu1 %v18506_v21  ;;  %v8611_v2 = vld [vmem:[#allocation14 + $0x5b0] sm:$0xff]  ;;  %v8608_v21 = vld [vmem:[#allocation14 + $0x598] sm:$0xff] }
 0x7fc   : > { %15784 = vmatmul.mubr.bf16.gmra.mrb[84].mxu0 %v22100_v19  ;;  %v18536_v23 = vcombine.high %v8607_v25, %v8611_v2  ;;  %v18538_v55 = vcombine.high %v8608_v21, %v8612_v37  ;;  %v18535_v50 = vcombine.low %v8607_v25, %v8611_v2  ;;  %v18537_v47 = vcombine.low %v8608_v21, %v8612_v37  ;;  %v8639_v2 = vld [vmem:[#allocation14 + $0x690] sm:$0xff]  ;;  %v8640_v37 = vld [vmem:[#allocation14 + $0x698] sm:$0xff] }
 0x7fd   : > { %15819 = vmatpush1.bf16.msra.mxu0 %v18503_v44  ;;  %16368 = vmatmul.mubr.bf16.gmra.mrb[84].mxu1 %v22100_v19  ;;  %v18528_v19 = vcombine.high %v8599_v31, %v8603_v26  ;;  %v8615_v44 = vld [vmem:[#allocation14 + $0x5d0] sm:$0xff] }
 0x7fe   : > { %16403 = vmatpush1.bf16.msra.mxu1 %v18505_v5  ;;  %15820 = vmatprep.subr.bf16.mxu0 %v18512_v8  ;;  %v8619_v5 = vld [vmem:[#allocation14 + $0x5f0] sm:$0xff]  ;;  %v8616_v8 = vld [vmem:[#allocation14 + $0x5d8] sm:$0xff] }
 0x7ff   : > { %16404 = vmatprep.subr.bf16.mxu1 %v18514_v32  ;;  %15793 = vmatprep.mubr.bf16.mxu0 %v22108_v28  ;;  %v8620_v32 = vld [vmem:[#allocation14 + $0x5f8] sm:$0xff]  ;;  %v8643_v21 = vld [vmem:[#allocation14 + $0x6b0] sm:$0xff] }
 0x800   : > { %16377 = vmatprep.mubr.bf16.mxu1 %v22108_v28  ;;  %v18529_v28 = vcombine.low %v8600_v10, %v8604_v15  ;;  %v18546_v35 = vcombine.high %v8616_v8, %v8620_v32  ;;  %v8631_v10 = vld [vmem:[#allocation14 + $0x650] sm:$0xff] }
 0x801   : > { %15821 = vmatpush1.bf16.msra.mxu0 %v18511_v30  ;;  %v8627_v30 = vld [vmem:[#allocation14 + $0x630] sm:$0xff] }
 0x802   : > { %16405 = vmatpush1.bf16.msra.mxu1 %v18513_v18  ;;  %15822 = vmatprep.subr.bf16.mxu0 %v18520_v54  ;;  %v8624_v18 = vld [vmem:[#allocation14 + $0x618] sm:$0xff]  ;;  %v18552_v31 = vcombine.high %v8623_v1, %v8627_v30  ;;  %v8635_v15 = vld [vmem:[#allocation14 + $0x670] sm:$0xff] }
 0x803   : > { %16406 = vmatprep.subr.bf16.mxu1 %v18522_v3  ;;  %v8628_v54 = vld [vmem:[#allocation14 + $0x638] sm:$0xff]  ;;  %v18543_v3 = vcombine.low %v8615_v44, %v8619_v5 }
 0x804   : > { %15794 = vmatmul.mubr.bf16.gmra.mrb[88].mxu0 %v22112_v29  ;;  %v18554_v26 = vcombine.high %v8624_v18, %v8628_v54 }
 0x805   : > { %15823 = vmatpush1.bf16.msra.mxu0 %v18519_v17  ;;  %16378 = vmatmul.mubr.bf16.gmra.mrb[88].mxu1 %v22112_v29  ;;  %v18544_v29 = vcombine.high %v8615_v44, %v8619_v5  ;;  %v8632_v17 = vld [vmem:[#allocation14 + $0x658] sm:$0xff]  ;;  %v8647_v44 = vld [vmem:[#allocation14 + $0x6d0] sm:$0xff] }
 0x806   : > { %16407 = vmatpush1.bf16.msra.mxu1 %v18521_v52  ;;  %15824 = vmatprep.subr.bf16.mxu0 %v18528_v19  ;;  %v8636_v52 = vld [vmem:[#allocation14 + $0x678] sm:$0xff]  ;;  %v18551_v19 = vcombine.low %v8623_v1, %v8627_v30  ;;  %v8651_v5 = vld [vmem:[#allocation14 + $0x6f0] sm:$0xff] }
 0x807   : > { %16408 = vmatprep.subr.bf16.mxu1 %v18530_v46  ;;  %15803 = vmatprep.mubr.bf16.mxu0 %v22118_v38  ;;  %v18553_v46 = vcombine.low %v8624_v18, %v8628_v54  ;;  %v18562_v25 = vcombine.high %v8632_v17, %v8636_v52  ;;  %v8655_v1 = vld [vmem:[#allocation14 + $0x710] sm:$0xff]  ;;  %v8656_v18 = vld [vmem:[#allocation14 + $0x718] sm:$0xff] }
 0x808   : > { %16387 = vmatprep.mubr.bf16.mxu1 %v22118_v38  ;;  %v18545_v38 = vcombine.low %v8616_v8, %v8620_v32  ;;  %v8648_v8 = vld [vmem:[#allocation14 + $0x6d8] sm:$0xff]  ;;  %v8659_v30 = vld [vmem:[#allocation14 + $0x730] sm:$0xff] }
 0x809   : > { %15825 = vmatpush1.bf16.msra.mxu0 %v18527_v7  ;;  %v8644_v7 = vld [vmem:[#allocation14 + $0x6b8] sm:$0xff] }
 0x80a   : > { %16409 = vmatpush1.bf16.msra.mxu1 %v18529_v28  ;;  %15826 = vmatprep.subr.bf16.mxu0 %v18536_v23  ;;  %v18559_v28 = vcombine.low %v8631_v10, %v8635_v15  ;;  %v18561_v23 = vcombine.low %v8632_v17, %v8636_v52  ;;  %v8652_v32 = vld [vmem:[#allocation14 + $0x6f8] sm:$0xff] }
 0x80b   : > { %16410 = vmatprep.subr.bf16.mxu1 %v18538_v55  ;;  %v18568_v55 = vcombine.high %v8639_v2, %v8643_v21  ;;  %v8660_v54 = vld [vmem:[#allocation14 + $0x738] sm:$0xff] }
 0x80c   : > { %15804 = vmatmul.mubr.bf16.gmra.mrb[92].mxu0 %v22122_v43  ;;  %v8664_v17 = vld [vmem:[#allocation14 + $0x758] sm:$0xff] }
 0x80d   : > { %15827 = vmatpush1.bf16.msra.mxu0 %v18535_v50  ;;  %16388 = vmatmul.mubr.bf16.gmra.mrb[92].mxu1 %v22122_v43  ;;  %v18560_v43 = vcombine.high %v8631_v10, %v8635_v15  ;;  %v18567_v50 = vcombine.low %v8639_v2, %v8643_v21  ;;  %v8663_v10 = vld [vmem:[#allocation14 + $0x750] sm:$0xff]  ;;  %v8668_v52 = vld [vmem:[#allocation14 + $0x778] sm:$0xff] }
 0x80e   : > { %16411 = vmatpush1.bf16.msra.mxu1 %v18537_v47  ;;  %15828 = vmatprep.subr.bf16.mxu0 %v18544_v29  ;;  %v18569_v47 = vcombine.low %v8640_v37, %v8644_v7  ;;  %v18576_v29 = vcombine.high %v8647_v44, %v8651_v5  ;;  %v8667_v15 = vld [vmem:[#allocation14 + $0x770] sm:$0xff] }
 0x80f   : > { %16412 = vmatprep.subr.bf16.mxu1 %v18546_v35  ;;  %15846 = vmatprep.mubr.bf16.mxu0 %v22132_v48  ;;  %v18578_v35 = vcombine.high %v8648_v8, %v8652_v32  ;;  %v8671_v2 = vld [vmem:[#allocation14 + $0x790] sm:$0xff] }
 0x810   : > { %16430 = vmatprep.mubr.bf16.mxu1 %v22132_v48  ;;  %v18570_v48 = vcombine.high %v8640_v37, %v8644_v7  ;;  %v8675_v21 = vld [vmem:[#allocation14 + $0x7b0] sm:$0xff]  ;;  %v8672_v37 = vld [vmem:[#allocation14 + $0x798] sm:$0xff] }
 0x811   : > { %15829 = vmatpush1.bf16.msra.mxu0 %v18543_v3  ;;  %v18575_v3 = vcombine.low %v8647_v44, %v8651_v5  ;;  %v8676_v7 = vld [vmem:[#allocation14 + $0x7b8] sm:$0xff]  ;;  %v8679_v44 = vld [vmem:[#allocation14 + $0x7d0] sm:$0xff] }
 0x812   : > { %16413 = vmatpush1.bf16.msra.mxu1 %v18545_v38  ;;  %15830 = vmatprep.subr.bf16.mxu0 %v18552_v31  ;;  %v18577_v38 = vcombine.low %v8648_v8, %v8652_v32  ;;  %v18584_v31 = vcombine.high %v8655_v1, %v8659_v30  ;;  %v8683_v5 = vld [vmem:[#allocation14 + $0x7f0] sm:$0xff]  ;;  %v8680_v8 = vld [vmem:[#allocation14 + $0x7d8] sm:$0xff] }
 0x813   : > { %16414 = vmatprep.subr.bf16.mxu1 %v18554_v26  ;;  %v18586_v26 = vcombine.high %v8656_v18, %v8660_v54  ;;  %v8684_v32 = vld [vmem:[#allocation14 + $0x7f8] sm:$0xff] }
 0x815   : > { %15831 = vmatpush1.bf16.msra.mxu0 %v18551_v19  ;;  %v18583_v19 = vcombine.low %v8655_v1, %v8659_v30  ;;  %v8687_v1 = vld [vmem:[#allocation14 + $0x810] sm:$0xff] }
 0x816   : > { %16415 = vmatpush1.bf16.msra.mxu1 %v18553_v46  ;;  %15832 = vmatprep.subr.bf16.mxu0 %v18560_v43  ;;  %v18585_v46 = vcombine.low %v8656_v18, %v8660_v54  ;;  %v18592_v43 = vcombine.high %v8663_v10, %v8667_v15  ;;  %v8691_v30 = vld [vmem:[#allocation14 + $0x830] sm:$0xff]  ;;  %v8688_v18 = vld [vmem:[#allocation14 + $0x818] sm:$0xff] }
 0x817   : > { %16416 = vmatprep.subr.bf16.mxu1 %v18562_v25  ;;  %v18594_v25 = vcombine.high %v8664_v17, %v8668_v52  ;;  %v8692_v54 = vld [vmem:[#allocation14 + $0x838] sm:$0xff] }
 0x819   : > { %15833 = vmatpush1.bf16.msra.mxu0 %v18559_v28  ;;  %v18591_v28 = vcombine.low %v8663_v10, %v8667_v15  ;;  %v8695_v10 = vld [vmem:[#allocation14 + $0x850] sm:$0xff] }
 0x81a   : > { %16417 = vmatpush1.bf16.msra.mxu1 %v18561_v23  ;;  %15834 = vmatprep.subr.bf16.mxu0 %v18568_v55  ;;  %v18593_v23 = vcombine.low %v8664_v17, %v8668_v52  ;;  %v18600_v55 = vcombine.high %v8671_v2, %v8675_v21  ;;  %v8699_v15 = vld [vmem:[#allocation14 + $0x870] sm:$0xff]  ;;  %v8696_v17 = vld [vmem:[#allocation14 + $0x858] sm:$0xff] }
 0x81b   : > { %16418 = vmatprep.subr.bf16.mxu1 %v18570_v48  ;;  %v18602_v48 = vcombine.high %v8672_v37, %v8676_v7  ;;  %v8700_v52 = vld [vmem:[#allocation14 + $0x878] sm:$0xff] }
 0x81d   : > { %15835 = vmatpush1.bf16.msra.mxu0 %v18567_v50  ;;  %v18599_v50 = vcombine.low %v8671_v2, %v8675_v21  ;;  %v8703_v2 = vld [vmem:[#allocation14 + $0x890] sm:$0xff] }
 0x81e   : > { %16419 = vmatpush1.bf16.msra.mxu1 %v18569_v47  ;;  %15836 = vmatprep.subr.bf16.mxu0 %v18576_v29  ;;  %v18601_v47 = vcombine.low %v8672_v37, %v8676_v7  ;;  %v18608_v29 = vcombine.high %v8679_v44, %v8683_v5  ;;  %v8707_v21 = vld [vmem:[#allocation14 + $0x8b0] sm:$0xff]  ;;  %v8704_v37 = vld [vmem:[#allocation14 + $0x898] sm:$0xff] }
 0x81f   : > { %16420 = vmatprep.subr.bf16.mxu1 %v18578_v35  ;;  %v18610_v35 = vcombine.high %v8680_v8, %v8684_v32  ;;  %v8708_v7 = vld [vmem:[#allocation14 + $0x8b8] sm:$0xff] }
 0x821   : > { %15837 = vmatpush1.bf16.msra.mxu0 %v18575_v3  ;;  %v18607_v3 = vcombine.low %v8679_v44, %v8683_v5  ;;  %v8711_v44 = vld [vmem:[#allocation14 + $0x8d0] sm:$0xff] }
 0x822   : > { %16421 = vmatpush1.bf16.msra.mxu1 %v18577_v38  ;;  %15838 = vmatprep.subr.bf16.mxu0 %v18584_v31  ;;  %v18609_v38 = vcombine.low %v8680_v8, %v8684_v32  ;;  %v18616_v31 = vcombine.high %v8687_v1, %v8691_v30  ;;  %v8715_v5 = vld [vmem:[#allocation14 + $0x8f0] sm:$0xff]  ;;  %v8712_v8 = vld [vmem:[#allocation14 + $0x8d8] sm:$0xff] }
 0x823   : > { %16422 = vmatprep.subr.bf16.mxu1 %v18586_v26  ;;  %v18618_v26 = vcombine.high %v8688_v18, %v8692_v54  ;;  %v8716_v32 = vld [vmem:[#allocation14 + $0x8f8] sm:$0xff] }
 0x825   : > { %15839 = vmatpush1.bf16.msra.mxu0 %v18583_v19  ;;  %v18615_v19 = vcombine.low %v8687_v1, %v8691_v30  ;;  %v8723_v1 = vld [vmem:[#allocation14 + $0x930] sm:$0xff]  ;;  %v8720_v30 = vld [vmem:[#allocation14 + $0x918] sm:$0xff] }
 0x826   : > { %16423 = vmatpush1.bf16.msra.mxu1 %v18585_v46  ;;  %15840 = vmatprep.subr.bf16.mxu0 %v18592_v43  ;;  %v18617_v46 = vcombine.low %v8688_v18, %v8692_v54  ;;  %v18624_v43 = vcombine.high %v8695_v10, %v8699_v15  ;;  %v8724_v18 = vld [vmem:[#allocation14 + $0x938] sm:$0xff]  ;;  %v18639_v54 = vcombine.low %v8711_v44, %v8715_v5 }
 0x827   : > { %16424 = vmatprep.subr.bf16.mxu1 %v18594_v25  ;;  %v18626_v25 = vcombine.high %v8696_v17, %v8700_v52 }
 0x829   : > { %15841 = vmatpush1.bf16.msra.mxu0 %v18591_v28  ;;  %v18623_v28 = vcombine.low %v8695_v10, %v8699_v15  ;;  %v8728_v10 = vld [vmem:[#allocation14 + $0x958] sm:$0xff] }
 0x82a   : > { %16425 = vmatpush1.bf16.msra.mxu1 %v18593_v23  ;;  %15842 = vmatprep.subr.bf16.mxu0 %v18600_v55  ;;  %v18625_v23 = vcombine.low %v8696_v17, %v8700_v52  ;;  %v18632_v55 = vcombine.high %v8703_v2, %v8707_v21  ;;  %v8732_v15 = vld [vmem:[#allocation14 + $0x978] sm:$0xff]  ;;  %v18649_v52 = vcombine.low %v8720_v30, %v8724_v18 }
 0x82b   : > { %16426 = vmatprep.subr.bf16.mxu1 %v18602_v48  ;;  %v18634_v48 = vcombine.high %v8704_v37, %v8708_v7 }
 0x82d   : > { %15843 = vmatpush1.bf16.msra.mxu0 %v18599_v50  ;;  %v18631_v50 = vcombine.low %v8703_v2, %v8707_v21  ;;  %v8740_v2 = vld [vmem:[#allocation14 + $0x9b8] sm:$0xff] }
 0x82e   : > { %16427 = vmatpush1.bf16.msra.mxu1 %v18601_v47  ;;  %15844 = vmatprep.subr.bf16.mxu0 %v18608_v29  ;;  %v18640_v47 = vcombine.high %v8711_v44, %v8715_v5  ;;  %v18642_v29 = vcombine.high %v8712_v8, %v8716_v32 }
 0x82f   : > { %16428 = vmatprep.subr.bf16.mxu1 %v18610_v35  ;;  %v8719_v35 = vld [vmem:[#allocation14 + $0x910] sm:$0xff] }
 0x830   : > { %v18647_v17 = vcombine.low %v8719_v35, %v8723_v1 }
 0x831   : > { %15845 = vmatpush1.bf16.msra.mxu0 %v18607_v3  ;;  %v18648_v3 = vcombine.high %v8719_v35, %v8723_v1 }
 0x832   : > { %16429 = vmatpush1.bf16.msra.mxu1 %v18609_v38  ;;  %15887 = vmatprep.subr.bf16.mxu0 %v18616_v31  ;;  %v18650_v38 = vcombine.high %v8720_v30, %v8724_v18  ;;  %v8727_v31 = vld [vmem:[#allocation14 + $0x950] sm:$0xff] }
 0x833   : > { %16471 = vmatprep.subr.bf16.mxu1 %v18618_v26  ;;  %v8731_v26 = vld [vmem:[#allocation14 + $0x970] sm:$0xff] }
 0x834   : > { %15847 = vmatmul.mubr.bf16.vlgmr.msra.gmra.mrb[80].mxu0 %v22140_v27  ;;  %v18655_v21 = vcombine.low %v8727_v31, %v8731_v26  ;;  %v8759_v30 = vld [vmem:[#allocation14 + $0xa50] sm:$0xff] }
 0x835   : > { %15888 = vmatpush1.bf16.msra.mxu0 %v18615_v19  ;;  %16431 = vmatmul.mubr.bf16.vlgmr.msra.gmra.mrb[80].mxu1 %v22140_v27  ;;  %v18633_v27 = vcombine.low %v8704_v37, %v8708_v7  ;;  %v18658_v19 = vcombine.high %v8728_v10, %v8732_v15  ;;  %v8763_v18 = vld [vmem:[#allocation14 + $0xa70] sm:$0xff] }
 0x836   : > { %16472 = vmatpush1.bf16.msra.mxu1 %v18617_v46  ;;  %15889 = vmatprep.subr.bf16.mxu0 %v18624_v43  ;;  %v8735_v46 = vld [vmem:[#allocation14 + $0x990] sm:$0xff] }
 0x837   : > { %16473 = vmatprep.subr.bf16.mxu1 %v18626_v25  ;;  %15856 = vmatprep.mubr.bf16.mxu0 %v22144_v34  ;;  %v8739_v43 = vld [vmem:[#allocation14 + $0x9b0] sm:$0xff]  ;;  %v8736_v25 = vld [vmem:[#allocation14 + $0x998] sm:$0xff] }
 0x838   : > { %16440 = vmatprep.mubr.bf16.mxu1 %v22144_v34  ;;  %v18641_v34 = vcombine.low %v8712_v8, %v8716_v32  ;;  %v18664_v37 = vcombine.high %v8735_v46, %v8739_v43  ;;  %v18666_v7 = vcombine.high %v8736_v25, %v8740_v2  ;;  %v18663_v44 = vcombine.low %v8735_v46, %v8739_v43  ;;  %v8751_v32 = vld [vmem:[#allocation14 + $0xa10] sm:$0xff] }
 0x839   : > { %15890 = vmatpush1.bf16.msra.mxu0 %v18623_v28  ;;  %v8743_v28 = vld [vmem:[#allocation14 + $0x9d0] sm:$0xff]  ;;  %v18665_v5 = vcombine.low %v8736_v25, %v8740_v2  ;;  %v8776_v25 = vld [vmem:[#allocation14 + $0xad8] sm:$0xff] }
 0x83a   : > { %16474 = vmatpush1.bf16.msra.mxu1 %v18625_v23  ;;  %15891 = vmatprep.subr.bf16.mxu0 %v18632_v55  ;;  %v8747_v23 = vld [vmem:[#allocation14 + $0x9f0] sm:$0xff]  ;;  %v8744_v55 = vld [vmem:[#allocation14 + $0x9d8] sm:$0xff] }
 0x83b   : > { %16475 = vmatprep.subr.bf16.mxu1 %v18634_v48  ;;  %v8748_v48 = vld [vmem:[#allocation14 + $0x9f8] sm:$0xff]  ;;  %v8775_v46 = vld [vmem:[#allocation14 + $0xad0] sm:$0xff] }
 0x83c   : > { %15857 = vmatmul.mubr.bf16.gmra.mrb[84].mxu0 %v22151_v41  ;;  %v18674_v8 = vcombine.high %v8744_v55, %v8748_v48  ;;  %v8779_v43 = vld [vmem:[#allocation14 + $0xaf0] sm:$0xff]  ;;  %v8780_v2 = vld [vmem:[#allocation14 + $0xaf8] sm:$0xff] }
 0x83d   : > { %15892 = vmatpush1.bf16.msra.mxu0 %v18631_v50  ;;  %16441 = vmatmul.mubr.bf16.gmra.mrb[84].mxu1 %v22151_v41  ;;  %v18656_v41 = vcombine.high %v8727_v31, %v8731_v26  ;;  %v8755_v50 = vld [vmem:[#allocation14 + $0xa30] sm:$0xff] }
 0x83e   : > { %16476 = vmatpush1.bf16.msra.mxu1 %v18633_v27  ;;  %15893 = vmatprep.subr.bf16.mxu0 %v18640_v47  ;;  %v8752_v27 = vld [vmem:[#allocation14 + $0xa18] sm:$0xff]  ;;  %v18680_v35 = vcombine.high %v8751_v32, %v8755_v50  ;;  %v8767_v26 = vld [vmem:[#allocation14 + $0xa90] sm:$0xff] }
 0x83f   : > { %16477 = vmatprep.subr.bf16.mxu1 %v18642_v29  ;;  %15866 = vmatprep.mubr.bf16.mxu0 %v22154_v49  ;;  %v8756_v47 = vld [vmem:[#allocation14 + $0xa38] sm:$0xff]  ;;  %v18671_v29 = vcombine.low %v8743_v28, %v8747_v23 }
 0x840   : > { %16450 = vmatprep.mubr.bf16.mxu1 %v22154_v49  ;;  %v18657_v49 = vcombine.low %v8728_v10, %v8732_v15  ;;  %v18682_v1 = vcombine.high %v8752_v27, %v8756_v47  ;;  %v8771_v10 = vld [vmem:[#allocation14 + $0xab0] sm:$0xff]  ;;  %v8768_v15 = vld [vmem:[#allocation14 + $0xa98] sm:$0xff] }
 0x841   : > { %15894 = vmatpush1.bf16.msra.mxu0 %v18639_v54  ;;  %v8760_v54 = vld [vmem:[#allocation14 + $0xa58] sm:$0xff] }
 0x842   : > { %16478 = vmatpush1.bf16.msra.mxu1 %v18641_v34  ;;  %15895 = vmatprep.subr.bf16.mxu0 %v18648_v3  ;;  %v8764_v34 = vld [vmem:[#allocation14 + $0xa78] sm:$0xff]  ;;  %v18679_v3 = vcombine.low %v8751_v32, %v8755_v50  ;;  %v8791_v32 = vld [vmem:[#allocation14 + $0xb50] sm:$0xff] }
 0x843   : > { %16479 = vmatprep.subr.bf16.mxu1 %v18650_v38  ;;  %v18681_v38 = vcombine.low %v8752_v27, %v8756_v47  ;;  %v18690_v31 = vcombine.high %v8760_v54, %v8764_v34  ;;  %v8795_v50 = vld [vmem:[#allocation14 + $0xb70] sm:$0xff]  ;;  %v8792_v27 = vld [vmem:[#allocation14 + $0xb58] sm:$0xff] }
 0x844   : > { %15867 = vmatmul.mubr.bf16.gmra.mrb[88].mxu0 %v22161_v56  ;;  %v8796_v47 = vld [vmem:[#allocation14 + $0xb78] sm:$0xff] }
 0x845   : > { %15896 = vmatpush1.bf16.msra.mxu0 %v18647_v17  ;;  %16451 = vmatmul.mubr.bf16.gmra.mrb[88].mxu1 %v22161_v56  ;;  %v18672_v56 = vcombine.high %v8743_v28, %v8747_v23  ;;  %v8772_v17 = vld [vmem:[#allocation14 + $0xab8] sm:$0xff]  ;;  %v8783_v28 = vld [vmem:[#allocation14 + $0xb10] sm:$0xff] }
 0x846   : > { %16480 = vmatpush1.bf16.msra.mxu1 %v18649_v52  ;;  %15897 = vmatprep.subr.bf16.mxu0 %v18656_v41  ;;  %v18687_v52 = vcombine.low %v8759_v30, %v8763_v18  ;;  %v18689_v41 = vcombine.low %v8760_v54, %v8764_v34  ;;  %v8787_v23 = vld [vmem:[#allocation14 + $0xb30] sm:$0xff]  ;;  %v8800_v54 = vld [vmem:[#allocation14 + $0xb98] sm:$0xff] }
 0x847   : > { %16481 = vmatprep.subr.bf16.mxu1 %v18658_v19  ;;  %15876 = vmatprep.mubr.bf16.mxu0 %v22164_v62  ;;  %v18696_v19 = vcombine.high %v8767_v26, %v8771_v10  ;;  %v8804_v34 = vld [vmem:[#allocation14 + $0xbb8] sm:$0xff] }
 0x848   : > { %16460 = vmatprep.mubr.bf16.mxu1 %v22164_v62  ;;  %v18673_v62 = vcombine.low %v8744_v55, %v8748_v48  ;;  %v8784_v55 = vld [vmem:[#allocation14 + $0xb18] sm:$0xff] }
 0x849   : > { %15898 = vmatpush1.bf16.msra.mxu0 %v18655_v21  ;;  %v18695_v21 = vcombine.low %v8767_v26, %v8771_v10  ;;  %v8788_v48 = vld [vmem:[#allocation14 + $0xb38] sm:$0xff]  ;;  %v8807_v26 = vld [vmem:[#allocation14 + $0xbd0] sm:$0xff] }
 0x84a   : > { %16482 = vmatpush1.bf16.msra.mxu1 %v18657_v49  ;;  %15899 = vmatprep.subr.bf16.mxu0 %v18664_v37  ;;  %v18697_v49 = vcombine.low %v8768_v15, %v8772_v17  ;;  %v18704_v37 = vcombine.high %v8775_v46, %v8779_v43  ;;  %v8811_v10 = vld [vmem:[#allocation14 + $0xbf0] sm:$0xff] }
 0x84b   : > { %16483 = vmatprep.subr.bf16.mxu1 %v18666_v7  ;;  %v18706_v7 = vcombine.high %v8776_v25, %v8780_v2 }
 0x84c   : > { %15877 = vmatmul.mubr.bf16.gmra.mrb[92].mxu0 %v22173_v4 }
 0x84d   : > { %15900 = vmatpush1.bf16.msra.mxu0 %v18663_v44  ;;  %16461 = vmatmul.mubr.bf16.gmra.mrb[92].mxu1 %v22173_v4  ;;  %v18688_v4 = vcombine.high %v8759_v30, %v8763_v18  ;;  %v18703_v44 = vcombine.low %v8775_v46, %v8779_v43  ;;  %v8799_v30 = vld [vmem:[#allocation14 + $0xb90] sm:$0xff] }
 0x84e   : > { %16484 = vmatpush1.bf16.msra.mxu1 %v18665_v5  ;;  %15901 = vmatprep.subr.bf16.mxu0 %v18672_v56  ;;  %v18705_v5 = vcombine.low %v8776_v25, %v8780_v2  ;;  %v18712_v56 = vcombine.high %v8783_v28, %v8787_v23  ;;  %v8803_v18 = vld [vmem:[#allocation14 + $0xbb0] sm:$0xff]  ;;  %v8816_v2 = vld [vmem:[#allocation14 + $0xc18] sm:$0xff] }
 0x84f   : > { %16485 = vmatprep.subr.bf16.mxu1 %v18674_v8  ;;  %15919 = vmatprep.mubr.bf16.mxu0 %v22180_v11  ;;  %v18714_v8 = vcombine.high %v8784_v55, %v8788_v48  ;;  %v8815_v43 = vld [vmem:[#allocation14 + $0xc10] sm:$0xff] }
 0x850   : > { %16503 = vmatprep.mubr.bf16.mxu1 %v22180_v11  ;;  %v18698_v11 = vcombine.high %v8768_v15, %v8772_v17  ;;  %v8808_v15 = vld [vmem:[#allocation14 + $0xbd8] sm:$0xff]  ;;  %v8819_v25 = vld [vmem:[#allocation14 + $0xc30] sm:$0xff] }
 0x851   : > { %15902 = vmatpush1.bf16.msra.mxu0 %v18671_v29  ;;  %v18711_v29 = vcombine.low %v8783_v28, %v8787_v23  ;;  %v8812_v17 = vld [vmem:[#allocation14 + $0xbf8] sm:$0xff]  ;;  %v24076_v28 = vld [vmem:[#allocation70_spill] sm:$0xff] }
 0x852   : > { %16486 = vmatpush1.bf16.msra.mxu1 %v18673_v62  ;;  %15903 = vmatprep.subr.bf16.mxu0 %v18680_v35  ;;  %v18713_v62 = vcombine.low %v8784_v55, %v8788_v48  ;;  %v18720_v35 = vcombine.high %v8791_v32, %v8795_v50  ;;  %v18738_v46 = vcombine.high %v8808_v15, %v8812_v17 }
 0x853   : > { %16487 = vmatprep.subr.bf16.mxu1 %v18682_v1  ;;  %v18722_v1 = vcombine.high %v8792_v27, %v8796_v47  ;;  %v18737_v55 = vcombine.low %v8808_v15, %v8812_v17  ;;  %v18744_v48 = vcombine.high %v8815_v43, %v8819_v25 }
 0x855   : > { %15904 = vmatpush1.bf16.msra.mxu0 %v18679_v3  ;;  %v18719_v3 = vcombine.low %v8791_v32, %v8795_v50  ;;  %v8827_v32 = vld [vmem:[#allocation14 + $0xc70] sm:$0xff] }
 0x856   : > { %16488 = vmatpush1.bf16.msra.mxu1 %v18681_v38  ;;  %15905 = vmatprep.subr.bf16.mxu0 %v18688_v4  ;;  %v18721_v38 = vcombine.low %v8792_v27, %v8796_v47  ;;  %v18728_v4 = vcombine.high %v8799_v30, %v8803_v18  ;;  %v24078_v50 = vld [vmem:[#allocation72_spill] sm:$0xff]  ;;  %v8824_v47 = vld [vmem:[#allocation14 + $0xc58] sm:$0xff] }
 0x857   : > { %16489 = vmatprep.subr.bf16.mxu1 %v18690_v31  ;;  %v18730_v31 = vcombine.high %v8800_v54, %v8804_v34 }
 0x859   : > { %15906 = vmatpush1.bf16.msra.mxu0 %v18687_v52  ;;  %v18727_v52 = vcombine.low %v8799_v30, %v8803_v18 }
 0x85a   : > { %16490 = vmatpush1.bf16.msra.mxu1 %v18689_v41  ;;  %15907 = vmatprep.subr.bf16.mxu0 %v18696_v19  ;;  %v6459_v41 = vld [vmem:[#allocation13] sm:$0xff]  ;;  %v18729_v19 = vcombine.low %v8800_v54, %v8804_v34 }
 0x85b   : > { %16491 = vmatprep.subr.bf16.mxu1 %v18698_v11  ;;  %v18736_v11 = vcombine.high %v8807_v26, %v8811_v10  ;;  %v22994_v23 = vrot.slane %v6459_v41, %v24076_v28  ;;  %v23000_v27 = vrot.slane %v6459_v41, %v24078_v50 }
 0x85d   : > { %15908 = vmatpush1.bf16.msra.mxu0 %v18695_v21  ;;  %v8820_v21 = vld [vmem:[#allocation14 + $0xc38] sm:$0xff]  ;;  %v23036_v15 = vadd.f32 %v22727_v39, %v23000_v27  ;;  %v23049_v39 = vld [vmem:[#allocation14 + $0xcf0] sm:$0xff]  ;;  %v23090_v50 = vadd.f32 %v22747_v51, %v23000_v27 }
 0x85e   : > { %16492 = vmatpush1.bf16.msra.mxu1 %v18697_v49  ;;  %15909 = vmatprep.subr.bf16.mxu0 %v18704_v37  ;;  %v24075_v49 = vld [vmem:[#allocation69_spill] sm:$0xff]  ;;  %v18745_v30 = vcombine.low %v8816_v2, %v8820_v21 }
 0x85f   : > { %16493 = vmatprep.subr.bf16.mxu1 %v18706_v7  ;;  %v22991_v37 = vrot.slane %v6459_v41, %v24075_v49  ;;  %v18735_v7 = vcombine.low %v8807_v26, %v8811_v10 }
 0x861   : > { %15910 = vmatpush1.bf16.msra.mxu0 %v18703_v44  ;;  %v24077_v44 = vld [vmem:[#allocation71_spill] sm:$0xff]  ;;  %v23067_v49 = vadd.f32 %v22740_v12, %v22991_v37 }
 0x862   : > { %16494 = vmatpush1.bf16.msra.mxu1 %v18705_v5  ;;  %15911 = vmatprep.subr.bf16.mxu0 %v18712_v56  ;;  %v22997_v5 = vrot.slane %v6459_v41, %v24077_v44  ;;  %v18746_v56 = vcombine.high %v8816_v2, %v8820_v21  ;;  %v23249_v2 = vld [vmem:[#allocation14 + $0xe38] sm:$0xff] }
 0x863   : > { %16495 = vmatprep.subr.bf16.mxu1 %v18714_v8  ;;  %v8823_v8 = vld [vmem:[#allocation14 + $0xc50] sm:$0xff] }
 0x864   : > { %v18752_v18 = vcombine.high %v8823_v8, %v8827_v32  ;;  %v23012_v54 = vadd.f32 %v22716_v40, %v22997_v5  ;;  %v23026_v40 = vadd.f32 %v22722_v58, %v22994_v23  ;;  %v23030_v10 = vadd.f32 %v22725_v0, %v22997_v5 }
 0x865   : > { %15912 = vmatpush1.bf16.msra.mxu0 %v18711_v29  ;;  %v8828_v29 = vld [vmem:[#allocation14 + $0xc78] sm:$0xff]  ;;  %v23041_v0 = vadd.f32 %v22731_v13, %v22991_v37  ;;  %v23056_v13 = vadd.f32 %v22736_v16, %v22997_v5  ;;  %v23080_v12 = vadd.f32 %v22745_v6, %v22997_v5  ;;  %v23108_v51 = vadd.f32 %v22754_v57, %v22997_v5  ;;  %v24086_v57 = vld [vmem:[#allocation79_spill] sm:$0xff] }
 0x866   : > { %16496 = vmatpush1.bf16.msra.mxu1 %v18713_v62  ;;  %15913 = vmatprep.subr.bf16.mxu0 %v18720_v35  ;;  %v23004_v62 = vadd.f32 %v22711_v53, %v22991_v37  ;;  %v18743_v35 = vcombine.low %v8815_v43, %v8819_v25  ;;  %v18754_v34 = vcombine.high %v8824_v47, %v8828_v29  ;;  %v8366_v58 = vmax.f32 %v23012_v54, 0.0  ;;  %v8840_v43 = vld [vmem:[#allocation14 + $0xcd8] sm:$0xff]  ;;  %v24098_v54 = vld [vmem:[#allocation27_spill] sm:$0xff] }
 0x867   : > { %16497 = vmatprep.subr.bf16.mxu1 %v18722_v1  ;;  %v23008_v1 = vadd.f32 %v22713_v20, %v22994_v23  ;;  %v23016_v53 = vadd.f32 %v22718_v61, %v23000_v27  ;;  %v23020_v20 = vadd.f32 %v22720_v60, %v22991_v37  ;;  %v18751_v61 = vcombine.low %v8823_v8, %v8827_v32  ;;  %v8844_v25 = vld [vmem:[#allocation14 + $0xcf8] sm:$0xff] }
 0x868   : > { %v8365_v26 = vmax.f32 %v23004_v62, 0.0  ;;  %v18753_v17 = vcombine.low %v8824_v47, %v8828_v29  ;;  %v18770_v44 = vcombine.high %v8840_v43, %v8844_v25  ;;  %v23094_v47 = vadd.f32 %v22750_v22, %v22991_v37  ;;  %v23096_v6 = vld [vmem:[#allocation14 + $0xd18] sm:$0xff]  ;;  %v23259_v62 = vld [vmem:[#allocation14 + $0xe50] sm:$0xff] }
 0x869   : > { %15914 = vmatpush1.bf16.msra.mxu0 %v18719_v3  ;;  %v8831_v3 = vld [vmem:[#allocation14 + $0xc90] sm:$0xff]  ;;  %v8367_v60 = vmax.f32 %v23008_v1, 0.0  ;;  %v23098_v29 = vld [vmem:[#allocation14 + $0xd38] sm:$0xff] }
 0x86a   : > { %16498 = vmatpush1.bf16.msra.mxu1 %v18721_v38  ;;  %15915 = vmatprep.subr.bf16.mxu0 %v18728_v4  ;;  %v8835_v38 = vld [vmem:[#allocation14 + $0xcb0] sm:$0xff]  ;;  %v8832_v4 = vld [vmem:[#allocation14 + $0xc98] sm:$0xff] }
 0x86b   : > { %16499 = vmatprep.subr.bf16.mxu1 %v18730_v31  ;;  %v8836_v31 = vld [vmem:[#allocation14 + $0xcb8] sm:$0xff]  ;;  %v23329_v1 = vld [vmem:[#allocation14 + $0xed0] sm:$0xff] }
 0x86c   : > { %v18762_v41 = vcombine.high %v8832_v4, %v8836_v31  ;;  %v18761_v28 = vcombine.low %v8832_v4, %v8836_v31  ;;  %v24080_v4 = vld [vmem:[#allocation74_spill] sm:$0xff]  ;;  %v24092_v32 = vld [vmem:[#allocation25_spill] sm:$0xff] }
 0x86d   : > { %15916 = vmatpush1.bf16.msra.mxu0 %v18727_v52  ;;  %v18760_v52 = vcombine.high %v8831_v3, %v8835_v38  ;;  %v23123_v31 = vadd.f32 %v24080_v4, %v22991_v37  ;;  %v23192_v4 = vld [vmem:[#allocation14 + $0xdb8] sm:$0xff] }
 0x86e   : > { %16500 = vmatpush1.bf16.msra.mxu1 %v18729_v19  ;;  %15917 = vmatprep.subr.bf16.mxu0 %v18736_v11  ;;  %v23047_v19 = vld [vmem:[#allocation14 + $0xcd0] sm:$0xff]  ;;  %v23212_v16 = vld [vmem:[#allocation14 + $0xdf8] sm:$0xff] }
 0x86f   : > { %16501 = vmatprep.subr.bf16.mxu1 %v18738_v46  ;;  %v18767_v22 = vcombine.low %v23047_v19, %v23049_v39 }
 0x871   : > { %15918 = vmatpush1.bf16.msra.mxu0 %v18735_v7  ;;  %v18759_v7 = vcombine.low %v8831_v3, %v8835_v38 }
 0x872   : > { %16502 = vmatpush1.bf16.msra.mxu1 %v18737_v55  ;;  %15960 = vmatprep.subr.bf16.mxu0 %v18744_v48  ;;  %v23210_v55 = vld [vmem:[#allocation14 + $0xdd8] sm:$0xff] }
 0x873   : > { %16544 = vmatprep.subr.bf16.mxu1 %v18746_v56  ;;  %v23082_v56 = vld [vmem:[#allocation14 + $0xd10] sm:$0xff] }
 0x874   : > { %15920 = vmatmul.mubr.bf16.vlgmr.msra.gmra.mrb[80].mxu0 %v22189_v63 }
 0x875   : > { %15961 = vmatpush1.bf16.msra.mxu0 %v18743_v35  ;;  %16504 = vmatmul.mubr.bf16.vlgmr.msra.gmra.mrb[80].mxu1 %v22189_v63  ;;  %v23045_v63 = vadd.f32 %v22733_v33, %v22994_v23  ;;  %v23060_v33 = vadd.f32 %v22738_v24, %v23000_v27  ;;  %v23072_v24 = vadd.f32 %v22742_v59, %v22994_v23  ;;  %v23084_v59 = vld [vmem:[#allocation14 + $0xd30] sm:$0xff] }
 0x876   : > { %16545 = vmatpush1.bf16.msra.mxu1 %v18745_v30  ;;  %15962 = vmatprep.subr.bf16.mxu0 %v18752_v18  ;;  %v23104_v30 = vadd.f32 %v22752_v42, %v22994_v23  ;;  %v18769_v42 = vcombine.low %v8840_v43, %v8844_v25  ;;  %v18776_v38 = vcombine.high %v23082_v56, %v23084_v59  ;;  %v24083_v25 = vld [vmem:[#allocation76_spill] sm:$0xff]  ;;  %v24085_v43 = vld [vmem:[#allocation78_spill] sm:$0xff] }
 0x877   : > { %16546 = vmatprep.subr.bf16.mxu1 %v18754_v34  ;;  %15929 = vmatprep.mubr.bf16.mxu0 %v22192_v9  ;;  %v24079_v34 = vld [vmem:[#allocation73_spill] sm:$0xff]  ;;  %v23162_v18 = vadd.f32 %v24086_v57, %v22994_v23  ;;  %v23194_v35 = vld [vmem:[#allocation14 + $0xdd0] sm:$0xff] }
 0x878   : > { %16513 = vmatprep.mubr.bf16.mxu1 %v22192_v9  ;;  %v18768_v9 = vcombine.high %v23047_v19, %v23049_v39  ;;  %v23116_v3 = vadd.f32 %v24079_v34, %v23000_v27  ;;  %v24082_v19 = vld [vmem:[#allocation24_spill] sm:$0xff]  ;;  %v23148_v34 = vld [vmem:[#allocation14 + $0xd78] sm:$0xff]  ;;  %v23155_v39 = vadd.f32 %v24085_v43, %v22991_v37 }
 0x879   : > { %15963 = vmatpush1.bf16.msra.mxu0 %v18751_v61  ;;  %24087 = vst [vmem:[#allocation69_spill] sm:$0xff] %v23162_v18  ;;  %v24090_v43 = vld [vmem:[#allocation81_spill] sm:$0xff] }
 0x87a   : > { %16547 = vmatpush1.bf16.msra.mxu1 %v18753_v17  ;;  %15964 = vmatprep.subr.bf16.mxu0 %v18760_v52  ;;  %v18778_v17 = vcombine.high %v23096_v6, %v23098_v29  ;;  %v23131_v52 = vld [vmem:[#allocation14 + $0xd50] sm:$0xff] }
 0x87b   : > { %16548 = vmatprep.subr.bf16.mxu1 %v18762_v41  ;;  %v23133_v41 = vld [vmem:[#allocation14 + $0xd70] sm:$0xff] }
 0x87c   : > { %15930 = vmatmul.mubr.bf16.gmra.mrb[84].mxu0 %v22199_v14 }
 0x87d   : > { %15965 = vmatpush1.bf16.msra.mxu0 %v18759_v7  ;;  %16514 = vmatmul.mubr.bf16.gmra.mrb[84].mxu1 %v22199_v14  ;;  %v24081_v14 = vld [vmem:[#allocation75_spill] sm:$0xff]  ;;  %v23140_v7 = vadd.f32 %v24083_v25, %v22997_v5  ;;  %v18775_v25 = vcombine.low %v23082_v56, %v23084_v59  ;;  %v24088_v56 = vld [vmem:[#allocation80_spill] sm:$0xff] }
 0x87e   : > { %16549 = vmatpush1.bf16.msra.mxu1 %v18761_v28  ;;  %15966 = vmatprep.subr.bf16.mxu0 %v18768_v9  ;;  %v23127_v61 = vadd.f32 %v24081_v14, %v22994_v23  ;;  %v24084_v28 = vld [vmem:[#allocation77_spill] sm:$0xff]  ;;  %v18784_v14 = vcombine.high %v23131_v52, %v23133_v41  ;;  %v23172_v59 = vadd.f32 %v24088_v56, %v22997_v5 }
 0x87f   : > { %16550 = vmatprep.subr.bf16.mxu1 %v18770_v44  ;;  %15939 = vmatprep.mubr.bf16.mxu0 %v24082_v19  ;;  %v23144_v9 = vadd.f32 %v24084_v28, %v23000_v27  ;;  %v23146_v44 = vld [vmem:[#allocation14 + $0xd58] sm:$0xff]  ;;  %v23184_v28 = vadd.f32 %v24090_v43, %v23000_v27  ;;  %v24094_v43 = vld [vmem:[#allocation84_spill] sm:$0xff] }
 0x880   : > { %16523 = vmatprep.mubr.bf16.mxu1 %v24082_v19  ;;  %v18777_v19 = vcombine.low %v23096_v6, %v23098_v29  ;;  %24089 = vst [vmem:[#allocation70_spill] sm:$0xff] %v23172_v59  ;;  %v18786_v57 = vcombine.high %v23146_v44, %v23148_v34  ;;  %v24093_v29 = vld [vmem:[#allocation83_spill] sm:$0xff]  ;;  %v23204_v48 = vadd.f32 %v24094_v43, %v22997_v5  ;;  %v23247_v6 = vld [vmem:[#allocation14 + $0xe18] sm:$0xff] }
 0x881   : > { %15967 = vmatpush1.bf16.msra.mxu0 %v18767_v22  ;;  %v24091_v22 = vld [vmem:[#allocation82_spill] sm:$0xff]  ;;  %v23200_v8 = vadd.f32 %v24093_v29, %v22994_v23  ;;  %v24095_v23 = vld [vmem:[#allocation85_spill] sm:$0xff]  ;;  %v18785_v5 = vcombine.low %v23146_v44, %v23148_v34 }
 0x882   : > { %16551 = vmatpush1.bf16.msra.mxu1 %v18769_v42  ;;  %15968 = vmatprep.subr.bf16.mxu0 %v18776_v38  ;;  %v23176_v42 = vld [vmem:[#allocation14 + $0xd90] sm:$0xff]  ;;  %v23188_v56 = vadd.f32 %v24091_v22, %v22991_v37  ;;  %v18783_v37 = vcombine.low %v23131_v52, %v23133_v41  ;;  %v23218_v29 = vadd.f32 %v24095_v23, %v23000_v27 }
 0x883   : > { %16552 = vmatprep.subr.bf16.mxu1 %v18778_v17  ;;  %v23178_v38 = vld [vmem:[#allocation14 + $0xdb0] sm:$0xff]  ;;  %v23190_v17 = vld [vmem:[#allocation14 + $0xd98] sm:$0xff] }
 0x884   : > { %15940 = vmatmul.mubr.bf16.gmra.mrb[88].mxu0 %v24092_v32  ;;  %v23208_v22 = vld [vmem:[#allocation14 + $0xdf0] sm:$0xff]  ;;  %v18792_v52 = vcombine.high %v23176_v42, %v23178_v38  ;;  %v18791_v27 = vcombine.low %v23176_v42, %v23178_v38  ;;  %v18794_v44 = vcombine.high %v23190_v17, %v23192_v4 }
 0x885   : > { %15969 = vmatpush1.bf16.msra.mxu0 %v18775_v25  ;;  %16524 = vmatmul.mubr.bf16.gmra.mrb[88].mxu1 %v24092_v32  ;;  %v23224_v41 = vld [vmem:[#allocation14 + $0xe10] sm:$0xff] }
 0x886   : > { %16553 = vmatpush1.bf16.msra.mxu1 %v18777_v19  ;;  %15970 = vmatprep.subr.bf16.mxu0 %v18784_v14  ;;  %v23226_v25 = vld [vmem:[#allocation14 + $0xe30] sm:$0xff]  ;;  %v18793_v14 = vcombine.low %v23190_v17, %v23192_v4  ;;  %v18802_v17 = vcombine.high %v23210_v55, %v23212_v16 }
 0x887   : > { %v15118_v43 = vpop.f32.mrb[64].mxu0  ;;  %16554 = vmatprep.subr.bf16.mxu1 %v18786_v57  ;;  %15949 = vmatprep.mubr.bf16.mxu0 %v24004_v36  ;;  %v18800_v57 = vcombine.high %v23194_v35, %v23208_v22 }
 0x888   : > { %v16909_v34 = vmax.f32 %v15118_v43, 0.0  ;;  %v15702_v19 = vpop.f32.mrb[64].mxu1  ;;  %v15120_v23 = vpop.f32.mrb[65].mxu0  ;;  %16533 = vmatprep.mubr.bf16.mxu1 %v24004_v36 }
 0x889   : > { %v16911_v38 = vmax.f32 %v15702_v19, 0.0  ;;  %v16910_v32 = vmax.f32 %v15120_v23, 0.0  ;;  %v15704_v21 = vpop.f32.mrb[65].mxu1  ;;  %v15122_v4 = vpop.f32.mrb[66].mxu0  ;;  %15971 = vmatpush1.bf16.msra.mxu0 %v18783_v37  ;;  %v18807_v37 = vcombine.low %v23224_v41, %v23226_v25 }
 0x88a   : > { %v16973_v42 = vadd.f32 %v16909_v34, %v8365_v26  ;;  %v16912_v46 = vmax.f32 %v15704_v21, 0.0  ;;  %v16917_v36 = vmax.f32 %v15122_v4, 0.0  ;;  %v15706_v19 = vpop.f32.mrb[66].mxu1  ;;  %16555 = vmatpush1.bf16.msra.mxu1 %v18785_v5  ;;  %v15124_v23 = vpop.f32.mrb[67].mxu0  ;;  %15972 = vmatprep.subr.bf16.mxu0 %v18792_v52  ;;  %v23261_v26 = vld [vmem:[#allocation14 + $0xe70] sm:$0xff]  ;;  %v24096_v21 = vmax.f32 %v23016_v53, 0.0 }
 0x88b   : > { %v16975_v11 = vadd.f32 %v16911_v38, %v8367_v60  ;;  %v16974_v43 = vadd.f32 %v16910_v32, %v8366_v58  ;;  %v16919_v45 = vmax.f32 %v15706_v19, 0.0  ;;  %v16918_v59 = vmax.f32 %v15124_v23, 0.0  ;;  %v15708_v18 = vpop.f32.mrb[67].mxu1  ;;  %16556 = vmatprep.subr.bf16.mxu1 %v18794_v44 }
 0x88c   : > { %v16976_v5 = vadd.f32 %v16912_v46, %v24096_v21  ;;  %v24097_v52 = vmax.f32 %v23020_v20, 0.0  ;;  %v16920_v4 = vmax.f32 %v15708_v18, 0.0  ;;  %15950 = vmatmul.mubr.bf16.gmra.mrb[92].mxu0 %v24098_v54  ;;  %v24099_v58 = vmax.f32 %v23026_v40, 0.0  ;;  %v23277_v20 = vld [vmem:[#allocation14 + $0xe58] sm:$0xff] }
 0x88d   : > { %v24100_v44 = vmax.f32 %v23030_v10, 0.0  ;;  %15973 = vmatpush1.bf16.msra.mxu0 %v18791_v27  ;;  %v18810_v53 = vcombine.high %v23247_v6, %v23249_v2  ;;  %v23279_v46 = vld [vmem:[#allocation14 + $0xe78] sm:$0xff]  ;;  %16534 = vmatmul.mubr.bf16.gmra.mrb[92].mxu1 %v24098_v54  ;;  %v24101_v19 = vmax.f32 %v23036_v15, 0.0  ;;  %v23287_v10 = vld [vmem:[#allocation14 + $0xe90] sm:$0xff] }
 0x88e   : > { %v16981_v34 = vadd.f32 %v16917_v36, %v24097_v52  ;;  %v16983_v32 = vadd.f32 %v16919_v45, %v24099_v58  ;;  %16557 = vmatpush1.bf16.msra.mxu1 %v18793_v14  ;;  %15974 = vmatprep.subr.bf16.mxu0 %v18800_v57  ;;  %v18816_v45 = vcombine.high %v23259_v62, %v23261_v26  ;;  %v23294_v15 = vld [vmem:[#allocation14 + $0xe98] sm:$0xff]  ;;  %v24102_v57 = vld [vmem:[#allocation28_spill] sm:$0xff] }
 0x88f   : > { %v16982_v38 = vadd.f32 %v16918_v59, %v24100_v44  ;;  %v16984_v40 = vadd.f32 %v16920_v4, %v24101_v19  ;;  %v23289_v59 = vld [vmem:[#allocation14 + $0xeb0] sm:$0xff]  ;;  %v15128_v52 = vpop.f32.mrb[68].mxu0  ;;  %16558 = vmatprep.subr.bf16.mxu1 %v18802_v17  ;;  %v23296_v14 = vld [vmem:[#allocation14 + $0xeb8] sm:$0xff]  ;;  %15992 = vmatprep.mubr.bf16.mxu0 %v24102_v57  ;;  %v24103_v19 = vcombine.low %v23194_v35, %v23208_v22  ;;  %v24110_v44 = vmax.f32 %v23067_v49, 0.0 }
 0x890   : > { %v17038_v36 = vadd.f32 %v16981_v34, %v16973_v42  ;;  %v17064_v23 = vadd.f32 %v16983_v32, %v16975_v11  ;;  %v16925_v4 = vmax.f32 %v15128_v52, 0.0  ;;  %v15712_v54 = vpop.f32.mrb[68].mxu1  ;;  %v15130_v58 = vpop.f32.mrb[69].mxu0  ;;  %v18818_v11 = vcombine.high %v23277_v20, %v23279_v46  ;;  %16576 = vmatprep.mubr.bf16.mxu1 %v24102_v57  ;;  %v23331_v22 = vld [vmem:[#allocation14 + $0xef0] sm:$0xff]  ;;  %v23342_v49 = vld [vmem:[#allocation14 + $0xef8] sm:$0xff] }
 0x891   : > { %v17051_v21 = vadd.f32 %v16982_v38, %v16974_v43  ;;  %v17077_v34 = vadd.f32 %v16984_v40, %v16976_v5  ;;  %v16927_v17 = vmax.f32 %v15712_v54, 0.0  ;;  %v16926_v43 = vmax.f32 %v15130_v58, 0.0  ;;  %v15714_v32 = vpop.f32.mrb[69].mxu1  ;;  %v15132_v38 = vpop.f32.mrb[70].mxu0  ;;  %15975 = vmatpush1.bf16.msra.mxu0 %v24103_v19 }
 0x892   : > { %v18824_v40 = vcombine.high %v23287_v10, %v23289_v59  ;;  %v24104_v52 = vmax.f32 %v23041_v0, 0.0  ;;  %v16928_v18 = vmax.f32 %v15714_v32, 0.0  ;;  %v16933_v60 = vmax.f32 %v15132_v38, 0.0  ;;  %v15716_v57 = vpop.f32.mrb[70].mxu1  ;;  %v15134_v58 = vpop.f32.mrb[71].mxu0 }
 0x893   : > { %v24105_v54 = vcombine.low %v23210_v55, %v23212_v16  ;;  %v24106_v35 = vcombine.high %v23224_v41, %v23226_v25  ;;  %v24107_v19 = vmax.f32 %v23045_v63, 0.0  ;;  %v24108_v0 = vmax.f32 %v23056_v13, 0.0  ;;  %v23352_v41 = vld [vmem:[#allocation14 + $0xf30] sm:$0xff] }
 0x894   : > { %v16989_v27 = vadd.f32 %v16925_v4, %v24104_v52  ;;  %v16935_v32 = vmax.f32 %v15716_v57, 0.0  ;;  %v16934_v38 = vmax.f32 %v15134_v58, 0.0  ;;  %v15718_v52 = vpop.f32.mrb[71].mxu1  ;;  %v24109_v55 = vmax.f32 %v23060_v33, 0.0  ;;  %v23340_v33 = vld [vmem:[#allocation14 + $0xed8] sm:$0xff] }
 0x895   : > { %16559 = vmatpush1.bf16.msra.mxu1 %v24105_v54  ;;  %15976 = vmatprep.subr.bf16.mxu0 %v24106_v35  ;;  %v16991_v5 = vadd.f32 %v16927_v17, %v24107_v19  ;;  %v16990_v4 = vadd.f32 %v16926_v43, %v24108_v0  ;;  %v16997_v35 = vadd.f32 %v16933_v60, %v24110_v44  ;;  %v16936_v42 = vmax.f32 %v15718_v52, 0.0 }
 0x896   : > { %16560 = vmatprep.subr.bf16.mxu1 %v18810_v53  ;;  %v17039_v16 = vadd.f32 %v17038_v36, %v16989_v27  ;;  %v16992_v54 = vadd.f32 %v16928_v18, %v24109_v55  ;;  %v24111_v13 = vmax.f32 %v23072_v24, 0.0  ;;  %v24112_v57 = vmax.f32 %v23080_v12, 0.0  ;;  %15977 = vmatpush1.bf16.msra.mxu0 %v18807_v37  ;;  %v23350_v12 = vld [vmem:[#allocation14 + $0xf10] sm:$0xff] }
 0x897   : > { %v17065_v63 = vadd.f32 %v17064_v23, %v16991_v5  ;;  %v17052_v17 = vadd.f32 %v17051_v21, %v16990_v4  ;;  %v8422_v60 = vmax.f32 %v23204_v48, 0.0  ;;  %v24113_v27 = vmax.f32 %v23090_v50, 0.0  ;;  %15978 = vmatprep.subr.bf16.mxu0 %v18816_v45  ;;  %v15138_v21 = vpop.f32.mrb[72].mxu0  ;;  %v8940_v48 = vld [vmem:[#allocation14 + $0xff8] sm:$0xff] }
 0x898   : > { %v16999_v43 = vadd.f32 %v16935_v32, %v24111_v13  ;;  %v16998_v53 = vadd.f32 %v16934_v38, %v24112_v57  ;;  %v17078_v18 = vadd.f32 %v17077_v34, %v16992_v54  ;;  %v17040_v36 = vadd.f32 %v17039_v16, %v16997_v35  ;;  %v15722_v5 = vpop.f32.mrb[72].mxu1 }
 0x899   : > { %v17000_v23 = vadd.f32 %v16936_v42, %v24113_v27  ;;  %v24114_v24 = vcombine.low %v23247_v6, %v23249_v2  ;;  %v18826_v34 = vcombine.high %v23294_v15, %v23296_v14  ;;  %v18832_v50 = vcombine.high %v23329_v1, %v23331_v22  ;;  %v15140_v2 = vpop.f32.mrb[73].mxu0  ;;  %v15724_v0 = vpop.f32.mrb[73].mxu1 }
 0x89a   : > { %v17066_v25 = vadd.f32 %v17065_v63, %v16999_v43  ;;  %v17053_v37 = vadd.f32 %v17052_v17, %v16998_v53  ;;  %v16941_v44 = vmax.f32 %v15138_v21, 0.0  ;;  %v18831_v6 = vcombine.low %v23329_v1, %v23331_v22  ;;  %v15726_v55 = vpop.f32.mrb[74].mxu1 }
 0x89b   : > { %16561 = vmatpush1.bf16.msra.mxu1 %v24114_v24  ;;  %v17079_v42 = vadd.f32 %v17078_v18, %v17000_v23  ;;  %v18833_v45 = vcombine.low %v23340_v33, %v23342_v49  ;;  %v16943_v58 = vmax.f32 %v15722_v5, 0.0  ;;  %v16942_v19 = vmax.f32 %v15140_v2, 0.0  ;;  %v15728_v57 = vpop.f32.mrb[75].mxu1  ;;  %v23384_v23 = vld [vmem:[#allocation14 + $0xf18] sm:$0xff] }
 0x89c   : > { %16562 = vmatprep.subr.bf16.mxu1 %v18818_v11  ;;  %v15142_v11 = vpop.f32.mrb[74].mxu0  ;;  %v24115_v4 = vcombine.low %v23259_v62, %v23261_v26  ;;  %v18834_v32 = vcombine.high %v23340_v33, %v23342_v49  ;;  %v18840_v38 = vcombine.high %v23350_v12, %v23352_v41  ;;  %v24116_v52 = vmax.f32 %v23094_v47, 0.0  ;;  %v23386_v24 = vld [vmem:[#allocation14 + $0xf38] sm:$0xff] }
 0x89d   : > { %v16944_v22 = vmax.f32 %v15724_v0, 0.0  ;;  %v16949_v16 = vmax.f32 %v15142_v11, 0.0  ;;  %v24117_v54 = vcombine.low %v23277_v20, %v23279_v46  ;;  %v15144_v35 = vpop.f32.mrb[75].mxu0  ;;  %v18839_v62 = vcombine.low %v23350_v12, %v23352_v41 }
 0x89e   : > { %15979 = vmatpush1.bf16.msra.mxu0 %v24115_v4  ;;  %v17005_v1 = vadd.f32 %v16941_v44, %v24116_v52  ;;  %v24118_v26 = vmax.f32 %v23104_v30, 0.0  ;;  %v24119_v17 = vmax.f32 %v23108_v51, 0.0  ;;  %v16951_v47 = vmax.f32 %v15726_v55, 0.0  ;;  %v23415_v4 = vld [vmem:[#allocation14 + $0xfb0] sm:$0xff] }
 0x89f   : > { %16563 = vmatpush1.bf16.msra.mxu1 %v24117_v54  ;;  %15980 = vmatprep.subr.bf16.mxu0 %v18824_v40  ;;  %v16950_v43 = vmax.f32 %v15144_v35, 0.0  ;;  %v24120_v18 = vmax.f32 %v23116_v3, 0.0  ;;  %v24121_v46 = vmax.f32 %v23123_v31, 0.0  ;;  %v16952_v27 = vmax.f32 %v15728_v57, 0.0  ;;  %v23397_v31 = vld [vmem:[#allocation14 + $0xf70] sm:$0xff]  ;;  %v15148_v11 = vpop.f32.mrb[76].mxu0 }
 0x8a0   : > { %v17007_v63 = vadd.f32 %v16943_v58, %v24118_v26  ;;  %v17006_v13 = vadd.f32 %v16942_v19, %v24119_v17  ;;  %16564 = vmatprep.subr.bf16.mxu1 %v18826_v34  ;;  %v17041_v53 = vadd.f32 %v17040_v36, %v17005_v1  ;;  %v24122_v51 = vmax.f32 %v23127_v61, 0.0  ;;  %v23395_v36 = vld [vmem:[#allocation14 + $0xf50] sm:$0xff]  ;;  %v15150_v52 = vpop.f32.mrb[77].mxu0 }
 0x8a1   : > { %v17008_v20 = vadd.f32 %v16944_v22, %v24120_v18  ;;  %v17013_v40 = vadd.f32 %v16949_v16, %v24121_v46  ;;  %v24123_v5 = vmax.f32 %v23140_v7, 0.0  ;;  %v24124_v3 = vcombine.low %v23287_v10, %v23289_v59  ;;  %v23405_v7 = vld [vmem:[#allocation14 + $0xf58] sm:$0xff]  ;;  %v15152_v54 = vpop.f32.mrb[78].mxu0  ;;  %v24130_v46 = vld [vmem:[#allocation70_spill] sm:$0xff] }
 0x8a2   : > { %v17067_v30 = vadd.f32 %v17066_v25, %v17007_v63  ;;  %v17054_v21 = vadd.f32 %v17053_v37, %v17006_v13  ;;  %v17015_v44 = vadd.f32 %v16951_v47, %v24122_v51  ;;  %v8424_v2 = vmax.f32 %v23218_v29, 0.0  ;;  %v23407_v10 = vld [vmem:[#allocation14 + $0xf78] sm:$0xff]  ;;  %v15154_v57 = vpop.f32.mrb[79].mxu0 }
 0x8a3   : > { %v17014_v34 = vadd.f32 %v16950_v43, %v24123_v5  ;;  %15981 = vmatpush1.bf16.msra.mxu0 %v24124_v3  ;;  %v17080_v58 = vadd.f32 %v17079_v42, %v17008_v20  ;;  %v17042_v19 = vadd.f32 %v17041_v53, %v17013_v40  ;;  %v24125_v25 = vmax.f32 %v23144_v9, 0.0  ;;  %v23413_v42 = vld [vmem:[#allocation14 + $0xf90] sm:$0xff]  ;;  %v24128_v53 = vld [vmem:[#allocation69_spill] sm:$0xff] }
 0x8a4   : > { %v24126_v61 = vcombine.low %v23294_v15, %v23296_v14  ;;  %15982 = vmatprep.subr.bf16.mxu0 %v18832_v50  ;;  %v17068_v59 = vadd.f32 %v17067_v30, %v17015_v44  ;;  %v18841_v29 = vcombine.low %v23384_v23, %v23386_v24  ;;  %v18842_v9 = vcombine.high %v23384_v23, %v23386_v24  ;;  %v15732_v50 = vpop.f32.mrb[76].mxu1  ;;  %v8928_v51 = vld [vmem:[#allocation14 + $0xf98] sm:$0xff] }
 0x8a5   : > { %v17016_v37 = vadd.f32 %v16952_v27, %v24125_v25  ;;  %v17055_v0 = vadd.f32 %v17054_v21, %v17014_v34  ;;  %v16957_v14 = vmax.f32 %v15148_v11, 0.0  ;;  %v18847_v1 = vcombine.low %v23395_v36, %v23397_v31  ;;  %v15734_v55 = vpop.f32.mrb[77].mxu1  ;;  %v8932_v44 = vld [vmem:[#allocation14 + $0xfb8] sm:$0xff] }
 0x8a6   : > { %16565 = vmatpush1.bf16.msra.mxu1 %v24126_v61  ;;  %v16959_v22 = vmax.f32 %v15732_v50, 0.0  ;;  %v16958_v16 = vmax.f32 %v15150_v52, 0.0  ;;  %v18849_v35 = vcombine.low %v23405_v7, %v23407_v10  ;;  %v18850_v26 = vcombine.high %v23405_v7, %v23407_v10  ;;  %v15736_v43 = vpop.f32.mrb[78].mxu1  ;;  %v8935_v61 = vld [vmem:[#allocation14 + $0xfd0] sm:$0xff] }
 0x8a7   : > { %16566 = vmatprep.subr.bf16.mxu1 %v18834_v32  ;;  %v17081_v15 = vadd.f32 %v17080_v58, %v17016_v37  ;;  %v18848_v32 = vcombine.high %v23395_v36, %v23397_v31  ;;  %15983 = vmatpush1.bf16.msra.mxu0 %v18831_v6  ;;  %v24127_v63 = vmax.f32 %v23155_v39, 0.0  ;;  %v16960_v13 = vmax.f32 %v15734_v55, 0.0  ;;  %v15738_v24 = vpop.f32.mrb[79].mxu1  ;;  %v8939_v7 = vld [vmem:[#allocation14 + $0xff0] sm:$0xff]  ;;  %v8948_v55 = vld [vmem:[#allocation14 + $0x1038] sm:$0xff] }
 0x8a8   : > { %v16965_v47 = vmax.f32 %v15152_v54, 0.0  ;;  %15984 = vmatprep.subr.bf16.mxu0 %v18840_v38  ;;  %v18856_v6 = vcombine.high %v23413_v42, %v23415_v4  ;;  %v24129_v18 = vmax.f32 %v24128_v53, 0.0  ;;  %v24131_v40 = vmax.f32 %v24130_v46, 0.0  ;;  %v8943_v52 = vld [vmem:[#allocation14 + $0x1010] sm:$0xff]  ;;  %v8952_v46 = vld [vmem:[#allocation14 + $0x1058] sm:$0xff] }
 0x8a9   : > { %v17021_v17 = vadd.f32 %v16957_v14, %v24127_v63  ;;  %v16967_v39 = vmax.f32 %v15736_v43, 0.0  ;;  %v16966_v23 = vmax.f32 %v15154_v57, 0.0  ;;  %v24132_v21 = vmax.f32 %v23184_v28, 0.0  ;;  %v8955_v53 = vld [vmem:[#allocation14 + $0x1070] sm:$0xff] }
 0x8aa   : > { %16567 = vmatpush1.bf16.msra.mxu1 %v18833_v45  ;;  %v17023_v20 = vadd.f32 %v16959_v22, %v24129_v18  ;;  %v17022_v27 = vadd.f32 %v16958_v16, %v24131_v40  ;;  %v24133_v49 = vmax.f32 %v23188_v56, 0.0  ;;  %v16968_v38 = vmax.f32 %v15738_v24, 0.0  ;;  %v8956_v40 = vld [vmem:[#allocation14 + $0x1078] sm:$0xff] }
 0x8ab   : > { %16568 = vmatprep.subr.bf16.mxu1 %v18842_v9  ;;  %v17043_v30 = vadd.f32 %v17042_v19, %v17021_v17  ;;  %v17024_v33 = vadd.f32 %v16960_v13, %v24132_v21  ;;  %v24134_v3 = vmax.f32 %v23200_v8, 0.0  ;;  %v17030_v31 = vadd.f32 %v16966_v23, %v8422_v60  ;;  %15985 = vmatpush1.bf16.msra.mxu0 %v18839_v62 }
 0x8ac   : > { %v17029_v45 = vadd.f32 %v16965_v47, %v24133_v49  ;;  %v17069_v5 = vadd.f32 %v17068_v59, %v17023_v20  ;;  %v17056_v34 = vadd.f32 %v17055_v0, %v17022_v27  ;;  %v17032_v19 = vadd.f32 %v16968_v38, %v8424_v2  ;;  %15986 = vmatprep.subr.bf16.mxu0 %v18848_v32  ;;  %v8936_v59 = vld [vmem:[#allocation14 + $0xfd8] sm:$0xff]  ;;  %v8947_v32 = vld [vmem:[#allocation14 + $0x1030] sm:$0xff] }
 0x8ad   : > { %v17031_v36 = vadd.f32 %v16967_v39, %v24134_v3  ;;  %v17082_v28 = vadd.f32 %v17081_v15, %v17024_v33  ;;  %v18858_v37 = vcombine.high %v8928_v51, %v8932_v44  ;;  %v18855_v12 = vcombine.low %v23413_v42, %v23415_v4  ;;  %v24135_v38 = vld [vmem:[#allocation68_spill] sm:$0xff] }
 0x8ae   : > { %v17044_v58 = vadd.f32 %v17043_v30, %v17029_v45  ;;  %16569 = vmatpush1.bf16.msra.mxu1 %v18841_v29  ;;  %v17057_v25 = vadd.f32 %v17056_v34, %v17030_v31  ;;  %v18857_v2 = vcombine.low %v8928_v51, %v8932_v44  ;;  %v18864_v11 = vcombine.high %v8935_v61, %v8939_v7  ;;  %v8963_v34 = vld [vmem:[#allocation14 + $0x10b0] sm:$0xff]  ;;  %v8960_v31 = vld [vmem:[#allocation14 + $0x1098] sm:$0xff] }
 0x8af   : > { %v17070_v56 = vadd.f32 %v17069_v5, %v17031_v36  ;;  %16570 = vmatprep.subr.bf16.mxu1 %v18850_v26  ;;  %v17083_v10 = vadd.f32 %v17082_v28, %v17032_v19  ;;  %15987 = vmatpush1.bf16.msra.mxu0 %v18847_v1  ;;  %v21724_v15 = vmov 1966171168   ;;  %v18866_v50 = vcombine.high %v8936_v59, %v8940_v48  ;;  %v8944_v1 = vld [vmem:[#allocation14 + $0x1018] sm:$0xff]  ;;  %v8959_v5 = vld [vmem:[#allocation14 + $0x1090] sm:$0xff] }
 0x8b0   : > { %v17045_v8 = vrot.slane %v17044_v58, 4  ;;  %v17058_v0 = vrot.slane %v17057_v25, 4  ;;  %15988 = vmatprep.subr.bf16.mxu0 %v18856_v6  ;;  %v17155_v14 = vunpack.c.l.s4 %v21724_v15  ;;  %v18863_v4 = vcombine.low %v8935_v61, %v8939_v7  ;;  %v8951_v6 = vld [vmem:[#allocation14 + $0x1050] sm:$0xff]  ;;  %v24136_v36 = vld [vmem:[#allocation29_spill] sm:$0xff] }
 0x8b1   : > { %v17071_v60 = vrot.slane %v17070_v56, 4  ;;  %v17084_v62 = vrot.slane %v17083_v10, 4  ;;  %v18865_v63 = vcombine.low %v8936_v59, %v8940_v48  ;;  %v18872_v17 = vcombine.high %v8943_v52, %v8947_v32  ;;  %v8964_v28 = vld [vmem:[#allocation14 + $0x10b8] sm:$0xff]  ;;  %v24137_v59 = vld [vmem:[#allocation30_spill] sm:$0xff] }
 0x8b2   : > { %v17046_v41 = vadd.f32 %v17045_v8, %v17044_v58  ;;  %16571 = vmatpush1.bf16.msra.mxu1 %v18849_v35  ;;  %v17059_v9 = vadd.f32 %v17058_v0, %v17057_v25  ;;  %v17156_v43 = vunpack.c.0.s8 %v17155_v14  ;;  %v18874_v57 = vcombine.high %v8944_v1, %v8948_v55  ;;  %v8967_v8 = vld [vmem:[#allocation14 + $0x10d0] sm:$0xff]  ;;  %v8972_v0 = vld [vmem:[#allocation14 + $0x10f8] sm:$0xff] }
 0x8b3   : > { %v17072_v29 = vadd.f32 %v17071_v60, %v17070_v56  ;;  %16572 = vmatprep.subr.bf16.mxu1 %v18858_v37  ;;  %v17085_v16 = vadd.f32 %v17084_v62, %v17083_v10  ;;  %15989 = vmatpush1.bf16.msra.mxu0 %v18855_v12  ;;  %v18871_v23 = vcombine.low %v8943_v52, %v8947_v32  ;;  %v8971_v10 = vld [vmem:[#allocation14 + $0x10f0] sm:$0xff]  ;;  %v8968_v60 = vld [vmem:[#allocation14 + $0x10d8] sm:$0xff] }
 0x8b4   : > { %v17047_v22 = vrot.slane %v17046_v41, 2  ;;  %v17060_v42 = vrot.slane %v17059_v9, 2  ;;  %15990 = vmatprep.subr.bf16.mxu0 %v18864_v11  ;;  %v18873_v21 = vcombine.low %v8944_v1, %v8948_v55  ;;  %v18880_v33 = vcombine.high %v8951_v6, %v8955_v53  ;;  %v8976_v15 = vld [vmem:[#allocation14 + $0x1118] sm:$0xff]  ;;  %v8983_v1 = vld [vmem:[#allocation14 + $0x1150] sm:$0xff] }
 0x8b5   : > { %v17073_v54 = vrot.slane %v17072_v29, 2  ;;  %v17086_v26 = vrot.slane %v17085_v16, 2  ;;  %v23450_v51 = vsub.s32 %v17156_v43, %v24135_v38  ;;  %v18882_v44 = vcombine.high %v8952_v46, %v8956_v40  ;;  %v8980_v14 = vld [vmem:[#allocation14 + $0x1138] sm:$0xff]  ;;  %v8987_v55 = vld [vmem:[#allocation14 + $0x1170] sm:$0xff] }
 0x8b6   : > { %v17048_v35 = vadd.f32 %v17047_v22, %v17046_v41  ;;  %16573 = vmatpush1.bf16.msra.mxu1 %v18857_v2  ;;  %v17061_v47 = vadd.f32 %v17060_v42, %v17059_v9  ;;  %v18879_v19 = vcombine.low %v8951_v6, %v8955_v53  ;;  %v18881_v25 = vcombine.low %v8952_v46, %v8956_v40  ;;  %v8979_v9 = vld [vmem:[#allocation14 + $0x1130] sm:$0xff]  ;;  %v8984_v42 = vld [vmem:[#allocation14 + $0x1158] sm:$0xff] }
 0x8b7   : > { %v17074_v13 = vadd.f32 %v17073_v54, %v17072_v29  ;;  %16574 = vmatprep.subr.bf16.mxu1 %v18866_v50  ;;  %v17087_v20 = vadd.f32 %v17086_v26, %v17085_v16  ;;  %15991 = vmatpush1.bf16.msra.mxu0 %v18863_v4  ;;  %v18888_v37 = vcombine.high %v8959_v5, %v8963_v34  ;;  %v8975_v29 = vld [vmem:[#allocation14 + $0x1110] sm:$0xff]  ;;  %v24138_v50 = vld [vmem:[#allocation31_spill] sm:$0xff]  ;;  %v8988_v4 = vld [vmem:[#allocation14 + $0x1178] sm:$0xff] }
 0x8b8   : > { %v17049_v18 = vrot.slane %v17048_v35, 1  ;;  %v17062_v39 = vrot.slane %v17061_v47, 1  ;;  %16033 = vmatprep.subr.bf16.mxu0 %v18872_v17  ;;  %v18890_v7 = vcombine.high %v8960_v31, %v8964_v28  ;;  %v18887_v12 = vcombine.low %v8959_v5, %v8963_v34  ;;  %v24139_v54 = vld [vmem:[#allocation32_spill] sm:$0xff]  ;;  %v8992_v43 = vld [vmem:[#allocation14 + $0x1198] sm:$0xff] }
 0x8b9   : > { %v17075_v27 = vrot.slane %v17074_v13, 1  ;;  %v17088_v30 = vrot.slane %v17087_v20, 1  ;;  %v18889_v62 = vcombine.low %v8960_v31, %v8964_v28  ;;  %v18896_v2 = vcombine.high %v8967_v8, %v8971_v10  ;;  %v24140_v6 = vld [vmem:[#allocation33_spill] sm:$0xff]  ;;  %v8999_v40 = vld [vmem:[#allocation14 + $0x11d0] sm:$0xff] }
 0x8ba   : > { %v17050_v24 = vadd.f32 %v17049_v18, %v17048_v35  ;;  %16575 = vmatpush1.bf16.msra.mxu1 %v18865_v63  ;;  %v17063_v45 = vadd.f32 %v17062_v39, %v17061_v47  ;;  %15993 = vmatmul.mubr.bf16.vlgmr.msra.gmra.mrb[80].mxu0 %v24136_v36  ;;  %v18898_v11 = vcombine.high %v8968_v60, %v8972_v0  ;;  %v8995_v47 = vld [vmem:[#allocation14 + $0x11b0] sm:$0xff]  ;;  %v24141_v39 = vld [vmem:[#allocation34_spill] sm:$0xff]  ;;  %v9008_v5 = vld [vmem:[#allocation14 + $0x1218] sm:$0xff] }
 0x8bb   : > { %v17076_v49 = vadd.f32 %v17075_v27, %v17074_v13  ;;  %16617 = vmatprep.subr.bf16.mxu1 %v18874_v57  ;;  %v17089_v3 = vadd.f32 %v17088_v30, %v17087_v20  ;;  %16034 = vmatpush1.bf16.msra.mxu0 %v18871_v23  ;;  %v18895_v52 = vcombine.low %v8967_v8, %v8971_v10  ;;  %v8991_v13 = vld [vmem:[#allocation14 + $0x1190] sm:$0xff]  ;;  %v8996_v57 = vld [vmem:[#allocation14 + $0x11b8] sm:$0xff] }
 0x8bc   : > { %v17150_v58 = vcombine.low %v17050_v24, %v17063_v45  ;;  %16035 = vmatprep.subr.bf16.mxu0 %v18880_v33  ;;  %16002 = vmatprep.mubr.bf16.mxu0 %v24137_v59  ;;  %v18897_v32 = vcombine.low %v8968_v60, %v8972_v0  ;;  %v18904_v22 = vcombine.high %v8975_v29, %v8979_v9  ;;  %v9003_v27 = vld [vmem:[#allocation14 + $0x11f0] sm:$0xff]  ;;  %v9000_v23 = vld [vmem:[#allocation14 + $0x11d8] sm:$0xff] }
 0x8bd   : > { %16577 = vmatmul.mubr.bf16.vlgmr.msra.gmra.mrb[80].mxu1 %v24136_v36  ;;  %v17151_v56 = vcombine.low %v17076_v49, %v17089_v3  ;;  %v18906_v16 = vcombine.high %v8976_v15, %v8980_v14  ;;  %v18903_v35 = vcombine.low %v8975_v29, %v8979_v9  ;;  %v18905_v26 = vcombine.low %v8976_v15, %v8980_v14  ;;  %v9004_v24 = vld [vmem:[#allocation14 + $0x11f8] sm:$0xff]  ;;  %v9007_v45 = vld [vmem:[#allocation14 + $0x1210] sm:$0xff]  ;;  %v24142_v3 = vld [vmem:[#allocation35_spill] sm:$0xff] }
 0x8be   : > { %16618 = vmatpush1.bf16.msra.mxu1 %v18873_v21  ;;  %v23455_v61 = vrot.slane %v17150_v58, %v23450_v51  ;;  %16586 = vmatprep.mubr.bf16.mxu1 %v24137_v59  ;;  %v18912_v63 = vcombine.high %v8983_v1, %v8987_v55  ;;  %v18914_v17 = vcombine.high %v8984_v42, %v8988_v4  ;;  %v9012_v34 = vld [vmem:[#allocation14 + $0x1238] sm:$0xff]  ;;  %v9023_v0 = vld [vmem:[#allocation14 + $0x1290] sm:$0xff] }
 0x8bf   : > { %16619 = vmatprep.subr.bf16.mxu1 %v18882_v44  ;;  %v23459_v48 = vrot.slane %v17151_v56, %v23450_v51  ;;  %16036 = vmatpush1.bf16.msra.mxu0 %v18879_v19  ;;  %v18911_v53 = vcombine.low %v8983_v1, %v8987_v55  ;;  %v18913_v18 = vcombine.low %v8984_v42, %v8988_v4  ;;  %v9011_v44 = vld [vmem:[#allocation14 + $0x1230] sm:$0xff]  ;;  %v9040_v4 = vld [vmem:[#allocation14 + $0x1318] sm:$0xff] }
 0x8c0   : > { %16037 = vmatprep.subr.bf16.mxu0 %v18888_v37  ;;  %v18920_v20 = vcombine.high %v8991_v13, %v8995_v47  ;;  %v18922_v46 = vcombine.high %v8992_v43, %v8996_v57  ;;  %v18919_v30 = vcombine.low %v8991_v13, %v8995_v47  ;;  %v18921_v21 = vcombine.low %v8992_v43, %v8996_v57  ;;  %v9015_v19 = vld [vmem:[#allocation14 + $0x1250] sm:$0xff]  ;;  %v9016_v37 = vld [vmem:[#allocation14 + $0x1258] sm:$0xff] }
 0x8c1   : > { %v17182_v41 = vcombine.low %v23455_v61, %v23459_v48  ;;  %v18928_v33 = vcombine.high %v8999_v40, %v9003_v27  ;;  %v18930_v49 = vcombine.high %v9000_v23, %v9004_v24  ;;  %v18927_v36 = vcombine.low %v8999_v40, %v9003_v27  ;;  %v9019_v56 = vld [vmem:[#allocation14 + $0x1270] sm:$0xff]  ;;  %v9048_v57 = vld [vmem:[#allocation14 + $0x1358] sm:$0xff] }
 0x8c2   : > { %16620 = vmatpush1.bf16.msra.mxu1 %v18881_v25  ;;  %16003 = vmatmul.mubr.bf16.gmra.mrb[84].mxu0 %v24138_v50  ;;  %v18929_v31 = vcombine.low %v9000_v23, %v9004_v24  ;;  %v18936_v28 = vcombine.high %v9007_v45, %v9011_v44  ;;  %v18938_v58 = vcombine.high %v9008_v5, %v9012_v34  ;;  %v24143_v25 = vld [vmem:[#allocation36_spill] sm:$0xff]  ;;  %v9060_v23 = vld [vmem:[#allocation14 + $0x13b8] sm:$0xff] }
 0x8c3   : > { %16621 = vmatprep.subr.bf16.mxu1 %v18890_v7  ;;  %16038 = vmatpush1.bf16.msra.mxu0 %v18887_v12  ;;  %v9020_v7 = vld [vmem:[#allocation14 + $0x1278] sm:$0xff]  ;;  %v18935_v8 = vcombine.low %v9007_v45, %v9011_v44  ;;  %v18937_v10 = vcombine.low %v9008_v5, %v9012_v34  ;;  %v18944_v59 = vcombine.high %v9015_v19, %v9019_v56  ;;  %v9027_v12 = vld [vmem:[#allocation14 + $0x12b0] sm:$0xff] }
 0x8c4   : > { %16039 = vmatprep.subr.bf16.mxu0 %v18896_v2  ;;  %16012 = vmatprep.mubr.bf16.mxu0 %v24139_v54  ;;  %v18946_v60 = vcombine.high %v9016_v37, %v9020_v7  ;;  %v9028_v2 = vld [vmem:[#allocation14 + $0x12b8] sm:$0xff]  ;;  %v18945_v29 = vcombine.low %v9016_v37, %v9020_v7  ;;  %v18952_v9 = vcombine.high %v9023_v0, %v9027_v12  ;;  %v9031_v14 = vld [vmem:[#allocation14 + $0x12d0] sm:$0xff] }
 0x8c5   : > { %16587 = vmatmul.mubr.bf16.gmra.mrb[84].mxu1 %v24138_v50  ;;  %v9035_v50 = vld [vmem:[#allocation14 + $0x12f0] sm:$0xff]  ;;  %v9064_v44 = vld [vmem:[#allocation14 + $0x13d8] sm:$0xff] }
 0x8c6   : > { %16622 = vmatpush1.bf16.msra.mxu1 %v18889_v62  ;;  %16596 = vmatprep.mubr.bf16.mxu1 %v24139_v54  ;;  %v9024_v62 = vld [vmem:[#allocation14 + $0x1298] sm:$0xff]  ;;  %v18960_v1 = vcombine.high %v9031_v14, %v9035_v50  ;;  %v9039_v54 = vld [vmem:[#allocation14 + $0x1310] sm:$0xff] }
 0x8c7   : > { %16623 = vmatprep.subr.bf16.mxu1 %v18898_v11  ;;  %16040 = vmatpush1.bf16.msra.mxu0 %v18895_v52  ;;  %v18943_v11 = vcombine.low %v9015_v19, %v9019_v56  ;;  %v18954_v15 = vcombine.high %v9024_v62, %v9028_v2  ;;  %v9032_v52 = vld [vmem:[#allocation14 + $0x12d8] sm:$0xff]  ;;  %v9043_v42 = vld [vmem:[#allocation14 + $0x1330] sm:$0xff] }
 0x8c8   : > { %16041 = vmatprep.subr.bf16.mxu0 %v18904_v22  ;;  %v18951_v22 = vcombine.low %v9023_v0, %v9027_v12  ;;  %v9047_v47 = vld [vmem:[#allocation14 + $0x1350] sm:$0xff]  ;;  %v9068_v5 = vld [vmem:[#allocation14 + $0x13f8] sm:$0xff] }
 0x8c9   : > { %v9051_v43 = vld [vmem:[#allocation14 + $0x1370] sm:$0xff]  ;;  %v9072_v19 = vld [vmem:[#allocation14 + $0x1418] sm:$0xff]  ;;  %v18993_v37 = vcombine.low %v9064_v44, %v9068_v5 }
 0x8ca   : > { %16624 = vmatpush1.bf16.msra.mxu1 %v18897_v32  ;;  %16013 = vmatmul.mubr.bf16.gmra.mrb[88].mxu0 %v24140_v6  ;;  %v9036_v32 = vld [vmem:[#allocation14 + $0x12f8] sm:$0xff]  ;;  %v9055_v40 = vld [vmem:[#allocation14 + $0x1390] sm:$0xff]  ;;  %v18975_v24 = vcombine.low %v9047_v47, %v9051_v43 }
 0x8cb   : > { %16625 = vmatprep.subr.bf16.mxu1 %v18906_v16  ;;  %16042 = vmatpush1.bf16.msra.mxu0 %v18903_v35  ;;  %v18953_v16 = vcombine.low %v9024_v62, %v9028_v2  ;;  %v18962_v55 = vcombine.high %v9032_v52, %v9036_v32  ;;  %v9044_v35 = vld [vmem:[#allocation14 + $0x1338] sm:$0xff]  ;;  %v9059_v27 = vld [vmem:[#allocation14 + $0x13b0] sm:$0xff] }
 0x8cc   : > { %16043 = vmatprep.subr.bf16.mxu0 %v18912_v63  ;;  %16022 = vmatprep.mubr.bf16.mxu0 %v24141_v39  ;;  %v18961_v63 = vcombine.low %v9032_v52, %v9036_v32  ;;  %v18970_v13 = vcombine.high %v9040_v4, %v9044_v35  ;;  %v9067_v45 = vld [vmem:[#allocation14 + $0x13f0] sm:$0xff]  ;;  %v18983_v34 = vcombine.low %v9055_v40, %v9059_v27  ;;  %v9076_v56 = vld [vmem:[#allocation14 + $0x1438] sm:$0xff] }
 0x8cd   : > { %16597 = vmatmul.mubr.bf16.gmra.mrb[88].mxu1 %v24140_v6  ;;  %v9052_v6 = vld [vmem:[#allocation14 + $0x1378] sm:$0xff]  ;;  %v19001_v62 = vcombine.low %v9072_v19, %v9076_v56 }
 0x8ce   : > { %16626 = vmatpush1.bf16.msra.mxu1 %v18905_v26  ;;  %16606 = vmatprep.mubr.bf16.mxu1 %v24141_v39  ;;  %v18959_v26 = vcombine.low %v9031_v14, %v9035_v50  ;;  %v9056_v39 = vld [vmem:[#allocation14 + $0x1398] sm:$0xff] }
 0x8cf   : > { %16627 = vmatprep.subr.bf16.mxu1 %v18914_v17  ;;  %16044 = vmatpush1.bf16.msra.mxu0 %v18911_v53  ;;  %v18968_v17 = vcombine.high %v9039_v54, %v9043_v42  ;;  %v18967_v53 = vcombine.low %v9039_v54, %v9043_v42  ;;  %v9084_v0 = vld [vmem:[#allocation14 + $0x1478] sm:$0xff]  ;;  %v24145_v54 = vld [vmem:[#allocation38_spill] sm:$0xff] }
 0x8d0   : > { %16045 = vmatprep.subr.bf16.mxu0 %v18920_v20  ;;  %v18976_v20 = vcombine.high %v9047_v47, %v9051_v43  ;;  %v9088_v14 = vld [vmem:[#allocation14 + $0x1498] sm:$0xff]  ;;  %v9107_v47 = vld [vmem:[#allocation14 + $0x1530] sm:$0xff] }
 0x8d1   : > { %v9092_v50 = vld [vmem:[#allocation14 + $0x14b8] sm:$0xff] }
 0x8d2   : > { %16628 = vmatpush1.bf16.msra.mxu1 %v18913_v18  ;;  %16023 = vmatmul.mubr.bf16.gmra.mrb[92].mxu0 %v24142_v3  ;;  %v18969_v18 = vcombine.low %v9040_v4, %v9044_v35  ;;  %v9096_v42 = vld [vmem:[#allocation14 + $0x14d8] sm:$0xff] }
 0x8d3   : > { %16629 = vmatprep.subr.bf16.mxu1 %v18922_v46  ;;  %16046 = vmatpush1.bf16.msra.mxu0 %v18919_v30  ;;  %v18978_v46 = vcombine.high %v9048_v57, %v9052_v6  ;;  %v18977_v30 = vcombine.low %v9048_v57, %v9052_v6  ;;  %v9100_v4 = vld [vmem:[#allocation14 + $0x14f8] sm:$0xff]  ;;  %v24146_v6 = vld [vmem:[#allocation39_spill] sm:$0xff] }
 0x8d4   : > { %16047 = vmatprep.subr.bf16.mxu0 %v18928_v33  ;;  %16065 = vmatprep.mubr.bf16.mxu0 %v24143_v25  ;;  %v18986_v33 = vcombine.high %v9056_v39, %v9060_v23  ;;  %v9104_v43 = vld [vmem:[#allocation14 + $0x1518] sm:$0xff] }
 0x8d5   : > { %16607 = vmatmul.mubr.bf16.gmra.mrb[92].mxu1 %v24142_v3  ;;  %v18985_v3 = vcombine.low %v9056_v39, %v9060_v23  ;;  %v9108_v57 = vld [vmem:[#allocation14 + $0x1538] sm:$0xff]  ;;  %v24147_v39 = vld [vmem:[#allocation40_spill] sm:$0xff] }
 0x8d6   : > { %16630 = vmatpush1.bf16.msra.mxu1 %v18921_v21  ;;  %16649 = vmatprep.mubr.bf16.mxu1 %v24143_v25  ;;  %v18984_v21 = vcombine.high %v9055_v40, %v9059_v27  ;;  %v9111_v40 = vld [vmem:[#allocation14 + $0x1550] sm:$0xff]  ;;  %v9112_v23 = vld [vmem:[#allocation14 + $0x1558] sm:$0xff] }
 0x8d7   : > { %16631 = vmatprep.subr.bf16.mxu1 %v18930_v49  ;;  %16048 = vmatpush1.bf16.msra.mxu0 %v18927_v36  ;;  %v9063_v49 = vld [vmem:[#allocation14 + $0x13d0] sm:$0xff] }
 0x8d8   : > { %16049 = vmatprep.subr.bf16.mxu0 %v18936_v28  ;;  %v18992_v36 = vcombine.high %v9063_v49, %v9067_v45  ;;  %v9071_v28 = vld [vmem:[#allocation14 + $0x1410] sm:$0xff]  ;;  %v18991_v25 = vcombine.low %v9063_v49, %v9067_v45 }
 0x8d9   : > { %v9115_v27 = vld [vmem:[#allocation14 + $0x1570] sm:$0xff] }
 0x8da   : > { %16632 = vmatpush1.bf16.msra.mxu1 %v18929_v31  ;;  %v18994_v31 = vcombine.high %v9064_v44, %v9068_v5  ;;  %v9119_v45 = vld [vmem:[#allocation14 + $0x1590] sm:$0xff]  ;;  %v9120_v5 = vld [vmem:[#allocation14 + $0x1598] sm:$0xff] }
 0x8db   : > { %16633 = vmatprep.subr.bf16.mxu1 %v18938_v58  ;;  %16050 = vmatpush1.bf16.msra.mxu0 %v18935_v8  ;;  %v9075_v58 = vld [vmem:[#allocation14 + $0x1430] sm:$0xff]  ;;  %v19002_v8 = vcombine.high %v9072_v19, %v9076_v56 }
 0x8dc   : > { %16051 = vmatprep.subr.bf16.mxu0 %v18944_v59  ;;  %v19000_v7 = vcombine.high %v9071_v28, %v9075_v58  ;;  %v9083_v59 = vld [vmem:[#allocation14 + $0x1470] sm:$0xff]  ;;  %v18999_v12 = vcombine.low %v9071_v28, %v9075_v58 }
 0x8dd   : > { %v9123_v44 = vld [vmem:[#allocation14 + $0x15b0] sm:$0xff] }
 0x8de   : > { %16634 = vmatpush1.bf16.msra.mxu1 %v18937_v10  ;;  %v9079_v10 = vld [vmem:[#allocation14 + $0x1450] sm:$0xff]  ;;  %v19048_v28 = vcombine.high %v9119_v45, %v9123_v44 }
 0x8df   : > { %16635 = vmatprep.subr.bf16.mxu1 %v18946_v60  ;;  %16052 = vmatpush1.bf16.msra.mxu0 %v18943_v11  ;;  %v9080_v60 = vld [vmem:[#allocation14 + $0x1458] sm:$0xff]  ;;  %v19008_v2 = vcombine.high %v9079_v10, %v9083_v59  ;;  %v19007_v52 = vcombine.low %v9079_v10, %v9083_v59  ;;  %v9127_v19 = vld [vmem:[#allocation14 + $0x15d0] sm:$0xff] }
 0x8e0   : > { %16053 = vmatprep.subr.bf16.mxu0 %v18952_v9  ;;  %v19010_v11 = vcombine.high %v9080_v60, %v9084_v0  ;;  %v9091_v9 = vld [vmem:[#allocation14 + $0x14b0] sm:$0xff]  ;;  %v19009_v32 = vcombine.low %v9080_v60, %v9084_v0 }
 0x8e1   : > { %v9131_v56 = vld [vmem:[#allocation14 + $0x15f0] sm:$0xff] }
 0x8e2   : > { %16636 = vmatpush1.bf16.msra.mxu1 %v18945_v29  ;;  %v9087_v29 = vld [vmem:[#allocation14 + $0x1490] sm:$0xff]  ;;  %v19056_v59 = vcombine.high %v9127_v19, %v9131_v56 }
 0x8e3   : > { %16637 = vmatprep.subr.bf16.mxu1 %v18954_v15  ;;  %16054 = vmatpush1.bf16.msra.mxu0 %v18951_v22  ;;  %v24144_v15 = vld [vmem:[#allocation37_spill] sm:$0xff]  ;;  %v19016_v22 = vcombine.high %v9087_v29, %v9091_v9  ;;  %v19015_v35 = vcombine.low %v9087_v29, %v9091_v9  ;;  %v9135_v0 = vld [vmem:[#allocation14 + $0x1610] sm:$0xff]  ;;  %v19055_v29 = vcombine.low %v9127_v19, %v9131_v56 }
 0x8e4   : > { %16055 = vmatprep.subr.bf16.mxu0 %v18960_v1  ;;  %v9095_v1 = vld [vmem:[#allocation14 + $0x14d0] sm:$0xff] }
 0x8e5   : > { %v9183_v19 = vld [vmem:[#allocation14 + $0x1790] sm:$0xff] }
 0x8e6   : > { %16638 = vmatpush1.bf16.msra.mxu1 %v18953_v16  ;;  %v19018_v16 = vcombine.high %v9088_v14, %v9092_v50  ;;  %v9187_v56 = vld [vmem:[#allocation14 + $0x17b0] sm:$0xff] }
 0x8e7   : > { %16639 = vmatprep.subr.bf16.mxu1 %v18962_v55  ;;  %16056 = vmatpush1.bf16.msra.mxu0 %v18959_v26  ;;  %v9099_v55 = vld [vmem:[#allocation14 + $0x14f0] sm:$0xff]  ;;  %v19017_v26 = vcombine.low %v9088_v14, %v9092_v50 }
 0x8e8   : > { %16057 = vmatprep.subr.bf16.mxu0 %v18968_v17  ;;  %v19026_v17 = vcombine.high %v9096_v42, %v9100_v4  ;;  %v9143_v50 = vld [vmem:[#allocation14 + $0x1650] sm:$0xff] }
 0x8ea   : > { %16640 = vmatpush1.bf16.msra.mxu1 %v18961_v63  ;;  %v19024_v63 = vcombine.high %v9095_v1, %v9099_v55 }
 0x8eb   : > { %16641 = vmatprep.subr.bf16.mxu1 %v18970_v13  ;;  %16058 = vmatpush1.bf16.msra.mxu0 %v18967_v53  ;;  %v9103_v13 = vld [vmem:[#allocation14 + $0x1510] sm:$0xff]  ;;  %v19023_v53 = vcombine.low %v9095_v1, %v9099_v55 }
 0x8ec   : > { %16059 = vmatprep.subr.bf16.mxu0 %v18976_v20  ;;  %v19032_v20 = vcombine.high %v9103_v13, %v9107_v47 }
 0x8ee   : > { %16642 = vmatpush1.bf16.msra.mxu1 %v18969_v18  ;;  %v19025_v18 = vcombine.low %v9096_v42, %v9100_v4  ;;  %v9151_v4 = vld [vmem:[#allocation14 + $0x1690] sm:$0xff] }
 0x8ef   : > { %16643 = vmatprep.subr.bf16.mxu1 %v18978_v46  ;;  %16060 = vmatpush1.bf16.msra.mxu0 %v18975_v24  ;;  %v19034_v46 = vcombine.high %v9104_v43, %v9108_v57  ;;  %v9116_v24 = vld [vmem:[#allocation14 + $0x1578] sm:$0xff] }
 0x8f0   : > { %16061 = vmatprep.subr.bf16.mxu0 %v18984_v21  ;;  %v19033_v21 = vcombine.low %v9104_v43, %v9108_v57  ;;  %v19042_v49 = vcombine.high %v9112_v23, %v9116_v24  ;;  %v9159_v57 = vld [vmem:[#allocation14 + $0x16d0] sm:$0xff] }
 0x8f2   : > { %16644 = vmatpush1.bf16.msra.mxu1 %v18977_v30  ;;  %v19031_v30 = vcombine.low %v9103_v13, %v9107_v47 }
 0x8f3   : > { %16645 = vmatprep.subr.bf16.mxu1 %v18986_v33  ;;  %16062 = vmatpush1.bf16.msra.mxu0 %v18983_v34  ;;  %v19040_v33 = vcombine.high %v9111_v40, %v9115_v27  ;;  %v9124_v34 = vld [vmem:[#allocation14 + $0x15b8] sm:$0xff] }
 0x8f4   : > { %16063 = vmatprep.subr.bf16.mxu0 %v18992_v36  ;;  %v19039_v36 = vcombine.low %v9111_v40, %v9115_v27  ;;  %v19050_v58 = vcombine.high %v9120_v5, %v9124_v34  ;;  %v19049_v10 = vcombine.low %v9120_v5, %v9124_v34  ;;  %v9179_v5 = vld [vmem:[#allocation14 + $0x1770] sm:$0xff]  ;;  %v9176_v34 = vld [vmem:[#allocation14 + $0x1758] sm:$0xff] }
 0x8f6   : > { %16646 = vmatpush1.bf16.msra.mxu1 %v18985_v3  ;;  %v24148_v3 = vld [vmem:[#allocation41_spill] sm:$0xff] }
 0x8f7   : > { %16647 = vmatprep.subr.bf16.mxu1 %v18994_v31  ;;  %16064 = vmatpush1.bf16.msra.mxu0 %v18991_v25  ;;  %v19041_v31 = vcombine.low %v9112_v23, %v9116_v24  ;;  %v24149_v25 = vld [vmem:[#allocation42_spill] sm:$0xff]  ;;  %v9171_v23 = vld [vmem:[#allocation14 + $0x1730] sm:$0xff]  ;;  %v9168_v24 = vld [vmem:[#allocation14 + $0x1718] sm:$0xff] }
 0x8f8   : > { %16106 = vmatprep.subr.bf16.mxu0 %v19000_v7  ;;  %v9132_v7 = vld [vmem:[#allocation14 + $0x15f8] sm:$0xff] }
 0x8fa   : > { %16648 = vmatpush1.bf16.msra.mxu1 %v18993_v37  ;;  %16066 = vmatmul.mubr.bf16.vlgmr.msra.gmra.mrb[80].mxu0 %v24144_v15  ;;  %v9128_v37 = vld [vmem:[#allocation14 + $0x15d8] sm:$0xff] }
 0x8fb   : > { %16690 = vmatprep.subr.bf16.mxu1 %v19002_v8  ;;  %16107 = vmatpush1.bf16.msra.mxu0 %v18999_v12  ;;  %v19047_v8 = vcombine.low %v9119_v45, %v9123_v44  ;;  %v19058_v60 = vcombine.high %v9128_v37, %v9132_v7  ;;  %v9139_v12 = vld [vmem:[#allocation14 + $0x1630] sm:$0xff]  ;;  %v19057_v9 = vcombine.low %v9128_v37, %v9132_v7  ;;  %v9188_v37 = vld [vmem:[#allocation14 + $0x17b8] sm:$0xff] }
 0x8fc   : > { %16108 = vmatprep.subr.bf16.mxu0 %v19008_v2  ;;  %16075 = vmatprep.mubr.bf16.mxu0 %v24145_v54  ;;  %v9140_v2 = vld [vmem:[#allocation14 + $0x1638] sm:$0xff]  ;;  %v19063_v1 = vcombine.low %v9135_v0, %v9139_v12  ;;  %v9175_v44 = vld [vmem:[#allocation14 + $0x1750] sm:$0xff] }
 0x8fd   : > { %16650 = vmatmul.mubr.bf16.vlgmr.msra.gmra.mrb[80].mxu1 %v24144_v15  ;;  %v19064_v15 = vcombine.high %v9135_v0, %v9139_v12  ;;  %v19103_v7 = vcombine.low %v9175_v44, %v9179_v5  ;;  %v9195_v0 = vld [vmem:[#allocation14 + $0x17f0] sm:$0xff]  ;;  %v9192_v12 = vld [vmem:[#allocation14 + $0x17d8] sm:$0xff] }
 0x8fe   : > { %16691 = vmatpush1.bf16.msra.mxu1 %v19001_v62  ;;  %16659 = vmatprep.mubr.bf16.mxu1 %v24145_v54  ;;  %v9136_v62 = vld [vmem:[#allocation14 + $0x1618] sm:$0xff] }
 0x8ff   : > { %16692 = vmatprep.subr.bf16.mxu1 %v19010_v11  ;;  %16109 = vmatpush1.bf16.msra.mxu0 %v19007_v52  ;;  %v24150_v11 = vld [vmem:[#allocation43_spill] sm:$0xff]  ;;  %v19066_v14 = vcombine.high %v9136_v62, %v9140_v2  ;;  %v9147_v52 = vld [vmem:[#allocation14 + $0x1670] sm:$0xff]  ;;  %v19065_v55 = vcombine.low %v9136_v62, %v9140_v2  ;;  %v9196_v62 = vld [vmem:[#allocation14 + $0x17f8] sm:$0xff]  ;;  %v19111_v2 = vcombine.low %v9183_v19, %v9187_v56 }
 0x900   : > { %16110 = vmatprep.subr.bf16.mxu0 %v19016_v22  ;;  %v9144_v22 = vld [vmem:[#allocation14 + $0x1658] sm:$0xff]  ;;  %v19072_v54 = vcombine.high %v9143_v50, %v9147_v52 }
 0x902   : > { %16693 = vmatpush1.bf16.msra.mxu1 %v19009_v32  ;;  %16076 = vmatmul.mubr.bf16.gmra.mrb[84].mxu0 %v24146_v6  ;;  %v24151_v32 = vld [vmem:[#allocation44_spill] sm:$0xff] }
 0x903   : > { %16694 = vmatprep.subr.bf16.mxu1 %v19018_v16  ;;  %16111 = vmatpush1.bf16.msra.mxu0 %v19015_v35  ;;  %v9148_v16 = vld [vmem:[#allocation14 + $0x1678] sm:$0xff]  ;;  %v9155_v35 = vld [vmem:[#allocation14 + $0x16b0] sm:$0xff] }
 0x904   : > { %16112 = vmatprep.subr.bf16.mxu0 %v19024_v63  ;;  %16085 = vmatprep.mubr.bf16.mxu0 %v24147_v39  ;;  %v19074_v42 = vcombine.high %v9144_v22, %v9148_v16  ;;  %v9156_v63 = vld [vmem:[#allocation14 + $0x16b8] sm:$0xff]  ;;  %v19073_v13 = vcombine.low %v9144_v22, %v9148_v16  ;;  %v19080_v47 = vcombine.high %v9151_v4, %v9155_v35 }
 0x905   : > { %16660 = vmatmul.mubr.bf16.gmra.mrb[84].mxu1 %v24146_v6  ;;  %v9163_v6 = vld [vmem:[#allocation14 + $0x16f0] sm:$0xff]  ;;  %v19121_v22 = vcombine.low %v9192_v12, %v9196_v62 }
 0x906   : > { %16695 = vmatpush1.bf16.msra.mxu1 %v19017_v26  ;;  %16669 = vmatprep.mubr.bf16.mxu1 %v24147_v39  ;;  %v9152_v26 = vld [vmem:[#allocation14 + $0x1698] sm:$0xff]  ;;  %v19088_v40 = vcombine.high %v9159_v57, %v9163_v6  ;;  %v9167_v39 = vld [vmem:[#allocation14 + $0x1710] sm:$0xff] }
 0x907   : > { %16696 = vmatprep.subr.bf16.mxu1 %v19026_v17  ;;  %16113 = vmatpush1.bf16.msra.mxu0 %v19023_v53  ;;  %v19071_v17 = vcombine.low %v9143_v50, %v9147_v52  ;;  %v19082_v43 = vcombine.high %v9152_v26, %v9156_v63  ;;  %v9160_v53 = vld [vmem:[#allocation14 + $0x16d8] sm:$0xff] }
 0x908   : > { %16114 = vmatprep.subr.bf16.mxu0 %v19032_v20  ;;  %v19079_v20 = vcombine.low %v9151_v4, %v9155_v35  ;;  %v9200_v50 = vld [vmem:[#allocation14 + $0x1818] sm:$0xff] }
 0x909   : > { %v9204_v52 = vld [vmem:[#allocation14 + $0x1838] sm:$0xff] }
 0x90a   : > { %16697 = vmatpush1.bf16.msra.mxu1 %v19025_v18  ;;  %16086 = vmatmul.mubr.bf16.gmra.mrb[88].mxu0 %v24148_v3  ;;  %v9164_v18 = vld [vmem:[#allocation14 + $0x16f8] sm:$0xff] }
 0x90b   : > { %16698 = vmatprep.subr.bf16.mxu1 %v19034_v46  ;;  %16115 = vmatpush1.bf16.msra.mxu0 %v19031_v30  ;;  %v19081_v46 = vcombine.low %v9152_v26, %v9156_v63  ;;  %v19090_v27 = vcombine.high %v9160_v53, %v9164_v18  ;;  %v9172_v30 = vld [vmem:[#allocation14 + $0x1738] sm:$0xff]  ;;  %v19129_v26 = vcombine.low %v9200_v50, %v9204_v52 }
 0x90c   : > { %16116 = vmatprep.subr.bf16.mxu0 %v19040_v33  ;;  %16095 = vmatprep.mubr.bf16.mxu0 %v24149_v25  ;;  %v19089_v33 = vcombine.low %v9160_v53, %v9164_v18  ;;  %v19098_v45 = vcombine.high %v9168_v24, %v9172_v30  ;;  %v9212_v4 = vld [vmem:[#allocation14 + $0x1878] sm:$0xff] }
 0x90d   : > { %16670 = vmatmul.mubr.bf16.gmra.mrb[88].mxu1 %v24148_v3  ;;  %v9180_v3 = vld [vmem:[#allocation14 + $0x1778] sm:$0xff] }
 0x90e   : > { %16699 = vmatpush1.bf16.msra.mxu1 %v19033_v21  ;;  %16679 = vmatprep.mubr.bf16.mxu1 %v24149_v25  ;;  %v19087_v21 = vcombine.low %v9159_v57, %v9163_v6  ;;  %v9184_v25 = vld [vmem:[#allocation14 + $0x1798] sm:$0xff] }
 0x90f   : > { %16700 = vmatprep.subr.bf16.mxu1 %v19042_v49  ;;  %16117 = vmatpush1.bf16.msra.mxu0 %v19039_v36  ;;  %v19096_v49 = vcombine.high %v9167_v39, %v9171_v23  ;;  %v19095_v36 = vcombine.low %v9167_v39, %v9171_v23  ;;  %v9216_v57 = vld [vmem:[#allocation14 + $0x1898] sm:$0xff]  ;;  %v24153_v39 = vld [vmem:[#allocation46_spill] sm:$0xff] }
 0x910   : > { %16118 = vmatprep.subr.bf16.mxu0 %v19048_v28  ;;  %v19104_v28 = vcombine.high %v9175_v44, %v9179_v5  ;;  %v9220_v6 = vld [vmem:[#allocation14 + $0x18b8] sm:$0xff]  ;;  %v9235_v44 = vld [vmem:[#allocation14 + $0x1930] sm:$0xff] }
 0x911   : > { %v9224_v23 = vld [vmem:[#allocation14 + $0x18d8] sm:$0xff] }
 0x912   : > { %16701 = vmatpush1.bf16.msra.mxu1 %v19041_v31  ;;  %16096 = vmatmul.mubr.bf16.gmra.mrb[92].mxu0 %v24150_v11  ;;  %v19097_v31 = vcombine.low %v9168_v24, %v9172_v30  ;;  %v9228_v24 = vld [vmem:[#allocation14 + $0x18f8] sm:$0xff] }
 0x913   : > { %16702 = vmatprep.subr.bf16.mxu1 %v19050_v58  ;;  %16119 = vmatpush1.bf16.msra.mxu0 %v19047_v8  ;;  %v19106_v58 = vcombine.high %v9176_v34, %v9180_v3  ;;  %v19105_v8 = vcombine.low %v9176_v34, %v9180_v3  ;;  %v9232_v5 = vld [vmem:[#allocation14 + $0x1918] sm:$0xff]  ;;  %v24154_v3 = vld [vmem:[#allocation47_spill] sm:$0xff] }
 0x914   : > { %16120 = vmatprep.subr.bf16.mxu0 %v19056_v59  ;;  %16138 = vmatprep.mubr.bf16.mxu0 %v24151_v32  ;;  %v19114_v59 = vcombine.high %v9184_v25, %v9188_v37  ;;  %v9236_v34 = vld [vmem:[#allocation14 + $0x1938] sm:$0xff] }
 0x915   : > { %16680 = vmatmul.mubr.bf16.gmra.mrb[92].mxu1 %v24150_v11  ;;  %v19113_v11 = vcombine.low %v9184_v25, %v9188_v37  ;;  %v24155_v25 = vld [vmem:[#allocation48_spill] sm:$0xff]  ;;  %v9240_v37 = vld [vmem:[#allocation14 + $0x1958] sm:$0xff] }
 0x916   : > { %16703 = vmatpush1.bf16.msra.mxu1 %v19049_v10  ;;  %16722 = vmatprep.mubr.bf16.mxu1 %v24151_v32  ;;  %v19112_v10 = vcombine.high %v9183_v19, %v9187_v56  ;;  %v9239_v19 = vld [vmem:[#allocation14 + $0x1950] sm:$0xff] }
 0x917   : > { %16704 = vmatprep.subr.bf16.mxu1 %v19058_v60  ;;  %16121 = vmatpush1.bf16.msra.mxu0 %v19055_v29  ;;  %v9191_v60 = vld [vmem:[#allocation14 + $0x17d0] sm:$0xff] }
 0x918   : > { %16122 = vmatprep.subr.bf16.mxu0 %v19064_v15  ;;  %v19120_v29 = vcombine.high %v9191_v60, %v9195_v0  ;;  %v9199_v15 = vld [vmem:[#allocation14 + $0x1810] sm:$0xff]  ;;  %v19119_v32 = vcombine.low %v9191_v60, %v9195_v0 }
 0x919   : > { %v9243_v56 = vld [vmem:[#allocation14 + $0x1970] sm:$0xff] }
 0x91a   : > { %16705 = vmatpush1.bf16.msra.mxu1 %v19057_v9  ;;  %v19122_v9 = vcombine.high %v9192_v12, %v9196_v62  ;;  %v9247_v0 = vld [vmem:[#allocation14 + $0x1990] sm:$0xff]  ;;  %v9248_v62 = vld [vmem:[#allocation14 + $0x1998] sm:$0xff] }
 0x91b   : > { %16706 = vmatprep.subr.bf16.mxu1 %v19066_v14  ;;  %16123 = vmatpush1.bf16.msra.mxu0 %v19063_v1  ;;  %v9203_v14 = vld [vmem:[#allocation14 + $0x1830] sm:$0xff]  ;;  %v19130_v1 = vcombine.high %v9200_v50, %v9204_v52 }
 0x91c   : > { %16124 = vmatprep.subr.bf16.mxu0 %v19072_v54  ;;  %v19128_v16 = vcombine.high %v9199_v15, %v9203_v14  ;;  %v9211_v54 = vld [vmem:[#allocation14 + $0x1870] sm:$0xff]  ;;  %v19127_v35 = vcombine.low %v9199_v15, %v9203_v14 }
 0x91d   : > { %v9251_v12 = vld [vmem:[#allocation14 + $0x19b0] sm:$0xff] }
 0x91e   : > { %16707 = vmatpush1.bf16.msra.mxu1 %v19065_v55  ;;  %v9207_v55 = vld [vmem:[#allocation14 + $0x1850] sm:$0xff]  ;;  %v19176_v15 = vcombine.high %v9247_v0, %v9251_v12 }
 0x91f   : > { %16708 = vmatprep.subr.bf16.mxu1 %v19074_v42  ;;  %16125 = vmatpush1.bf16.msra.mxu0 %v19071_v17  ;;  %v9208_v42 = vld [vmem:[#allocation14 + $0x1858] sm:$0xff]  ;;  %v19136_v63 = vcombine.high %v9207_v55, %v9211_v54  ;;  %v19135_v53 = vcombine.low %v9207_v55, %v9211_v54  ;;  %v9255_v50 = vld [vmem:[#allocation14 + $0x19d0] sm:$0xff] }
 0x920   : > { %16126 = vmatprep.subr.bf16.mxu0 %v19080_v47  ;;  %v19138_v17 = vcombine.high %v9208_v42, %v9212_v4  ;;  %v9219_v47 = vld [vmem:[#allocation14 + $0x18b0] sm:$0xff]  ;;  %v19137_v18 = vcombine.low %v9208_v42, %v9212_v4 }
 0x921   : > { %v9259_v52 = vld [vmem:[#allocation14 + $0x19f0] sm:$0xff] }
 0x922   : > { %16709 = vmatpush1.bf16.msra.mxu1 %v19073_v13  ;;  %v9215_v13 = vld [vmem:[#allocation14 + $0x1890] sm:$0xff]  ;;  %v19184_v54 = vcombine.high %v9255_v50, %v9259_v52 }
 0x923   : > { %16710 = vmatprep.subr.bf16.mxu1 %v19082_v43  ;;  %16127 = vmatpush1.bf16.msra.mxu0 %v19079_v20  ;;  %v24152_v43 = vld [vmem:[#allocation45_spill] sm:$0xff]  ;;  %v19144_v20 = vcombine.high %v9215_v13, %v9219_v47  ;;  %v19143_v30 = vcombine.low %v9215_v13, %v9219_v47  ;;  %v9263_v4 = vld [vmem:[#allocation14 + $0x1a10] sm:$0xff]  ;;  %v19183_v13 = vcombine.low %v9255_v50, %v9259_v52 }
 0x924   : > { %16128 = vmatprep.subr.bf16.mxu0 %v19088_v40  ;;  %v9223_v40 = vld [vmem:[#allocation14 + $0x18d0] sm:$0xff] }
 0x925   : > { %v9311_v50 = vld [vmem:[#allocation14 + $0x1b90] sm:$0xff] }
 0x926   : > { %16711 = vmatpush1.bf16.msra.mxu1 %v19081_v46  ;;  %v19146_v46 = vcombine.high %v9216_v57, %v9220_v6  ;;  %v9315_v52 = vld [vmem:[#allocation14 + $0x1bb0] sm:$0xff] }
 0x927   : > { %16712 = vmatprep.subr.bf16.mxu1 %v19090_v27  ;;  %16129 = vmatpush1.bf16.msra.mxu0 %v19087_v21  ;;  %v9227_v27 = vld [vmem:[#allocation14 + $0x18f0] sm:$0xff]  ;;  %v19145_v21 = vcombine.low %v9216_v57, %v9220_v6 }
 0x928   : > { %16130 = vmatprep.subr.bf16.mxu0 %v19096_v49  ;;  %v19154_v49 = vcombine.high %v9224_v23, %v9228_v24  ;;  %v9271_v6 = vld [vmem:[#allocation14 + $0x1a50] sm:$0xff] }
 0x92a   : > { %16713 = vmatpush1.bf16.msra.mxu1 %v19089_v33  ;;  %v19152_v33 = vcombine.high %v9223_v40, %v9227_v27 }
 0x92b   : > { %16714 = vmatprep.subr.bf16.mxu1 %v19098_v45  ;;  %16131 = vmatpush1.bf16.msra.mxu0 %v19095_v36  ;;  %v9231_v45 = vld [vmem:[#allocation14 + $0x1910] sm:$0xff]  ;;  %v19151_v36 = vcombine.low %v9223_v40, %v9227_v27 }
 0x92c   : > { %16132 = vmatprep.subr.bf16.mxu0 %v19104_v28  ;;  %v19160_v28 = vcombine.high %v9231_v45, %v9235_v44 }
 0x92e   : > { %16715 = vmatpush1.bf16.msra.mxu1 %v19097_v31  ;;  %v19153_v31 = vcombine.low %v9224_v23, %v9228_v24  ;;  %v9279_v24 = vld [vmem:[#allocation14 + $0x1a90] sm:$0xff] }
 0x92f   : > { %16716 = vmatprep.subr.bf16.mxu1 %v19106_v58  ;;  %16133 = vmatpush1.bf16.msra.mxu0 %v19103_v7  ;;  %v19162_v58 = vcombine.high %v9232_v5, %v9236_v34  ;;  %v9244_v7 = vld [vmem:[#allocation14 + $0x1978] sm:$0xff] }
 0x930   : > { %16134 = vmatprep.subr.bf16.mxu0 %v19112_v10  ;;  %v19161_v10 = vcombine.low %v9232_v5, %v9236_v34  ;;  %v19170_v60 = vcombine.high %v9240_v37, %v9244_v7  ;;  %v9287_v34 = vld [vmem:[#allocation14 + $0x1ad0] sm:$0xff] }
 0x932   : > { %16717 = vmatpush1.bf16.msra.mxu1 %v19105_v8  ;;  %v19159_v8 = vcombine.low %v9231_v45, %v9235_v44 }
 0x933   : > { %16718 = vmatprep.subr.bf16.mxu1 %v19114_v59  ;;  %16135 = vmatpush1.bf16.msra.mxu0 %v19111_v2  ;;  %v19168_v59 = vcombine.high %v9239_v19, %v9243_v56  ;;  %v9252_v2 = vld [vmem:[#allocation14 + $0x19b8] sm:$0xff] }
 0x934   : > { %16136 = vmatprep.subr.bf16.mxu0 %v19120_v29  ;;  %v19167_v29 = vcombine.low %v9239_v19, %v9243_v56  ;;  %v19178_v14 = vcombine.high %v9248_v62, %v9252_v2  ;;  %v19177_v55 = vcombine.low %v9248_v62, %v9252_v2  ;;  %v9307_v62 = vld [vmem:[#allocation14 + $0x1b70] sm:$0xff]  ;;  %v9304_v2 = vld [vmem:[#allocation14 + $0x1b58] sm:$0xff] }
 0x936   : > { %16719 = vmatpush1.bf16.msra.mxu1 %v19113_v11  ;;  %v24156_v11 = vld [vmem:[#allocation49_spill] sm:$0xff] }
 0x937   : > { %16720 = vmatprep.subr.bf16.mxu1 %v19122_v9  ;;  %16137 = vmatpush1.bf16.msra.mxu0 %v19119_v32  ;;  %v19169_v9 = vcombine.low %v9240_v37, %v9244_v7  ;;  %v24157_v32 = vld [vmem:[#allocation50_spill] sm:$0xff]  ;;  %v9299_v37 = vld [vmem:[#allocation14 + $0x1b30] sm:$0xff]  ;;  %v9296_v7 = vld [vmem:[#allocation14 + $0x1b18] sm:$0xff] }
 0x938   : > { %16179 = vmatprep.subr.bf16.mxu0 %v19128_v16  ;;  %v9260_v16 = vld [vmem:[#allocation14 + $0x19f8] sm:$0xff] }
 0x93a   : > { %16721 = vmatpush1.bf16.msra.mxu1 %v19121_v22  ;;  %16139 = vmatmul.mubr.bf16.vlgmr.msra.gmra.mrb[80].mxu0 %v24152_v43  ;;  %v9256_v22 = vld [vmem:[#allocation14 + $0x19d8] sm:$0xff] }
 0x93b   : > { %16763 = vmatprep.subr.bf16.mxu1 %v19130_v1  ;;  %16180 = vmatpush1.bf16.msra.mxu0 %v19127_v35  ;;  %v19175_v1 = vcombine.low %v9247_v0, %v9251_v12  ;;  %v19186_v42 = vcombine.high %v9256_v22, %v9260_v16  ;;  %v9267_v35 = vld [vmem:[#allocation14 + $0x1a30] sm:$0xff]  ;;  %v19185_v47 = vcombine.low %v9256_v22, %v9260_v16  ;;  %v9316_v22 = vld [vmem:[#allocation14 + $0x1bb8] sm:$0xff] }
 0x93c   : > { %16181 = vmatprep.subr.bf16.mxu0 %v19136_v63  ;;  %16148 = vmatprep.mubr.bf16.mxu0 %v24153_v39  ;;  %v9268_v63 = vld [vmem:[#allocation14 + $0x1a38] sm:$0xff]  ;;  %v19191_v40 = vcombine.low %v9263_v4, %v9267_v35  ;;  %v9303_v12 = vld [vmem:[#allocation14 + $0x1b50] sm:$0xff] }
 0x93d   : > { %16723 = vmatmul.mubr.bf16.vlgmr.msra.gmra.mrb[80].mxu1 %v24152_v43  ;;  %v19192_v43 = vcombine.high %v9263_v4, %v9267_v35  ;;  %v19231_v16 = vcombine.low %v9303_v12, %v9307_v62  ;;  %v9323_v4 = vld [vmem:[#allocation14 + $0x1bf0] sm:$0xff]  ;;  %v9320_v35 = vld [vmem:[#allocation14 + $0x1bd8] sm:$0xff] }
 0x93e   : > { %16764 = vmatpush1.bf16.msra.mxu1 %v19129_v26  ;;  %16732 = vmatprep.mubr.bf16.mxu1 %v24153_v39  ;;  %v9264_v26 = vld [vmem:[#allocation14 + $0x1a18] sm:$0xff] }
 0x93f   : > { %16765 = vmatprep.subr.bf16.mxu1 %v19138_v17  ;;  %16182 = vmatpush1.bf16.msra.mxu0 %v19135_v53  ;;  %v24158_v17 = vld [vmem:[#allocation51_spill] sm:$0xff]  ;;  %v19194_v57 = vcombine.high %v9264_v26, %v9268_v63  ;;  %v9275_v53 = vld [vmem:[#allocation14 + $0x1a70] sm:$0xff]  ;;  %v19193_v27 = vcombine.low %v9264_v26, %v9268_v63  ;;  %v9324_v26 = vld [vmem:[#allocation14 + $0x1bf8] sm:$0xff]  ;;  %v19239_v63 = vcombine.low %v9311_v50, %v9315_v52 }
 0x940   : > { %16183 = vmatprep.subr.bf16.mxu0 %v19144_v20  ;;  %v9272_v20 = vld [vmem:[#allocation14 + $0x1a58] sm:$0xff]  ;;  %v19200_v39 = vcombine.high %v9271_v6, %v9275_v53 }
 0x942   : > { %16766 = vmatpush1.bf16.msra.mxu1 %v19137_v18  ;;  %16149 = vmatmul.mubr.bf16.gmra.mrb[84].mxu0 %v24154_v3  ;;  %v24159_v18 = vld [vmem:[#allocation52_spill] sm:$0xff] }
 0x943   : > { %16767 = vmatprep.subr.bf16.mxu1 %v19146_v46  ;;  %16184 = vmatpush1.bf16.msra.mxu0 %v19143_v30  ;;  %v9276_v46 = vld [vmem:[#allocation14 + $0x1a78] sm:$0xff]  ;;  %v9283_v30 = vld [vmem:[#allocation14 + $0x1ab0] sm:$0xff] }
 0x944   : > { %16185 = vmatprep.subr.bf16.mxu0 %v19152_v33  ;;  %16158 = vmatprep.mubr.bf16.mxu0 %v24155_v25  ;;  %v19202_v23 = vcombine.high %v9272_v20, %v9276_v46  ;;  %v9284_v33 = vld [vmem:[#allocation14 + $0x1ab8] sm:$0xff]  ;;  %v19201_v45 = vcombine.low %v9272_v20, %v9276_v46  ;;  %v19208_v44 = vcombine.high %v9279_v24, %v9283_v30 }
 0x945   : > { %16733 = vmatmul.mubr.bf16.gmra.mrb[84].mxu1 %v24154_v3  ;;  %v9291_v3 = vld [vmem:[#allocation14 + $0x1af0] sm:$0xff]  ;;  %v19249_v20 = vcombine.low %v9320_v35, %v9324_v26 }
 0x946   : > { %16768 = vmatpush1.bf16.msra.mxu1 %v19145_v21  ;;  %16742 = vmatprep.mubr.bf16.mxu1 %v24155_v25  ;;  %v9280_v21 = vld [vmem:[#allocation14 + $0x1a98] sm:$0xff]  ;;  %v19216_v19 = vcombine.high %v9287_v34, %v9291_v3  ;;  %v9295_v25 = vld [vmem:[#allocation14 + $0x1b10] sm:$0xff] }
 0x947   : > { %16769 = vmatprep.subr.bf16.mxu1 %v19154_v49  ;;  %16186 = vmatpush1.bf16.msra.mxu0 %v19151_v36  ;;  %v19199_v49 = vcombine.low %v9271_v6, %v9275_v53  ;;  %v19210_v5 = vcombine.high %v9280_v21, %v9284_v33  ;;  %v9288_v36 = vld [vmem:[#allocation14 + $0x1ad8] sm:$0xff] }
 0x948   : > { %16187 = vmatprep.subr.bf16.mxu0 %v19160_v28  ;;  %v19207_v28 = vcombine.low %v9279_v24, %v9283_v30  ;;  %v9328_v6 = vld [vmem:[#allocation14 + $0x1c18] sm:$0xff] }
 0x949   : > { %v9332_v53 = vld [vmem:[#allocation14 + $0x1c38] sm:$0xff] }
 0x94a   : > { %16770 = vmatpush1.bf16.msra.mxu1 %v19153_v31  ;;  %16159 = vmatmul.mubr.bf16.gmra.mrb[88].mxu0 %v24156_v11  ;;  %v9292_v31 = vld [vmem:[#allocation14 + $0x1af8] sm:$0xff] }
 0x94b   : > { %16771 = vmatprep.subr.bf16.mxu1 %v19162_v58  ;;  %16188 = vmatpush1.bf16.msra.mxu0 %v19159_v8  ;;  %v19209_v58 = vcombine.low %v9280_v21, %v9284_v33  ;;  %v19218_v56 = vcombine.high %v9288_v36, %v9292_v31  ;;  %v9300_v8 = vld [vmem:[#allocation14 + $0x1b38] sm:$0xff]  ;;  %v19257_v21 = vcombine.low %v9328_v6, %v9332_v53 }
 0x94c   : > { %16189 = vmatprep.subr.bf16.mxu0 %v19168_v59  ;;  %16168 = vmatprep.mubr.bf16.mxu0 %v24157_v32  ;;  %v19217_v59 = vcombine.low %v9288_v36, %v9292_v31  ;;  %v19226_v0 = vcombine.high %v9296_v7, %v9300_v8  ;;  %v9340_v24 = vld [vmem:[#allocation14 + $0x1c78] sm:$0xff] }
 0x94d   : > { %16743 = vmatmul.mubr.bf16.gmra.mrb[88].mxu1 %v24156_v11  ;;  %v9308_v11 = vld [vmem:[#allocation14 + $0x1b78] sm:$0xff] }
 0x94e   : > { %16772 = vmatpush1.bf16.msra.mxu1 %v19161_v10  ;;  %16752 = vmatprep.mubr.bf16.mxu1 %v24157_v32  ;;  %v19215_v10 = vcombine.low %v9287_v34, %v9291_v3  ;;  %v9312_v32 = vld [vmem:[#allocation14 + $0x1b98] sm:$0xff] }
 0x94f   : > { %16773 = vmatprep.subr.bf16.mxu1 %v19170_v60  ;;  %16190 = vmatpush1.bf16.msra.mxu0 %v19167_v29  ;;  %v19224_v60 = vcombine.high %v9295_v25, %v9299_v37  ;;  %v19223_v29 = vcombine.low %v9295_v25, %v9299_v37  ;;  %v9344_v34 = vld [vmem:[#allocation14 + $0x1c98] sm:$0xff]  ;;  %v24161_v25 = vld [vmem:[#allocation54_spill] sm:$0xff] }
 0x950   : > { %16191 = vmatprep.subr.bf16.mxu0 %v19176_v15  ;;  %v19232_v15 = vcombine.high %v9303_v12, %v9307_v62  ;;  %v9348_v3 = vld [vmem:[#allocation14 + $0x1cb8] sm:$0xff]  ;;  %v9363_v12 = vld [vmem:[#allocation14 + $0x1d30] sm:$0xff] }
 0x951   : > { %v9352_v37 = vld [vmem:[#allocation14 + $0x1cd8] sm:$0xff] }
 0x952   : > { %16774 = vmatpush1.bf16.msra.mxu1 %v19169_v9  ;;  %16169 = vmatmul.mubr.bf16.gmra.mrb[92].mxu0 %v24158_v17  ;;  %v19225_v9 = vcombine.low %v9296_v7, %v9300_v8  ;;  %v9356_v7 = vld [vmem:[#allocation14 + $0x1cf8] sm:$0xff] }
 0x953   : > { %16775 = vmatprep.subr.bf16.mxu1 %v19178_v14  ;;  %16192 = vmatpush1.bf16.msra.mxu0 %v19175_v1  ;;  %v19234_v14 = vcombine.high %v9304_v2, %v9308_v11  ;;  %v19233_v1 = vcombine.low %v9304_v2, %v9308_v11  ;;  %v9360_v62 = vld [vmem:[#allocation14 + $0x1d18] sm:$0xff]  ;;  %v24162_v11 = vld [vmem:[#allocation55_spill] sm:$0xff] }
 0x954   : > { %16193 = vmatprep.subr.bf16.mxu0 %v19184_v54  ;;  %16211 = vmatprep.mubr.bf16.mxu0 %v24159_v18  ;;  %v19242_v54 = vcombine.high %v9312_v32, %v9316_v22  ;;  %v9364_v2 = vld [vmem:[#allocation14 + $0x1d38] sm:$0xff] }
 0x955   : > { %16753 = vmatmul.mubr.bf16.gmra.mrb[92].mxu1 %v24158_v17  ;;  %v19241_v17 = vcombine.low %v9312_v32, %v9316_v22  ;;  %v24163_v32 = vld [vmem:[#allocation56_spill] sm:$0xff]  ;;  %v9368_v22 = vld [vmem:[#allocation14 + $0x1d58] sm:$0xff] }
 0x956   : > { %16776 = vmatpush1.bf16.msra.mxu1 %v19177_v55  ;;  %16795 = vmatprep.mubr.bf16.mxu1 %v24159_v18  ;;  %v19240_v55 = vcombine.high %v9311_v50, %v9315_v52  ;;  %v9367_v50 = vld [vmem:[#allocation14 + $0x1d50] sm:$0xff] }
 0x957   : > { %16777 = vmatprep.subr.bf16.mxu1 %v19186_v42  ;;  %16194 = vmatpush1.bf16.msra.mxu0 %v19183_v13  ;;  %v9319_v42 = vld [vmem:[#allocation14 + $0x1bd0] sm:$0xff] }
 0x958   : > { %16195 = vmatprep.subr.bf16.mxu0 %v19192_v43  ;;  %v19248_v13 = vcombine.high %v9319_v42, %v9323_v4  ;;  %v9327_v43 = vld [vmem:[#allocation14 + $0x1c10] sm:$0xff]  ;;  %v19247_v18 = vcombine.low %v9319_v42, %v9323_v4 }
 0x959   : > { %v9371_v52 = vld [vmem:[#allocation14 + $0x1d70] sm:$0xff] }
 0x95a   : > { %16778 = vmatpush1.bf16.msra.mxu1 %v19185_v47  ;;  %v19250_v47 = vcombine.high %v9320_v35, %v9324_v26  ;;  %v9375_v4 = vld [vmem:[#allocation14 + $0x1d90] sm:$0xff]  ;;  %v9376_v26 = vld [vmem:[#allocation14 + $0x1d98] sm:$0xff] }
 0x95b   : > { %16779 = vmatprep.subr.bf16.mxu1 %v19194_v57  ;;  %16196 = vmatpush1.bf16.msra.mxu0 %v19191_v40  ;;  %v9331_v57 = vld [vmem:[#allocation14 + $0x1c30] sm:$0xff]  ;;  %v19258_v40 = vcombine.high %v9328_v6, %v9332_v53 }
 0x95c   : > { %16197 = vmatprep.subr.bf16.mxu0 %v19200_v39  ;;  %v19256_v46 = vcombine.high %v9327_v43, %v9331_v57  ;;  %v9339_v39 = vld [vmem:[#allocation14 + $0x1c70] sm:$0xff]  ;;  %v19255_v30 = vcombine.low %v9327_v43, %v9331_v57 }
 0x95d   : > { %v9379_v35 = vld [vmem:[#allocation14 + $0x1db0] sm:$0xff] }
 0x95e   : > { %16780 = vmatpush1.bf16.msra.mxu1 %v19193_v27  ;;  %v9335_v27 = vld [vmem:[#allocation14 + $0x1c50] sm:$0xff]  ;;  %v19304_v43 = vcombine.high %v9375_v4, %v9379_v35 }
 0x95f   : > { %16781 = vmatprep.subr.bf16.mxu1 %v19202_v23  ;;  %16198 = vmatpush1.bf16.msra.mxu0 %v19199_v49  ;;  %v9336_v23 = vld [vmem:[#allocation14 + $0x1c58] sm:$0xff]  ;;  %v19264_v33 = vcombine.high %v9335_v27, %v9339_v39  ;;  %v19263_v36 = vcombine.low %v9335_v27, %v9339_v39  ;;  %v9383_v6 = vld [vmem:[#allocation14 + $0x1dd0] sm:$0xff] }
 0x960   : > { %16199 = vmatprep.subr.bf16.mxu0 %v19208_v44  ;;  %v19266_v49 = vcombine.high %v9336_v23, %v9340_v24  ;;  %v9347_v44 = vld [vmem:[#allocation14 + $0x1cb0] sm:$0xff]  ;;  %v19265_v31 = vcombine.low %v9336_v23, %v9340_v24 }
 0x961   : > { %v9387_v53 = vld [vmem:[#allocation14 + $0x1df0] sm:$0xff] }
 0x962   : > { %16782 = vmatpush1.bf16.msra.mxu1 %v19201_v45  ;;  %v9343_v45 = vld [vmem:[#allocation14 + $0x1c90] sm:$0xff]  ;;  %v19312_v39 = vcombine.high %v9383_v6, %v9387_v53 }
 0x963   : > { %16783 = vmatprep.subr.bf16.mxu1 %v19210_v5  ;;  %16200 = vmatpush1.bf16.msra.mxu0 %v19207_v28  ;;  %v24160_v5 = vld [vmem:[#allocation53_spill] sm:$0xff]  ;;  %v19272_v28 = vcombine.high %v9343_v45, %v9347_v44  ;;  %v19271_v8 = vcombine.low %v9343_v45, %v9347_v44  ;;  %v9391_v24 = vld [vmem:[#allocation14 + $0x1e10] sm:$0xff]  ;;  %v19311_v45 = vcombine.low %v9383_v6, %v9387_v53 }
 0x964   : > { %16201 = vmatprep.subr.bf16.mxu0 %v19216_v19  ;;  %v9351_v19 = vld [vmem:[#allocation14 + $0x1cd0] sm:$0xff] }
 0x965   : > { %v9439_v6 = vld [vmem:[#allocation14 + $0x1f90] sm:$0xff] }
 0x966   : > { %16784 = vmatpush1.bf16.msra.mxu1 %v19209_v58  ;;  %v19274_v58 = vcombine.high %v9344_v34, %v9348_v3  ;;  %v9443_v53 = vld [vmem:[#allocation14 + $0x1fb0] sm:$0xff] }
 0x967   : > { %16785 = vmatprep.subr.bf16.mxu1 %v19218_v56  ;;  %16202 = vmatpush1.bf16.msra.mxu0 %v19215_v10  ;;  %v9355_v56 = vld [vmem:[#allocation14 + $0x1cf0] sm:$0xff]  ;;  %v19273_v10 = vcombine.low %v9344_v34, %v9348_v3 }
 0x968   : > { %16203 = vmatprep.subr.bf16.mxu0 %v19224_v60  ;;  %v19282_v60 = vcombine.high %v9352_v37, %v9356_v7  ;;  %v9399_v3 = vld [vmem:[#allocation14 + $0x1e50] sm:$0xff] }
 0x96a   : > { %16786 = vmatpush1.bf16.msra.mxu1 %v19217_v59  ;;  %v19280_v59 = vcombine.high %v9351_v19, %v9355_v56 }
 0x96b   : > { %16787 = vmatprep.subr.bf16.mxu1 %v19226_v0  ;;  %16204 = vmatpush1.bf16.msra.mxu0 %v19223_v29  ;;  %v9359_v0 = vld [vmem:[#allocation14 + $0x1d10] sm:$0xff]  ;;  %v19279_v29 = vcombine.low %v9351_v19, %v9355_v56 }
 0x96c   : > { %16205 = vmatprep.subr.bf16.mxu0 %v19232_v15  ;;  %v19288_v15 = vcombine.high %v9359_v0, %v9363_v12 }
 0x96e   : > { %16788 = vmatpush1.bf16.msra.mxu1 %v19225_v9  ;;  %v19281_v9 = vcombine.low %v9352_v37, %v9356_v7  ;;  %v9407_v7 = vld [vmem:[#allocation14 + $0x1e90] sm:$0xff] }
 0x96f   : > { %16789 = vmatprep.subr.bf16.mxu1 %v19234_v14  ;;  %16206 = vmatpush1.bf16.msra.mxu0 %v19231_v16  ;;  %v19290_v14 = vcombine.high %v9360_v62, %v9364_v2  ;;  %v9372_v16 = vld [vmem:[#allocation14 + $0x1d78] sm:$0xff] }
 0x970   : > { %16207 = vmatprep.subr.bf16.mxu0 %v19240_v55  ;;  %v19289_v55 = vcombine.low %v9360_v62, %v9364_v2  ;;  %v19298_v42 = vcombine.high %v9368_v22, %v9372_v16  ;;  %v9415_v2 = vld [vmem:[#allocation14 + $0x1ed0] sm:$0xff] }
 0x972   : > { %16790 = vmatpush1.bf16.msra.mxu1 %v19233_v1  ;;  %v19287_v1 = vcombine.low %v9359_v0, %v9363_v12 }
 0x973   : > { %16791 = vmatprep.subr.bf16.mxu1 %v19242_v54  ;;  %16208 = vmatpush1.bf16.msra.mxu0 %v19239_v63  ;;  %v19296_v54 = vcombine.high %v9367_v50, %v9371_v52  ;;  %v9380_v63 = vld [vmem:[#allocation14 + $0x1db8] sm:$0xff] }
 0x974   : > { %16209 = vmatprep.subr.bf16.mxu0 %v19248_v13  ;;  %v19295_v13 = vcombine.low %v9367_v50, %v9371_v52  ;;  %v19306_v57 = vcombine.high %v9376_v26, %v9380_v63  ;;  %v19305_v27 = vcombine.low %v9376_v26, %v9380_v63  ;;  %v9435_v26 = vld [vmem:[#allocation14 + $0x1f70] sm:$0xff]  ;;  %v9432_v63 = vld [vmem:[#allocation14 + $0x1f58] sm:$0xff] }
 0x976   : > { %16792 = vmatpush1.bf16.msra.mxu1 %v19241_v17  ;;  %v24164_v17 = vld [vmem:[#allocation57_spill] sm:$0xff] }
 0x977   : > { %16793 = vmatprep.subr.bf16.mxu1 %v19250_v47  ;;  %16210 = vmatpush1.bf16.msra.mxu0 %v19247_v18  ;;  %v19297_v47 = vcombine.low %v9368_v22, %v9372_v16  ;;  %v24165_v18 = vld [vmem:[#allocation58_spill] sm:$0xff]  ;;  %v9427_v22 = vld [vmem:[#allocation14 + $0x1f30] sm:$0xff]  ;;  %v9424_v16 = vld [vmem:[#allocation14 + $0x1f18] sm:$0xff] }
 0x978   : > { %16252 = vmatprep.subr.bf16.mxu0 %v19256_v46  ;;  %v9388_v46 = vld [vmem:[#allocation14 + $0x1df8] sm:$0xff] }
 0x97a   : > { %16794 = vmatpush1.bf16.msra.mxu1 %v19249_v20  ;;  %16212 = vmatmul.mubr.bf16.vlgmr.msra.gmra.mrb[80].mxu0 %v24160_v5  ;;  %v9384_v20 = vld [vmem:[#allocation14 + $0x1dd8] sm:$0xff] }
 0x97b   : > { %16836 = vmatprep.subr.bf16.mxu1 %v19258_v40  ;;  %16253 = vmatpush1.bf16.msra.mxu0 %v19255_v30  ;;  %v19303_v40 = vcombine.low %v9375_v4, %v9379_v35  ;;  %v19314_v23 = vcombine.high %v9384_v20, %v9388_v46  ;;  %v9395_v30 = vld [vmem:[#allocation14 + $0x1e30] sm:$0xff]  ;;  %v19313_v44 = vcombine.low %v9384_v20, %v9388_v46  ;;  %v9444_v20 = vld [vmem:[#allocation14 + $0x1fb8] sm:$0xff] }
 0x97c   : > { %16254 = vmatprep.subr.bf16.mxu0 %v19264_v33  ;;  %16221 = vmatprep.mubr.bf16.mxu0 %v24161_v25  ;;  %v9396_v33 = vld [vmem:[#allocation14 + $0x1e38] sm:$0xff]  ;;  %v19319_v19 = vcombine.low %v9391_v24, %v9395_v30  ;;  %v9431_v35 = vld [vmem:[#allocation14 + $0x1f50] sm:$0xff] }
 0x97d   : > { %16796 = vmatmul.mubr.bf16.vlgmr.msra.gmra.mrb[80].mxu1 %v24160_v5  ;;  %v19320_v5 = vcombine.high %v9391_v24, %v9395_v30  ;;  %v19359_v46 = vcombine.low %v9431_v35, %v9435_v26  ;;  %v9451_v24 = vld [vmem:[#allocation14 + $0x1ff0] sm:$0xff]  ;;  %v9448_v30 = vld [vmem:[#allocation14 + $0x1fd8] sm:$0xff] }
 0x97e   : > { %16837 = vmatpush1.bf16.msra.mxu1 %v19257_v21  ;;  %16805 = vmatprep.mubr.bf16.mxu1 %v24161_v25  ;;  %v9392_v21 = vld [vmem:[#allocation14 + $0x1e18] sm:$0xff] }
 0x97f   : > { %16838 = vmatprep.subr.bf16.mxu1 %v19266_v49  ;;  %16255 = vmatpush1.bf16.msra.mxu0 %v19263_v36  ;;  %v24166_v49 = vld [vmem:[#allocation59_spill] sm:$0xff]  ;;  %v19322_v34 = vcombine.high %v9392_v21, %v9396_v33  ;;  %v9403_v36 = vld [vmem:[#allocation14 + $0x1e70] sm:$0xff]  ;;  %v19321_v56 = vcombine.low %v9392_v21, %v9396_v33  ;;  %v9452_v21 = vld [vmem:[#allocation14 + $0x1ff8] sm:$0xff]  ;;  %v19367_v33 = vcombine.low %v9439_v6, %v9443_v53 }
 0x980   : > { %16256 = vmatprep.subr.bf16.mxu0 %v19272_v28  ;;  %v9400_v28 = vld [vmem:[#allocation14 + $0x1e58] sm:$0xff]  ;;  %v19328_v25 = vcombine.high %v9399_v3, %v9403_v36 }
 0x982   : > { %16839 = vmatpush1.bf16.msra.mxu1 %v19265_v31  ;;  %16222 = vmatmul.mubr.bf16.gmra.mrb[84].mxu0 %v24162_v11  ;;  %v24167_v31 = vld [vmem:[#allocation60_spill] sm:$0xff] }
 0x983   : > { %16840 = vmatprep.subr.bf16.mxu1 %v19274_v58  ;;  %16257 = vmatpush1.bf16.msra.mxu0 %v19271_v8  ;;  %v9404_v58 = vld [vmem:[#allocation14 + $0x1e78] sm:$0xff]  ;;  %v9411_v8 = vld [vmem:[#allocation14 + $0x1eb0] sm:$0xff] }
 0x984   : > { %16258 = vmatprep.subr.bf16.mxu0 %v19280_v59  ;;  %16231 = vmatprep.mubr.bf16.mxu0 %v24163_v32  ;;  %v19330_v37 = vcombine.high %v9400_v28, %v9404_v58  ;;  %v9412_v59 = vld [vmem:[#allocation14 + $0x1eb8] sm:$0xff]  ;;  %v19329_v0 = vcombine.low %v9400_v28, %v9404_v58  ;;  %v19336_v12 = vcombine.high %v9407_v7, %v9411_v8  ;;  %v24171_v28 = vld [vmem:[#allocation64_spill] sm:$0xff] }
 0x985   : > { %16806 = vmatmul.mubr.bf16.gmra.mrb[84].mxu1 %v24162_v11  ;;  %v9419_v11 = vld [vmem:[#allocation14 + $0x1ef0] sm:$0xff]  ;;  %v24172_v58 = vld [vmem:[#allocation65_spill] sm:$0xff] }
 0x986   : > { %16841 = vmatpush1.bf16.msra.mxu1 %v19273_v10  ;;  %16815 = vmatprep.mubr.bf16.mxu1 %v24163_v32  ;;  %v9408_v10 = vld [vmem:[#allocation14 + $0x1e98] sm:$0xff]  ;;  %v19344_v50 = vcombine.high %v9415_v2, %v9419_v11  ;;  %v9423_v32 = vld [vmem:[#allocation14 + $0x1f10] sm:$0xff] }
 0x987   : > { %16842 = vmatprep.subr.bf16.mxu1 %v19282_v60  ;;  %16259 = vmatpush1.bf16.msra.mxu0 %v19279_v29  ;;  %v19327_v60 = vcombine.low %v9399_v3, %v9403_v36  ;;  %v19338_v62 = vcombine.high %v9408_v10, %v9412_v59  ;;  %v9416_v29 = vld [vmem:[#allocation14 + $0x1ed8] sm:$0xff]  ;;  %v24169_v36 = vld [vmem:[#allocation62_spill] sm:$0xff] }
 0x988   : > { %16260 = vmatprep.subr.bf16.mxu0 %v19288_v15  ;;  %v19335_v15 = vcombine.low %v9407_v7, %v9411_v8  ;;  %v24168_v3 = vld [vmem:[#allocation61_spill] sm:$0xff]  ;;  %v6483_v7 = vsub.s32 5, %v24135_v38  ;;  %v6491_v8 = vsub.s32 7, %v24135_v38 }
 0x98a   : > { %16843 = vmatpush1.bf16.msra.mxu1 %v19281_v9  ;;  %16232 = vmatmul.mubr.bf16.gmra.mrb[88].mxu0 %v24164_v17  ;;  %v9420_v9 = vld [vmem:[#allocation14 + $0x1ef8] sm:$0xff] }
 0x98b   : > { %16844 = vmatprep.subr.bf16.mxu1 %v19290_v14  ;;  %16261 = vmatpush1.bf16.msra.mxu0 %v19287_v1  ;;  %v19337_v14 = vcombine.low %v9408_v10, %v9412_v59  ;;  %v19346_v52 = vcombine.high %v9416_v29, %v9420_v9  ;;  %v9428_v1 = vld [vmem:[#allocation14 + $0x1f38] sm:$0xff] }
 0x98c   : > { %16262 = vmatprep.subr.bf16.mxu0 %v19296_v54  ;;  %16241 = vmatprep.mubr.bf16.mxu0 %v24165_v18  ;;  %v19345_v54 = vcombine.low %v9416_v29, %v9420_v9  ;;  %v19354_v4 = vcombine.high %v9424_v16, %v9428_v1  ;;  %v21383_v10 = vld [vmem:[#allocation13] sm:$0xff]  ;;  %v24177_v9 = vld [vmem:[#allocation88_spill] sm:$0xff] }
 0x98d   : > { %16816 = vmatmul.mubr.bf16.gmra.mrb[88].mxu1 %v24164_v17  ;;  %v9436_v17 = vld [vmem:[#allocation14 + $0x1f78] sm:$0xff] }
 0x98e   : > { %16845 = vmatpush1.bf16.msra.mxu1 %v19289_v55  ;;  %16825 = vmatprep.mubr.bf16.mxu1 %v24165_v18  ;;  %v19343_v55 = vcombine.low %v9415_v2, %v9419_v11  ;;  %v9440_v18 = vld [vmem:[#allocation14 + $0x1f98] sm:$0xff]  ;;  %v24176_v11 = vld [vmem:[#allocation87_spill] sm:$0xff] }
 0x98f   : > { %16846 = vmatprep.subr.bf16.mxu1 %v19298_v42  ;;  %16263 = vmatpush1.bf16.msra.mxu0 %v19295_v13  ;;  %v19352_v42 = vcombine.high %v9423_v32, %v9427_v22  ;;  %v19351_v13 = vcombine.low %v9423_v32, %v9427_v22  ;;  %v24180_v32 = vld [vmem:[#allocation90_spill] sm:$0xff] }
 0x990   : > { %16264 = vmatprep.subr.bf16.mxu0 %v19304_v43  ;;  %v19360_v43 = vcombine.high %v9431_v35, %v9435_v26  ;;  %v24184_v35 = vld [vmem:[#allocation94_spill] sm:$0xff] }
 0x992   : > { %16847 = vmatpush1.bf16.msra.mxu1 %v19297_v47  ;;  %16242 = vmatmul.mubr.bf16.gmra.mrb[92].mxu0 %v24166_v49  ;;  %v19353_v47 = vcombine.low %v9424_v16, %v9428_v1  ;;  %v24181_v16 = vld [vmem:[#allocation91_spill] sm:$0xff] }
 0x993   : > { %16848 = vmatprep.subr.bf16.mxu1 %v19306_v57  ;;  %16265 = vmatpush1.bf16.msra.mxu0 %v19303_v40  ;;  %v19362_v57 = vcombine.high %v9432_v63, %v9436_v17  ;;  %v19361_v40 = vcombine.low %v9432_v63, %v9436_v17  ;;  %v24185_v63 = vld [vmem:[#allocation95_spill] sm:$0xff] }
 0x994   : > { %16266 = vmatprep.subr.bf16.mxu0 %v19312_v39  ;;  %16284 = vmatprep.mubr.bf16.mxu0 %v24167_v31  ;;  %v19370_v39 = vcombine.high %v9440_v18, %v9444_v20 }
 0x995   : > { %16826 = vmatmul.mubr.bf16.gmra.mrb[92].mxu1 %v24166_v49  ;;  %v19369_v49 = vcombine.low %v9440_v18, %v9444_v20 }
 0x996   : > { %16849 = vmatpush1.bf16.msra.mxu1 %v19305_v27  ;;  %16868 = vmatprep.mubr.bf16.mxu1 %v24167_v31  ;;  %v19368_v27 = vcombine.high %v9439_v6, %v9443_v53  ;;  %v24170_v31 = vld [vmem:[#allocation63_spill] sm:$0xff]  ;;  %v24188_v6 = vld [vmem:[#allocation98_spill] sm:$0xff] }
 0x997   : > { %16850 = vmatprep.subr.bf16.mxu1 %v19314_v23  ;;  %16267 = vmatpush1.bf16.msra.mxu0 %v19311_v45  ;;  %v9447_v23 = vld [vmem:[#allocation14 + $0x1fd0] sm:$0xff] }
 0x998   : > { %16268 = vmatprep.subr.bf16.mxu0 %v19320_v5  ;;  %v19376_v45 = vcombine.high %v9447_v23, %v9451_v24  ;;  %v19375_v5 = vcombine.low %v9447_v23, %v9451_v24 }
 0x99a   : > { %16851 = vmatpush1.bf16.msra.mxu1 %v19313_v44  ;;  %v19378_v44 = vcombine.high %v9448_v30, %v9452_v21 }
 0x99b   : > { %16852 = vmatprep.subr.bf16.mxu1 %v19322_v34  ;;  %16269 = vmatpush1.bf16.msra.mxu0 %v19319_v19  ;;  %v19377_v34 = vcombine.low %v9448_v30, %v9452_v21  ;;  %v24173_v19 = vld [vmem:[#allocation66_spill] sm:$0xff] }
 0x99c   : > { %16270 = vmatprep.subr.bf16.mxu0 %v19328_v25  ;;  %v6479_v25 = vsub.s32 4, %v24135_v38 }
 0x99e   : > { %16853 = vmatpush1.bf16.msra.mxu1 %v19321_v56  ;;  %v24174_v56 = vld [vmem:[#allocation67_spill] sm:$0xff]  ;;  %v23542_v59 = vrot.slane %v21383_v10, %v6479_v25 }
 0x99f   : > { %16854 = vmatprep.subr.bf16.mxu1 %v19330_v37  ;;  %16271 = vmatpush1.bf16.msra.mxu0 %v19327_v60  ;;  %v6487_v37 = vsub.s32 6, %v24135_v38  ;;  %v24178_v38 = vld [vmem:[#allocation26_spill] sm:$0xff] }
 0x9a0   : > { %16272 = vmatprep.subr.bf16.mxu0 %v19336_v12  ;;  %v23548_v12 = vrot.slane %v21383_v10, %v6491_v8  ;;  %v24192_v8 = vld [vmem:[#allocation102_spill] sm:$0xff] }
 0x9a1   : > { %v23544_v60 = vrot.slane %v21383_v10, %v6487_v37 }
 0x9a2   : > { %16855 = vmatpush1.bf16.msra.mxu1 %v19329_v0  ;;  %v23546_v0 = vrot.slane %v21383_v10, %v6483_v7 }
 0x9a3   : > { %16856 = vmatprep.subr.bf16.mxu1 %v19338_v62  ;;  %16273 = vmatpush1.bf16.msra.mxu0 %v19335_v15  ;;  %v24175_v62 = vld [vmem:[#allocation86_spill] sm:$0xff]  ;;  %v19498_v29 = vadd.f32 %v24176_v11, %v23544_v60  ;;  %v19500_v22 = vadd.f32 %v24180_v32, %v23544_v60  ;;  %v23572_v26 = vadd.f32 %v24184_v35, %v23544_v60  ;;  %v24195_v35 = vld [vmem:[#allocation105_spill] sm:$0xff] }
 0x9a4   : > { %16274 = vmatprep.subr.bf16.mxu0 %v19344_v50  ;;  %v19482_v2 = vadd.f32 %v24175_v62, %v23542_v59  ;;  %v19483_v15 = vadd.f32 %v24177_v9, %v23546_v0  ;;  %v24179_v50 = vld [vmem:[#allocation89_spill] sm:$0xff]  ;;  %v19485_v1 = vadd.f32 %v24181_v16, %v23546_v0  ;;  %v23576_v17 = vadd.f32 %v24185_v63, %v23546_v0  ;;  %v24193_v62 = vld [vmem:[#allocation103_spill] sm:$0xff] }
 0x9a5   : > { %v23588_v53 = vadd.f32 %v24188_v6, %v23544_v60  ;;  %v8371_v20 = vmax.f32 %v19498_v29, 0.0  ;;  %v8379_v21 = vmax.f32 %v19500_v22, 0.0  ;;  %v23612_v10 = vadd.f32 %v24192_v8, %v23544_v60 }
 0x9a6   : > { %16857 = vmatpush1.bf16.msra.mxu1 %v19337_v14  ;;  %v19499_v14 = vadd.f32 %v24178_v38, %v23548_v12  ;;  %v8369_v18 = vmax.f32 %v19482_v2, 0.0  ;;  %v8370_v23 = vmax.f32 %v19483_v15, 0.0  ;;  %v23616_v2 = vadd.f32 %v24193_v62, %v23546_v0  ;;  %v24194_v38 = vld [vmem:[#allocation104_spill] sm:$0xff] }
 0x9a7   : > { %16858 = vmatprep.subr.bf16.mxu1 %v19346_v52  ;;  %16275 = vmatpush1.bf16.msra.mxu0 %v19343_v55  ;;  %v19484_v52 = vadd.f32 %v24179_v50, %v23542_v59  ;;  %v24182_v55 = vld [vmem:[#allocation92_spill] sm:$0xff]  ;;  %v23624_v63 = vadd.f32 %v24195_v35, %v23542_v59 }
 0x9a8   : > { %16276 = vmatprep.subr.bf16.mxu0 %v19352_v42  ;;  %v24183_v42 = vld [vmem:[#allocation93_spill] sm:$0xff]  ;;  %v8372_v24 = vmax.f32 %v19499_v14, 0.0  ;;  %v23620_v14 = vadd.f32 %v24194_v38, %v23548_v12 }
 0x9a9   : > { %v8377_v30 = vmax.f32 %v19484_v52, 0.0 }
 0x9aa   : > { %16859 = vmatpush1.bf16.msra.mxu1 %v19345_v54  ;;  %v19501_v54 = vadd.f32 %v24182_v55, %v23548_v12 }
 0x9ab   : > { %16860 = vmatprep.subr.bf16.mxu1 %v19354_v4  ;;  %16277 = vmatpush1.bf16.msra.mxu0 %v19351_v13  ;;  %v23568_v4 = vadd.f32 %v24183_v42, %v23542_v59  ;;  %v24186_v13 = vld [vmem:[#allocation96_spill] sm:$0xff] }
 0x9ac   : > { %16278 = vmatprep.subr.bf16.mxu0 %v19360_v43  ;;  %v24187_v43 = vld [vmem:[#allocation97_spill] sm:$0xff] }
 0x9ae   : > { %16861 = vmatpush1.bf16.msra.mxu1 %v19353_v47  ;;  %v23580_v47 = vadd.f32 %v24186_v13, %v23548_v12 }
 0x9af   : > { %16862 = vmatprep.subr.bf16.mxu1 %v19362_v57  ;;  %16279 = vmatpush1.bf16.msra.mxu0 %v19359_v46  ;;  %v23584_v57 = vadd.f32 %v24187_v43, %v23542_v59  ;;  %v24189_v46 = vld [vmem:[#allocation99_spill] sm:$0xff] }
 0x9b0   : > { %16280 = vmatprep.subr.bf16.mxu0 %v19368_v27  ;;  %v24190_v27 = vld [vmem:[#allocation100_spill] sm:$0xff] }
 0x9b2   : > { %16863 = vmatpush1.bf16.msra.mxu1 %v19361_v40  ;;  %v23592_v40 = vadd.f32 %v24189_v46, %v23546_v0  ;;  %v24196_v46 = vld [vmem:[#allocation106_spill] sm:$0xff] }
 0x9b3   : > { %16864 = vmatprep.subr.bf16.mxu1 %v19370_v39  ;;  %16281 = vmatpush1.bf16.msra.mxu0 %v19367_v33  ;;  %v23596_v39 = vadd.f32 %v24190_v27, %v23548_v12  ;;  %v8378_v33 = vmax.f32 %v19485_v1, 0.0  ;;  %v23628_v27 = vadd.f32 %v24196_v46, %v23544_v60 }
 0x9b4   : > { %16282 = vmatprep.subr.bf16.mxu0 %v19376_v45  ;;  %v8385_v45 = vmax.f32 %v23568_v4, 0.0 }
 0x9b6   : > { %16865 = vmatpush1.bf16.msra.mxu1 %v19369_v49  ;;  %v8380_v49 = vmax.f32 %v19501_v54, 0.0 }
 0x9b7   : > { %16866 = vmatprep.subr.bf16.mxu1 %v19378_v44  ;;  %16283 = vmatpush1.bf16.msra.mxu0 %v19375_v5  ;;  %v8387_v44 = vmax.f32 %v23572_v26, 0.0  ;;  %v8386_v5 = vmax.f32 %v23576_v17, 0.0 }
 0x9ba   : > { %16867 = vmatpush1.bf16.msra.mxu1 %v19377_v34  ;;  %16285 = vmatmul.mubr.bf16.vlgmr.msra.gmra.mrb[80].mxu0 %v24168_v3  ;;  %v8388_v34 = vmax.f32 %v23580_v47, 0.0 }
 0x9bb   : > { %16294 = vmatprep.mubr.bf16.mxu0 %v24169_v36 }
 0x9bd   : > { %16869 = vmatmul.mubr.bf16.vlgmr.msra.gmra.mrb[80].mxu1 %v24168_v3  ;;  %v8393_v3 = vmax.f32 %v23584_v57, 0.0 }
 0x9be   : > { %16878 = vmatprep.mubr.bf16.mxu1 %v24169_v36  ;;  %v8395_v36 = vmax.f32 %v23588_v53, 0.0 }
 0x9c2   : > { %16295 = vmatmul.mubr.bf16.gmra.mrb[84].mxu0 %v24170_v31 }
 0x9c3   : > { %16304 = vmatprep.mubr.bf16.mxu0 %v24171_v28 }
 0x9c5   : > { %16879 = vmatmul.mubr.bf16.gmra.mrb[84].mxu1 %v24170_v31 }
 0x9c6   : > { %16888 = vmatprep.mubr.bf16.mxu1 %v24171_v28  ;;  %v8394_v28 = vmax.f32 %v23592_v40, 0.0 }
 0x9ca   : > { %16305 = vmatmul.mubr.bf16.gmra.mrb[88].mxu0 %v24172_v58 }
 0x9cb   : > { %16314 = vmatprep.mubr.bf16.mxu0 %v24173_v19 }
 0x9cd   : > { %16889 = vmatmul.mubr.bf16.gmra.mrb[88].mxu1 %v24172_v58  ;;  %v8396_v58 = vmax.f32 %v23596_v39, 0.0 }
 0x9ce   : > { %16898 = vmatprep.mubr.bf16.mxu1 %v24173_v19  ;;  %v24191_v19 = vld [vmem:[#allocation101_spill] sm:$0xff] }
 0x9d2   : > { %16315 = vmatmul.mubr.bf16.gmra.mrb[92].mxu0 %v24174_v56 }
 0x9d5   : > { %16899 = vmatmul.mubr.bf16.gmra.mrb[92].mxu1 %v24174_v56  ;;  %v23608_v56 = vadd.f32 %v24191_v19, %v23542_v59 }
 0x9d7   : > { %v8401_v19 = vmax.f32 %v23608_v56, 0.0 }
 0xa8d   : > { %v16286_v31 = vpop.f32.mrb[80].mxu0 }
 0xa8e   : > { %v16913_v25 = vmax.f32 %v16286_v31, 0.0  ;;  %v16288_v7 = vpop.f32.mrb[81].mxu0 }
 0xa8f   : > { %v16914_v29 = vmax.f32 %v16288_v7, 0.0  ;;  %v16290_v15 = vpop.f32.mrb[82].mxu0 }
 0xa90   : > { %v16870_v37 = vpop.f32.mrb[80].mxu1  ;;  %v16977_v50 = vadd.f32 %v16913_v25, %v8369_v18  ;;  %v16921_v32 = vmax.f32 %v16290_v15, 0.0  ;;  %v16292_v16 = vpop.f32.mrb[83].mxu0  ;;  %v24197_v18 = vld [vmem:[#allocation107_spill] sm:$0xff]  ;;  %v8403_v25 = vmax.f32 %v23612_v10, 0.0 }
 0xa91   : > { %v16915_v11 = vmax.f32 %v16870_v37, 0.0  ;;  %v16872_v9 = vpop.f32.mrb[81].mxu1  ;;  %v16978_v55 = vadd.f32 %v16914_v29, %v8370_v23  ;;  %v16922_v42 = vmax.f32 %v16292_v16, 0.0  ;;  %v23632_v31 = vadd.f32 %v24197_v18, %v23546_v0 }
 0xa92   : > { %v16916_v52 = vmax.f32 %v16872_v9, 0.0  ;;  %v16874_v22 = vpop.f32.mrb[82].mxu1  ;;  %v16985_v43 = vadd.f32 %v16921_v32, %v8377_v30  ;;  %v8404_v30 = vmax.f32 %v23620_v14, 0.0  ;;  %v8409_v29 = vmax.f32 %v23624_v63, 0.0  ;;  %v24198_v9 = vld [vmem:[#allocation108_spill] sm:$0xff] }
 0xa93   : > { %v16979_v1 = vadd.f32 %v16915_v11, %v8371_v20  ;;  %v16923_v54 = vmax.f32 %v16874_v22, 0.0  ;;  %v16876_v4 = vpop.f32.mrb[83].mxu1  ;;  %v16986_v23 = vadd.f32 %v16922_v42, %v8378_v33  ;;  %v23641_v15 = vadd.f32 %v24198_v9, %v23548_v12 }
 0xa94   : > { %v16980_v13 = vadd.f32 %v16916_v52, %v8372_v24  ;;  %v16924_v6 = vmax.f32 %v16876_v4, 0.0  ;;  %v17090_v37 = vadd.f32 %v16985_v43, %v16977_v50  ;;  %v8402_v24 = vmax.f32 %v23616_v2, 0.0 }
 0xa95   : > { %v16987_v20 = vadd.f32 %v16923_v54, %v8379_v21  ;;  %v17103_v62 = vadd.f32 %v16986_v23, %v16978_v55  ;;  %v16296_v11 = vpop.f32.mrb[84].mxu0  ;;  %v8411_v50 = vmax.f32 %v23628_v27, 0.0 }
 0xa96   : > { %v16988_v7 = vadd.f32 %v16924_v6, %v8380_v49  ;;  %v16929_v33 = vmax.f32 %v16296_v11, 0.0  ;;  %v16298_v38 = vpop.f32.mrb[85].mxu0  ;;  %v8410_v49 = vmax.f32 %v23632_v31, 0.0 }
 0xa97   : > { %v17116_v8 = vadd.f32 %v16987_v20, %v16979_v1  ;;  %v16930_v32 = vmax.f32 %v16298_v38, 0.0  ;;  %v16300_v16 = vpop.f32.mrb[86].mxu0  ;;  %v24199_v1 = vld [vmem:[#allocation109_spill] sm:$0xff] }
 0xa98   : > { %v17129_v21 = vadd.f32 %v16988_v7, %v16980_v13  ;;  %v16880_v56 = vpop.f32.mrb[84].mxu1  ;;  %v23647_v55 = vadd.f32 %v24199_v1, %v23542_v59  ;;  %v16993_v54 = vadd.f32 %v16929_v33, %v8385_v45  ;;  %v16937_v4 = vmax.f32 %v16300_v16, 0.0  ;;  %v16302_v13 = vpop.f32.mrb[87].mxu0  ;;  %v24203_v38 = vld [vmem:[#allocation113_spill] sm:$0xff] }
 0xa99   : > { %v16931_v52 = vmax.f32 %v16880_v56, 0.0  ;;  %v16882_v22 = vpop.f32.mrb[85].mxu1  ;;  %v16994_v6 = vadd.f32 %v16930_v32, %v8386_v5  ;;  %v16938_v18 = vmax.f32 %v16302_v13, 0.0  ;;  %v24204_v32 = vld [vmem:[#allocation114_spill] sm:$0xff] }
 0xa9a   : > { %v16932_v42 = vmax.f32 %v16882_v22, 0.0  ;;  %v16884_v35 = vpop.f32.mrb[86].mxu1  ;;  %v17091_v23 = vadd.f32 %v17090_v37, %v16993_v54  ;;  %v17001_v45 = vadd.f32 %v16937_v4, %v8393_v3  ;;  %v24201_v3 = vld [vmem:[#allocation111_spill] sm:$0xff]  ;;  %v8417_v40 = vmax.f32 %v23647_v55, 0.0 }
 0xa9b   : > { %v16995_v43 = vadd.f32 %v16931_v52, %v8387_v44  ;;  %v16939_v46 = vmax.f32 %v16884_v35, 0.0  ;;  %v16886_v20 = vpop.f32.mrb[87].mxu1  ;;  %v17104_v33 = vadd.f32 %v17103_v62, %v16994_v6  ;;  %v17002_v17 = vadd.f32 %v16938_v18, %v8394_v28  ;;  %v24202_v28 = vld [vmem:[#allocation112_spill] sm:$0xff]  ;;  %v24205_v55 = vld [vmem:[#allocation115_spill] sm:$0xff] }
 0xa9c   : > { %v16996_v7 = vadd.f32 %v16932_v42, %v8388_v34  ;;  %v16940_v11 = vmax.f32 %v16886_v20, 0.0  ;;  %v8412_v44 = vmax.f32 %v23641_v15, 0.0  ;;  %v17092_v56 = vadd.f32 %v17091_v23, %v17001_v45  ;;  %v24200_v34 = vld [vmem:[#allocation110_spill] sm:$0xff] }
 0xa9d   : > { %v17117_v9 = vadd.f32 %v17116_v8, %v16995_v43  ;;  %v17003_v26 = vadd.f32 %v16939_v46, %v8395_v36  ;;  %v23666_v57 = vadd.f32 %v24200_v34, %v23544_v60  ;;  %v23670_v37 = vadd.f32 %v24201_v3, %v23546_v0  ;;  %v16306_v8 = vpop.f32.mrb[88].mxu0 }
 0xa9e   : > { %v17130_v5 = vadd.f32 %v17129_v21, %v16996_v7  ;;  %v17004_v47 = vadd.f32 %v16940_v11, %v8396_v58  ;;  %v17105_v36 = vadd.f32 %v17104_v33, %v17002_v17  ;;  %v23675_v62 = vadd.f32 %v24202_v28, %v23548_v12  ;;  %v16308_v21 = vpop.f32.mrb[89].mxu0 }
 0xa9f   : > { %v17118_v53 = vadd.f32 %v17117_v9, %v17003_v26  ;;  %v16945_v39 = vmax.f32 %v16306_v8, 0.0  ;;  %v19496_v52 = vadd.f32 %v24203_v38, %v23542_v59  ;;  %v23681_v22 = vadd.f32 %v24204_v32, %v23544_v60  ;;  %v16310_v42 = vpop.f32.mrb[90].mxu0 }
 0xaa0   : > { %v17131_v15 = vadd.f32 %v17130_v5, %v17004_v47  ;;  %v16890_v58 = vpop.f32.mrb[88].mxu1  ;;  %v16946_v1 = vmax.f32 %v16308_v21, 0.0  ;;  %v19497_v4 = vadd.f32 %v24205_v55, %v23546_v0  ;;  %v16953_v43 = vmax.f32 %v16310_v42, 0.0  ;;  %v16312_v46 = vpop.f32.mrb[91].mxu0 }
 0xaa1   : > { %v16947_v16 = vmax.f32 %v16890_v58, 0.0  ;;  %v16892_v54 = vpop.f32.mrb[89].mxu1  ;;  %v17009_v35 = vadd.f32 %v16945_v39, %v8401_v19  ;;  %v16954_v20 = vmax.f32 %v16312_v46, 0.0  ;;  %v8419_v14 = vmax.f32 %v23666_v57, 0.0 }
 0xaa2   : > { %v16948_v13 = vmax.f32 %v16892_v54, 0.0  ;;  %v16894_v6 = vpop.f32.mrb[90].mxu1  ;;  %v17010_v59 = vadd.f32 %v16946_v1, %v8402_v24  ;;  %v17017_v0 = vadd.f32 %v16953_v43, %v8409_v29  ;;  %v8418_v63 = vmax.f32 %v23670_v37, 0.0 }
 0xaa3   : > { %v17011_v18 = vadd.f32 %v16947_v16, %v8403_v25  ;;  %v16955_v60 = vmax.f32 %v16894_v6, 0.0  ;;  %v16896_v23 = vpop.f32.mrb[91].mxu1  ;;  %v17093_v7 = vadd.f32 %v17092_v56, %v17009_v35  ;;  %v17018_v2 = vadd.f32 %v16954_v20, %v8410_v49  ;;  %v24206_v25 = vld [vmem:[#allocation116_spill] sm:$0xff] }
 0xaa4   : > { %v17012_v45 = vadd.f32 %v16948_v13, %v8404_v30  ;;  %v16956_v19 = vmax.f32 %v16896_v23, 0.0  ;;  %v17106_v9 = vadd.f32 %v17105_v36, %v17010_v59  ;;  %v19513_v24 = vadd.f32 %v24206_v25, %v23548_v12 }
 0xaa5   : > { %v17119_v11 = vadd.f32 %v17118_v53, %v17011_v18  ;;  %v17019_v10 = vadd.f32 %v16955_v60, %v8411_v50  ;;  %v17094_v26 = vadd.f32 %v17093_v7, %v17017_v0  ;;  %v16316_v5 = vpop.f32.mrb[92].mxu0  ;;  %v8420_v56 = vmax.f32 %v23675_v62, 0.0 }
 0xaa6   : > { %v17132_v33 = vadd.f32 %v17131_v15, %v17012_v45  ;;  %v17020_v17 = vadd.f32 %v16956_v19, %v8412_v44  ;;  %v17107_v29 = vadd.f32 %v17106_v9, %v17018_v2  ;;  %v8425_v27 = vmax.f32 %v19496_v52, 0.0  ;;  %v16318_v49 = vpop.f32.mrb[93].mxu0 }
 0xaa7   : > { %v17120_v30 = vadd.f32 %v17119_v11, %v17019_v10  ;;  %v16961_v47 = vmax.f32 %v16316_v5, 0.0  ;;  %v8427_v34 = vmax.f32 %v23681_v22, 0.0  ;;  %v8426_v12 = vmax.f32 %v19497_v4, 0.0  ;;  %v16320_v36 = vpop.f32.mrb[94].mxu0 }
 0xaa8   : > { %v17133_v50 = vadd.f32 %v17132_v33, %v17020_v17  ;;  %v16900_v31 = vpop.f32.mrb[92].mxu1  ;;  %v16962_v53 = vmax.f32 %v16318_v49, 0.0  ;;  %v8428_v57 = vmax.f32 %v19513_v24, 0.0  ;;  %v16969_v28 = vmax.f32 %v16320_v36, 0.0  ;;  %v16322_v39 = vpop.f32.mrb[95].mxu0 }
 0xaa9   : > { %v16963_v3 = vmax.f32 %v16900_v31, 0.0  ;;  %v16902_v44 = vpop.f32.mrb[93].mxu1  ;;  %v17025_v8 = vadd.f32 %v16961_v47, %v8417_v40  ;;  %v16970_v38 = vmax.f32 %v16322_v39, 0.0 }
 0xaaa   : > { %v16964_v37 = vmax.f32 %v16902_v44, 0.0  ;;  %v16904_v15 = vpop.f32.mrb[94].mxu1  ;;  %v17026_v62 = vadd.f32 %v16962_v53, %v8418_v63  ;;  %v17033_v1 = vadd.f32 %v16969_v28, %v8425_v27 }
 0xaab   : > { %v17027_v58 = vadd.f32 %v16963_v3, %v8419_v14  ;;  %v16971_v21 = vmax.f32 %v16904_v15, 0.0  ;;  %v16906_v52 = vpop.f32.mrb[95].mxu1  ;;  %v17095_v32 = vadd.f32 %v17094_v26, %v17025_v8  ;;  %v17034_v4 = vadd.f32 %v16970_v38, %v8426_v12 }
 0xaac   : > { %v17028_v16 = vadd.f32 %v16964_v37, %v8420_v56  ;;  %v16972_v22 = vmax.f32 %v16906_v52, 0.0  ;;  %v17108_v42 = vadd.f32 %v17107_v29, %v17026_v62 }
 0xaad   : > { %v17121_v54 = vadd.f32 %v17120_v30, %v17027_v58  ;;  %v17035_v55 = vadd.f32 %v16971_v21, %v8427_v34  ;;  %v17096_v13 = vadd.f32 %v17095_v32, %v17033_v1  ;;  %v17190_v34 = vrot.slane %v17182_v41, %v23450_v51 }
 0xaae   : > { %v17134_v35 = vadd.f32 %v17133_v50, %v17028_v16  ;;  %v17036_v40 = vadd.f32 %v16972_v22, %v8428_v57  ;;  %v17109_v6 = vadd.f32 %v17108_v42, %v17034_v4 }
 0xaaf   : > { %v17122_v43 = vadd.f32 %v17121_v54, %v17035_v55  ;;  %v17097_v46 = vrot.slane %v17096_v13, 4 }
 0xab0   : > { %v17135_v18 = vadd.f32 %v17134_v35, %v17036_v40  ;;  %v17110_v60 = vrot.slane %v17109_v6, 4 }
 0xab1   : > { %v17123_v59 = vrot.slane %v17122_v43, 4  ;;  %v17098_v20 = vadd.f32 %v17097_v46, %v17096_v13 }
 0xab2   : > { %v17136_v23 = vrot.slane %v17135_v18, 4  ;;  %v17111_v45 = vadd.f32 %v17110_v60, %v17109_v6 }
 0xab3   : > { %v17124_v7 = vadd.f32 %v17123_v59, %v17122_v43  ;;  %v17099_v0 = vrot.slane %v17098_v20, 2 }
 0xab4   : > { %v17137_v19 = vadd.f32 %v17136_v23, %v17135_v18  ;;  %v17112_v9 = vrot.slane %v17111_v45, 2 }
 0xab5   : > { %v17125_v11 = vrot.slane %v17124_v7, 2  ;;  %v17100_v10 = vadd.f32 %v17099_v0, %v17098_v20 }
 0xab6   : > { %v17138_v2 = vrot.slane %v17137_v19, 2  ;;  %v17113_v24 = vadd.f32 %v17112_v9, %v17111_v45 }
 0xab7   : > { %v17126_v25 = vadd.f32 %v17125_v11, %v17124_v7  ;;  %v17101_v33 = vrot.slane %v17100_v10, 1 }
 0xab8   : > { %v17139_v26 = vadd.f32 %v17138_v2, %v17137_v19  ;;  %v17114_v14 = vrot.slane %v17113_v24, 1 }
 0xab9   : > { %v17127_v17 = vrot.slane %v17126_v25, 1  ;;  %v17102_v63 = vadd.f32 %v17101_v33, %v17100_v10 }
 0xaba   : > { %v17140_v30 = vrot.slane %v17139_v26, 1  ;;  %v17115_v5 = vadd.f32 %v17114_v14, %v17113_v24 }
 0xabb   : > { %v17128_v29 = vadd.f32 %v17127_v17, %v17126_v25 }
 0xabc   : > { %v17141_v56 = vadd.f32 %v17140_v30, %v17139_v26  ;;  %v17152_v27 = vcombine.low %v17102_v63, %v17115_v5 }
 0xabe   : > { %v17153_v50 = vcombine.low %v17128_v29, %v17141_v56  ;;  %v17174_v47 = vrot.slane %v17152_v27, %v23450_v51 }
 0xac0   : > { %v17181_v31 = vrot.slane %v17153_v50, %v23450_v51 }
 0xac2   : > { %v17183_v49 = vcombine.low %v17174_v47, %v17181_v31 }
 0xac4   : > { %v17197_v12 = vrot.slane %v17183_v49, %v23450_v51 }
 0xac6   : > { %v17198_v3 = vcombine.low %v17190_v34, %v17197_v12 }
 0xac8   : > { %v17206_v53 = vmul.f32 0.015625, %v17198_v3 }
 0xaca   : > { %17207 = vst [vmem:[%s436_s17] sm:$0xff] %v17206_v53 }
 0xacb   : > { %21623 = shalt.err (!%p21620_p8)
}
 0xacc   : > { %s21624_s11 = scalar_lea.hbm %s23715_s22, 128  ;;  %s21628_s13 = scalar_lea.hbm %s24208_s14, 256 }
 0xacd   : > { %p21625_p3 = scmp.ne.s32.totalorder %s23715_s22, %s21624_s11  ;;  %p21629_p0 = scmp.lt.u32.totalorder %s23715_s22, %s24208_s14 }
 0xace   : > { %p21630_p1 = scmp.lt.u32.totalorder %s21628_s13, %s21624_s11  ;;  %p21632_p6 = scmp.lt.u32.totalorder %s21624_s11, %s23715_s22 }
 0xacf   : > { %p21626_p12 = pnand %p21625_p3, %p24209_p5 }
 0xad0   : > { %p21631_p7 = por %p21630_p1, %p21629_p0 }
 0xad1   : > { %p21627_p13 = pneg %p21626_p12 }
 0xad2   : > { %p21633_p10 = por %p21632_p6, %p21631_p7 }
 0xad4   : > { %p21634_p11 = pnand %p21633_p10, %p21627_p13 }
 0xad6   : > { %21637 = shalt.err (!%p21634_p11)
}
 0xad7   : > { %20312 = dma.vmem_to_hbm [thread:$0]  (%p24209_p5), %s23717_s19, 128, %s23715_s22, %s17209_s1  }
 0xad8 PF: > { %s17235_s16 = sand.u32 1, %s21688_s27   ;;  %p24210_p2 = scmp.ne.s32.totalorder %s23933_s8, 0 }
 0xad9   : > { %p24211_p4 = scmp.ge.s32.totalorder %s21708_s10, 2  ;;  %s17236_s24 = scalar_lea.sflag [#allocation4], %s17235_s16 }
 0xadb   : > { %p20341_p9 = pnand %p24211_p4, %p24210_p2 }
 0xadd   : > { %21683 = dma.done.wait (!%p20341_p9), %s17236_s24, 128  }
 0xade   : > { %21685 = vsyncadd (!%p20341_p9), %s17236_s24, 4294967168  ;;  %s28_s10 = sadd.s32 1, %s21708_s10   ;;  %s24212_s27 = smov %s21692_s28 }
 0xadf   : > { %p25_p8 = scmp.ge.s32.totalorder %s28_s10, 4   ;;  %s24213_s28 = smov %s21696_s29 }
 0xae0   : > { %s24214_s29 = smov %s22008_s20  ;;  %s24215_s30 = smov %s21704_s9 }
 0xae1   : > { %s24216_s9 = smov %s24218_s26  ;;  %27 = sbr.rel (!%p25_p8) target bundleno = 14 (0xe), region = 133 }
 0xae8   :  { %17241 = vsyncpa [#allocation3], 1 }
 0xae9   :  { %17243 = vsyncpa [#allocation3 + $0x1], 1 }
 0xaea   :  { %17244 = vsyncpa [#allocation6], 1 }
 0xaeb   :  { %17245 = vsyncpa [#allocation9], 1 }
 0xaec   :  { %17246 = vsyncpa [#allocation12], 1 }
 0xaed   :  { %17247 = vsyncpa [#allocation15], 1 }
 0xaee   :  { %17248 = vsyncpa [#allocation4], 1 }
 0xaef   :  { %17250 = vsyncpa [#allocation4 + $0x1], 1 }

</bundles_post_ra>
